<compile_context>
chip_gen: v5e
topology: v5e:2x2
jax: 0.10.0
libtpu: 0.0.40
codegen_flags: <defaults>
</compile_context>

<pallas_src>
import functools
import math

import jax
import jax.numpy as jnp
from jax.experimental import pallas as pl
from jax.experimental.pallas import tpu as pltpu


VMEM_LIMIT_BYTES = 32 * 1024 * 1024   # explicit scoped-VMEM budget for the matmul kernels


# ----------------------------------------------------------------------------
# Small helpers
# ----------------------------------------------------------------------------
def _round_up(x, m):
    return ((x + m - 1) // m) * m


def _tile_rows(dim, target):
    """Largest divisor of `dim` <= target that is a multiple of 8 (else full dim)."""
    if dim <= target:
        return dim
    t = (target // 8) * 8
    while t >= 8:
        if dim % t == 0:
            return t
        t -= 8
    return dim  # TODO(synk): awkward (e.g. prime) dims fall back to one big block


def _tile_cols(dim, target):
    """Largest divisor of `dim` <= target, preferring 256-multiples (full MXU
    passes on v6e/v7x), then 128-multiples (lane width); else full dim."""
    if dim <= target:
        return dim
    for base in (256, 128):
        t = (target // base) * base
        while t >= base:
            if dim % t == 0:
                return t
            t -= base
    return dim


def _pool_tile(batch):
    """Batch tile for pooling: multiple of 8 (sublane rule on the output block) and
    <= batch//2 when possible, so the grid has >= 2 parallel steps (v7x megacore)."""
    if batch % 8 != 0 or batch < 16:
        return batch
    t = (batch // 2 // 8) * 8
    while t >= 8:
        if batch % t == 0:
            return t
        t -= 8
    return batch


# ----------------------------------------------------------------------------
# Kernel 1: tiled matmul + bias (+GELU) (+residual), K-reduction with accumulator
# ----------------------------------------------------------------------------
def _linear_kernel(x_ref, w_ref, b_ref, *refs, activation, has_residual):
    if has_residual:
        res_ref, o_ref, acc_ref = refs
    else:
        res_ref = None
        o_ref, acc_ref = refs

    k = pl.program_id(2)

    @pl.when(k == 0)
    def _init():
        acc_ref[...] = jnp.zeros_like(acc_ref)

    # bf16 operands at the MXU, f32 accumulation.
    acc_ref[...] += jnp.dot(
        x_ref[...].astype(jnp.bfloat16),
        w_ref[...].astype(jnp.bfloat16),
        preferred_element_type=jnp.float32,
    )

    @pl.when(k == pl.num_programs(2) - 1)
    def _finalize():
        y = acc_ref[...] + b_ref[...].astype(jnp.float32)
        if activation == "gelu":
            y = jax.nn.gelu(y)                      # tanh-approx GELU (EUP)
        if res_ref is not None:
            y = y + res_ref[...].astype(jnp.float32)
        o_ref[...] = y.astype(o_ref.dtype)


def linear(x, w, b, residual=None, activation=None, out_dtype=jnp.float32,
           tm_target=512, tn_target=768, tk_target=512):
    """y = act(x @ w + b) (+ residual).  x:(M,K), w:(K,N) bf16, b:(N,) f32."""
    M, K = x.shape
    N = w.shape[1]
    tm = _tile_rows(M, tm_target)
    tn = _tile_cols(N, tn_target)
    tk = _tile_cols(K, tk_target)
    grid = (M // tm, N // tn, K // tk)

    in_specs = [
        pl.BlockSpec((tm, tk), lambda i, j, k: (i, k)),
        pl.BlockSpec((tk, tn), lambda i, j, k: (k, j)),
        pl.BlockSpec((1, tn), lambda i, j, k: (0, j)),
    ]
    args = [x, w, b.reshape(1, N)]
    if residual is not None:
        in_specs.append(pl.BlockSpec((tm, tn), lambda i, j, k: (i, j)))
        args.append(residual)

    out_size = jnp.dtype(out_dtype).itemsize
    cost = pl.CostEstimate(
        flops=2 * M * N * K,
        transcendentals=(M * N if activation == "gelu" else 0),
        bytes_accessed=int(x.dtype.itemsize * M * K * (N // tn)
                           + w.dtype.itemsize * K * N * (M // tm)
                           + out_size * M * N
                           + (residual.dtype.itemsize * M * N
                              if residual is not None else 0)),
    )

    return pl.pallas_call(
        functools.partial(_linear_kernel, activation=activation,
                          has_residual=residual is not None),
        out_shape=jax.ShapeDtypeStruct((M, N), out_dtype),
        grid=grid,
        in_specs=in_specs,
        out_specs=pl.BlockSpec((tm, tn), lambda i, j, k: (i, j)),
        scratch_shapes=[pltpu.VMEM((tm, tn), jnp.float32)],
        compiler_params=pltpu.CompilerParams(
            dimension_semantics=("parallel", "parallel", "arbitrary"),
            vmem_limit_bytes=VMEM_LIMIT_BYTES),
        cost_estimate=cost,
    )(*args)


# ----------------------------------------------------------------------------
# Kernel 2: fused LayerNorm -> matmul -> bias (-> GELU), LN result cached in VMEM
#           across all N tiles of the same row block (K untiled; K <= 3072).
# ----------------------------------------------------------------------------
def _ln_linear_kernel(x_ref, g_ref, bln_ref, w_ref, b_ref, o_ref, xn_ref,
                      *, eps, activation):
    # LayerNorm + f32->bf16 cast computed once per row block (j == 0), reused for
    # every N tile from the (tm, K) bf16 scratch.
    @pl.when(pl.program_id(1) == 0)
    def _ln():
        x = x_ref[...].astype(jnp.float32)
        mu = jnp.mean(x, axis=-1, keepdims=True)
        xc = x - mu
        var = jnp.mean(xc * xc, axis=-1, keepdims=True)
        xn = xc * jax.lax.rsqrt(var + eps)
        xn = xn * g_ref[...].astype(jnp.float32) + bln_ref[...].astype(jnp.float32)
        xn_ref[...] = xn.astype(xn_ref.dtype)

    y = jnp.dot(xn_ref[...], w_ref[...].astype(jnp.bfloat16),
                preferred_element_type=jnp.float32)
    y = y + b_ref[...].astype(jnp.float32)
    if activation == "gelu":
        y = jax.nn.gelu(y)
    o_ref[...] = y.astype(o_ref.dtype)


def ln_linear(x, g, bln, w, b, eps, activation=None, out_dtype=jnp.float32,
              tm_target=512, tn_target=768):
    """y = act(LayerNorm(x) @ w + b).  Normalized activations never leave VMEM."""
    M, K = x.shape
    N = w.shape[1]
    tm = _tile_rows(M, tm_target)
    tn = _tile_cols(N, tn_target)
    grid = (M // tm, N // tn)

    out_size = jnp.dtype(out_dtype).itemsize
    cost = pl.CostEstimate(
        flops=2 * M * N * K + 8 * M * K,
        transcendentals=(M * N if activation == "gelu" else 0) + M,
        bytes_accessed=int(x.dtype.itemsize * M * K
                           + w.dtype.itemsize * K * N * (M // tm)
                           + out_size * M * N),
    )

    return pl.pallas_call(
        functools.partial(_ln_linear_kernel, eps=eps, activation=activation),
        out_shape=jax.ShapeDtypeStruct((M, N), out_dtype),
        grid=grid,
        in_specs=[
            pl.BlockSpec((tm, K), lambda i, j: (i, 0)),
            pl.BlockSpec((1, K), lambda i, j: (0, 0)),
            pl.BlockSpec((1, K), lambda i, j: (0, 0)),
            pl.BlockSpec((K, tn), lambda i, j: (0, j)),
            pl.BlockSpec((1, tn), lambda i, j: (0, j)),
        ],
        out_specs=pl.BlockSpec((tm, tn), lambda i, j: (i, j)),
        scratch_shapes=[pltpu.VMEM((tm, K), jnp.bfloat16)],
        compiler_params=pltpu.CompilerParams(
            # j carries the cached LN scratch across iterations -> "arbitrary".
            dimension_semantics=("parallel", "arbitrary"),
            vmem_limit_bytes=VMEM_LIMIT_BYTES),
        cost_estimate=cost,
    )(x, g.reshape(1, K), bln.reshape(1, K), w, b.reshape(1, N))


# ----------------------------------------------------------------------------
# Kernel 3: fused multi-head attention on the natural (B, S, 3D) qkv layout.
#           Grid = (batch, head_group); each step does a 128-lane group of heads,
#           masked softmax, lane-dense (S, group_width) output store.
# ----------------------------------------------------------------------------
def _attn_kernel(q_ref, k_ref, v_ref, o_ref, *, scale, valid_len, head_dim):
    S, gw = q_ref.shape[1], q_ref.shape[2]
    heads_per_group = gw // head_dim
    # mask padded key positions (static valid_len)
    key_mask = jax.lax.broadcasted_iota(jnp.int32, (S, S), 1) < valid_len

    qg = q_ref[0].astype(jnp.bfloat16)          # (S, gw) bf16
    kg = k_ref[0].astype(jnp.bfloat16)
    vg = v_ref[0].astype(jnp.bfloat16)

    outs = []
    for h in range(heads_per_group):
        sl = slice(h * head_dim, (h + 1) * head_dim)
        q, k, v = qg[:, sl], kg[:, sl], vg[:, sl]
        s = jax.lax.dot_general(q, k, (((1,), (1,)), ((), ())),
                                preferred_element_type=jnp.float32) * scale
        s = jnp.where(key_mask, s, jnp.float32(-1e30))
        m = jnp.max(s, axis=-1, keepdims=True)
        p = jnp.exp(s - m)
        inv = pl.reciprocal(jnp.sum(p, axis=-1, keepdims=True), approx=True)  # EUP
        p = p * inv
        outs.append(jnp.dot(p.astype(jnp.bfloat16), v,
                            preferred_element_type=jnp.float32))
    # One lane-dense (S, gw) store per head group; only this group's heads are live.
    o_ref[0, :, :] = jnp.concatenate(outs, axis=-1).astype(o_ref.dtype)


def attention(qkv, num_heads, scale, valid_len):
    """qkv: (B, S_pad, 3*D) bf16 (columns = [Q heads | K heads | V heads])
    -> (B, S_pad, D) bf16 with padded key positions masked."""
    B, S, three_d = qkv.shape
    D = three_d // 3
    Dh = D // num_heads
    heads_per_group = max(1, 128 // Dh)
    while num_heads % heads_per_group:
        heads_per_group -= 1
    gw = heads_per_group * Dh
    if gw % 128 != 0:                       # fallback: one group = all heads
        heads_per_group, gw = num_heads, D
    G = num_heads // heads_per_group
    nD = D // gw                            # column blocks per Q/K/V section

    return pl.pallas_call(
        functools.partial(_attn_kernel, scale=scale, valid_len=valid_len,
                          head_dim=Dh),
        out_shape=jax.ShapeDtypeStruct((B, S, D), jnp.bfloat16),
        grid=(B, G),
        in_specs=[
            pl.BlockSpec((1, S, gw), lambda b, g: (b, 0, g)),            # Q window
            pl.BlockSpec((1, S, gw), lambda b, g: (b, 0, nD + g)),       # K window
            pl.BlockSpec((1, S, gw), lambda b, g: (b, 0, 2 * nD + g)),   # V window
        ],
        out_specs=pl.BlockSpec((1, S, gw), lambda b, g: (b, 0, g)),
        compiler_params=pltpu.CompilerParams(
            dimension_semantics=("parallel", "parallel")),
    )(qkv, qkv, qkv)


# ----------------------------------------------------------------------------
# Kernel 4: standalone LayerNorm (final LN of the TransformerHead)
# ----------------------------------------------------------------------------
def _layernorm_kernel(x_ref, g_ref, b_ref, o_ref, *, eps):
    x = x_ref[...].astype(jnp.float32)
    mu = jnp.mean(x, axis=-1, keepdims=True)
    xc = x - mu
    var = jnp.mean(xc * xc, axis=-1, keepdims=True)
    y = xc * jax.lax.rsqrt(var + eps)
    y = y * g_ref[...].astype(jnp.float32) + b_ref[...].astype(jnp.float32)
    o_ref[...] = y.astype(o_ref.dtype)


def layernorm(x, g, b, eps):
    M, D = x.shape
    tm = _tile_rows(M, 512)
    return pl.pallas_call(
        functools.partial(_layernorm_kernel, eps=eps),
        out_shape=jax.ShapeDtypeStruct((M, D), x.dtype),
        grid=(M // tm,),
        in_specs=[pl.BlockSpec((tm, D), lambda i: (i, 0)),
                  pl.BlockSpec((1, D), lambda i: (0, 0)),
                  pl.BlockSpec((1, D), lambda i: (0, 0))],
        out_specs=pl.BlockSpec((tm, D), lambda i: (i, 0)),
        compiler_params=pltpu.CompilerParams(dimension_semantics=("parallel",)),
    )(x, g.reshape(1, D), b.reshape(1, D))


# ----------------------------------------------------------------------------
# Kernel 5: avg-pool patch tokens (masked mean, no relayout slice) + L2 normalize
# ----------------------------------------------------------------------------
def _pool_l2norm_kernel(x_ref, o_ref, *, num_patches):
    x = x_ref[...].astype(jnp.float32)                      # (tb, S_pad, D)
    S = x.shape[1]
    row = jax.lax.broadcasted_iota(jnp.int32, (1, S, 1), 1)
    mask = (row >= 1) & (row < 1 + num_patches)             # skip cls + pad rows
    pooled = jnp.sum(jnp.where(mask, x, 0.0), axis=1) * (1.0 / num_patches)
    ss = jnp.sum(pooled * pooled, axis=-1, keepdims=True)
    inv = jax.lax.rsqrt(jnp.maximum(ss, 1e-24))             # eps=1e-12 on the norm
    o_ref[...] = (pooled * inv).astype(o_ref.dtype)


def pool_l2norm(x, num_patches):
    B, S, D = x.shape
    tb = _pool_tile(B)
    return pl.pallas_call(
        functools.partial(_pool_l2norm_kernel, num_patches=num_patches),
        out_shape=jax.ShapeDtypeStruct((B, D), x.dtype),
        grid=(B // tb,),
        in_specs=[pl.BlockSpec((tb, S, D), lambda i: (i, 0, 0))],
        out_specs=pl.BlockSpec((tb, D), lambda i: (i, 0)),
        compiler_params=pltpu.CompilerParams(dimension_semantics=("parallel",)),
    )(x)


# ----------------------------------------------------------------------------
# Model orchestration (thin JAX glue around the fused kernels)
# ----------------------------------------------------------------------------
def encoder_block(x, p, num_heads, valid_len, eps):
    """Pre-LN block: x + MHSA(LN(x)); x + MLP(LN(x)).
    Residual stream f32; qkv / attention / fc1 activations bf16; residual adds
    fused into the proj / fc2 matmul epilogues."""
    B, S, D = x.shape
    M = B * S
    x2 = x.reshape(M, D)                                     # f32 residual stream

    # LN1 -> qkv (fused), bf16 output in the natural (M, 3D) column layout.
    qkv = ln_linear(x2, p["ln1_g"], p["ln1_b"], p["qkv_w"], p["qkv_b"],
                    eps=eps, out_dtype=jnp.bfloat16)

    # fused attention straight off the (B, S, 3D) layout (no XLA transpose).
    attn_out = attention(qkv.reshape(B, S, 3 * D), num_heads,
                         scale=1.0 / math.sqrt(D // num_heads),
                         valid_len=valid_len)                # (B, S, D) bf16

    # attn proj + residual (fused epilogue)
    x2 = linear(attn_out.reshape(M, D), p["proj_w"], p["proj_b"],
                residual=x2, out_dtype=jnp.float32)

    # LN2 -> fc1 + GELU (fused, bf16 out), then fc2 + residual (fused)
    h = ln_linear(x2, p["ln2_g"], p["ln2_b"], p["fc1_w"], p["fc1_b"],
                  eps=eps, activation="gelu", out_dtype=jnp.bfloat16)
    x2 = linear(h, p["fc2_w"], p["fc2_b"], residual=x2, out_dtype=jnp.float32)
    return x2.reshape(B, S, D)


def mae_forward(x_bf, params, cfg):
    """x_bf: (B*F, C, H, W) NCHW -> L2-normalized pooled features (B*F, D)."""
    BF, C, H, W = x_bf.shape
    P = cfg["patch_size"]
    D = cfg["embed_dim"]
    gh, gw = H // P, W // P
    n_patch = gh * gw

    # PatchEmbed: Conv2d(C, D, kernel=P, stride=P) == unfold + matmul
    patches = (x_bf.reshape(BF, C, gh, P, gw, P)
               .transpose(0, 2, 4, 1, 3, 5)
               .reshape(BF * n_patch, C * P * P))
    tok = linear(patches, params["patch_w"], params["patch_b"],
                 out_dtype=jnp.float32).reshape(BF, n_patch, D)

    cls = jnp.broadcast_to(params["cls_token"], (BF, 1, D))
    x = jnp.concatenate([cls, tok], axis=1) + params["pos_embed"]  # pos_drop: identity
    S = n_patch + 1
    S_pad = _round_up(S, 8)                      # sublane-align the token axis
    x = jnp.pad(x, ((0, 0), (0, S_pad - S), (0, 0)))

    for blk in params["blocks"]:
        x = encoder_block(x, blk, cfg["num_heads"], valid_len=S, eps=1e-6)

    # self.norm and self.fc_norm are both Identity in this configuration.
    return pool_l2norm(x, num_patches=n_patch)   # (BF, D) f32, L2-normalized


def transformer_head_forward(seq, params, num_heads, eps=1e-5):
    # TODO(synk): TransformerHead source not provided; standard pre-LN encoder
    # over the frame axis + final LayerNorm.
    b, f, W = seq.shape
    f_pad = _round_up(f, 8)
    x = jnp.pad(seq, ((0, 0), (0, f_pad - f), (0, 0)))
    for blk in params["blocks"]:
        x = encoder_block(x, blk, num_heads, valid_len=f, eps=eps)
    x = layernorm(x.reshape(b * f_pad, W), params["ln_g"], params["ln_b"], eps)
    return x.reshape(b, f_pad, W)[:, :f, :]


def mae_transformer_forward(x, params, cfg):
    """x: (b, f, c, h, w) float32 -> (b, f, head_width)."""
    b, f, c, h, w = x.shape
    feat = mae_forward(x.reshape(b * f, c, h, w), params, cfg)    # (b*f, D), L2-normed
    # proj = LayerNorm -> Dropout(eval: identity) -> Linear, fused in one kernel
    feat = ln_linear(feat, params["proj_ln_g"], params["proj_ln_b"],
                     params["proj_w"], params["proj_b"], eps=1e-5,
                     out_dtype=jnp.float32)
    seq = feat.reshape(b, f, cfg["head_width"])
    return transformer_head_forward(seq, params["head"], cfg["head_num_heads"])


# ----------------------------------------------------------------------------
# Deterministic parameter init (synthetic; no checkpoint loading).
# Matmul weights are stored bf16 (MXU operands); LN params / biases stay f32.
# ----------------------------------------------------------------------------
def init_params(key, cfg):
    D = cfg["embed_dim"]
    C = cfg["in_chans"]
    P = cfg["patch_size"]
    S = cfg["num_patches"] + 1
    W = cfg["head_width"]
    keys = iter(jax.random.split(key, 512))

    def nrm(shape, std=0.02):
        return std * jax.random.normal(next(keys), shape, jnp.float32)

    def wgt(shape, std=0.02):
        return nrm(shape, std).astype(jnp.bfloat16)

    def zeros(shape):
        return jnp.zeros(shape, jnp.float32)

    def ones(shape):
        return jnp.ones(shape, jnp.float32)

    def block_params(dim, mlp_ratio):
        hid = dim * mlp_ratio
        return dict(
            ln1_g=ones((dim,)), ln1_b=zeros((dim,)),
            qkv_w=wgt((dim, 3 * dim)), qkv_b=zeros((3 * dim,)),
            proj_w=wgt((dim, dim)), proj_b=zeros((dim,)),
            ln2_g=ones((dim,)), ln2_b=zeros((dim,)),
            fc1_w=wgt((dim, hid)), fc1_b=zeros((hid,)),
            fc2_w=wgt((hid, dim)), fc2_b=zeros((dim,)),
        )

    return dict(
        patch_w=wgt((C * P * P, D)), patch_b=zeros((D,)),
        cls_token=zeros((1, 1, D)),
        pos_embed=nrm((1, S, D)),
        blocks=[block_params(D, cfg["mlp_ratio"]) for _ in range(cfg["depth"])],
        proj_ln_g=ones((D,)), proj_ln_b=zeros((D,)),
        proj_w=wgt((D, W)), proj_b=zeros((W,)),
        head=dict(
            blocks=[block_params(W, cfg["head_mlp_ratio"])
                    for _ in range(cfg["head_depth"])],
            ln_g=ones((W,)), ln_b=zeros((W,)),
        ),
    )


# ----------------------------------------------------------------------------
if __name__ == "__main__":
    # Small, self-consistent configuration (scaled-down ViT backbone + temporal head)
    cfg = dict(
        in_chans=3,
        patch_size=16,
        embed_dim=128,       # (real MAE: 768)
        depth=2,             # (real MAE: 12)
        num_heads=4,         # (real MAE: 12)
        mlp_ratio=4,
        head_width=128,
        head_depth=1,
        head_num_heads=4,
        head_mlp_ratio=4,
    )
    b, f, c, h, w = 2, 4, 3, 32, 32
    cfg["num_patches"] = (h // cfg["patch_size"]) * (w // cfg["patch_size"])

    params = init_params(jax.random.PRNGKey(0), cfg)
    x = jax.random.normal(jax.random.PRNGKey(0), (b, f, c, h, w), jnp.float32)

    fwd = jax.jit(lambda xx, pp: mae_transformer_forward(xx, pp, cfg))
    out = jax.block_until_ready(fwd(x, params))
    assert out.shape == (b, f, cfg["head_width"])
    assert bool(jnp.all(jnp.isfinite(out)))
    print("KERNEL_OK")
</pallas_src>

<mosaic_0001>
module attributes {stable_mosaic.version = 11 : i64} {
  func.func @_linear_kernel(%arg0: i32, %arg1: i32, %arg2: i32, %arg3: memref<32x256xf32, #tpu.memory_space<vmem>>, %arg4: memref<256x128xbf16, #tpu.memory_space<vmem>>, %arg5: memref<1x128xf32, #tpu.memory_space<vmem>>, %arg6: memref<32x128xf32, #tpu.memory_space<vmem>>, %arg7: memref<32x128xf32, #tpu.memory_space<vmem>>) attributes {dimension_semantics = [#tpu.dimension_semantics<parallel>, #tpu.dimension_semantics<parallel>, #tpu.dimension_semantics<arbitrary>], iteration_bounds = array<i64: 1, 1, 3>, scalar_prefetch = 0 : i64, scratch_operands = 1 : i64, tpu.core_type = #tpu.core_type<tc>, window_params = [{transform_indices = @transform_0, window_bounds = array<i64: 32, 256>}, {transform_indices = @transform_1, window_bounds = array<i64: 256, 128>}, {transform_indices = @transform_2, window_bounds = array<i64: 1, 128>}, {transform_indices = @transform_3, window_bounds = array<i64: 32, 128>}]} {
    %c0_i32 = arith.constant 0 : i32
    %0 = arith.cmpi eq, %arg2, %c0_i32 : i32
    %1 = arith.extui %0 : i1 to i32
    %c0_i32_0 = arith.constant 0 : i32
    %2 = arith.cmpi ne, %1, %c0_i32_0 : i32
    scf.if %2 {
      %cst_9 = arith.constant 0.000000e+00 : f32
      %13 = vector.broadcast %cst_9 : f32 to vector<32x128xf32>
      %c0_10 = arith.constant 0 : index
      %c0_11 = arith.constant 0 : index
      %14 = vector.load %arg7[%c0_10, %c0_11] : memref<32x128xf32, #tpu.memory_space<vmem>>, vector<32x128xf32>
      tpu.vector_store %arg7[%c0_10, %c0_11], %13 {strides = array<i32>} : memref<32x128xf32, #tpu.memory_space<vmem>>, vector<32x128xf32>,
    } else {
    }
    %c0 = arith.constant 0 : index
    %c0_1 = arith.constant 0 : index
    %3 = vector.load %arg7[%c0, %c0_1] : memref<32x128xf32, #tpu.memory_space<vmem>>, vector<32x128xf32>
    %c0_2 = arith.constant 0 : index
    %c0_3 = arith.constant 0 : index
    %4 = vector.load %arg3[%c0_2, %c0_3] : memref<32x256xf32, #tpu.memory_space<vmem>>, vector<32x256xf32>
    %5 = arith.truncf %4 : vector<32x256xf32> to vector<32x256xbf16>
    %c0_4 = arith.constant 0 : index
    %c0_5 = arith.constant 0 : index
    %6 = vector.load %arg4[%c0_4, %c0_5] : memref<256x128xbf16, #tpu.memory_space<vmem>>, vector<256x128xbf16>
    %cst = arith.constant dense<0.000000e+00> : vector<32x128xf32>
    %7 = tpu.matmul %5, %6, %cst {dimension_numbers = #tpu.dot_dimension_numbers<[1], [0], [0], [1], [0, 0, 1, 1], [], []>} : vector<32x256xbf16>, vector<256x128xbf16>, vector<32x128xf32> -> vector<32x128xf32>
    %8 = arith.addf %3, %7 : vector<32x128xf32>
    %c0_6 = arith.constant 0 : index
    %c0_7 = arith.constant 0 : index
    %9 = vector.load %arg7[%c0_6, %c0_7] : memref<32x128xf32, #tpu.memory_space<vmem>>, vector<32x128xf32>
    tpu.vector_store %arg7[%c0_6, %c0_7], %8 {strides = array<i32>} : memref<32x128xf32, #tpu.memory_space<vmem>>, vector<32x128xf32>,
    %c2_i32 = arith.constant 2 : i32
    %10 = arith.cmpi eq, %arg2, %c2_i32 : i32
    %11 = arith.extui %10 : i1 to i32
    %c0_i32_8 = arith.constant 0 : i32
    %12 = arith.cmpi ne, %11, %c0_i32_8 : i32
    scf.if %12 {
      %c0_9 = arith.constant 0 : index
      %c0_10 = arith.constant 0 : index
      %13 = vector.load %arg7[%c0_9, %c0_10] : memref<32x128xf32, #tpu.memory_space<vmem>>, vector<32x128xf32>
      %c0_11 = arith.constant 0 : index
      %c0_12 = arith.constant 0 : index
      %14 = vector.load %arg5[%c0_11, %c0_12] : memref<1x128xf32, #tpu.memory_space<vmem>>, vector<1x128xf32>
      %15 = vector.broadcast %14 : vector<1x128xf32> to vector<32x128xf32>
      %16 = arith.addf %13, %15 : vector<32x128xf32>
      %c0_13 = arith.constant 0 : index
      %c0_14 = arith.constant 0 : index
      %17 = vector.load %arg6[%c0_13, %c0_14] : memref<32x128xf32, #tpu.memory_space<vmem>>, vector<32x128xf32>
      tpu.vector_store %arg6[%c0_13, %c0_14], %16 {strides = array<i32>} : memref<32x128xf32, #tpu.memory_space<vmem>>, vector<32x128xf32>,
    } else {
    }
    return
  }
  func.func @transform_0(%arg0: i32, %arg1: i32, %arg2: i32) -> (i32, i32) {
    %c0_i32 = arith.constant 0 : i32
    return %arg0, %arg2 : i32, i32
  }
  func.func @transform_1(%arg0: i32, %arg1: i32, %arg2: i32) -> (i32, i32) {
    %c0_i32 = arith.constant 0 : i32
    return %arg2, %arg1 : i32, i32
  }
  func.func @transform_2(%arg0: i32, %arg1: i32, %arg2: i32) -> (i32, i32) {
    %c0_i32 = arith.constant 0 : i32
    %c0_i32_0 = arith.constant 0 : i32
    return %c0_i32, %arg1 : i32, i32
  }
  func.func @transform_3(%arg0: i32, %arg1: i32, %arg2: i32) -> (i32, i32) {
    %c0_i32 = arith.constant 0 : i32
    return %arg0, %arg1 : i32, i32
  }
}

module attributes {stable_mosaic.version = 11 : i64} {
  func.func @_ln_linear_kernel(%arg0: i32, %arg1: i32, %arg2: memref<64x128xf32, #tpu.memory_space<vmem>>, %arg3: memref<1x128xf32, #tpu.memory_space<vmem>>, %arg4: memref<1x128xf32, #tpu.memory_space<vmem>>, %arg5: memref<128x384xbf16, #tpu.memory_space<vmem>>, %arg6: memref<1x384xf32, #tpu.memory_space<vmem>>, %arg7: memref<64x384xbf16, #tpu.memory_space<vmem>>, %arg8: memref<64x128xbf16, #tpu.memory_space<vmem>>) attributes {dimension_semantics = [#tpu.dimension_semantics<parallel>, #tpu.dimension_semantics<arbitrary>], iteration_bounds = array<i64: 1, 1>, scalar_prefetch = 0 : i64, scratch_operands = 1 : i64, tpu.core_type = #tpu.core_type<tc>, window_params = [{transform_indices = @transform_0, window_bounds = array<i64: 64, 128>}, {pipeline_mode = #tpu.pipeline_mode<synchronous>, transform_indices = @transform_1, window_bounds = array<i64: 1, 128>}, {pipeline_mode = #tpu.pipeline_mode<synchronous>, transform_indices = @transform_2, window_bounds = array<i64: 1, 128>}, {transform_indices = @transform_3, window_bounds = array<i64: 128, 384>}, {transform_indices = @transform_4, window_bounds = array<i64: 1, 384>}, {transform_indices = @transform_5, window_bounds = array<i64: 64, 384>}]} {
    %c0_i32 = arith.constant 0 : i32
    %0 = arith.cmpi eq, %arg1, %c0_i32 : i32
    %1 = arith.extui %0 : i1 to i32
    %c0_i32_0 = arith.constant 0 : i32
    %2 = arith.cmpi ne, %1, %c0_i32_0 : i32
    scf.if %2 {
      %c0_8 = arith.constant 0 : index
      %c0_9 = arith.constant 0 : index
      %11 = vector.load %arg2[%c0_8, %c0_9] : memref<64x128xf32, #tpu.memory_space<vmem>>, vector<64x128xf32>
      %cst_10 = arith.constant dense<0.000000e+00> : vector<64xf32>
      %12 = vector.multi_reduction <add>, %11, %cst_10 [1] : vector<64x128xf32> to vector<64xf32>
      %13 = vector.shape_cast %12 : vector<64xf32> to vector<64x1xf32>
      %cst_11 = arith.constant 1.280000e+02 : f32
      %14 = vector.broadcast %cst_11 : f32 to vector<64x1xf32>
      %15 = arith.divf %13, %14 : vector<64x1xf32>
      %16 = vector.broadcast %15 : vector<64x1xf32> to vector<64x128xf32>
      %17 = arith.subf %11, %16 : vector<64x128xf32>
      %18 = arith.mulf %17, %17 : vector<64x128xf32>
      %cst_12 = arith.constant dense<0.000000e+00> : vector<64xf32>
      %19 = vector.multi_reduction <add>, %18, %cst_12 [1] : vector<64x128xf32> to vector<64xf32>
      %20 = vector.shape_cast %19 : vector<64xf32> to vector<64x1xf32>
      %cst_13 = arith.constant 1.280000e+02 : f32
      %21 = vector.broadcast %cst_13 : f32 to vector<64x1xf32>
      %22 = arith.divf %20, %21 : vector<64x1xf32>
      %cst_14 = arith.constant 9.99999997E-7 : f32
      %23 = vector.broadcast %cst_14 : f32 to vector<64x1xf32>
      %24 = arith.addf %22, %23 : vector<64x1xf32>
      %25 = math.rsqrt %24 : vector<64x1xf32>
      %26 = vector.broadcast %25 : vector<64x1xf32> to vector<64x128xf32>
      %27 = arith.mulf %17, %26 : vector<64x128xf32>
      %c0_15 = arith.constant 0 : index
      %c0_16 = arith.constant 0 : index
      %28 = vector.load %arg3[%c0_15, %c0_16] : memref<1x128xf32, #tpu.memory_space<vmem>>, vector<1x128xf32>
      %29 = vector.broadcast %28 : vector<1x128xf32> to vector<64x128xf32>
      %30 = arith.mulf %27, %29 : vector<64x128xf32>
      %c0_17 = arith.constant 0 : index
      %c0_18 = arith.constant 0 : index
      %31 = vector.load %arg4[%c0_17, %c0_18] : memref<1x128xf32, #tpu.memory_space<vmem>>, vector<1x128xf32>
      %32 = vector.broadcast %31 : vector<1x128xf32> to vector<64x128xf32>
      %33 = arith.addf %30, %32 : vector<64x128xf32>
      %34 = arith.truncf %33 : vector<64x128xf32> to vector<64x128xbf16>
      %c0_19 = arith.constant 0 : index
      %c0_20 = arith.constant 0 : index
      %35 = vector.load %arg8[%c0_19, %c0_20] : memref<64x128xbf16, #tpu.memory_space<vmem>>, vector<64x128xbf16>
      tpu.vector_store %arg8[%c0_19, %c0_20], %34 {strides = array<i32>} : memref<64x128xbf16, #tpu.memory_space<vmem>>, vector<64x128xbf16>,
    } else {
    }
    %c0 = arith.constant 0 : index
    %c0_1 = arith.constant 0 : index
    %3 = vector.load %arg8[%c0, %c0_1] : memref<64x128xbf16, #tpu.memory_space<vmem>>, vector<64x128xbf16>
    %c0_2 = arith.constant 0 : index
    %c0_3 = arith.constant 0 : index
    %4 = vector.load %arg5[%c0_2, %c0_3] : memref<128x384xbf16, #tpu.memory_space<vmem>>, vector<128x384xbf16>
    %cst = arith.constant dense<0.000000e+00> : vector<64x384xf32>
    %5 = tpu.matmul %3, %4, %cst {dimension_numbers = #tpu.dot_dimension_numbers<[1], [0], [0], [1], [0, 0, 1, 1], [], []>} : vector<64x128xbf16>, vector<128x384xbf16>, vector<64x384xf32> -> vector<64x384xf32>
    %c0_4 = arith.constant 0 : index
    %c0_5 = arith.constant 0 : index
    %6 = vector.load %arg6[%c0_4, %c0_5] : memref<1x384xf32, #tpu.memory_space<vmem>>, vector<1x384xf32>
    %7 = vector.broadcast %6 : vector<1x384xf32> to vector<64x384xf32>
    %8 = arith.addf %5, %7 : vector<64x384xf32>
    %9 = arith.truncf %8 : vector<64x384xf32> to vector<64x384xbf16>
    %c0_6 = arith.constant 0 : index
    %c0_7 = arith.constant 0 : index
    %10 = vector.load %arg7[%c0_6, %c0_7] : memref<64x384xbf16, #tpu.memory_space<vmem>>, vector<64x384xbf16>
    tpu.vector_store %arg7[%c0_6, %c0_7], %9 {strides = array<i32>} : memref<64x384xbf16, #tpu.memory_space<vmem>>, vector<64x384xbf16>,
    return
  }
  func.func @transform_0(%arg0: i32, %arg1: i32) -> (i32, i32) {
    %c0_i32 = arith.constant 0 : i32
    %c0_i32_0 = arith.constant 0 : i32
    return %arg0, %c0_i32 : i32, i32
  }
  func.func @transform_1(%arg0: i32, %arg1: i32) -> (i32, i32) {
    %c0_i32 = arith.constant 0 : i32
    %c0_i32_0 = arith.constant 0 : i32
    %c0_i32_1 = arith.constant 0 : i32
    return %c0_i32, %c0_i32_0 : i32, i32
  }
  func.func @transform_2(%arg0: i32, %arg1: i32) -> (i32, i32) {
    %c0_i32 = arith.constant 0 : i32
    %c0_i32_0 = arith.constant 0 : i32
    %c0_i32_1 = arith.constant 0 : i32
    return %c0_i32, %c0_i32_0 : i32, i32
  }
  func.func @transform_3(%arg0: i32, %arg1: i32) -> (i32, i32) {
    %c0_i32 = arith.constant 0 : i32
    %c0_i32_0 = arith.constant 0 : i32
    return %c0_i32, %arg1 : i32, i32
  }
  func.func @transform_4(%arg0: i32, %arg1: i32) -> (i32, i32) {
    %c0_i32 = arith.constant 0 : i32
    %c0_i32_0 = arith.constant 0 : i32
    return %c0_i32, %arg1 : i32, i32
  }
  func.func @transform_5(%arg0: i32, %arg1: i32) -> (i32, i32) {
    %c0_i32 = arith.constant 0 : i32
    return %arg0, %arg1 : i32, i32
  }
}

module attributes {stable_mosaic.version = 11 : i64} {
  func.func @_attn_kernel(%arg0: i32, %arg1: i32, %arg2: memref<1x8x128xbf16, #tpu.memory_space<vmem>>, %arg3: memref<1x8x128xbf16, #tpu.memory_space<vmem>>, %arg4: memref<1x8x128xbf16, #tpu.memory_space<vmem>>, %arg5: memref<1x8x128xbf16, #tpu.memory_space<vmem>>) attributes {dimension_semantics = [#tpu.dimension_semantics<parallel>, #tpu.dimension_semantics<parallel>], iteration_bounds = array<i64: 8, 1>, scalar_prefetch = 0 : i64, scratch_operands = 0 : i64, tpu.core_type = #tpu.core_type<tc>, window_params = [{transform_indices = @transform_0, window_bounds = array<i64: 1, 8, 128>}, {transform_indices = @transform_1, window_bounds = array<i64: 1, 8, 128>}, {transform_indices = @transform_2, window_bounds = array<i64: 1, 8, 128>}, {transform_indices = @transform_3, window_bounds = array<i64: 1, 8, 128>}]} {
    %0 = tpu.iota {dimensions = array<i32: 1>} : vector<8x8xi32>
    %c5_i32 = arith.constant 5 : i32
    %1 = vector.broadcast %c5_i32 : i32 to vector<8x8xi32>
    %2 = arith.cmpi slt, %0, %1 : vector<8x8xi32>
    %c0 = arith.constant 0 : index
    %c0_0 = arith.constant 0 : index
    %c0_1 = arith.constant 0 : index
    %3 = vector.load %arg2[%c0, %c0_0, %c0_1] : memref<1x8x128xbf16, #tpu.memory_space<vmem>>, vector<1x8x128xbf16>
    %4 = vector.shape_cast %3 : vector<1x8x128xbf16> to vector<8x128xbf16>
    %c0_2 = arith.constant 0 : index
    %c0_3 = arith.constant 0 : index
    %c0_4 = arith.constant 0 : index
    %5 = vector.load %arg3[%c0_2, %c0_3, %c0_4] : memref<1x8x128xbf16, #tpu.memory_space<vmem>>, vector<1x8x128xbf16>
    %6 = vector.shape_cast %5 : vector<1x8x128xbf16> to vector<8x128xbf16>
    %c0_5 = arith.constant 0 : index
    %c0_6 = arith.constant 0 : index
    %c0_7 = arith.constant 0 : index
    %7 = vector.load %arg4[%c0_5, %c0_6, %c0_7] : memref<1x8x128xbf16, #tpu.memory_space<vmem>>, vector<1x8x128xbf16>
    %8 = vector.shape_cast %7 : vector<1x8x128xbf16> to vector<8x128xbf16>
    %9 = vector.extract_strided_slice %4 {offsets = [0, 0], sizes = [8, 32], strides = [1, 1]} : vector<8x128xbf16> to vector<8x32xbf16>
    %10 = vector.extract_strided_slice %6 {offsets = [0, 0], sizes = [8, 32], strides = [1, 1]} : vector<8x128xbf16> to vector<8x32xbf16>
    %11 = vector.extract_strided_slice %8 {offsets = [0, 0], sizes = [8, 32], strides = [1, 1]} : vector<8x128xbf16> to vector<8x32xbf16>
    %cst = arith.constant dense<0.000000e+00> : vector<8x8xf32>
    %12 = tpu.matmul %9, %10, %cst {dimension_numbers = #tpu.dot_dimension_numbers<[1], [1], [0], [0], [0, 0, 1, 0], [], []>} : vector<8x32xbf16>, vector<8x32xbf16>, vector<8x8xf32> -> vector<8x8xf32>
    %cst_8 = arith.constant 0.176776692 : f32
    %13 = vector.broadcast %cst_8 : f32 to vector<8x8xf32>
    %14 = arith.mulf %12, %13 : vector<8x8xf32>
    %cst_9 = arith.constant -1.000000e+30 : f32
    %15 = vector.broadcast %cst_9 : f32 to vector<8x8xf32>
    %16 = arith.select %2, %14, %15 : vector<8x8xi1>, vector<8x8xf32>
    %cst_10 = arith.constant dense<0xFF800000> : vector<8xf32>
    %17 = vector.multi_reduction <maximumf>, %16, %cst_10 [1] : vector<8x8xf32> to vector<8xf32>
    %18 = vector.shape_cast %17 : vector<8xf32> to vector<8x1xf32>
    %19 = vector.broadcast %18 : vector<8x1xf32> to vector<8x8xf32>
    %20 = arith.subf %16, %19 : vector<8x8xf32>
    %21 = math.exp %20 : vector<8x8xf32>
    %cst_11 = arith.constant dense<0.000000e+00> : vector<8xf32>
    %22 = vector.multi_reduction <add>, %21, %cst_11 [1] : vector<8x8xf32> to vector<8xf32>
    %23 = vector.shape_cast %22 : vector<8xf32> to vector<8x1xf32>
    %24 = tpu.reciprocal %23 {approx = true} : vector<8x1xf32> -> vector<8x1xf32>
    %25 = vector.broadcast %24 : vector<8x1xf32> to vector<8x8xf32>
    %26 = arith.mulf %21, %25 : vector<8x8xf32>
    %27 = arith.truncf %26 : vector<8x8xf32> to vector<8x8xbf16>
    %cst_12 = arith.constant dense<0.000000e+00> : vector<8x32xf32>
    %28 = tpu.matmul %27, %11, %cst_12 {dimension_numbers = #tpu.dot_dimension_numbers<[1], [0], [0], [1], [0, 0, 1, 1], [], []>} : vector<8x8xbf16>, vector<8x32xbf16>, vector<8x32xf32> -> vector<8x32xf32>
    %29 = vector.extract_strided_slice %4 {offsets = [0, 32], sizes = [8, 32], strides = [1, 1]} : vector<8x128xbf16> to vector<8x32xbf16>
    %30 = vector.extract_strided_slice %6 {offsets = [0, 32], sizes = [8, 32], strides = [1, 1]} : vector<8x128xbf16> to vector<8x32xbf16>
    %31 = vector.extract_strided_slice %8 {offsets = [0, 32], sizes = [8, 32], strides = [1, 1]} : vector<8x128xbf16> to vector<8x32xbf16>
    %cst_13 = arith.constant dense<0.000000e+00> : vector<8x8xf32>
    %32 = tpu.matmul %29, %30, %cst_13 {dimension_numbers = #tpu.dot_dimension_numbers<[1], [1], [0], [0], [0, 0, 1, 0], [], []>} : vector<8x32xbf16>, vector<8x32xbf16>, vector<8x8xf32> -> vector<8x8xf32>
    %cst_14 = arith.constant 0.176776692 : f32
    %33 = vector.broadcast %cst_14 : f32 to vector<8x8xf32>
    %34 = arith.mulf %32, %33 : vector<8x8xf32>
    %cst_15 = arith.constant -1.000000e+30 : f32
    %35 = vector.broadcast %cst_15 : f32 to vector<8x8xf32>
    %36 = arith.select %2, %34, %35 : vector<8x8xi1>, vector<8x8xf32>
    %cst_16 = arith.constant dense<0xFF800000> : vector<8xf32>
    %37 = vector.multi_reduction <maximumf>, %36, %cst_16 [1] : vector<8x8xf32> to vector<8xf32>
    %38 = vector.shape_cast %37 : vector<8xf32> to vector<8x1xf32>
    %39 = vector.broadcast %38 : vector<8x1xf32> to vector<8x8xf32>
    %40 = arith.subf %36, %39 : vector<8x8xf32>
    %41 = math.exp %40 : vector<8x8xf32>
    %cst_17 = arith.constant dense<0.000000e+00> : vector<8xf32>
    %42 = vector.multi_reduction <add>, %41, %cst_17 [1] : vector<8x8xf32> to vector<8xf32>
    %43 = vector.shape_cast %42 : vector<8xf32> to vector<8x1xf32>
    %44 = tpu.reciprocal %43 {approx = true} : vector<8x1xf32> -> vector<8x1xf32>
    %45 = vector.broadcast %44 : vector<8x1xf32> to vector<8x8xf32>
    %46 = arith.mulf %41, %45 : vector<8x8xf32>
    %47 = arith.truncf %46 : vector<8x8xf32> to vector<8x8xbf16>
    %cst_18 = arith.constant dense<0.000000e+00> : vector<8x32xf32>
    %48 = tpu.matmul %47, %31, %cst_18 {dimension_numbers = #tpu.dot_dimension_numbers<[1], [0], [0], [1], [0, 0, 1, 1], [], []>} : vector<8x8xbf16>, vector<8x32xbf16>, vector<8x32xf32> -> vector<8x32xf32>
    %49 = vector.extract_strided_slice %4 {offsets = [0, 64], sizes = [8, 32], strides = [1, 1]} : vector<8x128xbf16> to vector<8x32xbf16>
    %50 = vector.extract_strided_slice %6 {offsets = [0, 64], sizes = [8, 32], strides = [1, 1]} : vector<8x128xbf16> to vector<8x32xbf16>
    %51 = vector.extract_strided_slice %8 {offsets = [0, 64], sizes = [8, 32], strides = [1, 1]} : vector<8x128xbf16> to vector<8x32xbf16>
    %cst_19 = arith.constant dense<0.000000e+00> : vector<8x8xf32>
    %52 = tpu.matmul %49, %50, %cst_19 {dimension_numbers = #tpu.dot_dimension_numbers<[1], [1], [0], [0], [0, 0, 1, 0], [], []>} : vector<8x32xbf16>, vector<8x32xbf16>, vector<8x8xf32> -> vector<8x8xf32>
    %cst_20 = arith.constant 0.176776692 : f32
    %53 = vector.broadcast %cst_20 : f32 to vector<8x8xf32>
    %54 = arith.mulf %52, %53 : vector<8x8xf32>
    %cst_21 = arith.constant -1.000000e+30 : f32
    %55 = vector.broadcast %cst_21 : f32 to vector<8x8xf32>
    %56 = arith.select %2, %54, %55 : vector<8x8xi1>, vector<8x8xf32>
    %cst_22 = arith.constant dense<0xFF800000> : vector<8xf32>
    %57 = vector.multi_reduction <maximumf>, %56, %cst_22 [1] : vector<8x8xf32> to vector<8xf32>
    %58 = vector.shape_cast %57 : vector<8xf32> to vector<8x1xf32>
    %59 = vector.broadcast %58 : vector<8x1xf32> to vector<8x8xf32>
    %60 = arith.subf %56, %59 : vector<8x8xf32>
    %61 = math.exp %60 : vector<8x8xf32>
    %cst_23 = arith.constant dense<0.000000e+00> : vector<8xf32>
    %62 = vector.multi_reduction <add>, %61, %cst_23 [1] : vector<8x8xf32> to vector<8xf32>
    %63 = vector.shape_cast %62 : vector<8xf32> to vector<8x1xf32>
    %64 = tpu.reciprocal %63 {approx = true} : vector<8x1xf32> -> vector<8x1xf32>
    %65 = vector.broadcast %64 : vector<8x1xf32> to vector<8x8xf32>
    %66 = arith.mulf %61, %65 : vector<8x8xf32>
    %67 = arith.truncf %66 : vector<8x8xf32> to vector<8x8xbf16>
    %cst_24 = arith.constant dense<0.000000e+00> : vector<8x32xf32>
    %68 = tpu.matmul %67, %51, %cst_24 {dimension_numbers = #tpu.dot_dimension_numbers<[1], [0], [0], [1], [0, 0, 1, 1], [], []>} : vector<8x8xbf16>, vector<8x32xbf16>, vector<8x32xf32> -> vector<8x32xf32>
    %69 = vector.extract_strided_slice %4 {offsets = [0, 96], sizes = [8, 32], strides = [1, 1]} : vector<8x128xbf16> to vector<8x32xbf16>
    %70 = vector.extract_strided_slice %6 {offsets = [0, 96], sizes = [8, 32], strides = [1, 1]} : vector<8x128xbf16> to vector<8x32xbf16>
    %71 = vector.extract_strided_slice %8 {offsets = [0, 96], sizes = [8, 32], strides = [1, 1]} : vector<8x128xbf16> to vector<8x32xbf16>
    %cst_25 = arith.constant dense<0.000000e+00> : vector<8x8xf32>
    %72 = tpu.matmul %69, %70, %cst_25 {dimension_numbers = #tpu.dot_dimension_numbers<[1], [1], [0], [0], [0, 0, 1, 0], [], []>} : vector<8x32xbf16>, vector<8x32xbf16>, vector<8x8xf32> -> vector<8x8xf32>
    %cst_26 = arith.constant 0.176776692 : f32
    %73 = vector.broadcast %cst_26 : f32 to vector<8x8xf32>
    %74 = arith.mulf %72, %73 : vector<8x8xf32>
    %cst_27 = arith.constant -1.000000e+30 : f32
    %75 = vector.broadcast %cst_27 : f32 to vector<8x8xf32>
    %76 = arith.select %2, %74, %75 : vector<8x8xi1>, vector<8x8xf32>
    %cst_28 = arith.constant dense<0xFF800000> : vector<8xf32>
    %77 = vector.multi_reduction <maximumf>, %76, %cst_28 [1] : vector<8x8xf32> to vector<8xf32>
    %78 = vector.shape_cast %77 : vector<8xf32> to vector<8x1xf32>
    %79 = vector.broadcast %78 : vector<8x1xf32> to vector<8x8xf32>
    %80 = arith.subf %76, %79 : vector<8x8xf32>
    %81 = math.exp %80 : vector<8x8xf32>
    %cst_29 = arith.constant dense<0.000000e+00> : vector<8xf32>
    %82 = vector.multi_reduction <add>, %81, %cst_29 [1] : vector<8x8xf32> to vector<8xf32>
    %83 = vector.shape_cast %82 : vector<8xf32> to vector<8x1xf32>
    %84 = tpu.reciprocal %83 {approx = true} : vector<8x1xf32> -> vector<8x1xf32>
    %85 = vector.broadcast %84 : vector<8x1xf32> to vector<8x8xf32>
    %86 = arith.mulf %81, %85 : vector<8x8xf32>
    %87 = arith.truncf %86 : vector<8x8xf32> to vector<8x8xbf16>
    %cst_30 = arith.constant dense<0.000000e+00> : vector<8x32xf32>
    %88 = tpu.matmul %87, %71, %cst_30 {dimension_numbers = #tpu.dot_dimension_numbers<[1], [0], [0], [1], [0, 0, 1, 1], [], []>} : vector<8x8xbf16>, vector<8x32xbf16>, vector<8x32xf32> -> vector<8x32xf32>
    %89 = tpu.concatenate %28, %48, %68, %88 in 1 : vector<8x32xf32>, vector<8x32xf32>, vector<8x32xf32>, vector<8x32xf32> -> vector<8x128xf32>
    %90 = arith.truncf %89 : vector<8x128xf32> to vector<8x128xbf16>
    %c0_31 = arith.constant 0 : index
    %c0_32 = arith.constant 0 : index
    %c0_33 = arith.constant 0 : index
    %91 = vector.load %arg5[%c0_31, %c0_32, %c0_33] : memref<1x8x128xbf16, #tpu.memory_space<vmem>>, vector<1x8x128xbf16>
    %92 = vector.shape_cast %91 : vector<1x8x128xbf16> to vector<8x128xbf16>
    %93 = vector.shape_cast %90 : vector<8x128xbf16> to vector<1x8x128xbf16>
    tpu.vector_store %arg5[%c0_31, %c0_32, %c0_33], %93 {strides = array<i32>} : memref<1x8x128xbf16, #tpu.memory_space<vmem>>, vector<1x8x128xbf16>,
    return
  }
  func.func @transform_0(%arg0: i32, %arg1: i32) -> (i32, i32, i32) {
    %c0_i32 = arith.constant 0 : i32
    %c0_i32_0 = arith.constant 0 : i32
    return %arg0, %c0_i32, %arg1 : i32, i32, i32
  }
  func.func @transform_1(%arg0: i32, %arg1: i32) -> (i32, i32, i32) {
    %c1_i32 = arith.constant 1 : i32
    %0 = arith.addi %c1_i32, %arg1 : i32
    %c0_i32 = arith.constant 0 : i32
    %c0_i32_0 = arith.constant 0 : i32
    return %arg0, %c0_i32, %0 : i32, i32, i32
  }
  func.func @transform_2(%arg0: i32, %arg1: i32) -> (i32, i32, i32) {
    %c2_i32 = arith.constant 2 : i32
    %0 = arith.addi %c2_i32, %arg1 : i32
    %c0_i32 = arith.constant 0 : i32
    %c0_i32_0 = arith.constant 0 : i32
    return %arg0, %c0_i32, %0 : i32, i32, i32
  }
  func.func @transform_3(%arg0: i32, %arg1: i32) -> (i32, i32, i32) {
    %c0_i32 = arith.constant 0 : i32
    %c0_i32_0 = arith.constant 0 : i32
    return %arg0, %c0_i32, %arg1 : i32, i32, i32
  }
}

module attributes {stable_mosaic.version = 11 : i64} {
  func.func @_linear_kernel(%arg0: i32, %arg1: i32, %arg2: i32, %arg3: memref<64x128xbf16, #tpu.memory_space<vmem>>, %arg4: memref<128x128xbf16, #tpu.memory_space<vmem>>, %arg5: memref<1x128xf32, #tpu.memory_space<vmem>>, %arg6: memref<64x128xf32, #tpu.memory_space<vmem>>, %arg7: memref<64x128xf32, #tpu.memory_space<vmem>>, %arg8: memref<64x128xf32, #tpu.memory_space<vmem>>) attributes {dimension_semantics = [#tpu.dimension_semantics<parallel>, #tpu.dimension_semantics<parallel>, #tpu.dimension_semantics<arbitrary>], iteration_bounds = array<i64: 1, 1, 1>, scalar_prefetch = 0 : i64, scratch_operands = 1 : i64, tpu.core_type = #tpu.core_type<tc>, window_params = [{transform_indices = @transform_0, window_bounds = array<i64: 64, 128>}, {transform_indices = @transform_1, window_bounds = array<i64: 128, 128>}, {transform_indices = @transform_2, window_bounds = array<i64: 1, 128>}, {transform_indices = @transform_3, window_bounds = array<i64: 64, 128>}, {transform_indices = @transform_4, window_bounds = array<i64: 64, 128>}]} {
    %c0_i32 = arith.constant 0 : i32
    %0 = arith.cmpi eq, %arg2, %c0_i32 : i32
    %1 = arith.extui %0 : i1 to i32
    %c0_i32_0 = arith.constant 0 : i32
    %2 = arith.cmpi ne, %1, %c0_i32_0 : i32
    scf.if %2 {
      %cst_10 = arith.constant 0.000000e+00 : f32
      %12 = vector.broadcast %cst_10 : f32 to vector<64x128xf32>
      %c0_11 = arith.constant 0 : index
      %c0_12 = arith.constant 0 : index
      %13 = vector.load %arg8[%c0_11, %c0_12] : memref<64x128xf32, #tpu.memory_space<vmem>>, vector<64x128xf32>
      tpu.vector_store %arg8[%c0_11, %c0_12], %12 {strides = array<i32>} : memref<64x128xf32, #tpu.memory_space<vmem>>, vector<64x128xf32>,
    } else {
    }
    %c0 = arith.constant 0 : index
    %c0_1 = arith.constant 0 : index
    %3 = vector.load %arg8[%c0, %c0_1] : memref<64x128xf32, #tpu.memory_space<vmem>>, vector<64x128xf32>
    %c0_2 = arith.constant 0 : index
    %c0_3 = arith.constant 0 : index
    %4 = vector.load %arg3[%c0_2, %c0_3] : memref<64x128xbf16, #tpu.memory_space<vmem>>, vector<64x128xbf16>
    %c0_4 = arith.constant 0 : index
    %c0_5 = arith.constant 0 : index
    %5 = vector.load %arg4[%c0_4, %c0_5] : memref<128x128xbf16, #tpu.memory_space<vmem>>, vector<128x128xbf16>
    %cst = arith.constant dense<0.000000e+00> : vector<64x128xf32>
    %6 = tpu.matmul %4, %5, %cst {dimension_numbers = #tpu.dot_dimension_numbers<[1], [0], [0], [1], [0, 0, 1, 1], [], []>} : vector<64x128xbf16>, vector<128x128xbf16>, vector<64x128xf32> -> vector<64x128xf32>
    %7 = arith.addf %3, %6 : vector<64x128xf32>
    %c0_6 = arith.constant 0 : index
    %c0_7 = arith.constant 0 : index
    %8 = vector.load %arg8[%c0_6, %c0_7] : memref<64x128xf32, #tpu.memory_space<vmem>>, vector<64x128xf32>
    tpu.vector_store %arg8[%c0_6, %c0_7], %7 {strides = array<i32>} : memref<64x128xf32, #tpu.memory_space<vmem>>, vector<64x128xf32>,
    %c0_i32_8 = arith.constant 0 : i32
    %9 = arith.cmpi eq, %arg2, %c0_i32_8 : i32
    %10 = arith.extui %9 : i1 to i32
    %c0_i32_9 = arith.constant 0 : i32
    %11 = arith.cmpi ne, %10, %c0_i32_9 : i32
    scf.if %11 {
      %c0_10 = arith.constant 0 : index
      %c0_11 = arith.constant 0 : index
      %12 = vector.load %arg8[%c0_10, %c0_11] : memref<64x128xf32, #tpu.memory_space<vmem>>, vector<64x128xf32>
      %c0_12 = arith.constant 0 : index
      %c0_13 = arith.constant 0 : index
      %13 = vector.load %arg5[%c0_12, %c0_13] : memref<1x128xf32, #tpu.memory_space<vmem>>, vector<1x128xf32>
      %14 = vector.broadcast %13 : vector<1x128xf32> to vector<64x128xf32>
      %15 = arith.addf %12, %14 : vector<64x128xf32>
      %c0_14 = arith.constant 0 : index
      %c0_15 = arith.constant 0 : index
      %16 = vector.load %arg6[%c0_14, %c0_15] : memref<64x128xf32, #tpu.memory_space<vmem>>, vector<64x128xf32>
      %17 = arith.addf %15, %16 : vector<64x128xf32>
      %c0_16 = arith.constant 0 : index
      %c0_17 = arith.constant 0 : index
      %18 = vector.load %arg7[%c0_16, %c0_17] : memref<64x128xf32, #tpu.memory_space<vmem>>, vector<64x128xf32>
      tpu.vector_store %arg7[%c0_16, %c0_17], %17 {strides = array<i32>} : memref<64x128xf32, #tpu.memory_space<vmem>>, vector<64x128xf32>,
    } else {
    }
    return
  }
  func.func @transform_0(%arg0: i32, %arg1: i32, %arg2: i32) -> (i32, i32) {
    %c0_i32 = arith.constant 0 : i32
    return %arg0, %arg2 : i32, i32
  }
  func.func @transform_1(%arg0: i32, %arg1: i32, %arg2: i32) -> (i32, i32) {
    %c0_i32 = arith.constant 0 : i32
    return %arg2, %arg1 : i32, i32
  }
  func.func @transform_2(%arg0: i32, %arg1: i32, %arg2: i32) -> (i32, i32) {
    %c0_i32 = arith.constant 0 : i32
    %c0_i32_0 = arith.constant 0 : i32
    return %c0_i32, %arg1 : i32, i32
  }
  func.func @transform_3(%arg0: i32, %arg1: i32, %arg2: i32) -> (i32, i32) {
    %c0_i32 = arith.constant 0 : i32
    return %arg0, %arg1 : i32, i32
  }
  func.func @transform_4(%arg0: i32, %arg1: i32, %arg2: i32) -> (i32, i32) {
    %c0_i32 = arith.constant 0 : i32
    return %arg0, %arg1 : i32, i32
  }
}

module attributes {stable_mosaic.version = 11 : i64} {
  func.func @_ln_linear_kernel(%arg0: i32, %arg1: i32, %arg2: memref<64x128xf32, #tpu.memory_space<vmem>>, %arg3: memref<1x128xf32, #tpu.memory_space<vmem>>, %arg4: memref<1x128xf32, #tpu.memory_space<vmem>>, %arg5: memref<128x512xbf16, #tpu.memory_space<vmem>>, %arg6: memref<1x512xf32, #tpu.memory_space<vmem>>, %arg7: memref<64x512xbf16, #tpu.memory_space<vmem>>, %arg8: memref<64x128xbf16, #tpu.memory_space<vmem>>) attributes {dimension_semantics = [#tpu.dimension_semantics<parallel>, #tpu.dimension_semantics<arbitrary>], iteration_bounds = array<i64: 1, 1>, scalar_prefetch = 0 : i64, scratch_operands = 1 : i64, tpu.core_type = #tpu.core_type<tc>, window_params = [{transform_indices = @transform_0, window_bounds = array<i64: 64, 128>}, {pipeline_mode = #tpu.pipeline_mode<synchronous>, transform_indices = @transform_1, window_bounds = array<i64: 1, 128>}, {pipeline_mode = #tpu.pipeline_mode<synchronous>, transform_indices = @transform_2, window_bounds = array<i64: 1, 128>}, {transform_indices = @transform_3, window_bounds = array<i64: 128, 512>}, {transform_indices = @transform_4, window_bounds = array<i64: 1, 512>}, {transform_indices = @transform_5, window_bounds = array<i64: 64, 512>}]} {
    %c0_i32 = arith.constant 0 : i32
    %0 = arith.cmpi eq, %arg1, %c0_i32 : i32
    %1 = arith.extui %0 : i1 to i32
    %c0_i32_0 = arith.constant 0 : i32
    %2 = arith.cmpi ne, %1, %c0_i32_0 : i32
    scf.if %2 {
      %c0_12 = arith.constant 0 : index
      %c0_13 = arith.constant 0 : index
      %24 = vector.load %arg2[%c0_12, %c0_13] : memref<64x128xf32, #tpu.memory_space<vmem>>, vector<64x128xf32>
      %cst_14 = arith.constant dense<0.000000e+00> : vector<64xf32>
      %25 = vector.multi_reduction <add>, %24, %cst_14 [1] : vector<64x128xf32> to vector<64xf32>
      %26 = vector.shape_cast %25 : vector<64xf32> to vector<64x1xf32>
      %cst_15 = arith.constant 1.280000e+02 : f32
      %27 = vector.broadcast %cst_15 : f32 to vector<64x1xf32>
      %28 = arith.divf %26, %27 : vector<64x1xf32>
      %29 = vector.broadcast %28 : vector<64x1xf32> to vector<64x128xf32>
      %30 = arith.subf %24, %29 : vector<64x128xf32>
      %31 = arith.mulf %30, %30 : vector<64x128xf32>
      %cst_16 = arith.constant dense<0.000000e+00> : vector<64xf32>
      %32 = vector.multi_reduction <add>, %31, %cst_16 [1] : vector<64x128xf32> to vector<64xf32>
      %33 = vector.shape_cast %32 : vector<64xf32> to vector<64x1xf32>
      %cst_17 = arith.constant 1.280000e+02 : f32
      %34 = vector.broadcast %cst_17 : f32 to vector<64x1xf32>
      %35 = arith.divf %33, %34 : vector<64x1xf32>
      %cst_18 = arith.constant 9.99999997E-7 : f32
      %36 = vector.broadcast %cst_18 : f32 to vector<64x1xf32>
      %37 = arith.addf %35, %36 : vector<64x1xf32>
      %38 = math.rsqrt %37 : vector<64x1xf32>
      %39 = vector.broadcast %38 : vector<64x1xf32> to vector<64x128xf32>
      %40 = arith.mulf %30, %39 : vector<64x128xf32>
      %c0_19 = arith.constant 0 : index
      %c0_20 = arith.constant 0 : index
      %41 = vector.load %arg3[%c0_19, %c0_20] : memref<1x128xf32, #tpu.memory_space<vmem>>, vector<1x128xf32>
      %42 = vector.broadcast %41 : vector<1x128xf32> to vector<64x128xf32>
      %43 = arith.mulf %40, %42 : vector<64x128xf32>
      %c0_21 = arith.constant 0 : index
      %c0_22 = arith.constant 0 : index
      %44 = vector.load %arg4[%c0_21, %c0_22] : memref<1x128xf32, #tpu.memory_space<vmem>>, vector<1x128xf32>
      %45 = vector.broadcast %44 : vector<1x128xf32> to vector<64x128xf32>
      %46 = arith.addf %43, %45 : vector<64x128xf32>
      %47 = arith.truncf %46 : vector<64x128xf32> to vector<64x128xbf16>
      %c0_23 = arith.constant 0 : index
      %c0_24 = arith.constant 0 : index
      %48 = vector.load %arg8[%c0_23, %c0_24] : memref<64x128xbf16, #tpu.memory_space<vmem>>, vector<64x128xbf16>
      tpu.vector_store %arg8[%c0_23, %c0_24], %47 {strides = array<i32>} : memref<64x128xbf16, #tpu.memory_space<vmem>>, vector<64x128xbf16>,
    } else {
    }
    %c0 = arith.constant 0 : index
    %c0_1 = arith.constant 0 : index
    %3 = vector.load %arg8[%c0, %c0_1] : memref<64x128xbf16, #tpu.memory_space<vmem>>, vector<64x128xbf16>
    %c0_2 = arith.constant 0 : index
    %c0_3 = arith.constant 0 : index
    %4 = vector.load %arg5[%c0_2, %c0_3] : memref<128x512xbf16, #tpu.memory_space<vmem>>, vector<128x512xbf16>
    %cst = arith.constant dense<0.000000e+00> : vector<64x512xf32>
    %5 = tpu.matmul %3, %4, %cst {dimension_numbers = #tpu.dot_dimension_numbers<[1], [0], [0], [1], [0, 0, 1, 1], [], []>} : vector<64x128xbf16>, vector<128x512xbf16>, vector<64x512xf32> -> vector<64x512xf32>
    %c0_4 = arith.constant 0 : index
    %c0_5 = arith.constant 0 : index
    %6 = vector.load %arg6[%c0_4, %c0_5] : memref<1x512xf32, #tpu.memory_space<vmem>>, vector<1x512xf32>
    %7 = vector.broadcast %6 : vector<1x512xf32> to vector<64x512xf32>
    %8 = arith.addf %5, %7 : vector<64x512xf32>
    %9 = arith.mulf %8, %8 : vector<64x512xf32>
    %10 = arith.mulf %8, %9 : vector<64x512xf32>
    %cst_6 = arith.constant 4.471500e-02 : f32
    %11 = vector.broadcast %cst_6 : f32 to vector<64x512xf32>
    %12 = arith.mulf %11, %10 : vector<64x512xf32>
    %13 = arith.addf %8, %12 : vector<64x512xf32>
    %cst_7 = arith.constant 0.797884583 : f32
    %14 = vector.broadcast %cst_7 : f32 to vector<64x512xf32>
    %15 = arith.mulf %14, %13 : vector<64x512xf32>
    %16 = math.tanh %15 : vector<64x512xf32>
    %cst_8 = arith.constant 1.000000e+00 : f32
    %17 = vector.broadcast %cst_8 : f32 to vector<64x512xf32>
    %18 = arith.addf %17, %16 : vector<64x512xf32>
    %cst_9 = arith.constant 5.000000e-01 : f32
    %19 = vector.broadcast %cst_9 : f32 to vector<64x512xf32>
    %20 = arith.mulf %19, %18 : vector<64x512xf32>
    %21 = arith.mulf %8, %20 : vector<64x512xf32>
    %22 = arith.truncf %21 : vector<64x512xf32> to vector<64x512xbf16>
    %c0_10 = arith.constant 0 : index
    %c0_11 = arith.constant 0 : index
    %23 = vector.load %arg7[%c0_10, %c0_11] : memref<64x512xbf16, #tpu.memory_space<vmem>>, vector<64x512xbf16>
    tpu.vector_store %arg7[%c0_10, %c0_11], %22 {strides = array<i32>} : memref<64x512xbf16, #tpu.memory_space<vmem>>, vector<64x512xbf16>,
    return
  }
  func.func @transform_0(%arg0: i32, %arg1: i32) -> (i32, i32) {
    %c0_i32 = arith.constant 0 : i32
    %c0_i32_0 = arith.constant 0 : i32
    return %arg0, %c0_i32 : i32, i32
  }
  func.func @transform_1(%arg0: i32, %arg1: i32) -> (i32, i32) {
    %c0_i32 = arith.constant 0 : i32
    %c0_i32_0 = arith.constant 0 : i32
    %c0_i32_1 = arith.constant 0 : i32
    return %c0_i32, %c0_i32_0 : i32, i32
  }
  func.func @transform_2(%arg0: i32, %arg1: i32) -> (i32, i32) {
    %c0_i32 = arith.constant 0 : i32
    %c0_i32_0 = arith.constant 0 : i32
    %c0_i32_1 = arith.constant 0 : i32
    return %c0_i32, %c0_i32_0 : i32, i32
  }
  func.func @transform_3(%arg0: i32, %arg1: i32) -> (i32, i32) {
    %c0_i32 = arith.constant 0 : i32
    %c0_i32_0 = arith.constant 0 : i32
    return %c0_i32, %arg1 : i32, i32
  }
  func.func @transform_4(%arg0: i32, %arg1: i32) -> (i32, i32) {
    %c0_i32 = arith.constant 0 : i32
    %c0_i32_0 = arith.constant 0 : i32
    return %c0_i32, %arg1 : i32, i32
  }
  func.func @transform_5(%arg0: i32, %arg1: i32) -> (i32, i32) {
    %c0_i32 = arith.constant 0 : i32
    return %arg0, %arg1 : i32, i32
  }
}

module attributes {stable_mosaic.version = 11 : i64} {
  func.func @_linear_kernel(%arg0: i32, %arg1: i32, %arg2: i32, %arg3: memref<64x512xbf16, #tpu.memory_space<vmem>>, %arg4: memref<512x128xbf16, #tpu.memory_space<vmem>>, %arg5: memref<1x128xf32, #tpu.memory_space<vmem>>, %arg6: memref<64x128xf32, #tpu.memory_space<vmem>>, %arg7: memref<64x128xf32, #tpu.memory_space<vmem>>, %arg8: memref<64x128xf32, #tpu.memory_space<vmem>>) attributes {dimension_semantics = [#tpu.dimension_semantics<parallel>, #tpu.dimension_semantics<parallel>, #tpu.dimension_semantics<arbitrary>], iteration_bounds = array<i64: 1, 1, 1>, scalar_prefetch = 0 : i64, scratch_operands = 1 : i64, tpu.core_type = #tpu.core_type<tc>, window_params = [{transform_indices = @transform_0, window_bounds = array<i64: 64, 512>}, {transform_indices = @transform_1, window_bounds = array<i64: 512, 128>}, {transform_indices = @transform_2, window_bounds = array<i64: 1, 128>}, {transform_indices = @transform_3, window_bounds = array<i64: 64, 128>}, {transform_indices = @transform_4, window_bounds = array<i64: 64, 128>}]} {
    %c0_i32 = arith.constant 0 : i32
    %0 = arith.cmpi eq, %arg2, %c0_i32 : i32
    %1 = arith.extui %0 : i1 to i32
    %c0_i32_0 = arith.constant 0 : i32
    %2 = arith.cmpi ne, %1, %c0_i32_0 : i32
    scf.if %2 {
      %cst_10 = arith.constant 0.000000e+00 : f32
      %12 = vector.broadcast %cst_10 : f32 to vector<64x128xf32>
      %c0_11 = arith.constant 0 : index
      %c0_12 = arith.constant 0 : index
      %13 = vector.load %arg8[%c0_11, %c0_12] : memref<64x128xf32, #tpu.memory_space<vmem>>, vector<64x128xf32>
      tpu.vector_store %arg8[%c0_11, %c0_12], %12 {strides = array<i32>} : memref<64x128xf32, #tpu.memory_space<vmem>>, vector<64x128xf32>,
    } else {
    }
    %c0 = arith.constant 0 : index
    %c0_1 = arith.constant 0 : index
    %3 = vector.load %arg8[%c0, %c0_1] : memref<64x128xf32, #tpu.memory_space<vmem>>, vector<64x128xf32>
    %c0_2 = arith.constant 0 : index
    %c0_3 = arith.constant 0 : index
    %4 = vector.load %arg3[%c0_2, %c0_3] : memref<64x512xbf16, #tpu.memory_space<vmem>>, vector<64x512xbf16>
    %c0_4 = arith.constant 0 : index
    %c0_5 = arith.constant 0 : index
    %5 = vector.load %arg4[%c0_4, %c0_5] : memref<512x128xbf16, #tpu.memory_space<vmem>>, vector<512x128xbf16>
    %cst = arith.constant dense<0.000000e+00> : vector<64x128xf32>
    %6 = tpu.matmul %4, %5, %cst {dimension_numbers = #tpu.dot_dimension_numbers<[1], [0], [0], [1], [0, 0, 1, 1], [], []>} : vector<64x512xbf16>, vector<512x128xbf16>, vector<64x128xf32> -> vector<64x128xf32>
    %7 = arith.addf %3, %6 : vector<64x128xf32>
    %c0_6 = arith.constant 0 : index
    %c0_7 = arith.constant 0 : index
    %8 = vector.load %arg8[%c0_6, %c0_7] : memref<64x128xf32, #tpu.memory_space<vmem>>, vector<64x128xf32>
    tpu.vector_store %arg8[%c0_6, %c0_7], %7 {strides = array<i32>} : memref<64x128xf32, #tpu.memory_space<vmem>>, vector<64x128xf32>,
    %c0_i32_8 = arith.constant 0 : i32
    %9 = arith.cmpi eq, %arg2, %c0_i32_8 : i32
    %10 = arith.extui %9 : i1 to i32
    %c0_i32_9 = arith.constant 0 : i32
    %11 = arith.cmpi ne, %10, %c0_i32_9 : i32
    scf.if %11 {
      %c0_10 = arith.constant 0 : index
      %c0_11 = arith.constant 0 : index
      %12 = vector.load %arg8[%c0_10, %c0_11] : memref<64x128xf32, #tpu.memory_space<vmem>>, vector<64x128xf32>
      %c0_12 = arith.constant 0 : index
      %c0_13 = arith.constant 0 : index
      %13 = vector.load %arg5[%c0_12, %c0_13] : memref<1x128xf32, #tpu.memory_space<vmem>>, vector<1x128xf32>
      %14 = vector.broadcast %13 : vector<1x128xf32> to vector<64x128xf32>
      %15 = arith.addf %12, %14 : vector<64x128xf32>
      %c0_14 = arith.constant 0 : index
      %c0_15 = arith.constant 0 : index
      %16 = vector.load %arg6[%c0_14, %c0_15] : memref<64x128xf32, #tpu.memory_space<vmem>>, vector<64x128xf32>
      %17 = arith.addf %15, %16 : vector<64x128xf32>
      %c0_16 = arith.constant 0 : index
      %c0_17 = arith.constant 0 : index
      %18 = vector.load %arg7[%c0_16, %c0_17] : memref<64x128xf32, #tpu.memory_space<vmem>>, vector<64x128xf32>
      tpu.vector_store %arg7[%c0_16, %c0_17], %17 {strides = array<i32>} : memref<64x128xf32, #tpu.memory_space<vmem>>, vector<64x128xf32>,
    } else {
    }
    return
  }
  func.func @transform_0(%arg0: i32, %arg1: i32, %arg2: i32) -> (i32, i32) {
    %c0_i32 = arith.constant 0 : i32
    return %arg0, %arg2 : i32, i32
  }
  func.func @transform_1(%arg0: i32, %arg1: i32, %arg2: i32) -> (i32, i32) {
    %c0_i32 = arith.constant 0 : i32
    return %arg2, %arg1 : i32, i32
  }
  func.func @transform_2(%arg0: i32, %arg1: i32, %arg2: i32) -> (i32, i32) {
    %c0_i32 = arith.constant 0 : i32
    %c0_i32_0 = arith.constant 0 : i32
    return %c0_i32, %arg1 : i32, i32
  }
  func.func @transform_3(%arg0: i32, %arg1: i32, %arg2: i32) -> (i32, i32) {
    %c0_i32 = arith.constant 0 : i32
    return %arg0, %arg1 : i32, i32
  }
  func.func @transform_4(%arg0: i32, %arg1: i32, %arg2: i32) -> (i32, i32) {
    %c0_i32 = arith.constant 0 : i32
    return %arg0, %arg1 : i32, i32
  }
}

module attributes {stable_mosaic.version = 11 : i64} {
  func.func @_pool_l2norm_kernel(%arg0: i32, %arg1: memref<8x8x128xf32, #tpu.memory_space<vmem>>, %arg2: memref<8x128xf32, #tpu.memory_space<vmem>>) attributes {dimension_semantics = [#tpu.dimension_semantics<parallel>], iteration_bounds = array<i64: 1>, scalar_prefetch = 0 : i64, scratch_operands = 0 : i64, tpu.core_type = #tpu.core_type<tc>, window_params = [{transform_indices = @transform_0, window_bounds = array<i64: 8, 8, 128>}, {transform_indices = @transform_1, window_bounds = array<i64: 8, 128>}]} {
    %c0 = arith.constant 0 : index
    %c0_0 = arith.constant 0 : index
    %c0_1 = arith.constant 0 : index
    %0 = vector.load %arg1[%c0, %c0_0, %c0_1] : memref<8x8x128xf32, #tpu.memory_space<vmem>>, vector<8x8x128xf32>
    %1 = tpu.iota {dimensions = array<i32: 1>} : vector<1x8x1xi32>
    %c1_i32 = arith.constant 1 : i32
    %2 = vector.broadcast %c1_i32 : i32 to vector<1x8x1xi32>
    %3 = arith.cmpi sge, %1, %2 : vector<1x8x1xi32>
    %c5_i32 = arith.constant 5 : i32
    %4 = vector.broadcast %c5_i32 : i32 to vector<1x8x1xi32>
    %5 = arith.cmpi slt, %1, %4 : vector<1x8x1xi32>
    %6 = arith.andi %3, %5 : vector<1x8x1xi1>
    %cst = arith.constant 0.000000e+00 : f32
    %7 = vector.shape_cast %6 : vector<1x8x1xi1> to vector<1x8x1xi1>
    %8 = vector.broadcast %7 : vector<1x8x1xi1> to vector<8x8x128xi1>
    %9 = vector.broadcast %cst : f32 to vector<8x8x128xf32>
    %10 = arith.select %8, %0, %9 : vector<8x8x128xi1>, vector<8x8x128xf32>
    %cst_2 = arith.constant dense<0.000000e+00> : vector<8x128xf32>
    %11 = vector.multi_reduction <add>, %10, %cst_2 [1] : vector<8x8x128xf32> to vector<8x128xf32>
    %cst_3 = arith.constant 2.500000e-01 : f32
    %12 = vector.broadcast %cst_3 : f32 to vector<8x128xf32>
    %13 = arith.mulf %11, %12 : vector<8x128xf32>
    %14 = arith.mulf %13, %13 : vector<8x128xf32>
    %cst_4 = arith.constant dense<0.000000e+00> : vector<8xf32>
    %15 = vector.multi_reduction <add>, %14, %cst_4 [1] : vector<8x128xf32> to vector<8xf32>
    %16 = vector.shape_cast %15 : vector<8xf32> to vector<8x1xf32>
    %cst_5 = arith.constant 1.000000e-24 : f32
    %17 = vector.broadcast %cst_5 : f32 to vector<8x1xf32>
    %18 = arith.maximumf %16, %17 : vector<8x1xf32>
    %19 = math.rsqrt %18 : vector<8x1xf32>
    %20 = vector.broadcast %19 : vector<8x1xf32> to vector<8x128xf32>
    %21 = arith.mulf %13, %20 : vector<8x128xf32>
    %c0_6 = arith.constant 0 : index
    %c0_7 = arith.constant 0 : index
    %22 = vector.load %arg2[%c0_6, %c0_7] : memref<8x128xf32, #tpu.memory_space<vmem>>, vector<8x128xf32>
    tpu.vector_store %arg2[%c0_6, %c0_7], %21 {strides = array<i32>} : memref<8x128xf32, #tpu.memory_space<vmem>>, vector<8x128xf32>,
    return
  }
  func.func @transform_0(%arg0: i32) -> (i32, i32, i32) {
    %c0_i32 = arith.constant 0 : i32
    %c0_i32_0 = arith.constant 0 : i32
    %c0_i32_1 = arith.constant 0 : i32
    return %arg0, %c0_i32, %c0_i32_0 : i32, i32, i32
  }
  func.func @transform_1(%arg0: i32) -> (i32, i32) {
    %c0_i32 = arith.constant 0 : i32
    %c0_i32_0 = arith.constant 0 : i32
    return %arg0, %c0_i32 : i32, i32
  }
}

module attributes {stable_mosaic.version = 11 : i64} {
  func.func @_ln_linear_kernel(%arg0: i32, %arg1: i32, %arg2: memref<8x128xf32, #tpu.memory_space<vmem>>, %arg3: memref<1x128xf32, #tpu.memory_space<vmem>>, %arg4: memref<1x128xf32, #tpu.memory_space<vmem>>, %arg5: memref<128x128xbf16, #tpu.memory_space<vmem>>, %arg6: memref<1x128xf32, #tpu.memory_space<vmem>>, %arg7: memref<8x128xf32, #tpu.memory_space<vmem>>, %arg8: memref<8x128xbf16, #tpu.memory_space<vmem>>) attributes {dimension_semantics = [#tpu.dimension_semantics<parallel>, #tpu.dimension_semantics<arbitrary>], iteration_bounds = array<i64: 1, 1>, scalar_prefetch = 0 : i64, scratch_operands = 1 : i64, tpu.core_type = #tpu.core_type<tc>, window_params = [{transform_indices = @transform_0, window_bounds = array<i64: 8, 128>}, {pipeline_mode = #tpu.pipeline_mode<synchronous>, transform_indices = @transform_1, window_bounds = array<i64: 1, 128>}, {pipeline_mode = #tpu.pipeline_mode<synchronous>, transform_indices = @transform_2, window_bounds = array<i64: 1, 128>}, {transform_indices = @transform_3, window_bounds = array<i64: 128, 128>}, {transform_indices = @transform_4, window_bounds = array<i64: 1, 128>}, {transform_indices = @transform_5, window_bounds = array<i64: 8, 128>}]} {
    %c0_i32 = arith.constant 0 : i32
    %0 = arith.cmpi eq, %arg1, %c0_i32 : i32
    %1 = arith.extui %0 : i1 to i32
    %c0_i32_0 = arith.constant 0 : i32
    %2 = arith.cmpi ne, %1, %c0_i32_0 : i32
    scf.if %2 {
      %c0_8 = arith.constant 0 : index
      %c0_9 = arith.constant 0 : index
      %10 = vector.load %arg2[%c0_8, %c0_9] : memref<8x128xf32, #tpu.memory_space<vmem>>, vector<8x128xf32>
      %cst_10 = arith.constant dense<0.000000e+00> : vector<8xf32>
      %11 = vector.multi_reduction <add>, %10, %cst_10 [1] : vector<8x128xf32> to vector<8xf32>
      %12 = vector.shape_cast %11 : vector<8xf32> to vector<8x1xf32>
      %cst_11 = arith.constant 1.280000e+02 : f32
      %13 = vector.broadcast %cst_11 : f32 to vector<8x1xf32>
      %14 = arith.divf %12, %13 : vector<8x1xf32>
      %15 = vector.broadcast %14 : vector<8x1xf32> to vector<8x128xf32>
      %16 = arith.subf %10, %15 : vector<8x128xf32>
      %17 = arith.mulf %16, %16 : vector<8x128xf32>
      %cst_12 = arith.constant dense<0.000000e+00> : vector<8xf32>
      %18 = vector.multi_reduction <add>, %17, %cst_12 [1] : vector<8x128xf32> to vector<8xf32>
      %19 = vector.shape_cast %18 : vector<8xf32> to vector<8x1xf32>
      %cst_13 = arith.constant 1.280000e+02 : f32
      %20 = vector.broadcast %cst_13 : f32 to vector<8x1xf32>
      %21 = arith.divf %19, %20 : vector<8x1xf32>
      %cst_14 = arith.constant 9.99999974E-6 : f32
      %22 = vector.broadcast %cst_14 : f32 to vector<8x1xf32>
      %23 = arith.addf %21, %22 : vector<8x1xf32>
      %24 = math.rsqrt %23 : vector<8x1xf32>
      %25 = vector.broadcast %24 : vector<8x1xf32> to vector<8x128xf32>
      %26 = arith.mulf %16, %25 : vector<8x128xf32>
      %c0_15 = arith.constant 0 : index
      %c0_16 = arith.constant 0 : index
      %27 = vector.load %arg3[%c0_15, %c0_16] : memref<1x128xf32, #tpu.memory_space<vmem>>, vector<1x128xf32>
      %28 = vector.broadcast %27 : vector<1x128xf32> to vector<8x128xf32>
      %29 = arith.mulf %26, %28 : vector<8x128xf32>
      %c0_17 = arith.constant 0 : index
      %c0_18 = arith.constant 0 : index
      %30 = vector.load %arg4[%c0_17, %c0_18] : memref<1x128xf32, #tpu.memory_space<vmem>>, vector<1x128xf32>
      %31 = vector.broadcast %30 : vector<1x128xf32> to vector<8x128xf32>
      %32 = arith.addf %29, %31 : vector<8x128xf32>
      %33 = arith.truncf %32 : vector<8x128xf32> to vector<8x128xbf16>
      %c0_19 = arith.constant 0 : index
      %c0_20 = arith.constant 0 : index
      %34 = vector.load %arg8[%c0_19, %c0_20] : memref<8x128xbf16, #tpu.memory_space<vmem>>, vector<8x128xbf16>
      tpu.vector_store %arg8[%c0_19, %c0_20], %33 {strides = array<i32>} : memref<8x128xbf16, #tpu.memory_space<vmem>>, vector<8x128xbf16>,
    } else {
    }
    %c0 = arith.constant 0 : index
    %c0_1 = arith.constant 0 : index
    %3 = vector.load %arg8[%c0, %c0_1] : memref<8x128xbf16, #tpu.memory_space<vmem>>, vector<8x128xbf16>
    %c0_2 = arith.constant 0 : index
    %c0_3 = arith.constant 0 : index
    %4 = vector.load %arg5[%c0_2, %c0_3] : memref<128x128xbf16, #tpu.memory_space<vmem>>, vector<128x128xbf16>
    %cst = arith.constant dense<0.000000e+00> : vector<8x128xf32>
    %5 = tpu.matmul %3, %4, %cst {dimension_numbers = #tpu.dot_dimension_numbers<[1], [0], [0], [1], [0, 0, 1, 1], [], []>} : vector<8x128xbf16>, vector<128x128xbf16>, vector<8x128xf32> -> vector<8x128xf32>
    %c0_4 = arith.constant 0 : index
    %c0_5 = arith.constant 0 : index
    %6 = vector.load %arg6[%c0_4, %c0_5] : memref<1x128xf32, #tpu.memory_space<vmem>>, vector<1x128xf32>
    %7 = vector.broadcast %6 : vector<1x128xf32> to vector<8x128xf32>
    %8 = arith.addf %5, %7 : vector<8x128xf32>
    %c0_6 = arith.constant 0 : index
    %c0_7 = arith.constant 0 : index
    %9 = vector.load %arg7[%c0_6, %c0_7] : memref<8x128xf32, #tpu.memory_space<vmem>>, vector<8x128xf32>
    tpu.vector_store %arg7[%c0_6, %c0_7], %8 {strides = array<i32>} : memref<8x128xf32, #tpu.memory_space<vmem>>, vector<8x128xf32>,
    return
  }
  func.func @transform_0(%arg0: i32, %arg1: i32) -> (i32, i32) {
    %c0_i32 = arith.constant 0 : i32
    %c0_i32_0 = arith.constant 0 : i32
    return %arg0, %c0_i32 : i32, i32
  }
  func.func @transform_1(%arg0: i32, %arg1: i32) -> (i32, i32) {
    %c0_i32 = arith.constant 0 : i32
    %c0_i32_0 = arith.constant 0 : i32
    %c0_i32_1 = arith.constant 0 : i32
    return %c0_i32, %c0_i32_0 : i32, i32
  }
  func.func @transform_2(%arg0: i32, %arg1: i32) -> (i32, i32) {
    %c0_i32 = arith.constant 0 : i32
    %c0_i32_0 = arith.constant 0 : i32
    %c0_i32_1 = arith.constant 0 : i32
    return %c0_i32, %c0_i32_0 : i32, i32
  }
  func.func @transform_3(%arg0: i32, %arg1: i32) -> (i32, i32) {
    %c0_i32 = arith.constant 0 : i32
    %c0_i32_0 = arith.constant 0 : i32
    return %c0_i32, %arg1 : i32, i32
  }
  func.func @transform_4(%arg0: i32, %arg1: i32) -> (i32, i32) {
    %c0_i32 = arith.constant 0 : i32
    %c0_i32_0 = arith.constant 0 : i32
    return %c0_i32, %arg1 : i32, i32
  }
  func.func @transform_5(%arg0: i32, %arg1: i32) -> (i32, i32) {
    %c0_i32 = arith.constant 0 : i32
    return %arg0, %arg1 : i32, i32
  }
}

module attributes {stable_mosaic.version = 11 : i64} {
  func.func @_attn_kernel(%arg0: i32, %arg1: i32, %arg2: memref<1x8x128xbf16, #tpu.memory_space<vmem>>, %arg3: memref<1x8x128xbf16, #tpu.memory_space<vmem>>, %arg4: memref<1x8x128xbf16, #tpu.memory_space<vmem>>, %arg5: memref<1x8x128xbf16, #tpu.memory_space<vmem>>) attributes {dimension_semantics = [#tpu.dimension_semantics<parallel>, #tpu.dimension_semantics<parallel>], iteration_bounds = array<i64: 2, 1>, scalar_prefetch = 0 : i64, scratch_operands = 0 : i64, tpu.core_type = #tpu.core_type<tc>, window_params = [{transform_indices = @transform_0, window_bounds = array<i64: 1, 8, 128>}, {transform_indices = @transform_1, window_bounds = array<i64: 1, 8, 128>}, {transform_indices = @transform_2, window_bounds = array<i64: 1, 8, 128>}, {transform_indices = @transform_3, window_bounds = array<i64: 1, 8, 128>}]} {
    %0 = tpu.iota {dimensions = array<i32: 1>} : vector<8x8xi32>
    %c4_i32 = arith.constant 4 : i32
    %1 = vector.broadcast %c4_i32 : i32 to vector<8x8xi32>
    %2 = arith.cmpi slt, %0, %1 : vector<8x8xi32>
    %c0 = arith.constant 0 : index
    %c0_0 = arith.constant 0 : index
    %c0_1 = arith.constant 0 : index
    %3 = vector.load %arg2[%c0, %c0_0, %c0_1] : memref<1x8x128xbf16, #tpu.memory_space<vmem>>, vector<1x8x128xbf16>
    %4 = vector.shape_cast %3 : vector<1x8x128xbf16> to vector<8x128xbf16>
    %c0_2 = arith.constant 0 : index
    %c0_3 = arith.constant 0 : index
    %c0_4 = arith.constant 0 : index
    %5 = vector.load %arg3[%c0_2, %c0_3, %c0_4] : memref<1x8x128xbf16, #tpu.memory_space<vmem>>, vector<1x8x128xbf16>
    %6 = vector.shape_cast %5 : vector<1x8x128xbf16> to vector<8x128xbf16>
    %c0_5 = arith.constant 0 : index
    %c0_6 = arith.constant 0 : index
    %c0_7 = arith.constant 0 : index
    %7 = vector.load %arg4[%c0_5, %c0_6, %c0_7] : memref<1x8x128xbf16, #tpu.memory_space<vmem>>, vector<1x8x128xbf16>
    %8 = vector.shape_cast %7 : vector<1x8x128xbf16> to vector<8x128xbf16>
    %9 = vector.extract_strided_slice %4 {offsets = [0, 0], sizes = [8, 32], strides = [1, 1]} : vector<8x128xbf16> to vector<8x32xbf16>
    %10 = vector.extract_strided_slice %6 {offsets = [0, 0], sizes = [8, 32], strides = [1, 1]} : vector<8x128xbf16> to vector<8x32xbf16>
    %11 = vector.extract_strided_slice %8 {offsets = [0, 0], sizes = [8, 32], strides = [1, 1]} : vector<8x128xbf16> to vector<8x32xbf16>
    %cst = arith.constant dense<0.000000e+00> : vector<8x8xf32>
    %12 = tpu.matmul %9, %10, %cst {dimension_numbers = #tpu.dot_dimension_numbers<[1], [1], [0], [0], [0, 0, 1, 0], [], []>} : vector<8x32xbf16>, vector<8x32xbf16>, vector<8x8xf32> -> vector<8x8xf32>
    %cst_8 = arith.constant 0.176776692 : f32
    %13 = vector.broadcast %cst_8 : f32 to vector<8x8xf32>
    %14 = arith.mulf %12, %13 : vector<8x8xf32>
    %cst_9 = arith.constant -1.000000e+30 : f32
    %15 = vector.broadcast %cst_9 : f32 to vector<8x8xf32>
    %16 = arith.select %2, %14, %15 : vector<8x8xi1>, vector<8x8xf32>
    %cst_10 = arith.constant dense<0xFF800000> : vector<8xf32>
    %17 = vector.multi_reduction <maximumf>, %16, %cst_10 [1] : vector<8x8xf32> to vector<8xf32>
    %18 = vector.shape_cast %17 : vector<8xf32> to vector<8x1xf32>
    %19 = vector.broadcast %18 : vector<8x1xf32> to vector<8x8xf32>
    %20 = arith.subf %16, %19 : vector<8x8xf32>
    %21 = math.exp %20 : vector<8x8xf32>
    %cst_11 = arith.constant dense<0.000000e+00> : vector<8xf32>
    %22 = vector.multi_reduction <add>, %21, %cst_11 [1] : vector<8x8xf32> to vector<8xf32>
    %23 = vector.shape_cast %22 : vector<8xf32> to vector<8x1xf32>
    %24 = tpu.reciprocal %23 {approx = true} : vector<8x1xf32> -> vector<8x1xf32>
    %25 = vector.broadcast %24 : vector<8x1xf32> to vector<8x8xf32>
    %26 = arith.mulf %21, %25 : vector<8x8xf32>
    %27 = arith.truncf %26 : vector<8x8xf32> to vector<8x8xbf16>
    %cst_12 = arith.constant dense<0.000000e+00> : vector<8x32xf32>
    %28 = tpu.matmul %27, %11, %cst_12 {dimension_numbers = #tpu.dot_dimension_numbers<[1], [0], [0], [1], [0, 0, 1, 1], [], []>} : vector<8x8xbf16>, vector<8x32xbf16>, vector<8x32xf32> -> vector<8x32xf32>
    %29 = vector.extract_strided_slice %4 {offsets = [0, 32], sizes = [8, 32], strides = [1, 1]} : vector<8x128xbf16> to vector<8x32xbf16>
    %30 = vector.extract_strided_slice %6 {offsets = [0, 32], sizes = [8, 32], strides = [1, 1]} : vector<8x128xbf16> to vector<8x32xbf16>
    %31 = vector.extract_strided_slice %8 {offsets = [0, 32], sizes = [8, 32], strides = [1, 1]} : vector<8x128xbf16> to vector<8x32xbf16>
    %cst_13 = arith.constant dense<0.000000e+00> : vector<8x8xf32>
    %32 = tpu.matmul %29, %30, %cst_13 {dimension_numbers = #tpu.dot_dimension_numbers<[1], [1], [0], [0], [0, 0, 1, 0], [], []>} : vector<8x32xbf16>, vector<8x32xbf16>, vector<8x8xf32> -> vector<8x8xf32>
    %cst_14 = arith.constant 0.176776692 : f32
    %33 = vector.broadcast %cst_14 : f32 to vector<8x8xf32>
    %34 = arith.mulf %32, %33 : vector<8x8xf32>
    %cst_15 = arith.constant -1.000000e+30 : f32
    %35 = vector.broadcast %cst_15 : f32 to vector<8x8xf32>
    %36 = arith.select %2, %34, %35 : vector<8x8xi1>, vector<8x8xf32>
    %cst_16 = arith.constant dense<0xFF800000> : vector<8xf32>
    %37 = vector.multi_reduction <maximumf>, %36, %cst_16 [1] : vector<8x8xf32> to vector<8xf32>
    %38 = vector.shape_cast %37 : vector<8xf32> to vector<8x1xf32>
    %39 = vector.broadcast %38 : vector<8x1xf32> to vector<8x8xf32>
    %40 = arith.subf %36, %39 : vector<8x8xf32>
    %41 = math.exp %40 : vector<8x8xf32>
    %cst_17 = arith.constant dense<0.000000e+00> : vector<8xf32>
    %42 = vector.multi_reduction <add>, %41, %cst_17 [1] : vector<8x8xf32> to vector<8xf32>
    %43 = vector.shape_cast %42 : vector<8xf32> to vector<8x1xf32>
    %44 = tpu.reciprocal %43 {approx = true} : vector<8x1xf32> -> vector<8x1xf32>
    %45 = vector.broadcast %44 : vector<8x1xf32> to vector<8x8xf32>
    %46 = arith.mulf %41, %45 : vector<8x8xf32>
    %47 = arith.truncf %46 : vector<8x8xf32> to vector<8x8xbf16>
    %cst_18 = arith.constant dense<0.000000e+00> : vector<8x32xf32>
    %48 = tpu.matmul %47, %31, %cst_18 {dimension_numbers = #tpu.dot_dimension_numbers<[1], [0], [0], [1], [0, 0, 1, 1], [], []>} : vector<8x8xbf16>, vector<8x32xbf16>, vector<8x32xf32> -> vector<8x32xf32>
    %49 = vector.extract_strided_slice %4 {offsets = [0, 64], sizes = [8, 32], strides = [1, 1]} : vector<8x128xbf16> to vector<8x32xbf16>
    %50 = vector.extract_strided_slice %6 {offsets = [0, 64], sizes = [8, 32], strides = [1, 1]} : vector<8x128xbf16> to vector<8x32xbf16>
    %51 = vector.extract_strided_slice %8 {offsets = [0, 64], sizes = [8, 32], strides = [1, 1]} : vector<8x128xbf16> to vector<8x32xbf16>
    %cst_19 = arith.constant dense<0.000000e+00> : vector<8x8xf32>
    %52 = tpu.matmul %49, %50, %cst_19 {dimension_numbers = #tpu.dot_dimension_numbers<[1], [1], [0], [0], [0, 0, 1, 0], [], []>} : vector<8x32xbf16>, vector<8x32xbf16>, vector<8x8xf32> -> vector<8x8xf32>
    %cst_20 = arith.constant 0.176776692 : f32
    %53 = vector.broadcast %cst_20 : f32 to vector<8x8xf32>
    %54 = arith.mulf %52, %53 : vector<8x8xf32>
    %cst_21 = arith.constant -1.000000e+30 : f32
    %55 = vector.broadcast %cst_21 : f32 to vector<8x8xf32>
    %56 = arith.select %2, %54, %55 : vector<8x8xi1>, vector<8x8xf32>
    %cst_22 = arith.constant dense<0xFF800000> : vector<8xf32>
    %57 = vector.multi_reduction <maximumf>, %56, %cst_22 [1] : vector<8x8xf32> to vector<8xf32>
    %58 = vector.shape_cast %57 : vector<8xf32> to vector<8x1xf32>
    %59 = vector.broadcast %58 : vector<8x1xf32> to vector<8x8xf32>
    %60 = arith.subf %56, %59 : vector<8x8xf32>
    %61 = math.exp %60 : vector<8x8xf32>
    %cst_23 = arith.constant dense<0.000000e+00> : vector<8xf32>
    %62 = vector.multi_reduction <add>, %61, %cst_23 [1] : vector<8x8xf32> to vector<8xf32>
    %63 = vector.shape_cast %62 : vector<8xf32> to vector<8x1xf32>
    %64 = tpu.reciprocal %63 {approx = true} : vector<8x1xf32> -> vector<8x1xf32>
    %65 = vector.broadcast %64 : vector<8x1xf32> to vector<8x8xf32>
    %66 = arith.mulf %61, %65 : vector<8x8xf32>
    %67 = arith.truncf %66 : vector<8x8xf32> to vector<8x8xbf16>
    %cst_24 = arith.constant dense<0.000000e+00> : vector<8x32xf32>
    %68 = tpu.matmul %67, %51, %cst_24 {dimension_numbers = #tpu.dot_dimension_numbers<[1], [0], [0], [1], [0, 0, 1, 1], [], []>} : vector<8x8xbf16>, vector<8x32xbf16>, vector<8x32xf32> -> vector<8x32xf32>
    %69 = vector.extract_strided_slice %4 {offsets = [0, 96], sizes = [8, 32], strides = [1, 1]} : vector<8x128xbf16> to vector<8x32xbf16>
    %70 = vector.extract_strided_slice %6 {offsets = [0, 96], sizes = [8, 32], strides = [1, 1]} : vector<8x128xbf16> to vector<8x32xbf16>
    %71 = vector.extract_strided_slice %8 {offsets = [0, 96], sizes = [8, 32], strides = [1, 1]} : vector<8x128xbf16> to vector<8x32xbf16>
    %cst_25 = arith.constant dense<0.000000e+00> : vector<8x8xf32>
    %72 = tpu.matmul %69, %70, %cst_25 {dimension_numbers = #tpu.dot_dimension_numbers<[1], [1], [0], [0], [0, 0, 1, 0], [], []>} : vector<8x32xbf16>, vector<8x32xbf16>, vector<8x8xf32> -> vector<8x8xf32>
    %cst_26 = arith.constant 0.176776692 : f32
    %73 = vector.broadcast %cst_26 : f32 to vector<8x8xf32>
    %74 = arith.mulf %72, %73 : vector<8x8xf32>
    %cst_27 = arith.constant -1.000000e+30 : f32
    %75 = vector.broadcast %cst_27 : f32 to vector<8x8xf32>
    %76 = arith.select %2, %74, %75 : vector<8x8xi1>, vector<8x8xf32>
    %cst_28 = arith.constant dense<0xFF800000> : vector<8xf32>
    %77 = vector.multi_reduction <maximumf>, %76, %cst_28 [1] : vector<8x8xf32> to vector<8xf32>
    %78 = vector.shape_cast %77 : vector<8xf32> to vector<8x1xf32>
    %79 = vector.broadcast %78 : vector<8x1xf32> to vector<8x8xf32>
    %80 = arith.subf %76, %79 : vector<8x8xf32>
    %81 = math.exp %80 : vector<8x8xf32>
    %cst_29 = arith.constant dense<0.000000e+00> : vector<8xf32>
    %82 = vector.multi_reduction <add>, %81, %cst_29 [1] : vector<8x8xf32> to vector<8xf32>
    %83 = vector.shape_cast %82 : vector<8xf32> to vector<8x1xf32>
    %84 = tpu.reciprocal %83 {approx = true} : vector<8x1xf32> -> vector<8x1xf32>
    %85 = vector.broadcast %84 : vector<8x1xf32> to vector<8x8xf32>
    %86 = arith.mulf %81, %85 : vector<8x8xf32>
    %87 = arith.truncf %86 : vector<8x8xf32> to vector<8x8xbf16>
    %cst_30 = arith.constant dense<0.000000e+00> : vector<8x32xf32>
    %88 = tpu.matmul %87, %71, %cst_30 {dimension_numbers = #tpu.dot_dimension_numbers<[1], [0], [0], [1], [0, 0, 1, 1], [], []>} : vector<8x8xbf16>, vector<8x32xbf16>, vector<8x32xf32> -> vector<8x32xf32>
    %89 = tpu.concatenate %28, %48, %68, %88 in 1 : vector<8x32xf32>, vector<8x32xf32>, vector<8x32xf32>, vector<8x32xf32> -> vector<8x128xf32>
    %90 = arith.truncf %89 : vector<8x128xf32> to vector<8x128xbf16>
    %c0_31 = arith.constant 0 : index
    %c0_32 = arith.constant 0 : index
    %c0_33 = arith.constant 0 : index
    %91 = vector.load %arg5[%c0_31, %c0_32, %c0_33] : memref<1x8x128xbf16, #tpu.memory_space<vmem>>, vector<1x8x128xbf16>
    %92 = vector.shape_cast %91 : vector<1x8x128xbf16> to vector<8x128xbf16>
    %93 = vector.shape_cast %90 : vector<8x128xbf16> to vector<1x8x128xbf16>
    tpu.vector_store %arg5[%c0_31, %c0_32, %c0_33], %93 {strides = array<i32>} : memref<1x8x128xbf16, #tpu.memory_space<vmem>>, vector<1x8x128xbf16>,
    return
  }
  func.func @transform_0(%arg0: i32, %arg1: i32) -> (i32, i32, i32) {
    %c0_i32 = arith.constant 0 : i32
    %c0_i32_0 = arith.constant 0 : i32
    return %arg0, %c0_i32, %arg1 : i32, i32, i32
  }
  func.func @transform_1(%arg0: i32, %arg1: i32) -> (i32, i32, i32) {
    %c1_i32 = arith.constant 1 : i32
    %0 = arith.addi %c1_i32, %arg1 : i32
    %c0_i32 = arith.constant 0 : i32
    %c0_i32_0 = arith.constant 0 : i32
    return %arg0, %c0_i32, %0 : i32, i32, i32
  }
  func.func @transform_2(%arg0: i32, %arg1: i32) -> (i32, i32, i32) {
    %c2_i32 = arith.constant 2 : i32
    %0 = arith.addi %c2_i32, %arg1 : i32
    %c0_i32 = arith.constant 0 : i32
    %c0_i32_0 = arith.constant 0 : i32
    return %arg0, %c0_i32, %0 : i32, i32, i32
  }
  func.func @transform_3(%arg0: i32, %arg1: i32) -> (i32, i32, i32) {
    %c0_i32 = arith.constant 0 : i32
    %c0_i32_0 = arith.constant 0 : i32
    return %arg0, %c0_i32, %arg1 : i32, i32, i32
  }
}

module attributes {stable_mosaic.version = 11 : i64} {
  func.func @_linear_kernel(%arg0: i32, %arg1: i32, %arg2: i32, %arg3: memref<16x128xbf16, #tpu.memory_space<vmem>>, %arg4: memref<128x128xbf16, #tpu.memory_space<vmem>>, %arg5: memref<1x128xf32, #tpu.memory_space<vmem>>, %arg6: memref<16x128xf32, #tpu.memory_space<vmem>>, %arg7: memref<16x128xf32, #tpu.memory_space<vmem>>, %arg8: memref<16x128xf32, #tpu.memory_space<vmem>>) attributes {dimension_semantics = [#tpu.dimension_semantics<parallel>, #tpu.dimension_semantics<parallel>, #tpu.dimension_semantics<arbitrary>], iteration_bounds = array<i64: 1, 1, 1>, scalar_prefetch = 0 : i64, scratch_operands = 1 : i64, tpu.core_type = #tpu.core_type<tc>, window_params = [{transform_indices = @transform_0, window_bounds = array<i64: 16, 128>}, {transform_indices = @transform_1, window_bounds = array<i64: 128, 128>}, {transform_indices = @transform_2, window_bounds = array<i64: 1, 128>}, {transform_indices = @transform_3, window_bounds = array<i64: 16, 128>}, {transform_indices = @transform_4, window_bounds = array<i64: 16, 128>}]} {
    %c0_i32 = arith.constant 0 : i32
    %0 = arith.cmpi eq, %arg2, %c0_i32 : i32
    %1 = arith.extui %0 : i1 to i32
    %c0_i32_0 = arith.constant 0 : i32
    %2 = arith.cmpi ne, %1, %c0_i32_0 : i32
    scf.if %2 {
      %cst_10 = arith.constant 0.000000e+00 : f32
      %12 = vector.broadcast %cst_10 : f32 to vector<16x128xf32>
      %c0_11 = arith.constant 0 : index
      %c0_12 = arith.constant 0 : index
      %13 = vector.load %arg8[%c0_11, %c0_12] : memref<16x128xf32, #tpu.memory_space<vmem>>, vector<16x128xf32>
      tpu.vector_store %arg8[%c0_11, %c0_12], %12 {strides = array<i32>} : memref<16x128xf32, #tpu.memory_space<vmem>>, vector<16x128xf32>,
    } else {
    }
    %c0 = arith.constant 0 : index
    %c0_1 = arith.constant 0 : index
    %3 = vector.load %arg8[%c0, %c0_1] : memref<16x128xf32, #tpu.memory_space<vmem>>, vector<16x128xf32>
    %c0_2 = arith.constant 0 : index
    %c0_3 = arith.constant 0 : index
    %4 = vector.load %arg3[%c0_2, %c0_3] : memref<16x128xbf16, #tpu.memory_space<vmem>>, vector<16x128xbf16>
    %c0_4 = arith.constant 0 : index
    %c0_5 = arith.constant 0 : index
    %5 = vector.load %arg4[%c0_4, %c0_5] : memref<128x128xbf16, #tpu.memory_space<vmem>>, vector<128x128xbf16>
    %cst = arith.constant dense<0.000000e+00> : vector<16x128xf32>
    %6 = tpu.matmul %4, %5, %cst {dimension_numbers = #tpu.dot_dimension_numbers<[1], [0], [0], [1], [0, 0, 1, 1], [], []>} : vector<16x128xbf16>, vector<128x128xbf16>, vector<16x128xf32> -> vector<16x128xf32>
    %7 = arith.addf %3, %6 : vector<16x128xf32>
    %c0_6 = arith.constant 0 : index
    %c0_7 = arith.constant 0 : index
    %8 = vector.load %arg8[%c0_6, %c0_7] : memref<16x128xf32, #tpu.memory_space<vmem>>, vector<16x128xf32>
    tpu.vector_store %arg8[%c0_6, %c0_7], %7 {strides = array<i32>} : memref<16x128xf32, #tpu.memory_space<vmem>>, vector<16x128xf32>,
    %c0_i32_8 = arith.constant 0 : i32
    %9 = arith.cmpi eq, %arg2, %c0_i32_8 : i32
    %10 = arith.extui %9 : i1 to i32
    %c0_i32_9 = arith.constant 0 : i32
    %11 = arith.cmpi ne, %10, %c0_i32_9 : i32
    scf.if %11 {
      %c0_10 = arith.constant 0 : index
      %c0_11 = arith.constant 0 : index
      %12 = vector.load %arg8[%c0_10, %c0_11] : memref<16x128xf32, #tpu.memory_space<vmem>>, vector<16x128xf32>
      %c0_12 = arith.constant 0 : index
      %c0_13 = arith.constant 0 : index
      %13 = vector.load %arg5[%c0_12, %c0_13] : memref<1x128xf32, #tpu.memory_space<vmem>>, vector<1x128xf32>
      %14 = vector.broadcast %13 : vector<1x128xf32> to vector<16x128xf32>
      %15 = arith.addf %12, %14 : vector<16x128xf32>
      %c0_14 = arith.constant 0 : index
      %c0_15 = arith.constant 0 : index
      %16 = vector.load %arg6[%c0_14, %c0_15] : memref<16x128xf32, #tpu.memory_space<vmem>>, vector<16x128xf32>
      %17 = arith.addf %15, %16 : vector<16x128xf32>
      %c0_16 = arith.constant 0 : index
      %c0_17 = arith.constant 0 : index
      %18 = vector.load %arg7[%c0_16, %c0_17] : memref<16x128xf32, #tpu.memory_space<vmem>>, vector<16x128xf32>
      tpu.vector_store %arg7[%c0_16, %c0_17], %17 {strides = array<i32>} : memref<16x128xf32, #tpu.memory_space<vmem>>, vector<16x128xf32>,
    } else {
    }
    return
  }
  func.func @transform_0(%arg0: i32, %arg1: i32, %arg2: i32) -> (i32, i32) {
    %c0_i32 = arith.constant 0 : i32
    return %arg0, %arg2 : i32, i32
  }
  func.func @transform_1(%arg0: i32, %arg1: i32, %arg2: i32) -> (i32, i32) {
    %c0_i32 = arith.constant 0 : i32
    return %arg2, %arg1 : i32, i32
  }
  func.func @transform_2(%arg0: i32, %arg1: i32, %arg2: i32) -> (i32, i32) {
    %c0_i32 = arith.constant 0 : i32
    %c0_i32_0 = arith.constant 0 : i32
    return %c0_i32, %arg1 : i32, i32
  }
  func.func @transform_3(%arg0: i32, %arg1: i32, %arg2: i32) -> (i32, i32) {
    %c0_i32 = arith.constant 0 : i32
    return %arg0, %arg1 : i32, i32
  }
  func.func @transform_4(%arg0: i32, %arg1: i32, %arg2: i32) -> (i32, i32) {
    %c0_i32 = arith.constant 0 : i32
    return %arg0, %arg1 : i32, i32
  }
}

module attributes {stable_mosaic.version = 11 : i64} {
  func.func @_ln_linear_kernel(%arg0: i32, %arg1: i32, %arg2: memref<16x128xf32, #tpu.memory_space<vmem>>, %arg3: memref<1x128xf32, #tpu.memory_space<vmem>>, %arg4: memref<1x128xf32, #tpu.memory_space<vmem>>, %arg5: memref<128x384xbf16, #tpu.memory_space<vmem>>, %arg6: memref<1x384xf32, #tpu.memory_space<vmem>>, %arg7: memref<16x384xbf16, #tpu.memory_space<vmem>>, %arg8: memref<16x128xbf16, #tpu.memory_space<vmem>>) attributes {dimension_semantics = [#tpu.dimension_semantics<parallel>, #tpu.dimension_semantics<arbitrary>], iteration_bounds = array<i64: 1, 1>, scalar_prefetch = 0 : i64, scratch_operands = 1 : i64, tpu.core_type = #tpu.core_type<tc>, window_params = [{transform_indices = @transform_0, window_bounds = array<i64: 16, 128>}, {pipeline_mode = #tpu.pipeline_mode<synchronous>, transform_indices = @transform_1, window_bounds = array<i64: 1, 128>}, {pipeline_mode = #tpu.pipeline_mode<synchronous>, transform_indices = @transform_2, window_bounds = array<i64: 1, 128>}, {transform_indices = @transform_3, window_bounds = array<i64: 128, 384>}, {transform_indices = @transform_4, window_bounds = array<i64: 1, 384>}, {transform_indices = @transform_5, window_bounds = array<i64: 16, 384>}]} {
    %c0_i32 = arith.constant 0 : i32
    %0 = arith.cmpi eq, %arg1, %c0_i32 : i32
    %1 = arith.extui %0 : i1 to i32
    %c0_i32_0 = arith.constant 0 : i32
    %2 = arith.cmpi ne, %1, %c0_i32_0 : i32
    scf.if %2 {
      %c0_8 = arith.constant 0 : index
      %c0_9 = arith.constant 0 : index
      %11 = vector.load %arg2[%c0_8, %c0_9] : memref<16x128xf32, #tpu.memory_space<vmem>>, vector<16x128xf32>
      %cst_10 = arith.constant dense<0.000000e+00> : vector<16xf32>
      %12 = vector.multi_reduction <add>, %11, %cst_10 [1] : vector<16x128xf32> to vector<16xf32>
      %13 = vector.shape_cast %12 : vector<16xf32> to vector<16x1xf32>
      %cst_11 = arith.constant 1.280000e+02 : f32
      %14 = vector.broadcast %cst_11 : f32 to vector<16x1xf32>
      %15 = arith.divf %13, %14 : vector<16x1xf32>
      %16 = vector.broadcast %15 : vector<16x1xf32> to vector<16x128xf32>
      %17 = arith.subf %11, %16 : vector<16x128xf32>
      %18 = arith.mulf %17, %17 : vector<16x128xf32>
      %cst_12 = arith.constant dense<0.000000e+00> : vector<16xf32>
      %19 = vector.multi_reduction <add>, %18, %cst_12 [1] : vector<16x128xf32> to vector<16xf32>
      %20 = vector.shape_cast %19 : vector<16xf32> to vector<16x1xf32>
      %cst_13 = arith.constant 1.280000e+02 : f32
      %21 = vector.broadcast %cst_13 : f32 to vector<16x1xf32>
      %22 = arith.divf %20, %21 : vector<16x1xf32>
      %cst_14 = arith.constant 9.99999974E-6 : f32
      %23 = vector.broadcast %cst_14 : f32 to vector<16x1xf32>
      %24 = arith.addf %22, %23 : vector<16x1xf32>
      %25 = math.rsqrt %24 : vector<16x1xf32>
      %26 = vector.broadcast %25 : vector<16x1xf32> to vector<16x128xf32>
      %27 = arith.mulf %17, %26 : vector<16x128xf32>
      %c0_15 = arith.constant 0 : index
      %c0_16 = arith.constant 0 : index
      %28 = vector.load %arg3[%c0_15, %c0_16] : memref<1x128xf32, #tpu.memory_space<vmem>>, vector<1x128xf32>
      %29 = vector.broadcast %28 : vector<1x128xf32> to vector<16x128xf32>
      %30 = arith.mulf %27, %29 : vector<16x128xf32>
      %c0_17 = arith.constant 0 : index
      %c0_18 = arith.constant 0 : index
      %31 = vector.load %arg4[%c0_17, %c0_18] : memref<1x128xf32, #tpu.memory_space<vmem>>, vector<1x128xf32>
      %32 = vector.broadcast %31 : vector<1x128xf32> to vector<16x128xf32>
      %33 = arith.addf %30, %32 : vector<16x128xf32>
      %34 = arith.truncf %33 : vector<16x128xf32> to vector<16x128xbf16>
      %c0_19 = arith.constant 0 : index
      %c0_20 = arith.constant 0 : index
      %35 = vector.load %arg8[%c0_19, %c0_20] : memref<16x128xbf16, #tpu.memory_space<vmem>>, vector<16x128xbf16>
      tpu.vector_store %arg8[%c0_19, %c0_20], %34 {strides = array<i32>} : memref<16x128xbf16, #tpu.memory_space<vmem>>, vector<16x128xbf16>,
    } else {
    }
    %c0 = arith.constant 0 : index
    %c0_1 = arith.constant 0 : index
    %3 = vector.load %arg8[%c0, %c0_1] : memref<16x128xbf16, #tpu.memory_space<vmem>>, vector<16x128xbf16>
    %c0_2 = arith.constant 0 : index
    %c0_3 = arith.constant 0 : index
    %4 = vector.load %arg5[%c0_2, %c0_3] : memref<128x384xbf16, #tpu.memory_space<vmem>>, vector<128x384xbf16>
    %cst = arith.constant dense<0.000000e+00> : vector<16x384xf32>
    %5 = tpu.matmul %3, %4, %cst {dimension_numbers = #tpu.dot_dimension_numbers<[1], [0], [0], [1], [0, 0, 1, 1], [], []>} : vector<16x128xbf16>, vector<128x384xbf16>, vector<16x384xf32> -> vector<16x384xf32>
    %c0_4 = arith.constant 0 : index
    %c0_5 = arith.constant 0 : index
    %6 = vector.load %arg6[%c0_4, %c0_5] : memref<1x384xf32, #tpu.memory_space<vmem>>, vector<1x384xf32>
    %7 = vector.broadcast %6 : vector<1x384xf32> to vector<16x384xf32>
    %8 = arith.addf %5, %7 : vector<16x384xf32>
    %9 = arith.truncf %8 : vector<16x384xf32> to vector<16x384xbf16>
    %c0_6 = arith.constant 0 : index
    %c0_7 = arith.constant 0 : index
    %10 = vector.load %arg7[%c0_6, %c0_7] : memref<16x384xbf16, #tpu.memory_space<vmem>>, vector<16x384xbf16>
    tpu.vector_store %arg7[%c0_6, %c0_7], %9 {strides = array<i32>} : memref<16x384xbf16, #tpu.memory_space<vmem>>, vector<16x384xbf16>,
    return
  }
  func.func @transform_0(%arg0: i32, %arg1: i32) -> (i32, i32) {
    %c0_i32 = arith.constant 0 : i32
    %c0_i32_0 = arith.constant 0 : i32
    return %arg0, %c0_i32 : i32, i32
  }
  func.func @transform_1(%arg0: i32, %arg1: i32) -> (i32, i32) {
    %c0_i32 = arith.constant 0 : i32
    %c0_i32_0 = arith.constant 0 : i32
    %c0_i32_1 = arith.constant 0 : i32
    return %c0_i32, %c0_i32_0 : i32, i32
  }
  func.func @transform_2(%arg0: i32, %arg1: i32) -> (i32, i32) {
    %c0_i32 = arith.constant 0 : i32
    %c0_i32_0 = arith.constant 0 : i32
    %c0_i32_1 = arith.constant 0 : i32
    return %c0_i32, %c0_i32_0 : i32, i32
  }
  func.func @transform_3(%arg0: i32, %arg1: i32) -> (i32, i32) {
    %c0_i32 = arith.constant 0 : i32
    %c0_i32_0 = arith.constant 0 : i32
    return %c0_i32, %arg1 : i32, i32
  }
  func.func @transform_4(%arg0: i32, %arg1: i32) -> (i32, i32) {
    %c0_i32 = arith.constant 0 : i32
    %c0_i32_0 = arith.constant 0 : i32
    return %c0_i32, %arg1 : i32, i32
  }
  func.func @transform_5(%arg0: i32, %arg1: i32) -> (i32, i32) {
    %c0_i32 = arith.constant 0 : i32
    return %arg0, %arg1 : i32, i32
  }
}

module attributes {stable_mosaic.version = 11 : i64} {
  func.func @_ln_linear_kernel(%arg0: i32, %arg1: i32, %arg2: memref<16x128xf32, #tpu.memory_space<vmem>>, %arg3: memref<1x128xf32, #tpu.memory_space<vmem>>, %arg4: memref<1x128xf32, #tpu.memory_space<vmem>>, %arg5: memref<128x512xbf16, #tpu.memory_space<vmem>>, %arg6: memref<1x512xf32, #tpu.memory_space<vmem>>, %arg7: memref<16x512xbf16, #tpu.memory_space<vmem>>, %arg8: memref<16x128xbf16, #tpu.memory_space<vmem>>) attributes {dimension_semantics = [#tpu.dimension_semantics<parallel>, #tpu.dimension_semantics<arbitrary>], iteration_bounds = array<i64: 1, 1>, scalar_prefetch = 0 : i64, scratch_operands = 1 : i64, tpu.core_type = #tpu.core_type<tc>, window_params = [{transform_indices = @transform_0, window_bounds = array<i64: 16, 128>}, {pipeline_mode = #tpu.pipeline_mode<synchronous>, transform_indices = @transform_1, window_bounds = array<i64: 1, 128>}, {pipeline_mode = #tpu.pipeline_mode<synchronous>, transform_indices = @transform_2, window_bounds = array<i64: 1, 128>}, {transform_indices = @transform_3, window_bounds = array<i64: 128, 512>}, {transform_indices = @transform_4, window_bounds = array<i64: 1, 512>}, {transform_indices = @transform_5, window_bounds = array<i64: 16, 512>}]} {
    %c0_i32 = arith.constant 0 : i32
    %0 = arith.cmpi eq, %arg1, %c0_i32 : i32
    %1 = arith.extui %0 : i1 to i32
    %c0_i32_0 = arith.constant 0 : i32
    %2 = arith.cmpi ne, %1, %c0_i32_0 : i32
    scf.if %2 {
      %c0_12 = arith.constant 0 : index
      %c0_13 = arith.constant 0 : index
      %24 = vector.load %arg2[%c0_12, %c0_13] : memref<16x128xf32, #tpu.memory_space<vmem>>, vector<16x128xf32>
      %cst_14 = arith.constant dense<0.000000e+00> : vector<16xf32>
      %25 = vector.multi_reduction <add>, %24, %cst_14 [1] : vector<16x128xf32> to vector<16xf32>
      %26 = vector.shape_cast %25 : vector<16xf32> to vector<16x1xf32>
      %cst_15 = arith.constant 1.280000e+02 : f32
      %27 = vector.broadcast %cst_15 : f32 to vector<16x1xf32>
      %28 = arith.divf %26, %27 : vector<16x1xf32>
      %29 = vector.broadcast %28 : vector<16x1xf32> to vector<16x128xf32>
      %30 = arith.subf %24, %29 : vector<16x128xf32>
      %31 = arith.mulf %30, %30 : vector<16x128xf32>
      %cst_16 = arith.constant dense<0.000000e+00> : vector<16xf32>
      %32 = vector.multi_reduction <add>, %31, %cst_16 [1] : vector<16x128xf32> to vector<16xf32>
      %33 = vector.shape_cast %32 : vector<16xf32> to vector<16x1xf32>
      %cst_17 = arith.constant 1.280000e+02 : f32
      %34 = vector.broadcast %cst_17 : f32 to vector<16x1xf32>
      %35 = arith.divf %33, %34 : vector<16x1xf32>
      %cst_18 = arith.constant 9.99999974E-6 : f32
      %36 = vector.broadcast %cst_18 : f32 to vector<16x1xf32>
      %37 = arith.addf %35, %36 : vector<16x1xf32>
      %38 = math.rsqrt %37 : vector<16x1xf32>
      %39 = vector.broadcast %38 : vector<16x1xf32> to vector<16x128xf32>
      %40 = arith.mulf %30, %39 : vector<16x128xf32>
      %c0_19 = arith.constant 0 : index
      %c0_20 = arith.constant 0 : index
      %41 = vector.load %arg3[%c0_19, %c0_20] : memref<1x128xf32, #tpu.memory_space<vmem>>, vector<1x128xf32>
      %42 = vector.broadcast %41 : vector<1x128xf32> to vector<16x128xf32>
      %43 = arith.mulf %40, %42 : vector<16x128xf32>
      %c0_21 = arith.constant 0 : index
      %c0_22 = arith.constant 0 : index
      %44 = vector.load %arg4[%c0_21, %c0_22] : memref<1x128xf32, #tpu.memory_space<vmem>>, vector<1x128xf32>
      %45 = vector.broadcast %44 : vector<1x128xf32> to vector<16x128xf32>
      %46 = arith.addf %43, %45 : vector<16x128xf32>
      %47 = arith.truncf %46 : vector<16x128xf32> to vector<16x128xbf16>
      %c0_23 = arith.constant 0 : index
      %c0_24 = arith.constant 0 : index
      %48 = vector.load %arg8[%c0_23, %c0_24] : memref<16x128xbf16, #tpu.memory_space<vmem>>, vector<16x128xbf16>
      tpu.vector_store %arg8[%c0_23, %c0_24], %47 {strides = array<i32>} : memref<16x128xbf16, #tpu.memory_space<vmem>>, vector<16x128xbf16>,
    } else {
    }
    %c0 = arith.constant 0 : index
    %c0_1 = arith.constant 0 : index
    %3 = vector.load %arg8[%c0, %c0_1] : memref<16x128xbf16, #tpu.memory_space<vmem>>, vector<16x128xbf16>
    %c0_2 = arith.constant 0 : index
    %c0_3 = arith.constant 0 : index
    %4 = vector.load %arg5[%c0_2, %c0_3] : memref<128x512xbf16, #tpu.memory_space<vmem>>, vector<128x512xbf16>
    %cst = arith.constant dense<0.000000e+00> : vector<16x512xf32>
    %5 = tpu.matmul %3, %4, %cst {dimension_numbers = #tpu.dot_dimension_numbers<[1], [0], [0], [1], [0, 0, 1, 1], [], []>} : vector<16x128xbf16>, vector<128x512xbf16>, vector<16x512xf32> -> vector<16x512xf32>
    %c0_4 = arith.constant 0 : index
    %c0_5 = arith.constant 0 : index
    %6 = vector.load %arg6[%c0_4, %c0_5] : memref<1x512xf32, #tpu.memory_space<vmem>>, vector<1x512xf32>
    %7 = vector.broadcast %6 : vector<1x512xf32> to vector<16x512xf32>
    %8 = arith.addf %5, %7 : vector<16x512xf32>
    %9 = arith.mulf %8, %8 : vector<16x512xf32>
    %10 = arith.mulf %8, %9 : vector<16x512xf32>
    %cst_6 = arith.constant 4.471500e-02 : f32
    %11 = vector.broadcast %cst_6 : f32 to vector<16x512xf32>
    %12 = arith.mulf %11, %10 : vector<16x512xf32>
    %13 = arith.addf %8, %12 : vector<16x512xf32>
    %cst_7 = arith.constant 0.797884583 : f32
    %14 = vector.broadcast %cst_7 : f32 to vector<16x512xf32>
    %15 = arith.mulf %14, %13 : vector<16x512xf32>
    %16 = math.tanh %15 : vector<16x512xf32>
    %cst_8 = arith.constant 1.000000e+00 : f32
    %17 = vector.broadcast %cst_8 : f32 to vector<16x512xf32>
    %18 = arith.addf %17, %16 : vector<16x512xf32>
    %cst_9 = arith.constant 5.000000e-01 : f32
    %19 = vector.broadcast %cst_9 : f32 to vector<16x512xf32>
    %20 = arith.mulf %19, %18 : vector<16x512xf32>
    %21 = arith.mulf %8, %20 : vector<16x512xf32>
    %22 = arith.truncf %21 : vector<16x512xf32> to vector<16x512xbf16>
    %c0_10 = arith.constant 0 : index
    %c0_11 = arith.constant 0 : index
    %23 = vector.load %arg7[%c0_10, %c0_11] : memref<16x512xbf16, #tpu.memory_space<vmem>>, vector<16x512xbf16>
    tpu.vector_store %arg7[%c0_10, %c0_11], %22 {strides = array<i32>} : memref<16x512xbf16, #tpu.memory_space<vmem>>, vector<16x512xbf16>,
    return
  }
  func.func @transform_0(%arg0: i32, %arg1: i32) -> (i32, i32) {
    %c0_i32 = arith.constant 0 : i32
    %c0_i32_0 = arith.constant 0 : i32
    return %arg0, %c0_i32 : i32, i32
  }
  func.func @transform_1(%arg0: i32, %arg1: i32) -> (i32, i32) {
    %c0_i32 = arith.constant 0 : i32
    %c0_i32_0 = arith.constant 0 : i32
    %c0_i32_1 = arith.constant 0 : i32
    return %c0_i32, %c0_i32_0 : i32, i32
  }
  func.func @transform_2(%arg0: i32, %arg1: i32) -> (i32, i32) {
    %c0_i32 = arith.constant 0 : i32
    %c0_i32_0 = arith.constant 0 : i32
    %c0_i32_1 = arith.constant 0 : i32
    return %c0_i32, %c0_i32_0 : i32, i32
  }
  func.func @transform_3(%arg0: i32, %arg1: i32) -> (i32, i32) {
    %c0_i32 = arith.constant 0 : i32
    %c0_i32_0 = arith.constant 0 : i32
    return %c0_i32, %arg1 : i32, i32
  }
  func.func @transform_4(%arg0: i32, %arg1: i32) -> (i32, i32) {
    %c0_i32 = arith.constant 0 : i32
    %c0_i32_0 = arith.constant 0 : i32
    return %c0_i32, %arg1 : i32, i32
  }
  func.func @transform_5(%arg0: i32, %arg1: i32) -> (i32, i32) {
    %c0_i32 = arith.constant 0 : i32
    return %arg0, %arg1 : i32, i32
  }
}

module attributes {stable_mosaic.version = 11 : i64} {
  func.func @_linear_kernel(%arg0: i32, %arg1: i32, %arg2: i32, %arg3: memref<16x512xbf16, #tpu.memory_space<vmem>>, %arg4: memref<512x128xbf16, #tpu.memory_space<vmem>>, %arg5: memref<1x128xf32, #tpu.memory_space<vmem>>, %arg6: memref<16x128xf32, #tpu.memory_space<vmem>>, %arg7: memref<16x128xf32, #tpu.memory_space<vmem>>, %arg8: memref<16x128xf32, #tpu.memory_space<vmem>>) attributes {dimension_semantics = [#tpu.dimension_semantics<parallel>, #tpu.dimension_semantics<parallel>, #tpu.dimension_semantics<arbitrary>], iteration_bounds = array<i64: 1, 1, 1>, scalar_prefetch = 0 : i64, scratch_operands = 1 : i64, tpu.core_type = #tpu.core_type<tc>, window_params = [{transform_indices = @transform_0, window_bounds = array<i64: 16, 512>}, {transform_indices = @transform_1, window_bounds = array<i64: 512, 128>}, {transform_indices = @transform_2, window_bounds = array<i64: 1, 128>}, {transform_indices = @transform_3, window_bounds = array<i64: 16, 128>}, {transform_indices = @transform_4, window_bounds = array<i64: 16, 128>}]} {
    %c0_i32 = arith.constant 0 : i32
    %0 = arith.cmpi eq, %arg2, %c0_i32 : i32
    %1 = arith.extui %0 : i1 to i32
    %c0_i32_0 = arith.constant 0 : i32
    %2 = arith.cmpi ne, %1, %c0_i32_0 : i32
    scf.if %2 {
      %cst_10 = arith.constant 0.000000e+00 : f32
      %12 = vector.broadcast %cst_10 : f32 to vector<16x128xf32>
      %c0_11 = arith.constant 0 : index
      %c0_12 = arith.constant 0 : index
      %13 = vector.load %arg8[%c0_11, %c0_12] : memref<16x128xf32, #tpu.memory_space<vmem>>, vector<16x128xf32>
      tpu.vector_store %arg8[%c0_11, %c0_12], %12 {strides = array<i32>} : memref<16x128xf32, #tpu.memory_space<vmem>>, vector<16x128xf32>,
    } else {
    }
    %c0 = arith.constant 0 : index
    %c0_1 = arith.constant 0 : index
    %3 = vector.load %arg8[%c0, %c0_1] : memref<16x128xf32, #tpu.memory_space<vmem>>, vector<16x128xf32>
    %c0_2 = arith.constant 0 : index
    %c0_3 = arith.constant 0 : index
    %4 = vector.load %arg3[%c0_2, %c0_3] : memref<16x512xbf16, #tpu.memory_space<vmem>>, vector<16x512xbf16>
    %c0_4 = arith.constant 0 : index
    %c0_5 = arith.constant 0 : index
    %5 = vector.load %arg4[%c0_4, %c0_5] : memref<512x128xbf16, #tpu.memory_space<vmem>>, vector<512x128xbf16>
    %cst = arith.constant dense<0.000000e+00> : vector<16x128xf32>
    %6 = tpu.matmul %4, %5, %cst {dimension_numbers = #tpu.dot_dimension_numbers<[1], [0], [0], [1], [0, 0, 1, 1], [], []>} : vector<16x512xbf16>, vector<512x128xbf16>, vector<16x128xf32> -> vector<16x128xf32>
    %7 = arith.addf %3, %6 : vector<16x128xf32>
    %c0_6 = arith.constant 0 : index
    %c0_7 = arith.constant 0 : index
    %8 = vector.load %arg8[%c0_6, %c0_7] : memref<16x128xf32, #tpu.memory_space<vmem>>, vector<16x128xf32>
    tpu.vector_store %arg8[%c0_6, %c0_7], %7 {strides = array<i32>} : memref<16x128xf32, #tpu.memory_space<vmem>>, vector<16x128xf32>,
    %c0_i32_8 = arith.constant 0 : i32
    %9 = arith.cmpi eq, %arg2, %c0_i32_8 : i32
    %10 = arith.extui %9 : i1 to i32
    %c0_i32_9 = arith.constant 0 : i32
    %11 = arith.cmpi ne, %10, %c0_i32_9 : i32
    scf.if %11 {
      %c0_10 = arith.constant 0 : index
      %c0_11 = arith.constant 0 : index
      %12 = vector.load %arg8[%c0_10, %c0_11] : memref<16x128xf32, #tpu.memory_space<vmem>>, vector<16x128xf32>
      %c0_12 = arith.constant 0 : index
      %c0_13 = arith.constant 0 : index
      %13 = vector.load %arg5[%c0_12, %c0_13] : memref<1x128xf32, #tpu.memory_space<vmem>>, vector<1x128xf32>
      %14 = vector.broadcast %13 : vector<1x128xf32> to vector<16x128xf32>
      %15 = arith.addf %12, %14 : vector<16x128xf32>
      %c0_14 = arith.constant 0 : index
      %c0_15 = arith.constant 0 : index
      %16 = vector.load %arg6[%c0_14, %c0_15] : memref<16x128xf32, #tpu.memory_space<vmem>>, vector<16x128xf32>
      %17 = arith.addf %15, %16 : vector<16x128xf32>
      %c0_16 = arith.constant 0 : index
      %c0_17 = arith.constant 0 : index
      %18 = vector.load %arg7[%c0_16, %c0_17] : memref<16x128xf32, #tpu.memory_space<vmem>>, vector<16x128xf32>
      tpu.vector_store %arg7[%c0_16, %c0_17], %17 {strides = array<i32>} : memref<16x128xf32, #tpu.memory_space<vmem>>, vector<16x128xf32>,
    } else {
    }
    return
  }
  func.func @transform_0(%arg0: i32, %arg1: i32, %arg2: i32) -> (i32, i32) {
    %c0_i32 = arith.constant 0 : i32
    return %arg0, %arg2 : i32, i32
  }
  func.func @transform_1(%arg0: i32, %arg1: i32, %arg2: i32) -> (i32, i32) {
    %c0_i32 = arith.constant 0 : i32
    return %arg2, %arg1 : i32, i32
  }
  func.func @transform_2(%arg0: i32, %arg1: i32, %arg2: i32) -> (i32, i32) {
    %c0_i32 = arith.constant 0 : i32
    %c0_i32_0 = arith.constant 0 : i32
    return %c0_i32, %arg1 : i32, i32
  }
  func.func @transform_3(%arg0: i32, %arg1: i32, %arg2: i32) -> (i32, i32) {
    %c0_i32 = arith.constant 0 : i32
    return %arg0, %arg1 : i32, i32
  }
  func.func @transform_4(%arg0: i32, %arg1: i32, %arg2: i32) -> (i32, i32) {
    %c0_i32 = arith.constant 0 : i32
    return %arg0, %arg1 : i32, i32
  }
}

module attributes {stable_mosaic.version = 11 : i64} {
  func.func @_layernorm_kernel(%arg0: i32, %arg1: memref<16x128xf32, #tpu.memory_space<vmem>>, %arg2: memref<1x128xf32, #tpu.memory_space<vmem>>, %arg3: memref<1x128xf32, #tpu.memory_space<vmem>>, %arg4: memref<16x128xf32, #tpu.memory_space<vmem>>) attributes {dimension_semantics = [#tpu.dimension_semantics<parallel>], iteration_bounds = array<i64: 1>, scalar_prefetch = 0 : i64, scratch_operands = 0 : i64, tpu.core_type = #tpu.core_type<tc>, window_params = [{transform_indices = @transform_0, window_bounds = array<i64: 16, 128>}, {pipeline_mode = #tpu.pipeline_mode<synchronous>, transform_indices = @transform_1, window_bounds = array<i64: 1, 128>}, {pipeline_mode = #tpu.pipeline_mode<synchronous>, transform_indices = @transform_2, window_bounds = array<i64: 1, 128>}, {transform_indices = @transform_3, window_bounds = array<i64: 16, 128>}]} {
    %c0 = arith.constant 0 : index
    %c0_0 = arith.constant 0 : index
    %0 = vector.load %arg1[%c0, %c0_0] : memref<16x128xf32, #tpu.memory_space<vmem>>, vector<16x128xf32>
    %cst = arith.constant dense<0.000000e+00> : vector<16xf32>
    %1 = vector.multi_reduction <add>, %0, %cst [1] : vector<16x128xf32> to vector<16xf32>
    %2 = vector.shape_cast %1 : vector<16xf32> to vector<16x1xf32>
    %cst_1 = arith.constant 1.280000e+02 : f32
    %3 = vector.broadcast %cst_1 : f32 to vector<16x1xf32>
    %4 = arith.divf %2, %3 : vector<16x1xf32>
    %5 = vector.broadcast %4 : vector<16x1xf32> to vector<16x128xf32>
    %6 = arith.subf %0, %5 : vector<16x128xf32>
    %7 = arith.mulf %6, %6 : vector<16x128xf32>
    %cst_2 = arith.constant dense<0.000000e+00> : vector<16xf32>
    %8 = vector.multi_reduction <add>, %7, %cst_2 [1] : vector<16x128xf32> to vector<16xf32>
    %9 = vector.shape_cast %8 : vector<16xf32> to vector<16x1xf32>
    %cst_3 = arith.constant 1.280000e+02 : f32
    %10 = vector.broadcast %cst_3 : f32 to vector<16x1xf32>
    %11 = arith.divf %9, %10 : vector<16x1xf32>
    %cst_4 = arith.constant 9.99999974E-6 : f32
    %12 = vector.broadcast %cst_4 : f32 to vector<16x1xf32>
    %13 = arith.addf %11, %12 : vector<16x1xf32>
    %14 = math.rsqrt %13 : vector<16x1xf32>
    %15 = vector.broadcast %14 : vector<16x1xf32> to vector<16x128xf32>
    %16 = arith.mulf %6, %15 : vector<16x128xf32>
    %c0_5 = arith.constant 0 : index
    %c0_6 = arith.constant 0 : index
    %17 = vector.load %arg2[%c0_5, %c0_6] : memref<1x128xf32, #tpu.memory_space<vmem>>, vector<1x128xf32>
    %18 = vector.broadcast %17 : vector<1x128xf32> to vector<16x128xf32>
    %19 = arith.mulf %16, %18 : vector<16x128xf32>
    %c0_7 = arith.constant 0 : index
    %c0_8 = arith.constant 0 : index
    %20 = vector.load %arg3[%c0_7, %c0_8] : memref<1x128xf32, #tpu.memory_space<vmem>>, vector<1x128xf32>
    %21 = vector.broadcast %20 : vector<1x128xf32> to vector<16x128xf32>
    %22 = arith.addf %19, %21 : vector<16x128xf32>
    %c0_9 = arith.constant 0 : index
    %c0_10 = arith.constant 0 : index
    %23 = vector.load %arg4[%c0_9, %c0_10] : memref<16x128xf32, #tpu.memory_space<vmem>>, vector<16x128xf32>
    tpu.vector_store %arg4[%c0_9, %c0_10], %22 {strides = array<i32>} : memref<16x128xf32, #tpu.memory_space<vmem>>, vector<16x128xf32>,
    return
  }
  func.func @transform_0(%arg0: i32) -> (i32, i32) {
    %c0_i32 = arith.constant 0 : i32
    %c0_i32_0 = arith.constant 0 : i32
    return %arg0, %c0_i32 : i32, i32
  }
  func.func @transform_1(%arg0: i32) -> (i32, i32) {
    %c0_i32 = arith.constant 0 : i32
    %c0_i32_0 = arith.constant 0 : i32
    %c0_i32_1 = arith.constant 0 : i32
    return %c0_i32, %c0_i32_0 : i32, i32
  }
  func.func @transform_2(%arg0: i32) -> (i32, i32) {
    %c0_i32 = arith.constant 0 : i32
    %c0_i32_0 = arith.constant 0 : i32
    %c0_i32_1 = arith.constant 0 : i32
    return %c0_i32, %c0_i32_0 : i32, i32
  }
  func.func @transform_3(%arg0: i32) -> (i32, i32) {
    %c0_i32 = arith.constant 0 : i32
    %c0_i32_0 = arith.constant 0 : i32
    return %arg0, %c0_i32 : i32, i32
  }
}

</mosaic_0001>

<bundles_post_ra>
// kernel: _lambda_.19
= control target key start
LH: loop header
LB: loop body
LE: loop exit
PB: predicated region body
PF: predicated region fallthrough
CT: control target
= control target key end

     0   :  { %s833_s12 = smov 0   ;;  %s835_s13 = smov 0   ;;  %s943_s0 = inlined_call_operand.vmem [shape: f32[32,768], index: 0, kind: input, shape index: {}]   ;;  %s944_s1 = inlined_call_operand.vmem [shape: bf16[768,128], index: 1, kind: input, shape index: {}]   ;;  %s945_s2 = inlined_call_operand.vmem [shape: f32[1,128], index: 2, kind: input, shape index: {}]   ;;  %s946_s3 = inlined_call_operand.vmem [shape: f32[32,128], index: 3, kind: output, shape index: {}]  }
   0x1   :  { %s837_s14 = smov 0   ;;  %s839_s15 = smov 0  }
   0x2   :  { %s841_s16 = smov 0  }
   0x3 LB: > { %s25_s17 = sadd.s32 1, %s806_s15  ;;  %p48_p1 = scmp.ne.s32.totalorder %s798_s13, %s794_s12  ;;  %s810_s16 = sphi %s841_s16, %s13_s16   ;;  %s806_s15 = sphi %s839_s15, %s950_s15   ;;  %s802_s14 = sphi %s837_s14, %s949_s14   ;;  %s798_s13 = sphi %s835_s13, %s948_s13   ;;  %s794_s12 = sphi %s833_s12, %s947_s12  }
   0x4   : > { %p26_p0 = scmp.ge.s32.totalorder %s25_s17, 3  ;;  %p49_p2 = scmp.eq.s32.totalorder %s810_s16, 0 }
   0x5   : > { %s41_s19 = sadd.s32 1, %s798_s13  ;;  %p619_p5 = scmp.ge.s32.totalorder %s810_s16, 3 }
   0x6   : > { %s952_s17 = smov (%p26_p0, %s25_s17), 0  ;;  %p50_p3 = por %p49_p2, %p48_p1 }
   0x7   : > { %s37_s18 = ssub.s32 %s806_s15, %s952_s17  ;;  %162 = sbr.rel (%p619_p5) target bundleno = 24 (0x18), region = 20 }
   0x8   : > { %p39_p4 = scmp.eq.s32.totalorder %s37_s18, 0 }
   0xa   : > { %s868_s20 = scalar_select %p39_p4, %s798_s13, %s41_s19  }
   0xc   : > { %165 = sbr.rel (!%p50_p3) target bundleno = 24 (0x18), region = 24  ;;  %s167_s21 = sand.u32 (%p50_p3), 1, %s798_s13  }
   0xd   : > { %s697_s22 = sshll.u32 (%p50_p3), %s806_s15, 4  ;;  %s620_s23 = sshll.u32 (%p50_p3), %s167_s21, 6 }
   0xe   : > { %s175_s26 = scalar_lea.vmem (%p50_p3), %s943_s0, %s697_s22  ;;  %s169_s27 = scalar_lea.vmem (%p50_p3), [#allocation3], %s620_s23 }
   0xf   : > { %v188_v0 = vld [vmem:[%s175_s26] sm:$0xff] (%p50_p3)  ;;  %v190_v1 = vld [vmem:[%s175_s26 + $0x8] sm:$0xff] (%p50_p3)  ;;  %v192_v2 = vld [vmem:[%s175_s26 + $0x30] sm:$0xff] (%p50_p3) }
  0x10   : > { %189 = vst [vmem:[%s169_s27] sm:$0xff] (%p50_p3), %v188_v0  ;;  %v194_v3 = vld [vmem:[%s175_s26 + $0x38] sm:$0xff] (%p50_p3)  ;;  %v196_v4 = vld [vmem:[%s175_s26 + $0x60] sm:$0xff] (%p50_p3)  ;;  %v198_v5 = vld [vmem:[%s175_s26 + $0x68] sm:$0xff] (%p50_p3) }
  0x11   : > { %191 = vst [vmem:[%s169_s27 + $0x8] sm:$0xff] %v190_v1  ;;  %v200_v6 = vld [vmem:[%s175_s26 + $0x90] sm:$0xff]  ;;  %v202_v7 = vld [vmem:[%s175_s26 + $0x98] sm:$0xff] }
  0x12   : > { %193 = vst [vmem:[%s169_s27 + $0x10] sm:$0xff] %v192_v2 }
  0x13   : > { %195 = vst [vmem:[%s169_s27 + $0x18] sm:$0xff] %v194_v3 }
  0x14   : > { %197 = vst [vmem:[%s169_s27 + $0x20] sm:$0xff] %v196_v4 }
  0x15   : > { %199 = vst [vmem:[%s169_s27 + $0x28] sm:$0xff] %v198_v5 }
  0x16   : > { %201 = vst [vmem:[%s169_s27 + $0x30] sm:$0xff] %v200_v6 }
  0x17   : > { %203 = vst [vmem:[%s169_s27 + $0x38] sm:$0xff] %v202_v7 }
  0x18 PF: > { %p623_p6 = scmp.ge.s32.totalorder %s810_s16, 1  ;;  %p220_p7 = scmp.lt.s32.totalorder %s810_s16, 4 }
  0x1a   : > { %p221_p8 = pnand %p623_p6, %p220_p7 }
  0x1b   : > { %s227_s28 = sand.u32 (!%p221_p8), 1, %s794_s12   ;;  %s625_s29 = sshll.u32 (!%p221_p8), %s802_s14, 5 }
  0x1c   : > { %224 = sbr.rel (%p221_p8) target bundleno = 231 (0xe7), region = 51  ;;  %s624_s30 = sshll.u32 (!%p221_p8), %s227_s28, 6 }
  0x1d   : > { %p267_p9 = scmp.lt.s32.totalorder (!%p221_p8), %s625_s29, 95  ;;  %s885_s8 = scalar_lea.vmem (!%p221_p8), [#allocation3], %s624_s30 }
  0x1e   : > { %p627_p10 = scmp.ne.s32.totalorder (!%p221_p8), %s802_s14, 0 }
  0x21   : > { %s954_s29 = smov (!%p267_p9, %s625_s29), 95  ;;  %290 = sbr.rel (%p627_p10) target bundleno = 43 (0x2b), region = 59 }
  0x22   : > { %s626_s4 = sshll.u32 %s954_s29, 2 }
  0x23   : > { %s883_s7 = scalar_lea.vmem %s944_s1, %s626_s4 }
  0x26   : > { %v812_v8 = vmov 0.0  }
  0x27   : > { %291 = vst [vmem:[#allocation2 + $0x10] sm:$0xff] %v812_v8 }
  0x28   : > { %292 = vst [vmem:[#allocation2] sm:$0xff] %v812_v8 }
  0x29   : > { %293 = vst [vmem:[#allocation2 + $0x18] sm:$0xff] %v812_v8 }
  0x2a   : > { %294 = vst [vmem:[#allocation2 + $0x8] sm:$0xff] %v812_v8 }
  0x2b PF: > { %v705_v9 = vld [vmem:[%s883_s7 + $0x38] sm:$0xff]  ;;  %v704_v11 = vld [vmem:[%s883_s7 + $0x30] sm:$0xff]  ;;  %v703_v13 = vld [vmem:[%s883_s7 + $0x28] sm:$0xff]  ;;  %p692_p11 = scmp.ne.s32.totalorder %s802_s14, 2 }
  0x2c   : > { %v713_v10 = vld [vmem:[%s883_s7 + $0x78] sm:$0xff]  ;;  %439 = vmatpush.bf16.msra.mxu0 %v705_v9  ;;  %714 = vmatpush.bf16.msra.mxu2 %v705_v9  ;;  %v712_v12 = vld [vmem:[%s883_s7 + $0x70] sm:$0xff]  ;;  %v711_v14 = vld [vmem:[%s883_s7 + $0x68] sm:$0xff] }
  0x2d   : > { %458 = vmatpush.bf16.msra.mxu1 %v713_v10  ;;  %722 = vmatpush.bf16.msra.mxu3 %v713_v10  ;;  %v702_v15 = vld [vmem:[%s883_s7 + $0x20] sm:$0xff]  ;;  %v701_v17 = vld [vmem:[%s883_s7 + $0x18] sm:$0xff]  ;;  %v700_v19 = vld [vmem:[%s883_s7 + $0x10] sm:$0xff] }
  0x2e   : > { %v710_v16 = vld [vmem:[%s883_s7 + $0x60] sm:$0xff]  ;;  %v709_v18 = vld [vmem:[%s883_s7 + $0x58] sm:$0xff]  ;;  %v708_v20 = vld [vmem:[%s883_s7 + $0x50] sm:$0xff] }
  0x2f   : > { %v699_v21 = vld [vmem:[%s883_s7 + $0x8] sm:$0xff]  ;;  %v698_v23 = vld [vmem:[%s883_s7] sm:$0xff]  ;;  %v301_v26 = vld [vmem:[%s885_s8 + $0x10] sm:$0xff] }
  0x30   : > { %440 = vmatpush.bf16.msra.mxu0 %v704_v11  ;;  %715 = vmatpush.bf16.msra.mxu2 %v704_v11  ;;  %v707_v22 = vld [vmem:[%s883_s7 + $0x48] sm:$0xff]  ;;  %v706_v24 = vld [vmem:[%s883_s7 + $0x40] sm:$0xff]  ;;  %v305_v28 = vld [vmem:[%s885_s8 + $0x30] sm:$0xff] }
  0x31   : > { %459 = vmatpush.bf16.msra.mxu1 %v712_v12  ;;  %723 = vmatpush.bf16.msra.mxu3 %v712_v12  ;;  %v299_v25 = vld [vmem:[%s885_s8] sm:$0xff]  ;;  %v300_v29 = vld [vmem:[%s885_s8 + $0x8] sm:$0xff]  ;;  %v302_v30 = vld [vmem:[%s885_s8 + $0x18] sm:$0xff] }
  0x32   : > { %v303_v27 = vld [vmem:[%s885_s8 + $0x20] sm:$0xff]  ;;  %v304_v31 = vld [vmem:[%s885_s8 + $0x28] sm:$0xff]  ;;  %v306_v32 = vld [vmem:[%s885_s8 + $0x38] sm:$0xff]  ;;  %v307_v33 = vpack.c.bf16 %v301_v26, %v299_v25  ;;  %v308_v35 = vpack.c.bf16 %v302_v30, %v300_v29 }
  0x33   : > { %v309_v34 = vpack.c.bf16 %v305_v28, %v303_v27  ;;  %v310_v36 = vpack.c.bf16 %v306_v32, %v304_v31  ;;  %v295_v38 = vld [vmem:[#allocation2 + $0x10] sm:$0xff]  ;;  %v297_v43 = vld [vmem:[#allocation2 + $0x18] sm:$0xff]  ;;  %v296_v47 = vld [vmem:[#allocation2] sm:$0xff] }
  0x34   : > { %441 = vmatpush.bf16.msra.mxu0 %v703_v13  ;;  %716 = vmatpush.bf16.msra.mxu2 %v703_v13  ;;  %v298_v53 = vld [vmem:[#allocation2 + $0x8] sm:$0xff] }
  0x35   : > { %460 = vmatpush.bf16.msra.mxu1 %v711_v14  ;;  %724 = vmatpush.bf16.msra.mxu3 %v711_v14 }
  0x38   : > { %442 = vmatpush.bf16.msra.mxu0 %v702_v15  ;;  %717 = vmatpush.bf16.msra.mxu2 %v702_v15 }
  0x39   : > { %461 = vmatpush.bf16.msra.mxu1 %v710_v16  ;;  %725 = vmatpush.bf16.msra.mxu3 %v710_v16 }
  0x3c   : > { %443 = vmatpush.bf16.msra.mxu0 %v701_v17  ;;  %718 = vmatpush.bf16.msra.mxu2 %v701_v17 }
  0x3d   : > { %462 = vmatpush.bf16.msra.mxu1 %v709_v18  ;;  %726 = vmatpush.bf16.msra.mxu3 %v709_v18 }
  0x40   : > { %444 = vmatpush.bf16.msra.mxu0 %v700_v19  ;;  %719 = vmatpush.bf16.msra.mxu2 %v700_v19 }
  0x41   : > { %463 = vmatpush.bf16.msra.mxu1 %v708_v20  ;;  %727 = vmatpush.bf16.msra.mxu3 %v708_v20 }
  0x44   : > { %445 = vmatpush.bf16.msra.mxu0 %v699_v21  ;;  %720 = vmatpush.bf16.msra.mxu2 %v699_v21 }
  0x45   : > { %464 = vmatpush.bf16.msra.mxu1 %v707_v22  ;;  %728 = vmatpush.bf16.msra.mxu3 %v707_v22 }
  0x48   : > { %446 = vmatpush.bf16.msra.mxu0 %v698_v23  ;;  %721 = vmatpush.bf16.msra.mxu2 %v698_v23 }
  0x49   : > { %465 = vmatpush.bf16.msra.mxu1 %v706_v24  ;;  %729 = vmatpush.bf16.msra.mxu3 %v706_v24 }
  0x4b   : > { %447 = vmatmul.bf16.vlgmr.msra.gmra.mxu0 %v307_v33  ;;  %452 = vmatmul.bf16.vlgmr.msra.gmra.mxu2 %v309_v34 }
  0x4c   : > { %466 = vmatmul.bf16.vlgmr.msra.gmra.mxu1 %v308_v35  ;;  %471 = vmatmul.bf16.vlgmr.msra.gmra.mxu3 %v310_v36 }
  0xc8   : > { %v448_v37 = vpop.f32.mrf.mxu0 }
  0xc9   : > { %v467_v39 = vpop.f32.mrf.mxu1 }
  0xca   : > { %v468_v40 = vadd.f32 %v467_v39, %v448_v37 }
  0xcc   : > { %v477_v41 = vadd.f32 %v468_v40, %v295_v38 }
  0xce   : > { %481 = vst [vmem:[#allocation2 + $0x10] sm:$0xff] %v477_v41  ;;  %v453_v42 = vpop.f32.mrf.mxu2 }
  0xcf   : > { %v472_v44 = vpop.f32.mrf.mxu3 }
  0xd0   : > { %v473_v45 = vadd.f32 %v472_v44, %v453_v42  ;;  %v450_v46 = vpop.f32.mrf.mxu0 }
  0xd1   : > { %v469_v48 = vpop.f32.mrf.mxu1 }
  0xd2   : > { %v479_v49 = vadd.f32 %v473_v45, %v297_v43  ;;  %v470_v50 = vadd.f32 %v469_v48, %v450_v46 }
  0xd4   : > { %483 = vst [vmem:[#allocation2 + $0x18] sm:$0xff] %v479_v49  ;;  %v478_v51 = vadd.f32 %v470_v50, %v296_v47 }
  0xd6   : > { %482 = vst [vmem:[#allocation2] sm:$0xff] %v478_v51  ;;  %v455_v52 = vpop.f32.mrf.mxu2 }
  0xd7   : > { %v474_v54 = vpop.f32.mrf.mxu3 }
  0xd8   : > { %v475_v55 = vadd.f32 %v474_v54, %v455_v52  ;;  %488 = sbr.rel (%p692_p11) target bundleno = 231 (0xe7), region = 63 }
  0xda   : > { %v480_v56 = vadd.f32 %v475_v55, %v298_v53 }
  0xdc   : > { %484 = vst [vmem:[#allocation2 + $0x8] sm:$0xff] %v480_v56 }
  0xdd   : > { %v489_v57 = vld [vmem:[#allocation2 + $0x10] sm:$0xff]  ;;  %v771_v58 = vld [vmem:[%s945_s2] ss:$0 sm:$0xff]  ;;  %v491_v60 = vld [vmem:[#allocation2 + $0x18] sm:$0xff] }
  0xde   : > { %v490_v59 = vld [vmem:[#allocation2] sm:$0xff]  ;;  %v497_v62 = vadd.f32 %v771_v58, %v489_v57  ;;  %v499_v0 = vadd.f32 %v771_v58, %v491_v60 }
  0xdf   : > { %v498_v63 = vadd.f32 %v771_v58, %v490_v59 }
  0xe0   : > { %501 = vst [vmem:[%s946_s3] sm:$0xff] %v497_v62 }
  0xe1   : > { %502 = vst [vmem:[%s946_s3 + $0x8] sm:$0xff] %v498_v63 }
  0xe2   : > { %503 = vst [vmem:[%s946_s3 + $0x10] sm:$0xff] %v499_v0 }
  0xe3   : > { %v492_v61 = vld [vmem:[#allocation2 + $0x8] sm:$0xff] }
  0xe4   : > { %v500_v1 = vadd.f32 %v771_v58, %v492_v61 }
  0xe6   : > { %504 = vst [vmem:[%s946_s3 + $0x18] sm:$0xff] %v500_v1 }
  0xe7 PF: > { %s13_s16 = sadd.s32 1, %s810_s16   ;;  %s947_s12 = smov %s798_s13 }
  0xe8   : > { %p10_p12 = scmp.ge.s32.totalorder %s13_s16, 5   ;;  %s948_s13 = smov %s868_s20 }
  0xe9   : > { %s949_s14 = smov %s806_s15  ;;  %s950_s15 = smov %s952_s17 }
  0xea   :  { %12 = sbr.rel (!%p10_p12) target bundleno = 3 (0x3), region = 104 }

// kernel: _lambda_.21
= control target key start
LH: loop header
LB: loop body
LE: loop exit
PB: predicated region body
PF: predicated region fallthrough
CT: control target
= control target key end

     0   :  { %s769_s12 = smov 0   ;;  %s771_s13 = smov 0   ;;  %s861_s0 = inlined_call_operand.vmem [shape: bf16[8,8,384], index: 0, kind: input, shape index: {}, may-alias: {0,1,2}]   ;;  %s862_s1 = inlined_call_operand.vmem [shape: bf16[8,8,384], index: 1, kind: input, shape index: {}, may-alias: {0,1,2}]   ;;  %s863_s2 = inlined_call_operand.vmem [shape: bf16[8,8,384], index: 2, kind: input, shape index: {}, may-alias: {0,1,2}]   ;;  %s864_s3 = inlined_call_operand.vmem [shape: bf16[8,8,128], index: 3, kind: output, shape index: {}]  }
   0x1   :  { %s773_s14 = smov 0  }
   0x2 LB: > { %s25_s15 = sadd.s32 1, %s740_s13  ;;  %p657_p0 = scmp.ge.s32.totalorder %s744_s14, 1  ;;  %s744_s14 = sphi %s773_s14, %s13_s14   ;;  %s740_s13 = sphi %s771_s13, %s866_s13   ;;  %s736_s12 = sphi %s769_s12, %s865_s12  }
   0x3   : > { %p27_p1 = scmp.ge.s32.totalorder %s25_s15, 8  ;;  %p194_p2 = scmp.lt.s32.totalorder %s744_s14, 9 }
   0x5   : > { %s868_s15 = smov (%p27_p1, %s25_s15), 0  ;;  %p195_p3 = pnand %p657_p0, %p194_p2 }
   0x6   : > { %p241_p4 = scmp.lt.s32.totalorder (!%p195_p3), %s736_s12, 7  ;;  %s746_s24 = smov (!%p195_p3), 64  }
   0x7   : > { %198 = sbr.rel (%p195_p3) target bundleno = 1086 (0x43e), region = 32  ;;  %s747_s25 = smov (!%p195_p3), 32  }
   0x8   : > { %s748_s26 = smov (!%p195_p3), 96  }
   0xc   : > { %s870_s12 = smov (!%p241_p4, %s736_s12), 7  ;;  %vm283_vm0 = vcmask 261120   ;;  %v277_v7 = vlaneseq  ;;  %vm305_vm2 = vcmask 64512   ;;  %vm321_vm3 = vcmask 1043456  }
   0xd   : > { %s790_s16 = smul.u32 12, %s870_s12  ;;  %vm534_vm4 = vcmask 523264   ;;  %s661_s4 = sshll.u32 %s870_s12, 2  ;;  %vm536_vm5 = vcmask 785408  }
   0xe   : > { %v278_v8 = vand.u32 127, %v277_v7  ;;  %s275_s7 = scalar_lea.vmem %s864_s3, %s661_s4 }
   0xf   : > { %s673_s17 = sadd.s32 4, %s790_s16  ;;  %s248_s23 = scalar_lea.vmem %s861_s0, %s790_s16 }
  0x10   : > { %s257_s20 = scalar_lea.vmem %s862_s1, %s673_s17  ;;  %v280_v2 = vld [vmem:[%s248_s23] sm:$0xf]  ;;  %vm279_vm1 = vcmp.lt.s32.totalorder %v278_v8, 5  ;;  %s675_s27 = sadd.s32 8, %s790_s16 }
  0x11   : > { %v281_v0 = vld [vmem:[%s257_s20] sm:$0xf]  ;;  %v339_v5 = vunpack.c.l.b16 %v280_v2  ;;  %s267_s30 = scalar_lea.vmem %s863_s2, %s675_s27 }
  0x12   : > { %v288_v1 = vsel %vm283_vm0, %v281_v0, 0  ;;  %v344_v3 = vunpack.c.l.b16 %v281_v0  ;;  %v282_v24 = vld [vmem:[%s267_s30] sm:$0xf] }
  0x13   : > { %297 = vmatpush.bf16.xpose.msra.mxu0 %v288_v1  ;;  %v340_v6 = vpack.c.b16 %v339_v5, %v339_v5  ;;  %v323_v25 = vsel %vm321_vm3, %v282_v24, 0  ;;  %v382_v51 = vunpack.c.l.b16 %v282_v24 }
  0x14   : > { %v345_v4 = vpack.c.b16 %v344_v3, %v344_v3  ;;  %332 = vmatpush.bf16.msra.mxu1 %v323_v25 }
  0x15   : > { %v383_v52 = vpack.c.b16 %v382_v51, %v382_v51 }
  0x16   : > { %407 = vrot.lane.b32.xlu2 %v345_v4, %s746_s24 }
  0x1a   : > { %662 = vmatmul.msk.bf16.vlgmr.msra.gmra.mxu0 %vm283_vm0, %v280_v2 }
  0x1e   : > { %465 = vrot.lane.b32.xlu2 %v345_v4, %s747_s25 }
  0x26   : > { %405 = vrot.lane.b32.xlu2 %v340_v6, %s746_s24 }
  0x2e   : > { %463 = vrot.lane.b32.xlu2 %v340_v6, %s747_s25 }
  0x70   : > { %v408_v14 = vpop.permute.xlu2 %407 }
  0x71   : > { %v413_v26 = vsel %vm283_vm0, %v408_v14, 0 }
  0x72   : > { %422 = vmatpush.bf16.xpose.msrb.mxu1 %v413_v26 }
  0x78   : > { %v466_v15 = vpop.permute.xlu2 %465 }
  0x79   : > { %v471_v20 = vsel %vm283_vm0, %v466_v15, 0 }
  0x7a   : > { %480 = vmatpush.bf16.xpose.msrb.mxu0 %v471_v20 }
  0x80   : > { %v406_v19 = vpop.permute.xlu2 %405 }
  0x88   : > { %v464_v23 = vpop.permute.xlu2 %463 }
  0x89   : > { %668 = vmatmul.msk.bf16.vlgmr.msrb.gmra.mxu0 %vm283_vm0, %v464_v23 }
  0x97   : > { %v299_v9 = vpop.f32.mrf.mxu0 }
  0x98   : > { %v303_v10 = vmul.f32 0.17677669, %v299_v9 }
  0x9a   : > { %v304_v11 = vsel %vm279_vm1, %v303_v10, -1e+30 }
  0x9b   : > { %v306_v12 = vsel %vm305_vm2, %v304_v11, -inf }
  0x9c   : > { %307 = vmax.xlane.f32.xlu0 %v306_v12 }
  0x9f   : > { %v301_v13 = vpop.f32.mrf.mxu0 }
  0xb0   : > { %346 = vrot.lane.b32.xlu0 %v345_v4, %s748_s26 }
 0x106   : > { %v482_v33 = vpop.f32.mrf.mxu0 }
 0x107   : > { %v486_v34 = vmul.f32 0.17677669, %v482_v33 }
 0x109   : > { %v487_v35 = vsel %vm279_vm1, %v486_v34, -1e+30 }
 0x10a   : > { %v488_v36 = vsel %vm305_vm2, %v487_v35, -inf }
 0x10e   : > { %v484_v37 = vpop.f32.mrf.mxu0 }
 0x10f   : > { %v308_v16 = vpop.xlane.xlu0 %307 }
 0x110   : > { %v309_v17 = vsub.f32 %v304_v11, %v308_v16 }
 0x112   : > { %v310_v18 = vmul.f32 1.442695, %v309_v17 }
 0x114   : > { %706 = vpow2.f32 %v310_v18 }
 0x11a   : > { %v707_v21 = vpop.eup %706 }
 0x11b   : > { %v312_v22 = vsel %vm305_vm2, %v707_v21, 0.0 }
 0x11c   : > { %313 = vadd.xlane.f32.xlu1 %v312_v22 }
 0x122   : > { %v347_v27 = vpop.permute.xlu0 %346 }
 0x123   : > { %v352_v28 = vsel %vm283_vm0, %v347_v27, 0 }
 0x124   : > { %361 = vmatpush.bf16.xpose.msra.mxu2 %v352_v28 }
 0x135   : > { %341 = vrot.lane.b32.xlu1 %v340_v6, %s748_s26 }
 0x15f   : > { %489 = vmax.xlane.f32.xlu1 %v488_v36 }
 0x18f   : > { %v314_v29 = vpop.xlane.xlu1 %313 }
 0x190   : > { %708 = vrcp.f32 %v314_v29 }
 0x196   : > { %v709_v30 = vpop.eup %708 }
 0x197   : > { %v316_v31 = vmul.f32 %v709_v30, %v707_v21 }
 0x199   : > { %v317_v32 = vpack.c.bf16 %v316_v31, %v316_v31 }
 0x19b   : > { %663 = vmatmul.msk.bf16.vlgmr.msra.gmra.mxu1 %vm305_vm2, %v317_v32 }
 0x1a7   : > { %v342_v38 = vpop.permute.xlu1 %341 }
 0x1a8   : > { %664 = vmatmul.msk.bf16.vlgmr.msra.gmra.mxu2 %vm283_vm0, %v342_v38 }
 0x1ab   : > { %666 = vmatmul.msk.bf16.vlgmr.msrb.gmra.mxu1 %vm283_vm0, %v406_v19 }
 0x1d2   : > { %v490_v55 = vpop.xlane.xlu1 %489 }
 0x1d3   : > { %v491_v59 = vsub.f32 %v487_v35, %v490_v55 }
 0x1d5   : > { %v492_v61 = vmul.f32 1.442695, %v491_v59 }
 0x218   : > { %v825_v39 = vpop.f32.mrf.mxu1 }
 0x220   : > { %v336_v40 = vpop.f32.mrf.mxu1 }
 0x228   : > { %v424_v41 = vpop.f32.mrf.mxu1 }
 0x229   : > { %v428_v42 = vmul.f32 0.17677669, %v424_v41 }
 0x22b   : > { %v363_v43 = vpop.f32.mrf.mxu2  ;;  %v429_v44 = vsel %vm279_vm1, %v428_v42, -1e+30 }
 0x22c   : > { %v367_v45 = vmul.f32 0.17677669, %v363_v43  ;;  %v430_v46 = vsel %vm305_vm2, %v429_v44, -inf }
 0x22d   : > { %431 = vmax.xlane.f32.xlu2 %v430_v46 }
 0x22e   : > { %v368_v47 = vsel %vm279_vm1, %v367_v45, -1e+30 }
 0x22f   : > { %v369_v48 = vsel %vm305_vm2, %v368_v47, -inf }
 0x230   : > { %v426_v49 = vpop.f32.mrf.mxu1  ;;  %370 = vmax.xlane.f32.xlu0 %v369_v48 }
 0x233   : > { %v365_v50 = vpop.f32.mrf.mxu2 }
 0x245   : > { %384 = vrot.lane.b32.xlu2 %v383_v52, %s748_s26 }
 0x2a0   : > { %v432_v53 = vpop.xlane.xlu2 %431 }
 0x2a1   : > { %v433_v54 = vsub.f32 %v429_v44, %v432_v53 }
 0x2a3   : > { %v434_v56 = vmul.f32 1.442695, %v433_v54  ;;  %v371_v57 = vpop.xlane.xlu0 %370 }
 0x2a4   : > { %v372_v58 = vsub.f32 %v368_v47, %v371_v57 }
 0x2a5   : > { %710 = vpow2.f32 %v434_v56 }
 0x2a6   : > { %v373_v60 = vmul.f32 1.442695, %v372_v58 }
 0x2a8   : > { %712 = vpow2.f32 %v373_v60  ;;  %v385_v4 = vpop.permute.xlu2 %384 }
 0x2a9   : > { %714 = vpow2.f32 %v492_v61  ;;  %v390_v5 = vsel %vm321_vm3, %v385_v4, 0 }
 0x2aa   : > { %399 = vmatpush.bf16.msra.mxu3 %v390_v5 }
 0x2ab   : > { %v711_v62 = vpop.eup %710 }
 0x2ac   : > { %v436_v63 = vsel %vm305_vm2, %v711_v62, 0.0 }
 0x2ad   : > { %437 = vadd.xlane.f32.xlu1 %v436_v63 }
 0x2ae   : > { %v713_v0 = vpop.eup %712 }
 0x2af   : > { %v375_v1 = vsel %vm305_vm2, %v713_v0, 0.0  ;;  %v715_v2 = vpop.eup %714 }
 0x2b0   : > { %376 = vadd.xlane.f32.xlu0 %v375_v1  ;;  %v494_v3 = vsel %vm305_vm2, %v715_v2, 0.0 }
 0x2b8   : > { %495 = vadd.xlane.f32.xlu0 %v494_v3 }
 0x2c6   : > { %442 = vrot.lane.b32.xlu1 %v383_v52, %s746_s24 }
 0x2cc   : > { %500 = vrot.lane.b32.xlu0 %v383_v52, %s747_s25 }
 0x320   : > { %v438_v9 = vpop.xlane.xlu1 %437 }
 0x323   : > { %v377_v6 = vpop.xlane.xlu0 %376 }
 0x324   : > { %716 = vrcp.f32 %v377_v6 }
 0x325   : > { %718 = vrcp.f32 %v438_v9 }
 0x32a   : > { %v717_v7 = vpop.eup %716 }
 0x32b   : > { %v379_v8 = vmul.f32 %v717_v7, %v713_v0  ;;  %v496_v11 = vpop.xlane.xlu0 %495  ;;  %v719_v12 = vpop.eup %718 }
 0x32c   : > { %720 = vrcp.f32 %v496_v11  ;;  %v440_v14 = vmul.f32 %v719_v12, %v711_v62 }
 0x32d   : > { %v380_v10 = vpack.c.bf16 %v379_v8, %v379_v8 }
 0x32e   : > { %v441_v18 = vpack.c.bf16 %v440_v14, %v440_v14 }
 0x32f   : > { %665 = vmatmul.msk.bf16.vlgmr.msra.gmra.mxu3 %vm305_vm2, %v380_v10 }
 0x332   : > { %v721_v16 = vpop.eup %720 }
 0x333   : > { %v498_v17 = vmul.f32 %v721_v16, %v715_v2 }
 0x335   : > { %v499_v21 = vpack.c.bf16 %v498_v17, %v498_v17 }
 0x338   : > { %v443_v13 = vpop.permute.xlu1 %442 }
 0x339   : > { %v448_v15 = vsel %vm321_vm3, %v443_v13, 0 }
 0x33a   : > { %457 = vmatpush.bf16.msrb.mxu3 %v448_v15 }
 0x33e   : > { %v501_v19 = vpop.permute.xlu0 %500 }
 0x33f   : > { %667 = vmatmul.msk.bf16.vlgmr.msrb.gmra.mxu3 %vm305_vm2, %v441_v18  ;;  %v506_v20 = vsel %vm321_vm3, %v501_v19, 0 }
 0x340   : > { %515 = vmatpush.bf16.msrb.mxu2 %v506_v20 }
 0x343   : > { %669 = vmatmul.msk.bf16.vlgmr.msrb.gmra.mxu2 %vm305_vm2, %v499_v21 }
 0x3b2   : > { %v401_v22 = vpop.f32.mrf.mxu3 }
 0x3b3   : > { %522 = vrot.lane.b32.xlu2 %v401_v22, %s747_s25 }
 0x3ba   : > { %v403_v23 = vpop.f32.mrf.mxu3 }
 0x3c2   : > { %v459_v24 = vpop.f32.mrf.mxu3 }
 0x3c3   : > { %526 = vrot.lane.b32.xlu2 %v459_v24, %s746_s24 }
 0x3c6   : > { %v517_v25 = vpop.f32.mrf.mxu2 }
 0x3c7   : > { %530 = vrot.lane.b32.xlu0 %v517_v25, %s748_s26 }
 0x3ca   : > { %v461_v26 = vpop.f32.mrf.mxu3 }
 0x3ce   : > { %v519_v27 = vpop.f32.mrf.mxu2 }
 0x40d   : > { %v523_v28 = vpop.permute.xlu2 %522 }
 0x40e   : > { %v533_v30 = vsel %vm283_vm0, %v825_v39, %v523_v28 }
 0x41d   : > { %v527_v29 = vpop.permute.xlu2 %526 }
 0x41e   : > { %v535_v31 = vsel %vm534_vm4, %v533_v30, %v527_v29 }
 0x439   : > { %v531_v32 = vpop.permute.xlu0 %530 }
 0x43a   : > { %v537_v33 = vsel %vm536_vm5, %v535_v31, %v531_v32 }
 0x43b   : > { %v538_v34 = vpack.c.bf16 %v537_v33, %v537_v33 }
 0x43d   : > { %539 = vst [vmem:[%s275_s7] sm:$0xf] %v538_v34 }
 0x43e PF: > { %s13_s14 = sadd.s32 1, %s744_s14   ;;  %s865_s12 = smov %s740_s13 }
 0x43f   : > { %p10_p5 = scmp.ge.s32.totalorder %s13_s14, 10   ;;  %s866_s13 = smov %s868_s15 }
 0x441   :  { %12 = sbr.rel (!%p10_p5) target bundleno = 2 (0x2), region = 68 }

// kernel: _lambda_.22
= control target key start
LH: loop header
LB: loop body
LE: loop exit
PB: predicated region body
PF: predicated region fallthrough
CT: control target
= control target key end

     0   :  { %s426_s1 = inlined_call_operand.vmem [shape: bf16[128,128], index: 1, kind: input, shape index: {}]   ;;  %s427_s2 = inlined_call_operand.vmem [shape: f32[1,128], index: 2, kind: input, shape index: {}]   ;;  %s428_s0 = inlined_call_operand.vmem [shape: bf16[64,128], index: 0, kind: input, shape index: {}]   ;;  %s429_s3 = inlined_call_operand.vmem [shape: f32[64,128], index: 3, kind: input, shape index: {}]   ;;  %s430_s4 = inlined_call_operand.vmem [shape: f32[64,128], index: 4, kind: output, shape index: {}]  }
   0x1   :  { %v288_v0 = vld [vmem:[%s426_s1 + $0x38] sm:$0xff]  ;;  %v287_v1 = vld [vmem:[%s426_s1 + $0x30] sm:$0xff]  ;;  %v286_v2 = vld [vmem:[%s426_s1 + $0x28] sm:$0xff] }
   0x2   :  { %133 = vmatpush.bf16.msra.mxu0 %v288_v0  ;;  %289 = vmatpush.bf16.msra.mxu1 %v288_v0  ;;  %v285_v3 = vld [vmem:[%s426_s1 + $0x20] sm:$0xff]  ;;  %v284_v4 = vld [vmem:[%s426_s1 + $0x18] sm:$0xff]  ;;  %v283_v5 = vld [vmem:[%s426_s1 + $0x10] sm:$0xff] }
   0x3   :  { %290 = vmatpush.bf16.msra.mxu2 %v288_v0  ;;  %291 = vmatpush.bf16.msra.mxu3 %v288_v0  ;;  %v282_v6 = vld [vmem:[%s426_s1 + $0x8] sm:$0xff]  ;;  %v281_v7 = vld [vmem:[%s426_s1] sm:$0xff]  ;;  %v279_v10 = vld [vmem:[%s428_s0 + $0x10] sm:$0xff] }
   0x4   :  { %v277_v8 = vld [vmem:[%s428_s0] sm:$0xff]  ;;  %v278_v9 = vld [vmem:[%s428_s0 + $0x8] sm:$0xff]  ;;  %v280_v11 = vld [vmem:[%s428_s0 + $0x18] sm:$0xff] }
   0x5   :  { %v313_v12 = vld [vmem:[%s427_s2] ss:$0 sm:$0xff]  ;;  %v203_v16 = vld [vmem:[%s429_s3 + $0x10] sm:$0xff]  ;;  %v202_v28 = vld [vmem:[%s429_s3 + $0x8] sm:$0xff] }
   0x6   :  { %134 = vmatpush.bf16.msra.mxu0 %v287_v1  ;;  %292 = vmatpush.bf16.msra.mxu1 %v287_v1  ;;  %v201_v14 = vld [vmem:[%s429_s3] sm:$0xff]  ;;  %v207_v24 = vld [vmem:[%s429_s3 + $0x30] sm:$0xff]  ;;  %v204_v30 = vld [vmem:[%s429_s3 + $0x18] sm:$0xff] }
   0x7   :  { %293 = vmatpush.bf16.msra.mxu2 %v287_v1  ;;  %294 = vmatpush.bf16.msra.mxu3 %v287_v1  ;;  %v205_v22 = vld [vmem:[%s429_s3 + $0x20] sm:$0xff]  ;;  %v206_v38 = vld [vmem:[%s429_s3 + $0x28] sm:$0xff]  ;;  %v208_v40 = vld [vmem:[%s429_s3 + $0x38] sm:$0xff] }
   0xa   :  { %135 = vmatpush.bf16.msra.mxu0 %v286_v2  ;;  %295 = vmatpush.bf16.msra.mxu1 %v286_v2 }
   0xb   :  { %296 = vmatpush.bf16.msra.mxu2 %v286_v2  ;;  %297 = vmatpush.bf16.msra.mxu3 %v286_v2 }
   0xe   :  { %136 = vmatpush.bf16.msra.mxu0 %v285_v3  ;;  %298 = vmatpush.bf16.msra.mxu1 %v285_v3 }
   0xf   :  { %299 = vmatpush.bf16.msra.mxu2 %v285_v3  ;;  %300 = vmatpush.bf16.msra.mxu3 %v285_v3 }
  0x12   :  { %137 = vmatpush.bf16.msra.mxu0 %v284_v4  ;;  %301 = vmatpush.bf16.msra.mxu1 %v284_v4 }
  0x13   :  { %302 = vmatpush.bf16.msra.mxu2 %v284_v4  ;;  %303 = vmatpush.bf16.msra.mxu3 %v284_v4 }
  0x16   :  { %138 = vmatpush.bf16.msra.mxu0 %v283_v5  ;;  %304 = vmatpush.bf16.msra.mxu1 %v283_v5 }
  0x17   :  { %305 = vmatpush.bf16.msra.mxu2 %v283_v5  ;;  %306 = vmatpush.bf16.msra.mxu3 %v283_v5 }
  0x1a   :  { %139 = vmatpush.bf16.msra.mxu0 %v282_v6  ;;  %307 = vmatpush.bf16.msra.mxu1 %v282_v6 }
  0x1b   :  { %308 = vmatpush.bf16.msra.mxu2 %v282_v6  ;;  %309 = vmatpush.bf16.msra.mxu3 %v282_v6 }
  0x1e   :  { %140 = vmatpush.bf16.msra.mxu0 %v281_v7  ;;  %310 = vmatpush.bf16.msra.mxu1 %v281_v7 }
  0x1f   :  { %311 = vmatpush.bf16.msra.mxu2 %v281_v7  ;;  %312 = vmatpush.bf16.msra.mxu3 %v281_v7 }
  0x21   :  { %141 = vmatmul.bf16.vlgmr.msra.gmra.mxu0 %v277_v8  ;;  %146 = vmatmul.bf16.vlgmr.msra.gmra.mxu1 %v278_v9 }
  0x22   :  { %151 = vmatmul.bf16.vlgmr.msra.gmra.mxu2 %v279_v10  ;;  %156 = vmatmul.bf16.vlgmr.msra.gmra.mxu3 %v280_v11 }
  0x9e   :  { %v142_v13 = vpop.f32.mrf.mxu0  ;;  %v147_v15 = vpop.f32.mrf.mxu1 }
  0x9f   :  { %v193_v17 = vadd.f32 %v313_v12, %v142_v13  ;;  %v195_v18 = vadd.f32 %v313_v12, %v147_v15 }
  0xa1   :  { %v209_v19 = vadd.f32 %v201_v14, %v193_v17  ;;  %v211_v20 = vadd.f32 %v203_v16, %v195_v18 }
  0xa3   :  { %217 = vst [vmem:[%s430_s4] sm:$0xff] %v209_v19 }
  0xa4   :  { %219 = vst [vmem:[%s430_s4 + $0x10] sm:$0xff] %v211_v20 }
  0xa5   :  { %v152_v21 = vpop.f32.mrf.mxu2  ;;  %v157_v23 = vpop.f32.mrf.mxu3 }
  0xa6   :  { %v197_v25 = vadd.f32 %v313_v12, %v152_v21  ;;  %v199_v26 = vadd.f32 %v313_v12, %v157_v23  ;;  %v144_v27 = vpop.f32.mrf.mxu0  ;;  %v149_v29 = vpop.f32.mrf.mxu1 }
  0xa7   :  { %v194_v31 = vadd.f32 %v313_v12, %v144_v27  ;;  %v196_v32 = vadd.f32 %v313_v12, %v149_v29 }
  0xa8   :  { %v213_v33 = vadd.f32 %v205_v22, %v197_v25  ;;  %v215_v34 = vadd.f32 %v207_v24, %v199_v26 }
  0xa9   :  { %v210_v35 = vadd.f32 %v202_v28, %v194_v31  ;;  %v212_v36 = vadd.f32 %v204_v30, %v196_v32 }
  0xaa   :  { %221 = vst [vmem:[%s430_s4 + $0x20] sm:$0xff] %v213_v33 }
  0xab   :  { %223 = vst [vmem:[%s430_s4 + $0x30] sm:$0xff] %v215_v34 }
  0xac   :  { %218 = vst [vmem:[%s430_s4 + $0x8] sm:$0xff] %v210_v35 }
  0xad   :  { %220 = vst [vmem:[%s430_s4 + $0x18] sm:$0xff] %v212_v36  ;;  %v154_v37 = vpop.f32.mrf.mxu2  ;;  %v159_v39 = vpop.f32.mrf.mxu3 }
  0xae   :  { %v198_v41 = vadd.f32 %v313_v12, %v154_v37  ;;  %v200_v42 = vadd.f32 %v313_v12, %v159_v39 }
  0xb0   :  { %v214_v43 = vadd.f32 %v206_v38, %v198_v41  ;;  %v216_v44 = vadd.f32 %v208_v40, %v200_v42 }
  0xb2   :  { %222 = vst [vmem:[%s430_s4 + $0x28] sm:$0xff] %v214_v43 }
  0xb3   :  { %224 = vst [vmem:[%s430_s4 + $0x38] sm:$0xff] %v216_v44 }

// kernel: _lambda_.20
= control target key start
LH: loop header
LB: loop body
LE: loop exit
PB: predicated region body
PF: predicated region fallthrough
CT: control target
= control target key end

     0   :  { %v754_v7 = vmov 128.0   ;;  %s1138_s0 = inlined_call_operand.vmem [shape: f32[64,128], index: 0, kind: input, shape index: {}]   ;;  %s1139_s1 = inlined_call_operand.vmem [shape: f32[1,128], index: 1, kind: input, shape index: {}]   ;;  %s1140_s2 = inlined_call_operand.vmem [shape: f32[1,128], index: 2, kind: input, shape index: {}]   ;;  %s1141_s3 = inlined_call_operand.vmem [shape: bf16[128,384], index: 3, kind: input, shape index: {}]   ;;  %s1142_s4 = inlined_call_operand.vmem [shape: f32[1,384], index: 4, kind: input, shape index: {}]   ;;  %s1143_s5 = inlined_call_operand.vmem [shape: bf16[64,384], index: 5, kind: output, shape index: {}]  }
   0x1   :  { %v28_v0 = vld [vmem:[%s1138_s0 + $0x20] sm:$0xff]  ;;  %v26_v1 = vld [vmem:[%s1138_s0 + $0x10] sm:$0xff]  ;;  %v29_v3 = vld [vmem:[%s1138_s0 + $0x28] sm:$0xff]  ;;  %736 = vrcp.f32 %v754_v7 }
   0x2   :  { %v24_v2 = vld [vmem:[%s1138_s0] sm:$0xff]  ;;  %40 = vadd.xlane.f32.xlu2 %v28_v0  ;;  %36 = vadd.xlane.f32.xlu1 %v26_v1  ;;  %v27_v4 = vld [vmem:[%s1138_s0 + $0x18] sm:$0xff]  ;;  %v25_v5 = vld [vmem:[%s1138_s0 + $0x8] sm:$0xff] }
   0x3   :  { %32 = vadd.xlane.f32.xlu0 %v24_v2  ;;  %v30_v6 = vld [vmem:[%s1138_s0 + $0x30] sm:$0xff]  ;;  %v826_v30 = vld [vmem:[%s1138_s0 + $0x38] sm:$0xff]  ;;  %v664_v43 = vld [vmem:[%s1141_s3 + $0xa8] sm:$0xf] }
   0x4   :  { %v700_v44 = vld [vmem:[%s1141_s3 + $0xb0] sm:$0xf0]  ;;  %v699_v45 = vld [vmem:[%s1141_s3 + $0xac] sm:$0xf]  ;;  %v666_v47 = vld [vmem:[%s1141_s3 + $0xb4] sm:$0xf0] }
   0x5   :  { %v665_v46 = vor.u32 %v700_v44, %v664_v43  ;;  %v672_v48 = vld [vmem:[%s1141_s3 + $0xb0] sm:$0xf]  ;;  %v701_v49 = vld [vmem:[%s1141_s3 + $0xb8] sm:$0xf0]  ;;  %v669_v50 = vor.u32 %v699_v45, %v666_v47  ;;  %v696_v54 = vld [vmem:[%s1141_s3 + $0x94] sm:$0xf] }
   0x6   :  { %v673_v51 = vor.u32 %v701_v49, %v672_v48  ;;  %v652_v52 = vld [vmem:[%s1141_s3 + $0x90] sm:$0xf]  ;;  %v697_v53 = vld [vmem:[%s1141_s3 + $0x98] sm:$0xf0]  ;;  %v654_v56 = vld [vmem:[%s1141_s3 + $0x9c] sm:$0xf0] }
   0x7   :  { %v737_v8 = vpop.eup %736  ;;  %439 = vmatpush.bf16.msra.mxu0 %v665_v46  ;;  %725 = vmatpush.bf16.msra.mxu3 %v665_v46  ;;  %v653_v55 = vor.u32 %v697_v53, %v652_v52  ;;  %v660_v57 = vld [vmem:[%s1141_s3 + $0x98] sm:$0xf]  ;;  %v698_v58 = vld [vmem:[%s1141_s3 + $0xa0] sm:$0xf0]  ;;  %v657_v59 = vor.u32 %v696_v54, %v654_v56  ;;  %v693_v63 = vld [vmem:[%s1141_s3 + $0x7c] sm:$0xf] }
   0x8   :  { %v49_v9 = vmul.f32 128.0, %v737_v8  ;;  %vm53_vm0 = vweird.f32 %v737_v8  ;;  %468 = vmatpush.bf16.msra.mxu1 %v669_v50  ;;  %497 = vmatpush.bf16.msra.mxu2 %v673_v51  ;;  %v661_v60 = vor.u32 %v698_v58, %v660_v57  ;;  %v640_v61 = vld [vmem:[%s1141_s3 + $0x78] sm:$0xf]  ;;  %v694_v62 = vld [vmem:[%s1141_s3 + $0x80] sm:$0xf0] }
   0x9   :  { %v691_v7 = vld [vmem:[%s1141_s3 + $0x68] sm:$0xf0]  ;;  %v686_v43 = vld [vmem:[%s1141_s3 + $0x40] sm:$0xf0]  ;;  %v592_v46 = vld [vmem:[%s1141_s3 + $0x18] sm:$0xf] }
   0xa   :  { %42 = vadd.xlane.f32.xlu2 %v29_v3  ;;  %38 = vadd.xlane.f32.xlu1 %v27_v4  ;;  %v50_v10 = vsub.f32 1.0, %v49_v9  ;;  %v682_v47 = vld [vmem:[%s1141_s3 + $0x20] sm:$0xf0]  ;;  %v681_v48 = vld [vmem:[%s1141_s3 + $0x1c] sm:$0xf] }
   0xb   :  { %34 = vadd.xlane.f32.xlu0 %v25_v5  ;;  %440 = vmatpush.bf16.msra.mxu0 %v653_v55  ;;  %v593_v52 = vor.u32 %v682_v47, %v592_v46  ;;  %v594_v53 = vld [vmem:[%s1141_s3 + $0x24] sm:$0xf0]  ;;  %v600_v54 = vld [vmem:[%s1141_s3 + $0x20] sm:$0xf] }
   0xc   :  { %v51_v11 = vmul.f32 %v737_v8, %v50_v10  ;;  %726 = vmatpush.bf16.msra.mxu3 %v653_v55  ;;  %469 = vmatpush.bf16.msra.mxu1 %v657_v59  ;;  %v630_v10 = vld [vmem:[%s1141_s3 + $0x6c] sm:$0xf0]  ;;  %v683_v55 = vld [vmem:[%s1141_s3 + $0x28] sm:$0xf0]  ;;  %v597_v58 = vor.u32 %v681_v48, %v594_v53 }
   0xd   :  { %498 = vmatpush.bf16.msra.mxu2 %v661_v60  ;;  %v601_v59 = vor.u32 %v683_v55, %v600_v54 }
   0xe   :  { %v52_v12 = vadd.f32 %v737_v8, %v51_v11  ;;  %v636_v11 = vld [vmem:[%s1141_s3 + $0x68] sm:$0xf] }
  0x10   :  { %v806_v13 = vsel %vm53_vm0, %v737_v8, %v52_v12  ;;  %v690_v8 = vld [vmem:[%s1141_s3 + $0x64] sm:$0xf]  ;;  %v692_v12 = vld [vmem:[%s1141_s3 + $0x70] sm:$0xf0] }
  0x12   :  { %44 = vadd.xlane.f32.xlu2 %v30_v6 }
  0x75   :  { %v41_v14 = vpop.xlane.xlu2 %40  ;;  %v37_v15 = vpop.xlane.xlu1 %36 }
  0x76   :  { %v33_v16 = vpop.xlane.xlu0 %32  ;;  %v59_v26 = vmul.f32 %v806_v13, %v41_v14  ;;  %v57_v27 = vmul.f32 %v806_v13, %v37_v15  ;;  %v633_v14 = vor.u32 %v690_v8, %v630_v10  ;;  %v637_v15 = vor.u32 %v692_v12, %v636_v11 }
  0x77   :  { %v55_v17 = vmul.f32 %v806_v13, %v33_v16  ;;  %v616_v16 = vld [vmem:[%s1141_s3 + $0x48] sm:$0xf] }
  0x78   :  { %v830_v32 = vsub.f32 %v28_v0, %v59_v26  ;;  %v832_v33 = vsub.f32 %v26_v1, %v57_v27  ;;  %v641_v0 = vor.u32 %v694_v62, %v640_v61  ;;  %v642_v1 = vld [vmem:[%s1141_s3 + $0x84] sm:$0xf0] }
  0x79   :  { %v809_v18 = vsub.f32 %v24_v2, %v55_v17  ;;  %v648_v2 = vld [vmem:[%s1141_s3 + $0x80] sm:$0xf]  ;;  %v688_v17 = vld [vmem:[%s1141_s3 + $0x50] sm:$0xf0] }
  0x7a   :  { %v75_v38 = vmul.f32 %v830_v32, %v830_v32  ;;  %v73_v39 = vmul.f32 %v832_v33, %v832_v33  ;;  %441 = vmatpush.bf16.msra.mxu0 %v641_v0  ;;  %727 = vmatpush.bf16.msra.mxu3 %v641_v0  ;;  %v580_v0 = vld [vmem:[%s1141_s3] sm:$0xf] }
  0x7b   :  { %v71_v19 = vmul.f32 %v809_v18, %v809_v18 }
  0x7d   :  { %79 = vadd.xlane.f32.xlu0 %v71_v19  ;;  %v43_v20 = vpop.xlane.xlu2 %42  ;;  %v39_v21 = vpop.xlane.xlu1 %38  ;;  %v687_v19 = vld [vmem:[%s1141_s3 + $0x4c] sm:$0xf] }
  0x7e   :  { %v58_v22 = vmul.f32 %v806_v13, %v39_v21  ;;  %v35_v23 = vpop.xlane.xlu0 %34  ;;  %v60_v37 = vmul.f32 %v806_v13, %v43_v20  ;;  %v617_v21 = vor.u32 %v688_v17, %v616_v16 }
  0x7f   :  { %v56_v24 = vmul.f32 %v806_v13, %v35_v23  ;;  %v624_v23 = vld [vmem:[%s1141_s3 + $0x50] sm:$0xf] }
  0x80   :  { %v815_v25 = vsub.f32 %v27_v4, %v58_v22  ;;  %v845_v41 = vsub.f32 %v29_v3, %v60_v37  ;;  %v695_v3 = vld [vmem:[%s1141_s3 + $0x88] sm:$0xf0]  ;;  %v645_v4 = vor.u32 %v693_v63, %v642_v1  ;;  %v618_v22 = vld [vmem:[%s1141_s3 + $0x54] sm:$0xf0] }
  0x81   :  { %v819_v28 = vsub.f32 %v25_v5, %v56_v24  ;;  %v649_v5 = vor.u32 %v695_v3, %v648_v2  ;;  %v689_v24 = vld [vmem:[%s1141_s3 + $0x58] sm:$0xf0]  ;;  %v621_v27 = vor.u32 %v687_v19, %v618_v22  ;;  %v679_v1 = vld [vmem:[%s1141_s3 + $0x8] sm:$0xf0]  ;;  %v678_v3 = vld [vmem:[%s1141_s3 + $0x4] sm:$0xf] }
  0x82   :  { %v74_v29 = vmul.f32 %v815_v25, %v815_v25  ;;  %v76_v42 = vmul.f32 %v845_v41, %v845_v41  ;;  %470 = vmatpush.bf16.msra.mxu1 %v645_v4  ;;  %v588_v4 = vld [vmem:[%s1141_s3 + $0x8] sm:$0xf] }
  0x83   :  { %v72_v31 = vmul.f32 %v819_v28, %v819_v28  ;;  %499 = vmatpush.bf16.msra.mxu2 %v649_v5 }
  0x84   :  { %85 = vadd.xlane.f32.xlu2 %v74_v29  ;;  %v625_v29 = vor.u32 %v689_v24, %v624_v23 }
  0x85   :  { %46 = vadd.xlane.f32.xlu0 %v826_v30  ;;  %81 = vadd.xlane.f32.xlu1 %v72_v31  ;;  %v45_v34 = vpop.xlane.xlu2 %44 }
  0x86   :  { %v61_v35 = vmul.f32 %v806_v13, %v45_v34  ;;  %471 = vmatpush.bf16.msra.mxu1 %v633_v14  ;;  %v604_v34 = vld [vmem:[%s1141_s3 + $0x30] sm:$0xf] }
  0x87   :  { %500 = vmatpush.bf16.msra.mxu2 %v637_v15 }
  0x88   :  { %v836_v36 = vsub.f32 %v30_v6, %v61_v35  ;;  %v628_v6 = vld [vmem:[%s1141_s3 + $0x60] sm:$0xf]  ;;  %v685_v35 = vld [vmem:[%s1141_s3 + $0x38] sm:$0xf0] }
  0x89   :  { %v629_v9 = vor.u32 %v691_v7, %v628_v6  ;;  %v605_v37 = vor.u32 %v685_v35, %v604_v34  ;;  %v581_v6 = vor.u32 %v679_v1, %v580_v0  ;;  %v680_v7 = vld [vmem:[%s1141_s3 + $0x10] sm:$0xf0] }
  0x8a   :  { %v77_v40 = vmul.f32 %v836_v36, %v836_v36  ;;  %472 = vmatpush.bf16.msra.mxu1 %v621_v27  ;;  %v589_v10 = vor.u32 %v680_v7, %v588_v4 }
  0x8b   :  { %442 = vmatpush.bf16.msra.mxu0 %v629_v9  ;;  %728 = vmatpush.bf16.msra.mxu3 %v629_v9 }
  0x8c   :  { %91 = vadd.xlane.f32.xlu2 %v77_v40  ;;  %501 = vmatpush.bf16.msra.mxu2 %v625_v29  ;;  %v612_v40 = vld [vmem:[%s1141_s3 + $0x38] sm:$0xf] }
  0x8d   :  { %87 = vadd.xlane.f32.xlu0 %v75_v38  ;;  %83 = vadd.xlane.f32.xlu1 %v73_v39  ;;  %v684_v38 = vld [vmem:[%s1141_s3 + $0x34] sm:$0xf]  ;;  %v606_v39 = vld [vmem:[%s1141_s3 + $0x3c] sm:$0xf0]  ;;  %v613_v44 = vor.u32 %v686_v43, %v612_v40 }
  0x8f   :  { %443 = vmatpush.bf16.msra.mxu0 %v617_v21  ;;  %729 = vmatpush.bf16.msra.mxu3 %v617_v21 }
  0x90   :  { %502 = vmatpush.bf16.msra.mxu2 %v613_v44 }
  0x93   :  { %444 = vmatpush.bf16.msra.mxu0 %v605_v37  ;;  %730 = vmatpush.bf16.msra.mxu3 %v605_v37 }
  0x94   :  { %503 = vmatpush.bf16.msra.mxu2 %v601_v59 }
  0x95   :  { %89 = vadd.xlane.f32.xlu1 %v76_v42  ;;  %v609_v42 = vor.u32 %v684_v38, %v606_v39 }
  0x97   :  { %473 = vmatpush.bf16.msra.mxu1 %v609_v42  ;;  %445 = vmatpush.bf16.msra.mxu0 %v593_v52  ;;  %v1017_v42 = vld [vmem:[%s1139_s1] ss:$0 sm:$0xff] }
  0x98   :  { %731 = vmatpush.bf16.msra.mxu3 %v593_v52  ;;  %504 = vmatpush.bf16.msra.mxu2 %v589_v10 }
  0x9b   :  { %474 = vmatpush.bf16.msra.mxu1 %v597_v58  ;;  %446 = vmatpush.bf16.msra.mxu0 %v581_v6 }
  0x9c   :  { %732 = vmatpush.bf16.msra.mxu3 %v581_v6 }
  0xf0   :  { %v80_v20 = vpop.xlane.xlu0 %79 }
  0xf1   :  { %v95_v26 = vmul.f32 %v80_v20, %v806_v13 }
  0xf3   :  { %v940_v31 = vadd.f32 1e-06, %v95_v26 }
  0xf5   :  { %738 = vrsqrt.f32 %v940_v31  ;;  %vm117_vm2 = vweird.f32 %v940_v31 }
  0xf7   :  { %v86_v45 = vpop.xlane.xlu2 %85 }
  0xf8   :  { %v98_v49 = vmul.f32 %v86_v45, %v806_v13  ;;  %v82_v50 = vpop.xlane.xlu1 %81  ;;  %v47_v51 = vpop.xlane.xlu0 %46 }
  0xf9   :  { %v96_v56 = vmul.f32 %v82_v50, %v806_v13  ;;  %v62_v57 = vmul.f32 %v806_v13, %v47_v51 }
  0xfa   :  { %v982_v60 = vadd.f32 1e-06, %v98_v49 }
  0xfb   :  { %v739_v61 = vpop.eup %738  ;;  %v104_v62 = vadd.f32 1e-06, %v96_v56  ;;  %v985_v63 = vsub.f32 %v826_v30, %v62_v57  ;;  %v582_v30 = vld [vmem:[%s1141_s3 + $0xc] sm:$0xf0] }
  0xfc   :  { %v112_v2 = vmul.f32 %v739_v61, %v940_v31  ;;  %740 = vrsqrt.f32 %v982_v60  ;;  %v585_v9 = vor.u32 %v678_v3, %v582_v30  ;;  %vm118_vm1 = vweird.f32 %v739_v61 }
  0xfd   :  { %742 = vrsqrt.f32 %v104_v62  ;;  %v78_v5 = vmul.f32 %v985_v63, %v985_v63  ;;  %vm119_vm3 = vmor %vm117_vm2, %vm118_vm1  ;;  %vm127_vm4 = vweird.f32 %v104_v62  ;;  %vm147_vm6 = vweird.f32 %v982_v60 }
  0xfe   :  { %v113_v8 = vmul.f32 %v739_v61, %v112_v2  ;;  %475 = vmatpush.bf16.msra.mxu1 %v585_v9 }
  0xff   :  { %93 = vadd.xlane.f32.xlu0 %v78_v5 }
 0x100   :  { %v114_v11 = vmul.f32 0.5, %v113_v8  ;;  %v84_v12 = vpop.xlane.xlu1 %83  ;;  %v88_v14 = vpop.xlane.xlu0 %87 }
 0x101   :  { %v97_v15 = vmul.f32 %v84_v12, %v806_v13  ;;  %v99_v16 = vmul.f32 %v88_v14, %v806_v13 }
 0x102   :  { %v741_v17 = vpop.eup %740  ;;  %v115_v19 = vsub.f32 1.5, %v114_v11 }
 0x103   :  { %v743_v20 = vpop.eup %742  ;;  %v142_v21 = vmul.f32 %v741_v17, %v982_v60  ;;  %v105_v22 = vadd.f32 1e-06, %v97_v15  ;;  %v107_v23 = vadd.f32 1e-06, %v99_v16  ;;  %vm148_vm7 = vweird.f32 %v741_v17 }
 0x104   :  { %v116_v24 = vmul.f32 %v739_v61, %v115_v19  ;;  %v122_v26 = vmul.f32 %v743_v20, %v104_v62  ;;  %vm128_vm5 = vweird.f32 %v743_v20  ;;  %vm1021_vm9 = vmor %vm147_vm6, %vm148_vm7 }
 0x105   :  { %v143_v27 = vmul.f32 %v741_v17, %v142_v21  ;;  %744 = vrsqrt.f32 %v105_v22  ;;  %vm129_vm8 = vmor %vm127_vm4, %vm128_vm5  ;;  %vm137_vm10 = vweird.f32 %v105_v22  ;;  %vm157_vm12 = vweird.f32 %v107_v23 }
 0x106   :  { %v123_v29 = vmul.f32 %v743_v20, %v122_v26  ;;  %746 = vrsqrt.f32 %v107_v23  ;;  %v120_v34 = vsel %vm119_vm3, %v739_v61, %v116_v24 }
 0x107   :  { %v144_v35 = vmul.f32 0.5, %v143_v27  ;;  %v191_v31 = vmul.f32 %v120_v34, %v809_v18  ;;  %v1028_v18 = vld [vmem:[%s1140_s2] ss:$0 sm:$0xff] }
 0x108   :  { %v124_v37 = vmul.f32 0.5, %v123_v29  ;;  %v90_v38 = vpop.xlane.xlu1 %89 }
 0x109   :  { %v145_v39 = vsub.f32 1.5, %v144_v35  ;;  %v100_v40 = vmul.f32 %v90_v38, %v806_v13  ;;  %v203_v52 = vmul.f32 %v1017_v42, %v191_v31 }
 0x10a   :  { %v125_v43 = vsub.f32 1.5, %v124_v37 }
 0x10b   :  { %v745_v44 = vpop.eup %744  ;;  %v146_v46 = vmul.f32 %v741_v17, %v145_v39  ;;  %v108_v49 = vadd.f32 1e-06, %v100_v40  ;;  %v215_v61 = vadd.f32 %v1028_v18, %v203_v52 }
 0x10c   :  { %v747_v45 = vpop.eup %746  ;;  %v126_v47 = vmul.f32 %v743_v20, %v125_v43  ;;  %v132_v48 = vmul.f32 %v745_v44, %v105_v22  ;;  %vm138_vm11 = vweird.f32 %v745_v44 }
 0x10d   :  { %v152_v51 = vmul.f32 %v747_v45, %v107_v23  ;;  %748 = vrsqrt.f32 %v108_v49  ;;  %v150_v57 = vsel %vm1021_vm9, %v741_v17, %v146_v46  ;;  %vm139_vm13 = vmor %vm137_vm10, %vm138_vm11  ;;  %vm158_vm14 = vweird.f32 %v747_v45 }
 0x10e   :  { %v130_v53 = vsel %vm129_vm8, %v743_v20, %v126_v47  ;;  %v133_v54 = vmul.f32 %v745_v44, %v132_v48  ;;  %v194_v0 = vmul.f32 %v150_v57, %v815_v25  ;;  %vm159_vm15 = vmor %vm157_vm12, %vm158_vm14  ;;  %vm167_vm0 = vweird.f32 %v108_v49 }
 0x10f   :  { %v192_v55 = vmul.f32 %v130_v53, %v819_v28  ;;  %v153_v56 = vmul.f32 %v747_v45, %v152_v51 }
 0x110   :  { %v134_v58 = vmul.f32 0.5, %v133_v54  ;;  %v206_v7 = vmul.f32 %v1017_v42, %v194_v0 }
 0x111   :  { %v204_v59 = vmul.f32 %v1017_v42, %v192_v55  ;;  %v154_v60 = vmul.f32 0.5, %v153_v56 }
 0x112   :  { %v135_v62 = vsub.f32 1.5, %v134_v58  ;;  %v218_v12 = vadd.f32 %v1028_v18, %v206_v7 }
 0x113   :  { %v216_v1 = vadd.f32 %v1028_v18, %v204_v59  ;;  %v155_v28 = vsub.f32 1.5, %v154_v60  ;;  %v749_v2 = vpop.eup %748 }
 0x114   :  { %v136_v3 = vmul.f32 %v745_v44, %v135_v62  ;;  %v162_v5 = vmul.f32 %v749_v2, %v108_v49  ;;  %vm168_vm1 = vweird.f32 %v749_v2 }
 0x115   :  { %v705_v30 = vpack.c.bf16 %v216_v1, %v215_v61  ;;  %v156_v4 = vmul.f32 %v747_v45, %v155_v28  ;;  %vm169_vm2 = vmor %vm167_vm0, %vm168_vm1 }
 0x116   :  { %v140_v6 = vsel %vm139_vm13, %v745_v44, %v136_v3  ;;  %v163_v9 = vmul.f32 %v749_v2, %v162_v5 }
 0x117   :  { %706 = vst [vmem:[#allocation2 + $0x10] sm:$0xff] %v705_v30   ;;  %v193_v8 = vmul.f32 %v140_v6, %v832_v33  ;;  %v160_v10 = vsel %vm159_vm15, %v747_v45, %v156_v4 }
 0x118   :  { %v164_v11 = vmul.f32 0.5, %v163_v9  ;;  %v195_v16 = vmul.f32 %v160_v10, %v830_v32 }
 0x119   :  { %v205_v25 = vmul.f32 %v1017_v42, %v193_v8 }
 0x11a   :  { %v165_v15 = vsub.f32 1.5, %v164_v11  ;;  %v207_v21 = vmul.f32 %v1017_v42, %v195_v16 }
 0x11b   :  { %v217_v14 = vadd.f32 %v1028_v18, %v205_v25 }
 0x11c   :  { %v166_v19 = vmul.f32 %v749_v2, %v165_v15  ;;  %v219_v24 = vadd.f32 %v1028_v18, %v207_v21 }
 0x11d   :  { %v710_v17 = vpack.c.bf16 %v218_v12, %v217_v14 }
 0x11e   :  { %v674_v20 = vld [vmem:[#allocation2 + $0x10] sm:$0xff]  ;;  %v170_v33 = vsel %vm169_vm2, %v749_v2, %v166_v19 }
 0x11f   :  { %722 = vst [vmem:[#allocation2] sm:$0xff] %v710_v17   ;;  %v196_v22 = vmul.f32 %v170_v33, %v845_v41  ;;  %447 = vmatmul.bf16.vlgmr.msra.gmra.mxu0 %v674_v20  ;;  %476 = vmatmul.bf16.vlgmr.msra.gmra.mxu1 %v674_v20  ;;  %v92_v41 = vpop.xlane.xlu2 %91 }
 0x120   :  { %505 = vmatmul.bf16.vlgmr.msra.gmra.mxu2 %v674_v20  ;;  %v101_v34 = vmul.f32 %v92_v41, %v806_v13 }
 0x121   :  { %v208_v23 = vmul.f32 %v1017_v42, %v196_v22 }
 0x122   :  { %v109_v35 = vadd.f32 1e-06, %v101_v34 }
 0x123   :  { %v220_v26 = vadd.f32 %v1028_v18, %v208_v23 }
 0x124   :  { %750 = vrsqrt.f32 %v109_v35  ;;  %vm177_vm3 = vweird.f32 %v109_v35 }
 0x125   :  { %v715_v32 = vpack.c.bf16 %v220_v26, %v219_v24 }
 0x126   :  { %v675_v27 = vld [vmem:[#allocation2] sm:$0xff] }
 0x127   :  { %723 = vst [vmem:[#allocation2 + $0x18] sm:$0xff] %v715_v32   ;;  %452 = vmatmul.bf16.vlgmr.msra.gmra.mxu3 %v675_v27 }
 0x12a   :  { %v751_v37 = vpop.eup %750 }
 0x12b   :  { %v172_v38 = vmul.f32 %v751_v37, %v109_v35  ;;  %vm178_vm4 = vweird.f32 %v751_v37 }
 0x12c   :  { %vm179_vm5 = vmor %vm177_vm3, %vm178_vm4 }
 0x12d   :  { %v173_v39 = vmul.f32 %v751_v37, %v172_v38 }
 0x12e   :  { %v676_v29 = vld [vmem:[#allocation2 + $0x18] sm:$0xff] }
 0x12f   :  { %481 = vmatmul.bf16.gmra.mxu1 %v675_v27  ;;  %v174_v44 = vmul.f32 0.5, %v173_v39 }
 0x130   :  { %510 = vmatmul.bf16.gmra.mxu2 %v675_v27 }
 0x131   :  { %v175_v45 = vsub.f32 1.5, %v174_v44 }
 0x133   :  { %v176_v47 = vmul.f32 %v751_v37, %v175_v45 }
 0x135   :  { %v180_v50 = vsel %vm179_vm5, %v751_v37, %v176_v47 }
 0x136   :  { %v197_v53 = vmul.f32 %v180_v50, %v836_v36  ;;  %v279_v36 = vld [vmem:[%s1142_s4] sm:$0x7] }
 0x137   :  { %457 = vmatmul.bf16.gmra.mxu3 %v676_v29  ;;  %v1060_v62 = vperm.slane %v279_v36, 0  ;;  %v1062_v0 = vperm.slane %v279_v36, 1  ;;  %v1066_v2 = vperm.slane %v279_v36, 2 }
 0x138   :  { %v209_v55 = vmul.f32 %v1017_v42, %v197_v53 }
 0x13a   :  { %v221_v58 = vadd.f32 %v1028_v18, %v209_v55 }
 0x13f   :  { %486 = vmatmul.bf16.gmra.mxu1 %v676_v29 }
 0x140   :  { %515 = vmatmul.bf16.gmra.mxu2 %v676_v29 }
 0x172   :  { %v94_v40 = vpop.xlane.xlu0 %93 }
 0x173   :  { %v102_v31 = vmul.f32 %v94_v40, %v806_v13 }
 0x175   :  { %v110_v43 = vadd.f32 1e-06, %v102_v31 }
 0x177   :  { %752 = vrsqrt.f32 %v110_v43  ;;  %vm187_vm7 = vweird.f32 %v110_v43 }
 0x17d   :  { %v753_v46 = vpop.eup %752 }
 0x17e   :  { %v182_v48 = vmul.f32 %v753_v46, %v110_v43  ;;  %vm188_vm6 = vweird.f32 %v753_v46 }
 0x17f   :  { %vm189_vm8 = vmor %vm187_vm7, %vm188_vm6 }
 0x180   :  { %v183_v49 = vmul.f32 %v753_v46, %v182_v48 }
 0x182   :  { %v184_v51 = vmul.f32 0.5, %v183_v49 }
 0x184   :  { %v185_v52 = vsub.f32 1.5, %v184_v51 }
 0x186   :  { %v186_v54 = vmul.f32 %v753_v46, %v185_v52 }
 0x188   :  { %v190_v13 = vsel %vm189_vm8, %v753_v46, %v186_v54 }
 0x189   :  { %v198_v56 = vmul.f32 %v190_v13, %v985_v63 }
 0x18b   :  { %v210_v57 = vmul.f32 %v1017_v42, %v198_v56 }
 0x18d   :  { %v222_v59 = vadd.f32 %v1028_v18, %v210_v57 }
 0x18f   :  { %v720_v60 = vpack.c.bf16 %v222_v59, %v221_v58 }
 0x191   :  { %724 = vst [vmem:[#allocation2 + $0x8] sm:$0xff] %v720_v60  }
 0x198   :  { %v677_v61 = vld [vmem:[#allocation2 + $0x8] sm:$0xff] }
 0x199   :  { %462 = vmatmul.bf16.gmra.mxu3 %v677_v61  ;;  %491 = vmatmul.bf16.gmra.mxu1 %v677_v61 }
 0x19a   :  { %520 = vmatmul.bf16.gmra.mxu2 %v677_v61 }
 0x19c   :  { %v448_v63 = vpop.f32.mrf.mxu0  ;;  %v477_v42 = vpop.f32.mrf.mxu1 }
 0x19d   :  { %v449_v1 = vadd.f32 %v448_v63, %v1060_v62  ;;  %v478_v18 = vadd.f32 %v477_v42, %v1062_v0 }
 0x19f   :  { %v526_v28 = vpack.c.bf16 %v478_v18, %v449_v1 }
 0x1a1   :  { %542 = vst [vmem:[%s1143_s5] sm:$0xff] %v526_v28 }
 0x1a3   :  { %v506_v3 = vpop.f32.mrf.mxu2 }
 0x1a4   :  { %v507_v30 = vadd.f32 %v506_v3, %v1066_v2  ;;  %v450_v4 = vpop.f32.mrf.mxu0  ;;  %v479_v5 = vpop.f32.mrf.mxu1 }
 0x1a5   :  { %v451_v6 = vadd.f32 %v450_v4, %v1060_v62  ;;  %v480_v7 = vadd.f32 %v479_v5, %v1062_v0 }
 0x1a6   :  { %v527_v8 = vpack.c.bf16 %v507_v30, %v507_v30 }
 0x1a7   :  { %v528_v9 = vpack.c.bf16 %v480_v7, %v451_v6 }
 0x1a8   :  { %543 = vst [vmem:[%s1143_s5 + $0x8] sm:$0xf] %v527_v8 }
 0x1a9   :  { %544 = vst [vmem:[%s1143_s5 + $0xc] sm:$0xff] %v528_v9 }
 0x1aa   :  { %v453_v25 = vpop.f32.mrf.mxu3 }
 0x1ab   :  { %v508_v10 = vpop.f32.mrf.mxu2  ;;  %v454_v14 = vadd.f32 %v453_v25, %v1060_v62 }
 0x1ac   :  { %v509_v11 = vadd.f32 %v508_v10, %v1066_v2  ;;  %v482_v12 = vpop.f32.mrf.mxu1 }
 0x1ad   :  { %v483_v15 = vadd.f32 %v482_v12, %v1062_v0 }
 0x1ae   :  { %v529_v16 = vpack.c.bf16 %v509_v11, %v509_v11 }
 0x1af   :  { %v530_v17 = vpack.c.bf16 %v483_v15, %v454_v14 }
 0x1b0   :  { %545 = vst [vmem:[%s1143_s5 + $0x14] sm:$0xf] %v529_v16 }
 0x1b1   :  { %546 = vst [vmem:[%s1143_s5 + $0x18] sm:$0xff] %v530_v17 }
 0x1b2   :  { %v455_v19 = vpop.f32.mrf.mxu3 }
 0x1b3   :  { %v511_v20 = vpop.f32.mrf.mxu2  ;;  %v456_v22 = vadd.f32 %v455_v19, %v1060_v62 }
 0x1b4   :  { %v512_v33 = vadd.f32 %v511_v20, %v1066_v2  ;;  %v484_v21 = vpop.f32.mrf.mxu1 }
 0x1b5   :  { %v485_v23 = vadd.f32 %v484_v21, %v1062_v0 }
 0x1b6   :  { %v531_v24 = vpack.c.bf16 %v512_v33, %v512_v33 }
 0x1b7   :  { %v532_v26 = vpack.c.bf16 %v485_v23, %v456_v22 }
 0x1b8   :  { %547 = vst [vmem:[%s1143_s5 + $0x20] sm:$0xf] %v531_v24 }
 0x1b9   :  { %548 = vst [vmem:[%s1143_s5 + $0x24] sm:$0xff] %v532_v26 }
 0x1ba   :  { %v458_v32 = vpop.f32.mrf.mxu3 }
 0x1bb   :  { %v513_v27 = vpop.f32.mrf.mxu2  ;;  %v459_v34 = vadd.f32 %v458_v32, %v1060_v62 }
 0x1bc   :  { %v514_v29 = vadd.f32 %v513_v27, %v1066_v2  ;;  %v487_v41 = vpop.f32.mrf.mxu1 }
 0x1bd   :  { %v488_v35 = vadd.f32 %v487_v41, %v1062_v0 }
 0x1be   :  { %v533_v37 = vpack.c.bf16 %v514_v29, %v514_v29 }
 0x1bf   :  { %v534_v38 = vpack.c.bf16 %v488_v35, %v459_v34 }
 0x1c0   :  { %549 = vst [vmem:[%s1143_s5 + $0x2c] sm:$0xf] %v533_v37 }
 0x1c1   :  { %550 = vst [vmem:[%s1143_s5 + $0x30] sm:$0xff] %v534_v38 }
 0x1c2   :  { %v460_v39 = vpop.f32.mrf.mxu3 }
 0x1c3   :  { %v516_v40 = vpop.f32.mrf.mxu2  ;;  %v461_v44 = vadd.f32 %v460_v39, %v1060_v62 }
 0x1c4   :  { %v517_v31 = vadd.f32 %v516_v40, %v1066_v2  ;;  %v489_v43 = vpop.f32.mrf.mxu1 }
 0x1c5   :  { %v490_v45 = vadd.f32 %v489_v43, %v1062_v0 }
 0x1c6   :  { %v535_v46 = vpack.c.bf16 %v517_v31, %v517_v31 }
 0x1c7   :  { %v536_v47 = vpack.c.bf16 %v490_v45, %v461_v44 }
 0x1c8   :  { %551 = vst [vmem:[%s1143_s5 + $0x38] sm:$0xf] %v535_v46 }
 0x1c9   :  { %552 = vst [vmem:[%s1143_s5 + $0x3c] sm:$0xff] %v536_v47 }
 0x1cb   :  { %v518_v48 = vpop.f32.mrf.mxu2 }
 0x1cc   :  { %v519_v49 = vadd.f32 %v518_v48, %v1066_v2 }
 0x1ce   :  { %v537_v50 = vpack.c.bf16 %v519_v49, %v519_v49 }
 0x1d0   :  { %553 = vst [vmem:[%s1143_s5 + $0x44] sm:$0xf] %v537_v50 }
 0x216   :  { %v492_v51 = vpop.f32.mrf.mxu1 }
 0x217   :  { %v493_v53 = vadd.f32 %v492_v51, %v1062_v0 }
 0x21c   :  { %v463_v52 = vpop.f32.mrf.mxu3 }
 0x21d   :  { %v464_v54 = vadd.f32 %v463_v52, %v1060_v62  ;;  %v521_v13 = vpop.f32.mrf.mxu2 }
 0x21e   :  { %v522_v55 = vadd.f32 %v521_v13, %v1066_v2  ;;  %v494_v58 = vpop.f32.mrf.mxu1 }
 0x21f   :  { %v538_v56 = vpack.c.bf16 %v493_v53, %v464_v54  ;;  %v495_v60 = vadd.f32 %v494_v58, %v1062_v0 }
 0x220   :  { %v539_v57 = vpack.c.bf16 %v522_v55, %v522_v55 }
 0x221   :  { %554 = vst [vmem:[%s1143_s5 + $0x48] sm:$0xff] %v538_v56 }
 0x222   :  { %555 = vst [vmem:[%s1143_s5 + $0x50] sm:$0xf] %v539_v57 }
 0x224   :  { %v465_v59 = vpop.f32.mrf.mxu3 }
 0x225   :  { %v466_v36 = vadd.f32 %v465_v59, %v1060_v62  ;;  %v523_v61 = vpop.f32.mrf.mxu2 }
 0x226   :  { %v524_v63 = vadd.f32 %v523_v61, %v1066_v2 }
 0x227   :  { %v540_v42 = vpack.c.bf16 %v495_v60, %v466_v36 }
 0x228   :  { %v541_v1 = vpack.c.bf16 %v524_v63, %v524_v63 }
 0x229   :  { %556 = vst [vmem:[%s1143_s5 + $0x54] sm:$0xff] %v540_v42 }
 0x22a   :  { %557 = vst [vmem:[%s1143_s5 + $0x5c] sm:$0xf] %v541_v1 }

// kernel: _lambda_.30
= control target key start
LH: loop header
LB: loop body
LE: loop exit
PB: predicated region body
PF: predicated region fallthrough
CT: control target
= control target key end

     0   :  { %v16_v0 = vlaneseq  ;;  %vm103_vm3 = vcmask 1041409   ;;  %vm105_vm4 = vcmask 1042434   ;;  %vm107_vm5 = vcmask 1043459   ;;  %s236_s0 = inlined_call_operand.vmem [shape: f32[8,8,128], index: 0, kind: input, shape index: {}]   ;;  %s237_s1 = inlined_call_operand.vmem [shape: f32[8,128], index: 1, kind: output, shape index: {}]  }
   0x1   :  { %v8_v1 = vld [vmem:[%s236_s0] sm:$0xff]  ;;  %v9_v2 = vld [vmem:[%s236_s0 + $0x8] sm:$0xff]  ;;  %v10_v4 = vld [vmem:[%s236_s0 + $0x10] sm:$0xff]  ;;  %vm109_vm6 = vcmask 1044484   ;;  %vm111_vm7 = vcmask 1045509   ;;  %vm113_vm8 = vcmask 1046534  }
   0x2   :  { %v17_v3 = vshrl.u32 %v16_v0, 7  ;;  %v11_v5 = vld [vmem:[%s236_s0 + $0x18] sm:$0xff]  ;;  %v12_v6 = vld [vmem:[%s236_s0 + $0x20] sm:$0xff]  ;;  %v13_v7 = vld [vmem:[%s236_s0 + $0x28] sm:$0xff]  ;;  %vm115_vm9 = vcmask 1047559  }
   0x3   :  { %v14_v8 = vld [vmem:[%s236_s0 + $0x30] sm:$0xff]  ;;  %v15_v9 = vld [vmem:[%s236_s0 + $0x38] sm:$0xff] }
   0x4   :  { %vm18_vm0 = vcmp.ge.s32.totalorder %v17_v3, 1  ;;  %vm19_vm1 = vcmp.lt.s32.totalorder %v17_v3, 5 }
   0x5   :  { %vm20_vm2 = vmand %vm18_vm0, %vm19_vm1 }
   0x6   :  { %v23_v10 = vsel %vm20_vm2, %v8_v1, 0.0  ;;  %v24_v11 = vsel %vm20_vm2, %v9_v2, 0.0  ;;  %v25_v12 = vsel %vm20_vm2, %v10_v4, 0.0  ;;  %v26_v13 = vsel %vm20_vm2, %v11_v5, 0.0 }
   0x7   :  { %v27_v14 = vsel %vm20_vm2, %v12_v6, 0.0  ;;  %v28_v15 = vsel %vm20_vm2, %v13_v7, 0.0  ;;  %v29_v16 = vsel %vm20_vm2, %v14_v8, 0.0  ;;  %v30_v17 = vsel %vm20_vm2, %v15_v9, 0.0 }
   0x8   :  { %v31_v18 = vrot.slane %v23_v10, 4  ;;  %v37_v19 = vrot.slane %v24_v11, 4  ;;  %v43_v20 = vrot.slane %v25_v12, 4  ;;  %v49_v21 = vrot.slane %v26_v13, 4 }
   0x9   :  { %v55_v22 = vrot.slane %v27_v14, 4  ;;  %v61_v23 = vrot.slane %v28_v15, 4  ;;  %v67_v24 = vrot.slane %v29_v16, 4  ;;  %v73_v25 = vrot.slane %v30_v17, 4 }
   0xa   :  { %v32_v26 = vadd.f32 %v31_v18, %v23_v10  ;;  %v38_v27 = vadd.f32 %v37_v19, %v24_v11  ;;  %v44_v28 = vadd.f32 %v43_v20, %v25_v12  ;;  %v50_v29 = vadd.f32 %v49_v21, %v26_v13 }
   0xb   :  { %v56_v30 = vadd.f32 %v55_v22, %v27_v14  ;;  %v62_v31 = vadd.f32 %v61_v23, %v28_v15  ;;  %v68_v32 = vadd.f32 %v67_v24, %v29_v16  ;;  %v74_v33 = vadd.f32 %v73_v25, %v30_v17 }
   0xc   :  { %v33_v34 = vrot.slane %v32_v26, 2  ;;  %v39_v35 = vrot.slane %v38_v27, 2  ;;  %v45_v36 = vrot.slane %v44_v28, 2  ;;  %v51_v37 = vrot.slane %v50_v29, 2 }
   0xd   :  { %v57_v38 = vrot.slane %v56_v30, 2  ;;  %v63_v39 = vrot.slane %v62_v31, 2  ;;  %v69_v40 = vrot.slane %v68_v32, 2  ;;  %v75_v41 = vrot.slane %v74_v33, 2 }
   0xe   :  { %v34_v42 = vadd.f32 %v33_v34, %v32_v26  ;;  %v40_v43 = vadd.f32 %v39_v35, %v38_v27  ;;  %v46_v44 = vadd.f32 %v45_v36, %v44_v28  ;;  %v52_v45 = vadd.f32 %v51_v37, %v50_v29 }
   0xf   :  { %v58_v46 = vadd.f32 %v57_v38, %v56_v30  ;;  %v64_v47 = vadd.f32 %v63_v39, %v62_v31  ;;  %v70_v48 = vadd.f32 %v69_v40, %v68_v32  ;;  %v76_v49 = vadd.f32 %v75_v41, %v74_v33 }
  0x10   :  { %v35_v50 = vrot.slane %v34_v42, 1  ;;  %v41_v51 = vrot.slane %v40_v43, 1  ;;  %v47_v52 = vrot.slane %v46_v44, 1  ;;  %v53_v53 = vrot.slane %v52_v45, 1 }
  0x11   :  { %v59_v54 = vrot.slane %v58_v46, 1  ;;  %v65_v55 = vrot.slane %v64_v47, 1  ;;  %v71_v56 = vrot.slane %v70_v48, 1  ;;  %v77_v57 = vrot.slane %v76_v49, 1 }
  0x12   :  { %v36_v58 = vadd.f32 %v35_v50, %v34_v42  ;;  %v42_v59 = vadd.f32 %v41_v51, %v40_v43  ;;  %v48_v60 = vadd.f32 %v47_v52, %v46_v44  ;;  %v54_v61 = vadd.f32 %v53_v53, %v52_v45 }
  0x13   :  { %v60_v62 = vadd.f32 %v59_v54, %v58_v46  ;;  %v66_v63 = vadd.f32 %v65_v55, %v64_v47  ;;  %v72_v0 = vadd.f32 %v71_v56, %v70_v48  ;;  %v78_v1 = vadd.f32 %v77_v57, %v76_v49 }
  0x14   :  { %v79_v2 = vmul.f32 0.25, %v36_v58  ;;  %v80_v3 = vmul.f32 0.25, %v42_v59  ;;  %v81_v4 = vmul.f32 0.25, %v48_v60  ;;  %v82_v5 = vmul.f32 0.25, %v54_v61 }
  0x15   :  { %v83_v6 = vmul.f32 0.25, %v60_v62  ;;  %v84_v7 = vmul.f32 0.25, %v66_v63  ;;  %v85_v8 = vmul.f32 0.25, %v72_v0  ;;  %v86_v9 = vmul.f32 0.25, %v78_v1 }
  0x16   :  { %v87_v10 = vmul.f32 %v79_v2, %v79_v2  ;;  %v88_v11 = vmul.f32 %v80_v3, %v80_v3  ;;  %v89_v12 = vmul.f32 %v81_v4, %v81_v4  ;;  %v90_v13 = vmul.f32 %v82_v5, %v82_v5 }
  0x17   :  { %v91_v14 = vmul.f32 %v83_v6, %v83_v6  ;;  %v92_v15 = vmul.f32 %v84_v7, %v84_v7  ;;  %v93_v17 = vmul.f32 %v85_v8, %v85_v8  ;;  %v94_v19 = vmul.f32 %v86_v9, %v86_v9 }
  0x18   :  { %v104_v16 = vsel %vm103_vm3, %v88_v11, %v87_v10 }
  0x19   :  { %v106_v18 = vsel %vm105_vm4, %v89_v12, %v104_v16 }
  0x1a   :  { %v108_v20 = vsel %vm107_vm5, %v90_v13, %v106_v18 }
  0x1b   :  { %v110_v21 = vsel %vm109_vm6, %v91_v14, %v108_v20 }
  0x1c   :  { %v112_v22 = vsel %vm111_vm7, %v92_v15, %v110_v21 }
  0x1d   :  { %v114_v23 = vsel %vm113_vm8, %v93_v17, %v112_v22 }
  0x1e   :  { %v116_v24 = vsel %vm115_vm9, %v94_v19, %v114_v23 }
  0x1f   :  { %118 = vadd.xlane.f32.xlu0 %v116_v24 }
  0x92   :  { %v119_v25 = vpop.xlane.xlu0 %118 }
  0x93   :  { %v120_v26 = vmax.f32 %v119_v25, 1e-24 }
  0x95   :  { %183 = vrsqrt.f32 %v120_v26  ;;  %vm127_vm11 = vweird.f32 %v120_v26 }
  0x9b   :  { %v184_v27 = vpop.eup %183 }
  0x9c   :  { %v122_v28 = vmul.f32 %v184_v27, %v120_v26  ;;  %vm128_vm10 = vweird.f32 %v184_v27 }
  0x9d   :  { %vm129_vm12 = vmor %vm127_vm11, %vm128_vm10 }
  0x9e   :  { %v123_v29 = vmul.f32 %v184_v27, %v122_v28 }
  0xa0   :  { %v124_v30 = vmul.f32 0.5, %v123_v29 }
  0xa2   :  { %v125_v31 = vsub.f32 1.5, %v124_v30 }
  0xa4   :  { %v126_v32 = vmul.f32 %v184_v27, %v125_v31 }
  0xa6   :  { %v130_v33 = vsel %vm129_vm12, %v184_v27, %v126_v32 }
  0xa7   :  { %v132_v34 = vrot.slane %v130_v33, 1  ;;  %v133_v35 = vrot.slane %v130_v33, 2  ;;  %v134_v36 = vrot.slane %v130_v33, 3  ;;  %v135_v37 = vrot.slane %v130_v33, 4 }
  0xa8   :  { %v136_v38 = vrot.slane %v130_v33, 5  ;;  %v137_v39 = vrot.slane %v130_v33, 6  ;;  %v138_v40 = vrot.slane %v130_v33, 7  ;;  %v147_v45 = vmul.f32 %v130_v33, %v79_v2 }
  0xa9   :  { %v148_v41 = vmul.f32 %v132_v34, %v80_v3  ;;  %v149_v42 = vmul.f32 %v133_v35, %v81_v4  ;;  %v150_v43 = vmul.f32 %v134_v36, %v82_v5  ;;  %v151_v44 = vmul.f32 %v135_v37, %v83_v6 }
  0xaa   :  { %v152_v46 = vmul.f32 %v136_v38, %v84_v7  ;;  %v153_v49 = vmul.f32 %v137_v39, %v85_v8  ;;  %v154_v50 = vmul.f32 %v138_v40, %v86_v9 }
  0xab   :  { %v163_v47 = vrot.slane %v148_v41, 7  ;;  %v165_v48 = vrot.slane %v149_v42, 6  ;;  %v167_v52 = vrot.slane %v150_v43, 5  ;;  %v169_v54 = vrot.slane %v151_v44, 4 }
  0xac   :  { %v171_v56 = vrot.slane %v152_v46, 3  ;;  %v173_v58 = vrot.slane %v153_v49, 2  ;;  %v175_v60 = vrot.slane %v154_v50, 1 }
  0xad   :  { %v164_v51 = vsel %vm103_vm3, %v163_v47, %v147_v45 }
  0xae   :  { %v166_v53 = vsel %vm105_vm4, %v165_v48, %v164_v51 }
  0xaf   :  { %v168_v55 = vsel %vm107_vm5, %v167_v52, %v166_v53 }
  0xb0   :  { %v170_v57 = vsel %vm109_vm6, %v169_v54, %v168_v55 }
  0xb1   :  { %v172_v59 = vsel %vm111_vm7, %v171_v56, %v170_v57 }
  0xb2   :  { %v174_v61 = vsel %vm113_vm8, %v173_v58, %v172_v59 }
  0xb3   :  { %v176_v62 = vsel %vm115_vm9, %v175_v60, %v174_v61 }
  0xb4   :  { %178 = vst [vmem:[%s237_s1] sm:$0xff] %v176_v62 }

// kernel: _lambda_.31
= control target key start
LH: loop header
LB: loop body
LE: loop exit
PB: predicated region body
PF: predicated region fallthrough
CT: control target
= control target key end

     0   :  { %v199_v1 = vmov 128.0   ;;  %s269_s0 = inlined_call_operand.vmem [shape: f32[8,128], index: 0, kind: input, shape index: {}]   ;;  %s270_s1 = inlined_call_operand.vmem [shape: f32[1,128], index: 1, kind: input, shape index: {}]   ;;  %s271_s2 = inlined_call_operand.vmem [shape: f32[1,128], index: 2, kind: input, shape index: {}]   ;;  %s272_s4 = inlined_call_operand.vmem [shape: f32[1,128], index: 4, kind: input, shape index: {}]   ;;  %s273_s3 = inlined_call_operand.vmem [shape: bf16[128,128], index: 3, kind: input, shape index: {}]   ;;  %s274_s5 = inlined_call_operand.vmem [shape: f32[8,128], index: 5, kind: output, shape index: {}]  }
   0x1   :  { %v24_v0 = vld [vmem:[%s269_s0] sm:$0xff]  ;;  %195 = vrcp.f32 %v199_v1  ;;  %v190_v12 = vld [vmem:[%s273_s3 + $0x38] sm:$0xff]  ;;  %v189_v13 = vld [vmem:[%s273_s3 + $0x30] sm:$0xff] }
   0x2   :  { %25 = vadd.xlane.f32.xlu0 %v24_v0  ;;  %133 = vmatpush.bf16.msra.mxu0 %v190_v12  ;;  %v188_v14 = vld [vmem:[%s273_s3 + $0x28] sm:$0xff]  ;;  %v187_v15 = vld [vmem:[%s273_s3 + $0x20] sm:$0xff]  ;;  %v186_v16 = vld [vmem:[%s273_s3 + $0x18] sm:$0xff] }
   0x3   :  { %v185_v17 = vld [vmem:[%s273_s3 + $0x10] sm:$0xff]  ;;  %v184_v18 = vld [vmem:[%s273_s3 + $0x8] sm:$0xff]  ;;  %v183_v20 = vld [vmem:[%s273_s3] sm:$0xff] }
   0x4   :  { %v192_v29 = vld [vmem:[%s270_s1] ss:$0 sm:$0xff] }
   0x5   :  { %v193_v31 = vld [vmem:[%s271_s2] ss:$0 sm:$0xff] }
   0x6   :  { %134 = vmatpush.bf16.msra.mxu0 %v189_v13  ;;  %v194_v37 = vld [vmem:[%s272_s4] ss:$0 sm:$0xff] }
   0x7   :  { %v196_v2 = vpop.eup %195 }
   0x8   :  { %v28_v3 = vmul.f32 128.0, %v196_v2  ;;  %vm32_vm0 = vweird.f32 %v196_v2 }
   0xa   :  { %v29_v4 = vsub.f32 1.0, %v28_v3  ;;  %135 = vmatpush.bf16.msra.mxu0 %v188_v14 }
   0xc   :  { %v30_v5 = vmul.f32 %v196_v2, %v29_v4 }
   0xe   :  { %v31_v6 = vadd.f32 %v196_v2, %v30_v5  ;;  %136 = vmatpush.bf16.msra.mxu0 %v187_v15 }
  0x10   :  { %v33_v7 = vsel %vm32_vm0, %v196_v2, %v31_v6 }
  0x12   :  { %137 = vmatpush.bf16.msra.mxu0 %v186_v16 }
  0x16   :  { %138 = vmatpush.bf16.msra.mxu0 %v185_v17 }
  0x1a   :  { %139 = vmatpush.bf16.msra.mxu0 %v184_v18 }
  0x1e   :  { %140 = vmatpush.bf16.msra.mxu0 %v183_v20 }
  0x75   :  { %v26_v8 = vpop.xlane.xlu0 %25 }
  0x76   :  { %v34_v9 = vmul.f32 %v33_v7, %v26_v8 }
  0x78   :  { %v35_v10 = vsub.f32 %v24_v0, %v34_v9 }
  0x7a   :  { %v36_v11 = vmul.f32 %v35_v10, %v35_v10 }
  0x7c   :  { %37 = vadd.xlane.f32.xlu0 %v36_v11 }
  0xef   :  { %v38_v19 = vpop.xlane.xlu0 %37 }
  0xf0   :  { %v39_v21 = vmul.f32 %v38_v19, %v33_v7 }
  0xf2   :  { %v40_v22 = vadd.f32 1e-05, %v39_v21 }
  0xf4   :  { %197 = vrsqrt.f32 %v40_v22  ;;  %vm47_vm2 = vweird.f32 %v40_v22 }
  0xfa   :  { %v198_v23 = vpop.eup %197 }
  0xfb   :  { %v42_v24 = vmul.f32 %v198_v23, %v40_v22  ;;  %vm48_vm1 = vweird.f32 %v198_v23 }
  0xfc   :  { %vm49_vm3 = vmor %vm47_vm2, %vm48_vm1 }
  0xfd   :  { %v43_v25 = vmul.f32 %v198_v23, %v42_v24 }
  0xff   :  { %v44_v26 = vmul.f32 0.5, %v43_v25 }
 0x101   :  { %v45_v27 = vsub.f32 1.5, %v44_v26 }
 0x103   :  { %v46_v28 = vmul.f32 %v198_v23, %v45_v27 }
 0x105   :  { %v50_v30 = vsel %vm49_vm3, %v198_v23, %v46_v28 }
 0x106   :  { %v51_v32 = vmul.f32 %v50_v30, %v35_v10 }
 0x108   :  { %v56_v33 = vmul.f32 %v192_v29, %v51_v32 }
 0x10a   :  { %v61_v34 = vadd.f32 %v193_v31, %v56_v33 }
 0x10c   :  { %v62_v35 = vpack.c.bf16 %v61_v34, %v61_v34 }
 0x10e   :  { %63 = vst [vmem:[#allocation2] sm:$0xf] %v62_v35 }
 0x115   :  { %v64_v36 = vld [vmem:[#allocation2] sm:$0xf] }
 0x116   :  { %141 = vmatmul.bf16.vlgmr.msra.gmra.mxu0 %v64_v36 }
 0x193   :  { %v142_v38 = vpop.f32.mrf.mxu0 }
 0x194   :  { %v143_v39 = vadd.f32 %v194_v37, %v142_v38 }
 0x196   :  { %146 = vst [vmem:[%s274_s5] sm:$0xff] %v143_v39 }
 0x19b   :  { %v144_v40 = vpop.f32.mrf.mxu0 }

// kernel: _lambda_.24
= control target key start
LH: loop header
LB: loop body
LE: loop exit
PB: predicated region body
PF: predicated region fallthrough
CT: control target
= control target key end

     0   :  { %s1091_s1 = inlined_call_operand.vmem [shape: bf16[512,128], index: 1, kind: input, shape index: {}]   ;;  %s1092_s0 = inlined_call_operand.vmem [shape: bf16[64,512], index: 0, kind: input, shape index: {}]   ;;  %s1093_s2 = inlined_call_operand.vmem [shape: f32[1,128], index: 2, kind: input, shape index: {}]   ;;  %s1094_s3 = inlined_call_operand.vmem [shape: f32[64,128], index: 3, kind: input, shape index: {}]   ;;  %s1095_s4 = inlined_call_operand.vmem [shape: f32[64,128], index: 4, kind: output, shape index: {}]  }
   0x1   :  { %v787_v0 = vld [vmem:[%s1091_s1 + $0x38] sm:$0xff]  ;;  %v786_v4 = vld [vmem:[%s1091_s1 + $0x30] sm:$0xff]  ;;  %v785_v8 = vld [vmem:[%s1091_s1 + $0x28] sm:$0xff] }
   0x2   :  { %v795_v1 = vld [vmem:[%s1091_s1 + $0x78] sm:$0xff]  ;;  %389 = vmatpush.bf16.msra.mxu0 %v787_v0  ;;  %v794_v5 = vld [vmem:[%s1091_s1 + $0x70] sm:$0xff]  ;;  %v793_v9 = vld [vmem:[%s1091_s1 + $0x68] sm:$0xff] }
   0x3   :  { %v803_v2 = vld [vmem:[%s1091_s1 + $0xb8] sm:$0xff]  ;;  %418 = vmatpush.bf16.msra.mxu1 %v795_v1  ;;  %v802_v6 = vld [vmem:[%s1091_s1 + $0xb0] sm:$0xff]  ;;  %v801_v10 = vld [vmem:[%s1091_s1 + $0xa8] sm:$0xff] }
   0x4   :  { %v811_v3 = vld [vmem:[%s1091_s1 + $0xf8] sm:$0xff]  ;;  %447 = vmatpush.bf16.msra.mxu2 %v803_v2  ;;  %v810_v7 = vld [vmem:[%s1091_s1 + $0xf0] sm:$0xff]  ;;  %v809_v11 = vld [vmem:[%s1091_s1 + $0xe8] sm:$0xff] }
   0x5   :  { %476 = vmatpush.bf16.msra.mxu3 %v811_v3  ;;  %v784_v12 = vld [vmem:[%s1091_s1 + $0x20] sm:$0xff]  ;;  %v783_v16 = vld [vmem:[%s1091_s1 + $0x18] sm:$0xff]  ;;  %v782_v20 = vld [vmem:[%s1091_s1 + $0x10] sm:$0xff] }
   0x6   :  { %390 = vmatpush.bf16.msra.mxu0 %v786_v4  ;;  %v792_v13 = vld [vmem:[%s1091_s1 + $0x60] sm:$0xff]  ;;  %v791_v17 = vld [vmem:[%s1091_s1 + $0x58] sm:$0xff]  ;;  %v790_v21 = vld [vmem:[%s1091_s1 + $0x50] sm:$0xff] }
   0x7   :  { %419 = vmatpush.bf16.msra.mxu1 %v794_v5  ;;  %v800_v14 = vld [vmem:[%s1091_s1 + $0xa0] sm:$0xff]  ;;  %v799_v18 = vld [vmem:[%s1091_s1 + $0x98] sm:$0xff]  ;;  %v798_v22 = vld [vmem:[%s1091_s1 + $0x90] sm:$0xff] }
   0x8   :  { %448 = vmatpush.bf16.msra.mxu2 %v802_v6  ;;  %v808_v15 = vld [vmem:[%s1091_s1 + $0xe0] sm:$0xff]  ;;  %v807_v19 = vld [vmem:[%s1091_s1 + $0xd8] sm:$0xff]  ;;  %v806_v23 = vld [vmem:[%s1091_s1 + $0xd0] sm:$0xff] }
   0x9   :  { %477 = vmatpush.bf16.msra.mxu3 %v810_v7  ;;  %v781_v24 = vld [vmem:[%s1091_s1 + $0x8] sm:$0xff]  ;;  %v780_v28 = vld [vmem:[%s1091_s1] sm:$0xff]  ;;  %v766_v33 = vld [vmem:[%s1092_s0 + $0xc] sm:$0xf0] }
   0xa   :  { %391 = vmatpush.bf16.msra.mxu0 %v785_v8  ;;  %v789_v25 = vld [vmem:[%s1091_s1 + $0x48] sm:$0xff]  ;;  %v788_v29 = vld [vmem:[%s1091_s1 + $0x40] sm:$0xff]  ;;  %v576_v35 = vld [vmem:[%s1092_s0 + $0x10] sm:$0xf0] }
   0xb   :  { %420 = vmatpush.bf16.msra.mxu1 %v793_v9  ;;  %v797_v26 = vld [vmem:[%s1091_s1 + $0x88] sm:$0xff]  ;;  %v796_v30 = vld [vmem:[%s1091_s1 + $0x80] sm:$0xff]  ;;  %v767_v37 = vld [vmem:[%s1092_s0 + $0x14] sm:$0xf0] }
   0xc   :  { %449 = vmatpush.bf16.msra.mxu2 %v801_v10  ;;  %v805_v27 = vld [vmem:[%s1091_s1 + $0xc8] sm:$0xff]  ;;  %v804_v31 = vld [vmem:[%s1091_s1 + $0xc0] sm:$0xff]  ;;  %v584_v39 = vld [vmem:[%s1092_s0 + $0x18] sm:$0xf0] }
   0xd   :  { %478 = vmatpush.bf16.msra.mxu3 %v809_v11  ;;  %v574_v32 = vld [vmem:[%s1092_s0] sm:$0xf]  ;;  %v764_v34 = vld [vmem:[%s1092_s0 + $0x4] sm:$0xf]  ;;  %v582_v36 = vld [vmem:[%s1092_s0 + $0x8] sm:$0xf] }
   0xe   :  { %392 = vmatpush.bf16.msra.mxu0 %v784_v12  ;;  %v765_v38 = vld [vmem:[%s1092_s0 + $0xc] sm:$0xf]  ;;  %v575_v40 = vor.u32 %v766_v33, %v574_v32  ;;  %v579_v41 = vor.u32 %v764_v34, %v576_v35  ;;  %v583_v42 = vor.u32 %v767_v37, %v582_v36  ;;  %v590_v44 = vld [vmem:[%s1092_s0 + $0x20] sm:$0xf]  ;;  %v770_v45 = vld [vmem:[%s1092_s0 + $0x2c] sm:$0xf0] }
   0xf   :  { %421 = vmatpush.bf16.msra.mxu1 %v792_v13  ;;  %v587_v43 = vor.u32 %v765_v38, %v584_v39  ;;  %v768_v46 = vld [vmem:[%s1092_s0 + $0x24] sm:$0xf]  ;;  %v592_v47 = vld [vmem:[%s1092_s0 + $0x30] sm:$0xf0]  ;;  %v598_v48 = vld [vmem:[%s1092_s0 + $0x28] sm:$0xf]  ;;  %v591_v52 = vor.u32 %v770_v45, %v590_v44 }
  0x10   :  { %450 = vmatpush.bf16.msra.mxu2 %v800_v14  ;;  %v771_v49 = vld [vmem:[%s1092_s0 + $0x34] sm:$0xf0]  ;;  %v769_v50 = vld [vmem:[%s1092_s0 + $0x2c] sm:$0xf]  ;;  %v600_v51 = vld [vmem:[%s1092_s0 + $0x38] sm:$0xf0]  ;;  %v595_v53 = vor.u32 %v768_v46, %v592_v47 }
  0x11   :  { %479 = vmatpush.bf16.msra.mxu3 %v808_v15  ;;  %v599_v54 = vor.u32 %v771_v49, %v598_v48  ;;  %v603_v55 = vor.u32 %v769_v50, %v600_v51  ;;  %v606_v56 = vld [vmem:[%s1092_s0 + $0x40] sm:$0xf]  ;;  %v774_v57 = vld [vmem:[%s1092_s0 + $0x4c] sm:$0xf0]  ;;  %v772_v58 = vld [vmem:[%s1092_s0 + $0x44] sm:$0xf] }
  0x12   :  { %393 = vmatpush.bf16.msra.mxu0 %v783_v16  ;;  %v608_v59 = vld [vmem:[%s1092_s0 + $0x50] sm:$0xf0]  ;;  %v614_v60 = vld [vmem:[%s1092_s0 + $0x48] sm:$0xf]  ;;  %v775_v61 = vld [vmem:[%s1092_s0 + $0x54] sm:$0xf0]  ;;  %v607_v0 = vor.u32 %v774_v57, %v606_v56 }
  0x13   :  { %422 = vmatpush.bf16.msra.mxu1 %v791_v17  ;;  %v773_v62 = vld [vmem:[%s1092_s0 + $0x4c] sm:$0xf]  ;;  %v616_v63 = vld [vmem:[%s1092_s0 + $0x58] sm:$0xf0]  ;;  %v611_v1 = vor.u32 %v772_v58, %v608_v59  ;;  %v615_v2 = vor.u32 %v775_v61, %v614_v60  ;;  %v622_v4 = vld [vmem:[%s1092_s0 + $0x60] sm:$0xf] }
  0x14   :  { %451 = vmatpush.bf16.msra.mxu2 %v799_v18  ;;  %v619_v3 = vor.u32 %v773_v62, %v616_v63  ;;  %v778_v5 = vld [vmem:[%s1092_s0 + $0x6c] sm:$0xf0]  ;;  %v776_v6 = vld [vmem:[%s1092_s0 + $0x64] sm:$0xf]  ;;  %v624_v7 = vld [vmem:[%s1092_s0 + $0x70] sm:$0xf0] }
  0x15   :  { %480 = vmatpush.bf16.msra.mxu3 %v807_v19  ;;  %v630_v8 = vld [vmem:[%s1092_s0 + $0x68] sm:$0xf]  ;;  %v779_v9 = vld [vmem:[%s1092_s0 + $0x74] sm:$0xf0]  ;;  %v777_v10 = vld [vmem:[%s1092_s0 + $0x6c] sm:$0xf]  ;;  %v623_v12 = vor.u32 %v778_v5, %v622_v4  ;;  %v627_v13 = vor.u32 %v776_v6, %v624_v7 }
  0x16   :  { %394 = vmatpush.bf16.msra.mxu0 %v782_v20  ;;  %v632_v11 = vld [vmem:[%s1092_s0 + $0x78] sm:$0xf0]  ;;  %v631_v14 = vor.u32 %v779_v9, %v630_v8  ;;  %v545_v36 = vld [vmem:[%s1094_s3 + $0x8] sm:$0xff]  ;;  %v546_v46 = vld [vmem:[%s1094_s3 + $0x10] sm:$0xff] }
  0x17   :  { %423 = vmatpush.bf16.msra.mxu1 %v790_v21  ;;  %v635_v15 = vor.u32 %v777_v10, %v632_v11  ;;  %v547_v56 = vld [vmem:[%s1094_s3 + $0x18] sm:$0xff] }
  0x18   :  { %452 = vmatpush.bf16.msra.mxu2 %v798_v22  ;;  %v1033_v22 = vld [vmem:[%s1093_s2] ss:$0 sm:$0xff] }
  0x19   :  { %481 = vmatpush.bf16.msra.mxu3 %v806_v23 }
  0x1a   :  { %395 = vmatpush.bf16.msra.mxu0 %v781_v24 }
  0x1b   :  { %424 = vmatpush.bf16.msra.mxu1 %v789_v25 }
  0x1c   :  { %453 = vmatpush.bf16.msra.mxu2 %v797_v26  ;;  %v544_v26 = vld [vmem:[%s1094_s3] sm:$0xff] }
  0x1d   :  { %482 = vmatpush.bf16.msra.mxu3 %v805_v27 }
  0x1e   :  { %396 = vmatpush.bf16.msra.mxu0 %v780_v28 }
  0x1f   :  { %425 = vmatpush.bf16.msra.mxu1 %v788_v29 }
  0x20   :  { %454 = vmatpush.bf16.msra.mxu2 %v796_v30 }
  0x21   :  { %483 = vmatpush.bf16.msra.mxu3 %v804_v31  ;;  %397 = vmatmul.bf16.vlgmr.msra.gmra.mxu0 %v575_v40 }
  0x22   :  { %426 = vmatmul.bf16.vlgmr.msra.gmra.mxu1 %v579_v41 }
  0x23   :  { %455 = vmatmul.bf16.vlgmr.msra.gmra.mxu2 %v583_v42 }
  0x24   :  { %484 = vmatmul.bf16.vlgmr.msra.gmra.mxu3 %v587_v43 }
  0x31   :  { %402 = vmatmul.bf16.gmra.mxu0 %v591_v52 }
  0x32   :  { %431 = vmatmul.bf16.gmra.mxu1 %v595_v53 }
  0x33   :  { %460 = vmatmul.bf16.gmra.mxu2 %v599_v54 }
  0x34   :  { %489 = vmatmul.bf16.gmra.mxu3 %v603_v55 }
  0x41   :  { %407 = vmatmul.bf16.gmra.mxu0 %v607_v0 }
  0x42   :  { %436 = vmatmul.bf16.gmra.mxu1 %v611_v1 }
  0x43   :  { %465 = vmatmul.bf16.gmra.mxu2 %v615_v2  ;;  %v548_v2 = vld [vmem:[%s1094_s3 + $0x20] sm:$0xff] }
  0x44   :  { %494 = vmatmul.bf16.gmra.mxu3 %v619_v3 }
  0x51   :  { %412 = vmatmul.bf16.gmra.mxu0 %v623_v12  ;;  %v549_v12 = vld [vmem:[%s1094_s3 + $0x28] sm:$0xff] }
  0x52   :  { %441 = vmatmul.bf16.gmra.mxu1 %v627_v13 }
  0x53   :  { %470 = vmatmul.bf16.gmra.mxu2 %v631_v14 }
  0x54   :  { %499 = vmatmul.bf16.gmra.mxu3 %v635_v15 }
  0x9e   :  { %v398_v16 = vpop.f32.mrf.mxu0 }
  0x9f   :  { %v427_v17 = vpop.f32.mrf.mxu1 }
  0xa0   :  { %v428_v18 = vadd.f32 %v427_v17, %v398_v16 }
  0xa6   :  { %v456_v19 = vpop.f32.mrf.mxu2  ;;  %v400_v23 = vpop.f32.mrf.mxu0 }
  0xa7   :  { %v485_v20 = vpop.f32.mrf.mxu3  ;;  %v457_v21 = vadd.f32 %v456_v19, %v428_v18  ;;  %v429_v24 = vpop.f32.mrf.mxu1 }
  0xa8   :  { %v430_v29 = vadd.f32 %v429_v24, %v400_v23 }
  0xa9   :  { %v486_v25 = vadd.f32 %v485_v20, %v457_v21  ;;  %v550_v20 = vld [vmem:[%s1094_s3 + $0x30] sm:$0xff] }
  0xab   :  { %v536_v27 = vadd.f32 %v1033_v22, %v486_v25 }
  0xad   :  { %v552_v28 = vadd.f32 %v544_v26, %v536_v27 }
  0xae   :  { %v458_v30 = vpop.f32.mrf.mxu2  ;;  %v403_v33 = vpop.f32.mrf.mxu0 }
  0xaf   :  { %v487_v31 = vpop.f32.mrf.mxu3  ;;  %560 = vst [vmem:[%s1095_s4] sm:$0xff] %v552_v28  ;;  %v459_v32 = vadd.f32 %v458_v30, %v430_v29  ;;  %v432_v34 = vpop.f32.mrf.mxu1 }
  0xb0   :  { %v433_v38 = vadd.f32 %v432_v34, %v403_v33 }
  0xb1   :  { %v488_v35 = vadd.f32 %v487_v31, %v459_v32  ;;  %v551_v31 = vld [vmem:[%s1094_s3 + $0x38] sm:$0xff] }
  0xb3   :  { %v537_v37 = vadd.f32 %v1033_v22, %v488_v35 }
  0xb5   :  { %v553_v39 = vadd.f32 %v545_v36, %v537_v37 }
  0xb6   :  { %v461_v40 = vpop.f32.mrf.mxu2  ;;  %v405_v43 = vpop.f32.mrf.mxu0 }
  0xb7   :  { %v490_v41 = vpop.f32.mrf.mxu3  ;;  %561 = vst [vmem:[%s1095_s4 + $0x8] sm:$0xff] %v553_v39  ;;  %v462_v42 = vadd.f32 %v461_v40, %v433_v38  ;;  %v434_v44 = vpop.f32.mrf.mxu1 }
  0xb8   :  { %v435_v49 = vadd.f32 %v434_v44, %v405_v43 }
  0xb9   :  { %v491_v45 = vadd.f32 %v490_v41, %v462_v42 }
  0xbb   :  { %v538_v47 = vadd.f32 %v1033_v22, %v491_v45 }
  0xbd   :  { %v554_v48 = vadd.f32 %v546_v46, %v538_v47 }
  0xbe   :  { %v463_v50 = vpop.f32.mrf.mxu2  ;;  %v408_v53 = vpop.f32.mrf.mxu0 }
  0xbf   :  { %v492_v51 = vpop.f32.mrf.mxu3  ;;  %562 = vst [vmem:[%s1095_s4 + $0x10] sm:$0xff] %v554_v48  ;;  %v464_v52 = vadd.f32 %v463_v50, %v435_v49  ;;  %v437_v54 = vpop.f32.mrf.mxu1 }
  0xc0   :  { %v438_v58 = vadd.f32 %v437_v54, %v408_v53 }
  0xc1   :  { %v493_v55 = vadd.f32 %v492_v51, %v464_v52 }
  0xc3   :  { %v539_v57 = vadd.f32 %v1033_v22, %v493_v55 }
  0xc5   :  { %v555_v59 = vadd.f32 %v547_v56, %v539_v57 }
  0xc6   :  { %v466_v60 = vpop.f32.mrf.mxu2  ;;  %v410_v63 = vpop.f32.mrf.mxu0 }
  0xc7   :  { %v495_v61 = vpop.f32.mrf.mxu3  ;;  %563 = vst [vmem:[%s1095_s4 + $0x18] sm:$0xff] %v555_v59  ;;  %v467_v62 = vadd.f32 %v466_v60, %v438_v58  ;;  %v439_v0 = vpop.f32.mrf.mxu1 }
  0xc8   :  { %v440_v5 = vadd.f32 %v439_v0, %v410_v63 }
  0xc9   :  { %v496_v1 = vadd.f32 %v495_v61, %v467_v62 }
  0xcb   :  { %v540_v3 = vadd.f32 %v1033_v22, %v496_v1 }
  0xcd   :  { %v556_v4 = vadd.f32 %v548_v2, %v540_v3 }
  0xce   :  { %v468_v6 = vpop.f32.mrf.mxu2  ;;  %v413_v9 = vpop.f32.mrf.mxu0 }
  0xcf   :  { %v497_v7 = vpop.f32.mrf.mxu3  ;;  %564 = vst [vmem:[%s1095_s4 + $0x20] sm:$0xff] %v556_v4  ;;  %v469_v8 = vadd.f32 %v468_v6, %v440_v5  ;;  %v442_v10 = vpop.f32.mrf.mxu1 }
  0xd0   :  { %v443_v14 = vadd.f32 %v442_v10, %v413_v9 }
  0xd1   :  { %v498_v11 = vadd.f32 %v497_v7, %v469_v8 }
  0xd3   :  { %v541_v13 = vadd.f32 %v1033_v22, %v498_v11 }
  0xd5   :  { %v557_v15 = vadd.f32 %v549_v12, %v541_v13 }
  0xd6   :  { %v471_v16 = vpop.f32.mrf.mxu2  ;;  %v415_v21 = vpop.f32.mrf.mxu0 }
  0xd7   :  { %v500_v17 = vpop.f32.mrf.mxu3  ;;  %565 = vst [vmem:[%s1095_s4 + $0x28] sm:$0xff] %v557_v15  ;;  %v472_v18 = vadd.f32 %v471_v16, %v443_v14  ;;  %v444_v23 = vpop.f32.mrf.mxu1 }
  0xd8   :  { %v445_v26 = vadd.f32 %v444_v23, %v415_v21 }
  0xd9   :  { %v501_v19 = vadd.f32 %v500_v17, %v472_v18 }
  0xdb   :  { %v542_v24 = vadd.f32 %v1033_v22, %v501_v19 }
  0xdd   :  { %v558_v25 = vadd.f32 %v550_v20, %v542_v24 }
  0xde   :  { %v473_v27 = vpop.f32.mrf.mxu2 }
  0xdf   :  { %566 = vst [vmem:[%s1095_s4 + $0x30] sm:$0xff] %v558_v25  ;;  %v474_v28 = vadd.f32 %v473_v27, %v445_v26  ;;  %v502_v29 = vpop.f32.mrf.mxu3 }
  0xe1   :  { %v503_v30 = vadd.f32 %v502_v29, %v474_v28 }
  0xe3   :  { %v543_v32 = vadd.f32 %v1033_v22, %v503_v30 }
  0xe5   :  { %v559_v33 = vadd.f32 %v551_v31, %v543_v32 }
  0xe7   :  { %567 = vst [vmem:[%s1095_s4 + $0x38] sm:$0xff] %v559_v33 }

// kernel: _lambda_.23
= control target key start
LH: loop header
LB: loop body
LE: loop exit
PB: predicated region body
PF: predicated region fallthrough
CT: control target
= control target key end

     0   :  { %v1201_v7 = vmov 128.0   ;;  %s1846_s0 = inlined_call_operand.vmem [shape: f32[64,128], index: 0, kind: input, shape index: {}]   ;;  %s1847_s1 = inlined_call_operand.vmem [shape: f32[1,128], index: 1, kind: input, shape index: {}]   ;;  %s1848_s2 = inlined_call_operand.vmem [shape: f32[1,128], index: 2, kind: input, shape index: {}]   ;;  %s1849_s3 = inlined_call_operand.vmem [shape: bf16[128,512], index: 3, kind: input, shape index: {}]   ;;  %s1850_s4 = inlined_call_operand.vmem [shape: f32[1,512], index: 4, kind: input, shape index: {}]   ;;  %s1851_s5 = inlined_call_operand.vmem [shape: bf16[64,512], index: 5, kind: output, shape index: {}]  }
   0x1   :  { %v28_v0 = vld [vmem:[%s1846_s0 + $0x20] sm:$0xff]  ;;  %v26_v1 = vld [vmem:[%s1846_s0 + $0x10] sm:$0xff]  ;;  %v29_v3 = vld [vmem:[%s1846_s0 + $0x28] sm:$0xff]  ;;  %1119 = vrcp.f32 %v1201_v7 }
   0x2   :  { %v24_v2 = vld [vmem:[%s1846_s0] sm:$0xff]  ;;  %40 = vadd.xlane.f32.xlu2 %v28_v0  ;;  %36 = vadd.xlane.f32.xlu1 %v26_v1  ;;  %v27_v4 = vld [vmem:[%s1846_s0 + $0x18] sm:$0xff]  ;;  %v25_v5 = vld [vmem:[%s1846_s0 + $0x8] sm:$0xff] }
   0x3   :  { %32 = vadd.xlane.f32.xlu0 %v24_v2  ;;  %v30_v6 = vld [vmem:[%s1846_s0 + $0x30] sm:$0xff]  ;;  %v1273_v30 = vld [vmem:[%s1846_s0 + $0x38] sm:$0xff]  ;;  %v1043_v43 = vld [vmem:[%s1849_s3 + $0xe0] sm:$0xf] }
   0x4   :  { %v1091_v44 = vld [vmem:[%s1849_s3 + $0xec] sm:$0xf0]  ;;  %v1089_v45 = vld [vmem:[%s1849_s3 + $0xe4] sm:$0xf]  ;;  %v1045_v47 = vld [vmem:[%s1849_s3 + $0xf0] sm:$0xf0] }
   0x5   :  { %v1044_v46 = vor.u32 %v1091_v44, %v1043_v43  ;;  %v1051_v48 = vld [vmem:[%s1849_s3 + $0xe8] sm:$0xf]  ;;  %v1092_v49 = vld [vmem:[%s1849_s3 + $0xf4] sm:$0xf0]  ;;  %v1048_v50 = vor.u32 %v1089_v45, %v1045_v47  ;;  %v1090_v52 = vld [vmem:[%s1849_s3 + $0xec] sm:$0xf] }
   0x6   :  { %v1052_v51 = vor.u32 %v1092_v49, %v1051_v48  ;;  %v1053_v53 = vld [vmem:[%s1849_s3 + $0xf8] sm:$0xf0]  ;;  %v1027_v55 = vld [vmem:[%s1849_s3 + $0xc0] sm:$0xf]  ;;  %v1087_v56 = vld [vmem:[%s1849_s3 + $0xcc] sm:$0xf0] }
   0x7   :  { %v1120_v8 = vpop.eup %1119  ;;  %473 = vmatpush.bf16.msra.mxu0 %v1044_v46  ;;  %v1056_v54 = vor.u32 %v1090_v52, %v1053_v53  ;;  %502 = vmatpush.bf16.msra.mxu1 %v1048_v50  ;;  %v1085_v57 = vld [vmem:[%s1849_s3 + $0xc4] sm:$0xf]  ;;  %v1028_v58 = vor.u32 %v1087_v56, %v1027_v55  ;;  %v1029_v59 = vld [vmem:[%s1849_s3 + $0xd0] sm:$0xf0]  ;;  %v1035_v60 = vld [vmem:[%s1849_s3 + $0xc8] sm:$0xf] }
   0x8   :  { %v49_v9 = vmul.f32 128.0, %v1120_v8  ;;  %vm53_vm0 = vweird.f32 %v1120_v8  ;;  %531 = vmatpush.bf16.msra.mxu2 %v1052_v51  ;;  %v1088_v61 = vld [vmem:[%s1849_s3 + $0xd4] sm:$0xf0]  ;;  %v1032_v62 = vor.u32 %v1085_v57, %v1029_v59  ;;  %v1013_v7 = vld [vmem:[%s1849_s3 + $0xb0] sm:$0xf0] }
   0x9   :  { %560 = vmatpush.bf16.msra.mxu3 %v1056_v54  ;;  %v1036_v63 = vor.u32 %v1088_v61, %v1035_v60  ;;  %v1076_v43 = vld [vmem:[%s1849_s3 + $0x74] sm:$0xf0]  ;;  %v1074_v47 = vld [vmem:[%s1849_s3 + $0x6c] sm:$0xf]  ;;  %v989_v48 = vld [vmem:[%s1849_s3 + $0x78] sm:$0xf0] }
   0xa   :  { %42 = vadd.xlane.f32.xlu2 %v29_v3  ;;  %38 = vadd.xlane.f32.xlu1 %v27_v4  ;;  %v50_v10 = vsub.f32 1.0, %v49_v9  ;;  %v1084_v9 = vld [vmem:[%s1849_s3 + $0xb4] sm:$0xf0]  ;;  %v992_v49 = vor.u32 %v1074_v47, %v989_v48  ;;  %v963_v51 = vld [vmem:[%s1849_s3 + $0x40] sm:$0xf] }
   0xb   :  { %34 = vadd.xlane.f32.xlu0 %v25_v5  ;;  %474 = vmatpush.bf16.msra.mxu0 %v1028_v58  ;;  %v1071_v52 = vld [vmem:[%s1849_s3 + $0x4c] sm:$0xf0]  ;;  %v1069_v54 = vld [vmem:[%s1849_s3 + $0x44] sm:$0xf]  ;;  %v965_v55 = vld [vmem:[%s1849_s3 + $0x50] sm:$0xf0] }
   0xc   :  { %v51_v11 = vmul.f32 %v1120_v8, %v50_v10  ;;  %503 = vmatpush.bf16.msra.mxu1 %v1032_v62  ;;  %532 = vmatpush.bf16.msra.mxu2 %v1036_v63  ;;  %v964_v53 = vor.u32 %v1071_v52, %v963_v51  ;;  %v971_v56 = vld [vmem:[%s1849_s3 + $0x48] sm:$0xf]  ;;  %v968_v57 = vor.u32 %v1069_v54, %v965_v55  ;;  %v1072_v58 = vld [vmem:[%s1849_s3 + $0x54] sm:$0xf0]  ;;  %v1070_v59 = vld [vmem:[%s1849_s3 + $0x4c] sm:$0xf] }
   0xd   :  { %v973_v60 = vld [vmem:[%s1849_s3 + $0x58] sm:$0xf0]  ;;  %v972_v61 = vor.u32 %v1072_v58, %v971_v56 }
   0xe   :  { %v52_v12 = vadd.f32 %v1120_v8, %v51_v11  ;;  %v976_v62 = vor.u32 %v1070_v59, %v973_v60 }
  0x10   :  { %v1253_v13 = vsel %vm53_vm0, %v1120_v8, %v52_v12  ;;  %v1019_v8 = vld [vmem:[%s1849_s3 + $0xa8] sm:$0xf]  ;;  %v1082_v12 = vld [vmem:[%s1849_s3 + $0xac] sm:$0xf] }
  0x11   :  { %v1020_v11 = vor.u32 %v1084_v9, %v1019_v8  ;;  %v955_v8 = vld [vmem:[%s1849_s3 + $0x28] sm:$0xf]  ;;  %v1068_v9 = vld [vmem:[%s1849_s3 + $0x34] sm:$0xf0] }
  0x12   :  { %44 = vadd.xlane.f32.xlu2 %v30_v6 }
  0x13   :  { %533 = vmatpush.bf16.msra.mxu2 %v1020_v11 }
  0x75   :  { %v41_v14 = vpop.xlane.xlu2 %40  ;;  %v37_v15 = vpop.xlane.xlu1 %36 }
  0x76   :  { %v33_v16 = vpop.xlane.xlu0 %32  ;;  %v59_v26 = vmul.f32 %v1253_v13, %v41_v14  ;;  %v57_v27 = vmul.f32 %v1253_v13, %v37_v15  ;;  %v1021_v14 = vld [vmem:[%s1849_s3 + $0xb8] sm:$0xf0] }
  0x77   :  { %v55_v17 = vmul.f32 %v1253_v13, %v33_v16  ;;  %v1024_v15 = vor.u32 %v1082_v12, %v1021_v14  ;;  %v995_v16 = vld [vmem:[%s1849_s3 + $0x80] sm:$0xf]  ;;  %v956_v14 = vor.u32 %v1068_v9, %v955_v8 }
  0x78   :  { %v1277_v32 = vsub.f32 %v28_v0, %v59_v26  ;;  %v1279_v33 = vsub.f32 %v26_v1, %v57_v27  ;;  %v1086_v0 = vld [vmem:[%s1849_s3 + $0xcc] sm:$0xf]  ;;  %v1037_v1 = vld [vmem:[%s1849_s3 + $0xd8] sm:$0xf0] }
  0x79   :  { %v1256_v18 = vsub.f32 %v24_v2, %v55_v17  ;;  %v1040_v2 = vor.u32 %v1086_v0, %v1037_v1  ;;  %v1079_v17 = vld [vmem:[%s1849_s3 + $0x8c] sm:$0xf0]  ;;  %v1078_v27 = vld [vmem:[%s1849_s3 + $0x8c] sm:$0xf]  ;;  %v947_v0 = vld [vmem:[%s1849_s3 + $0x20] sm:$0xf] }
  0x7a   :  { %v75_v38 = vmul.f32 %v1277_v32, %v1277_v32  ;;  %v73_v39 = vmul.f32 %v1279_v33, %v1279_v33  ;;  %v1067_v1 = vld [vmem:[%s1849_s3 + $0x2c] sm:$0xf0] }
  0x7b   :  { %v71_v19 = vmul.f32 %v1256_v18, %v1256_v18  ;;  %561 = vmatpush.bf16.msra.mxu3 %v1040_v2  ;;  %v1065_v2 = vld [vmem:[%s1849_s3 + $0x24] sm:$0xf] }
  0x7d   :  { %79 = vadd.xlane.f32.xlu0 %v71_v19  ;;  %v43_v20 = vpop.xlane.xlu2 %42  ;;  %v39_v21 = vpop.xlane.xlu1 %38  ;;  %v1077_v19 = vld [vmem:[%s1849_s3 + $0x84] sm:$0xf] }
  0x7e   :  { %v58_v22 = vmul.f32 %v1253_v13, %v39_v21  ;;  %v35_v23 = vpop.xlane.xlu0 %34  ;;  %v60_v37 = vmul.f32 %v1253_v13, %v43_v20  ;;  %v996_v20 = vor.u32 %v1079_v17, %v995_v16  ;;  %v997_v21 = vld [vmem:[%s1849_s3 + $0x90] sm:$0xf0]  ;;  %v957_v16 = vld [vmem:[%s1849_s3 + $0x38] sm:$0xf0] }
  0x7f   :  { %v56_v24 = vmul.f32 %v1253_v13, %v35_v23  ;;  %562 = vmatpush.bf16.msra.mxu3 %v1024_v15  ;;  %v1080_v23 = vld [vmem:[%s1849_s3 + $0x94] sm:$0xf0]  ;;  %v1066_v15 = vld [vmem:[%s1849_s3 + $0x2c] sm:$0xf] }
  0x80   :  { %v1262_v25 = vsub.f32 %v27_v4, %v58_v22  ;;  %v1292_v41 = vsub.f32 %v29_v3, %v60_v37  ;;  %v1011_v3 = vld [vmem:[%s1849_s3 + $0xa0] sm:$0xf]  ;;  %v1083_v4 = vld [vmem:[%s1849_s3 + $0xac] sm:$0xf0]  ;;  %v1003_v22 = vld [vmem:[%s1849_s3 + $0x88] sm:$0xf] }
  0x81   :  { %v1266_v28 = vsub.f32 %v25_v5, %v56_v24  ;;  %v1081_v5 = vld [vmem:[%s1849_s3 + $0xa4] sm:$0xf]  ;;  %v1000_v24 = vor.u32 %v1077_v19, %v997_v21  ;;  %v1004_v26 = vor.u32 %v1080_v23, %v1003_v22  ;;  %v960_v19 = vor.u32 %v1066_v15, %v957_v16  ;;  %v931_v23 = vld [vmem:[%s1849_s3] sm:$0xf] }
  0x82   :  { %v74_v29 = vmul.f32 %v1262_v25, %v1262_v25  ;;  %v76_v42 = vmul.f32 %v1292_v41, %v1292_v41  ;;  %v1016_v10 = vor.u32 %v1081_v5, %v1013_v7  ;;  %v1073_v37 = vld [vmem:[%s1849_s3 + $0x64] sm:$0xf]  ;;  %v949_v7 = vld [vmem:[%s1849_s3 + $0x30] sm:$0xf0] }
  0x83   :  { %v72_v31 = vmul.f32 %v1266_v28, %v1266_v28  ;;  %534 = vmatpush.bf16.msra.mxu2 %v1004_v26  ;;  %v952_v12 = vor.u32 %v1065_v2, %v949_v7  ;;  %v1512_v2 = vld [vmem:[%s1847_s1] ss:$0 sm:$0xff] }
  0x84   :  { %85 = vadd.xlane.f32.xlu2 %v74_v29  ;;  %504 = vmatpush.bf16.msra.mxu1 %v1016_v10  ;;  %v1005_v29 = vld [vmem:[%s1849_s3 + $0x98] sm:$0xf0] }
  0x85   :  { %46 = vadd.xlane.f32.xlu0 %v1273_v30  ;;  %81 = vadd.xlane.f32.xlu1 %v72_v31  ;;  %v45_v34 = vpop.xlane.xlu2 %44  ;;  %v1008_v31 = vor.u32 %v1078_v27, %v1005_v29  ;;  %v933_v27 = vld [vmem:[%s1849_s3 + $0x10] sm:$0xf0]  ;;  %v939_v29 = vld [vmem:[%s1849_s3 + $0x8] sm:$0xf] }
  0x86   :  { %v61_v35 = vmul.f32 %v1253_v13, %v45_v34  ;;  %v979_v34 = vld [vmem:[%s1849_s3 + $0x60] sm:$0xf] }
  0x87   :  { %563 = vmatpush.bf16.msra.mxu3 %v1008_v31 }
  0x88   :  { %v1283_v36 = vsub.f32 %v30_v6, %v61_v35  ;;  %v1012_v6 = vor.u32 %v1083_v4, %v1011_v3  ;;  %505 = vmatpush.bf16.msra.mxu1 %v1000_v24  ;;  %v1075_v35 = vld [vmem:[%s1849_s3 + $0x6c] sm:$0xf0] }
  0x89   :  { %v1063_v24 = vld [vmem:[%s1849_s3 + $0xc] sm:$0xf0] }
  0x8a   :  { %v77_v40 = vmul.f32 %v1283_v36, %v1283_v36  ;;  %475 = vmatpush.bf16.msra.mxu0 %v1012_v6  ;;  %v948_v6 = vor.u32 %v1067_v1, %v947_v0 }
  0x8b   :  { %564 = vmatpush.bf16.msra.mxu3 %v992_v49 }
  0x8c   :  { %91 = vadd.xlane.f32.xlu2 %v77_v40  ;;  %v981_v40 = vld [vmem:[%s1849_s3 + $0x70] sm:$0xf0] }
  0x8d   :  { %87 = vadd.xlane.f32.xlu0 %v75_v38  ;;  %83 = vadd.xlane.f32.xlu1 %v73_v39  ;;  %v980_v39 = vor.u32 %v1075_v35, %v979_v34  ;;  %v984_v45 = vor.u32 %v1073_v37, %v981_v40  ;;  %v932_v34 = vor.u32 %v1063_v24, %v931_v23  ;;  %v1064_v35 = vld [vmem:[%s1849_s3 + $0x14] sm:$0xf0]  ;;  %v1062_v37 = vld [vmem:[%s1849_s3 + $0xc] sm:$0xf] }
  0x8e   :  { %476 = vmatpush.bf16.msra.mxu0 %v996_v20  ;;  %v940_v40 = vor.u32 %v1064_v35, %v939_v29 }
  0x8f   :  { %506 = vmatpush.bf16.msra.mxu1 %v984_v45  ;;  %565 = vmatpush.bf16.msra.mxu3 %v976_v62 }
  0x92   :  { %477 = vmatpush.bf16.msra.mxu0 %v980_v39 }
  0x93   :  { %507 = vmatpush.bf16.msra.mxu1 %v968_v57  ;;  %566 = vmatpush.bf16.msra.mxu3 %v960_v19 }
  0x95   :  { %89 = vadd.xlane.f32.xlu1 %v76_v42  ;;  %v987_v42 = vld [vmem:[%s1849_s3 + $0x68] sm:$0xf] }
  0x96   :  { %v988_v46 = vor.u32 %v1076_v43, %v987_v42  ;;  %478 = vmatpush.bf16.msra.mxu0 %v964_v53  ;;  %v941_v42 = vld [vmem:[%s1849_s3 + $0x18] sm:$0xf0] }
  0x97   :  { %508 = vmatpush.bf16.msra.mxu1 %v952_v12  ;;  %v944_v43 = vor.u32 %v1062_v37, %v941_v42 }
  0x98   :  { %535 = vmatpush.bf16.msra.mxu2 %v988_v46 }
  0x99   :  { %567 = vmatpush.bf16.msra.mxu3 %v944_v43 }
  0x9a   :  { %479 = vmatpush.bf16.msra.mxu0 %v948_v6 }
  0x9c   :  { %536 = vmatpush.bf16.msra.mxu2 %v972_v61 }
  0x9e   :  { %480 = vmatpush.bf16.msra.mxu0 %v932_v34 }
  0xa0   :  { %537 = vmatpush.bf16.msra.mxu2 %v956_v14 }
  0xa4   :  { %538 = vmatpush.bf16.msra.mxu2 %v940_v40 }
  0xf0   :  { %v80_v38 = vpop.xlane.xlu0 %79 }
  0xf1   :  { %v95_v44 = vmul.f32 %v80_v38, %v1253_v13 }
  0xf3   :  { %v1417_v50 = vadd.f32 1e-06, %v95_v44 }
  0xf5   :  { %1121 = vrsqrt.f32 %v1417_v50  ;;  %vm117_vm2 = vweird.f32 %v1417_v50 }
  0xf7   :  { %v86_v63 = vpop.xlane.xlu2 %85 }
  0xf8   :  { %v98_v3 = vmul.f32 %v86_v63, %v1253_v13  ;;  %v82_v4 = vpop.xlane.xlu1 %81  ;;  %v47_v5 = vpop.xlane.xlu0 %46 }
  0xf9   :  { %v96_v10 = vmul.f32 %v82_v4, %v1253_v13  ;;  %v62_v11 = vmul.f32 %v1253_v13, %v47_v5 }
  0xfa   :  { %v1471_v17 = vadd.f32 1e-06, %v98_v3 }
  0xfb   :  { %v1122_v20 = vpop.eup %1121  ;;  %v104_v21 = vadd.f32 1e-06, %v96_v10  ;;  %v1474_v22 = vsub.f32 %v1273_v30, %v62_v11  ;;  %v1061_v30 = vld [vmem:[%s1849_s3 + $0x4] sm:$0xf] }
  0xfc   :  { %v112_v26 = vmul.f32 %v1122_v20, %v1417_v50  ;;  %1123 = vrsqrt.f32 %v1471_v17  ;;  %v936_v39 = vor.u32 %v1061_v30, %v933_v27  ;;  %vm118_vm1 = vweird.f32 %v1122_v20 }
  0xfd   :  { %1125 = vrsqrt.f32 %v104_v21  ;;  %v78_v31 = vmul.f32 %v1474_v22, %v1474_v22  ;;  %vm119_vm3 = vmor %vm117_vm2, %vm118_vm1  ;;  %vm127_vm4 = vweird.f32 %v104_v21  ;;  %vm147_vm6 = vweird.f32 %v1471_v17 }
  0xfe   :  { %v113_v38 = vmul.f32 %v1122_v20, %v112_v26  ;;  %509 = vmatpush.bf16.msra.mxu1 %v936_v39 }
  0xff   :  { %93 = vadd.xlane.f32.xlu0 %v78_v31 }
 0x100   :  { %v114_v44 = vmul.f32 0.5, %v113_v38  ;;  %v84_v45 = vpop.xlane.xlu1 %83  ;;  %v88_v46 = vpop.xlane.xlu0 %87 }
 0x101   :  { %v97_v47 = vmul.f32 %v84_v45, %v1253_v13  ;;  %v99_v48 = vmul.f32 %v88_v46, %v1253_v13 }
 0x102   :  { %v1124_v49 = vpop.eup %1123  ;;  %v115_v51 = vsub.f32 1.5, %v114_v44 }
 0x103   :  { %v1126_v52 = vpop.eup %1125  ;;  %v142_v53 = vmul.f32 %v1124_v49, %v1471_v17  ;;  %v105_v54 = vadd.f32 1e-06, %v97_v47  ;;  %v107_v55 = vadd.f32 1e-06, %v99_v48  ;;  %vm148_vm7 = vweird.f32 %v1124_v49 }
 0x104   :  { %v116_v56 = vmul.f32 %v1122_v20, %v115_v51  ;;  %v122_v57 = vmul.f32 %v1126_v52, %v104_v21  ;;  %vm128_vm5 = vweird.f32 %v1126_v52  ;;  %vm1516_vm9 = vmor %vm147_vm6, %vm148_vm7 }
 0x105   :  { %v143_v58 = vmul.f32 %v1124_v49, %v142_v53  ;;  %1127 = vrsqrt.f32 %v105_v54  ;;  %vm129_vm8 = vmor %vm127_vm4, %vm128_vm5  ;;  %vm137_vm10 = vweird.f32 %v105_v54  ;;  %vm157_vm12 = vweird.f32 %v107_v55 }
 0x106   :  { %v123_v59 = vmul.f32 %v1126_v52, %v122_v57  ;;  %1129 = vrsqrt.f32 %v107_v55  ;;  %v120_v60 = vsel %vm119_vm3, %v1122_v20, %v116_v56 }
 0x107   :  { %v144_v61 = vmul.f32 0.5, %v143_v58  ;;  %v191_v50 = vmul.f32 %v120_v60, %v1256_v18  ;;  %v1523_v18 = vld [vmem:[%s1848_s2] ss:$0 sm:$0xff] }
 0x108   :  { %v124_v62 = vmul.f32 0.5, %v123_v59  ;;  %v90_v63 = vpop.xlane.xlu1 %89 }
 0x109   :  { %v145_v0 = vsub.f32 1.5, %v144_v61  ;;  %v100_v1 = vmul.f32 %v90_v63, %v1253_v13  ;;  %v203_v12 = vmul.f32 %v1512_v2, %v191_v50 }
 0x10a   :  { %v125_v3 = vsub.f32 1.5, %v124_v62 }
 0x10b   :  { %v1128_v4 = vpop.eup %1127  ;;  %v146_v6 = vmul.f32 %v1124_v49, %v145_v0  ;;  %v108_v9 = vadd.f32 1e-06, %v100_v1  ;;  %v215_v24 = vadd.f32 %v1523_v18, %v203_v12 }
 0x10c   :  { %v1130_v5 = vpop.eup %1129  ;;  %v126_v7 = vmul.f32 %v1126_v52, %v125_v3  ;;  %v132_v8 = vmul.f32 %v1128_v4, %v105_v54  ;;  %vm138_vm11 = vweird.f32 %v1128_v4 }
 0x10d   :  { %v152_v11 = vmul.f32 %v1130_v5, %v107_v55  ;;  %1131 = vrsqrt.f32 %v108_v9  ;;  %v150_v19 = vsel %vm1516_vm9, %v1124_v49, %v146_v6  ;;  %vm139_vm13 = vmor %vm137_vm10, %vm138_vm11  ;;  %vm158_vm14 = vweird.f32 %v1130_v5 }
 0x10e   :  { %v130_v14 = vsel %vm129_vm8, %v1126_v52, %v126_v7  ;;  %v133_v15 = vmul.f32 %v1128_v4, %v132_v8  ;;  %v194_v30 = vmul.f32 %v150_v19, %v1262_v25  ;;  %vm159_vm15 = vmor %vm157_vm12, %vm158_vm14  ;;  %vm167_vm0 = vweird.f32 %v108_v9 }
 0x10f   :  { %v192_v16 = vmul.f32 %v130_v14, %v1266_v28  ;;  %v153_v17 = vmul.f32 %v1130_v5, %v152_v11 }
 0x110   :  { %v134_v20 = vmul.f32 0.5, %v133_v15  ;;  %v206_v39 = vmul.f32 %v1512_v2, %v194_v30 }
 0x111   :  { %v204_v21 = vmul.f32 %v1512_v2, %v192_v16  ;;  %v154_v23 = vmul.f32 0.5, %v153_v17 }
 0x112   :  { %v135_v26 = vsub.f32 1.5, %v134_v20  ;;  %v218_v45 = vadd.f32 %v1523_v18, %v206_v39 }
 0x113   :  { %v216_v27 = vadd.f32 %v1523_v18, %v204_v21  ;;  %v155_v28 = vsub.f32 1.5, %v154_v23  ;;  %v1132_v29 = vpop.eup %1131 }
 0x114   :  { %v136_v31 = vmul.f32 %v1128_v4, %v135_v26  ;;  %v162_v37 = vmul.f32 %v1132_v29, %v108_v9  ;;  %vm168_vm1 = vweird.f32 %v1132_v29 }
 0x115   :  { %v1096_v34 = vpack.c.bf16 %v216_v27, %v215_v24  ;;  %v156_v35 = vmul.f32 %v1130_v5, %v155_v28  ;;  %vm169_vm2 = vmor %vm167_vm0, %vm168_vm1 }
 0x116   :  { %v140_v38 = vsel %vm139_vm13, %v1128_v4, %v136_v31  ;;  %v163_v42 = vmul.f32 %v1132_v29, %v162_v37 }
 0x117   :  { %1097 = vst [vmem:[#allocation2 + $0x10] sm:$0xff] %v1096_v34   ;;  %v193_v40 = vmul.f32 %v140_v38, %v1279_v33  ;;  %v160_v43 = vsel %vm159_vm15, %v1130_v5, %v156_v35 }
 0x118   :  { %v164_v44 = vmul.f32 0.5, %v163_v42  ;;  %v195_v48 = vmul.f32 %v160_v43, %v1277_v32 }
 0x119   :  { %v205_v25 = vmul.f32 %v1512_v2, %v193_v40 }
 0x11a   :  { %v165_v47 = vsub.f32 1.5, %v164_v44  ;;  %v207_v53 = vmul.f32 %v1512_v2, %v195_v48 }
 0x11b   :  { %v217_v46 = vadd.f32 %v1523_v18, %v205_v25 }
 0x11c   :  { %v166_v51 = vmul.f32 %v1132_v29, %v165_v47  ;;  %v219_v56 = vadd.f32 %v1523_v18, %v207_v53 }
 0x11d   :  { %v1101_v49 = vpack.c.bf16 %v218_v45, %v217_v46 }
 0x11e   :  { %v1057_v52 = vld [vmem:[#allocation2 + $0x10] sm:$0xff]  ;;  %v170_v33 = vsel %vm169_vm2, %v1132_v29, %v166_v51 }
 0x11f   :  { %1113 = vst [vmem:[#allocation2] sm:$0xff] %v1101_v49   ;;  %v196_v54 = vmul.f32 %v170_v33, %v1292_v41  ;;  %481 = vmatmul.bf16.vlgmr.msra.gmra.mxu0 %v1057_v52  ;;  %510 = vmatmul.bf16.vlgmr.msra.gmra.mxu1 %v1057_v52  ;;  %v92_v41 = vpop.xlane.xlu2 %91 }
 0x120   :  { %539 = vmatmul.bf16.vlgmr.msra.gmra.mxu2 %v1057_v52  ;;  %568 = vmatmul.bf16.vlgmr.msra.gmra.mxu3 %v1057_v52  ;;  %v101_v60 = vmul.f32 %v92_v41, %v1253_v13 }
 0x121   :  { %v208_v55 = vmul.f32 %v1512_v2, %v196_v54 }
 0x122   :  { %v109_v61 = vadd.f32 1e-06, %v101_v60 }
 0x123   :  { %v220_v32 = vadd.f32 %v1523_v18, %v208_v55 }
 0x124   :  { %1133 = vrsqrt.f32 %v109_v61  ;;  %vm177_vm3 = vweird.f32 %v109_v61 }
 0x125   :  { %v1106_v57 = vpack.c.bf16 %v220_v32, %v219_v56 }
 0x126   :  { %v1058_v58 = vld [vmem:[#allocation2] sm:$0xff] }
 0x127   :  { %1114 = vst [vmem:[#allocation2 + $0x18] sm:$0xff] %v1106_v57  }
 0x12a   :  { %v1134_v62 = vpop.eup %1133 }
 0x12b   :  { %v172_v63 = vmul.f32 %v1134_v62, %v109_v61  ;;  %vm178_vm4 = vweird.f32 %v1134_v62 }
 0x12c   :  { %vm179_vm5 = vmor %vm177_vm3, %vm178_vm4 }
 0x12d   :  { %v173_v0 = vmul.f32 %v1134_v62, %v172_v63 }
 0x12e   :  { %v1059_v59 = vld [vmem:[#allocation2 + $0x18] sm:$0xff] }
 0x12f   :  { %486 = vmatmul.bf16.gmra.mxu0 %v1058_v58  ;;  %515 = vmatmul.bf16.gmra.mxu1 %v1058_v58  ;;  %v174_v4 = vmul.f32 0.5, %v173_v0 }
 0x130   :  { %544 = vmatmul.bf16.gmra.mxu2 %v1058_v58  ;;  %573 = vmatmul.bf16.gmra.mxu3 %v1058_v58 }
 0x131   :  { %v175_v5 = vsub.f32 1.5, %v174_v4 }
 0x133   :  { %v176_v7 = vmul.f32 %v1134_v62, %v175_v5 }
 0x135   :  { %v180_v10 = vsel %vm179_vm5, %v1134_v62, %v176_v7 }
 0x136   :  { %v197_v14 = vmul.f32 %v180_v10, %v1283_v36  ;;  %v279_v36 = vld [vmem:[%s1850_s4] sm:$0xf] }
 0x137   :  { %v1555_v26 = vperm.slane %v279_v36, 0  ;;  %v1557_v30 = vperm.slane %v279_v36, 1  ;;  %v1569_v31 = vperm.slane %v279_v36, 2  ;;  %v1571_v34 = vperm.slane %v279_v36, 3 }
 0x138   :  { %v209_v16 = vmul.f32 %v1512_v2, %v197_v14 }
 0x13a   :  { %v221_v20 = vadd.f32 %v1523_v18, %v209_v16 }
 0x13f   :  { %491 = vmatmul.bf16.gmra.mxu0 %v1059_v59  ;;  %520 = vmatmul.bf16.gmra.mxu1 %v1059_v59 }
 0x140   :  { %549 = vmatmul.bf16.gmra.mxu2 %v1059_v59  ;;  %578 = vmatmul.bf16.gmra.mxu3 %v1059_v59 }
 0x172   :  { %v94_v1 = vpop.xlane.xlu0 %93 }
 0x173   :  { %v102_v50 = vmul.f32 %v94_v1, %v1253_v13 }
 0x175   :  { %v110_v3 = vadd.f32 1e-06, %v102_v50 }
 0x177   :  { %1135 = vrsqrt.f32 %v110_v3  ;;  %vm187_vm7 = vweird.f32 %v110_v3 }
 0x17d   :  { %v1136_v6 = vpop.eup %1135 }
 0x17e   :  { %v182_v8 = vmul.f32 %v1136_v6, %v110_v3  ;;  %vm188_vm6 = vweird.f32 %v1136_v6 }
 0x17f   :  { %vm189_vm8 = vmor %vm187_vm7, %vm188_vm6 }
 0x180   :  { %v183_v9 = vmul.f32 %v1136_v6, %v182_v8 }
 0x182   :  { %v184_v11 = vmul.f32 0.5, %v183_v9 }
 0x184   :  { %v185_v12 = vsub.f32 1.5, %v184_v11 }
 0x186   :  { %v186_v15 = vmul.f32 %v1136_v6, %v185_v12 }
 0x188   :  { %v190_v13 = vsel %vm189_vm8, %v1136_v6, %v186_v15 }
 0x189   :  { %v198_v17 = vmul.f32 %v190_v13, %v1474_v22 }
 0x18b   :  { %v210_v19 = vmul.f32 %v1512_v2, %v198_v17 }
 0x18d   :  { %v222_v21 = vadd.f32 %v1523_v18, %v210_v19 }
 0x18f   :  { %v1111_v23 = vpack.c.bf16 %v222_v21, %v221_v20 }
 0x191   :  { %1115 = vst [vmem:[#allocation2 + $0x8] sm:$0xff] %v1111_v23  }
 0x198   :  { %v1060_v24 = vld [vmem:[#allocation2 + $0x8] sm:$0xff] }
 0x199   :  { %496 = vmatmul.bf16.gmra.mxu0 %v1060_v24  ;;  %525 = vmatmul.bf16.gmra.mxu1 %v1060_v24 }
 0x19a   :  { %554 = vmatmul.bf16.gmra.mxu2 %v1060_v24  ;;  %583 = vmatmul.bf16.gmra.mxu3 %v1060_v24 }
 0x19c   :  { %v482_v22 = vpop.f32.mrf.mxu0  ;;  %v511_v2 = vpop.f32.mrf.mxu1 }
 0x19d   :  { %v1560_v27 = vadd.f32 %v482_v22, %v1555_v26  ;;  %v1563_v18 = vadd.f32 %v511_v2, %v1557_v30 }
 0x19f   :  { %v589_v28 = vmul.f32 %v1560_v27, %v1560_v27  ;;  %v590_v29 = vmul.f32 %v1563_v18, %v1563_v18 }
 0x1a1   :  { %v621_v35 = vmul.f32 %v589_v28, %v1560_v27  ;;  %v622_v37 = vmul.f32 %v590_v29, %v1563_v18 }
 0x1a3   :  { %v653_v38 = vmul.f32 0.044715, %v621_v35  ;;  %v654_v39 = vmul.f32 0.044715, %v622_v37  ;;  %v540_v40 = vpop.f32.mrf.mxu2  ;;  %v569_v42 = vpop.f32.mrf.mxu3 }
 0x1a4   :  { %v1576_v25 = vadd.f32 %v540_v40, %v1569_v31  ;;  %v1579_v43 = vadd.f32 %v569_v42, %v1571_v34  ;;  %v484_v44 = vpop.f32.mrf.mxu0  ;;  %v513_v45 = vpop.f32.mrf.mxu1 }
 0x1a5   :  { %v685_v46 = vadd.f32 %v653_v38, %v1560_v27  ;;  %v686_v47 = vadd.f32 %v654_v39, %v1563_v18  ;;  %v1584_v48 = vadd.f32 %v484_v44, %v1555_v26  ;;  %v1587_v49 = vadd.f32 %v513_v45, %v1557_v30 }
 0x1a6   :  { %v591_v51 = vmul.f32 %v1576_v25, %v1576_v25  ;;  %v592_v52 = vmul.f32 %v1579_v43, %v1579_v43 }
 0x1a7   :  { %v717_v33 = vmul.f32 0.7978846, %v685_v46  ;;  %v718_v53 = vmul.f32 0.7978846, %v686_v47  ;;  %v593_v54 = vmul.f32 %v1584_v48, %v1584_v48  ;;  %v594_v55 = vmul.f32 %v1587_v49, %v1587_v49 }
 0x1a8   :  { %v623_v56 = vmul.f32 %v591_v51, %v1576_v25  ;;  %v624_v32 = vmul.f32 %v592_v52, %v1579_v43 }
 0x1a9   :  { %1137 = vtanh.f32 %v717_v33  ;;  %v625_v57 = vmul.f32 %v593_v54, %v1584_v48  ;;  %v626_v58 = vmul.f32 %v594_v55, %v1587_v49 }
 0x1aa   :  { %1139 = vtanh.f32 %v718_v53  ;;  %v655_v59 = vmul.f32 0.044715, %v623_v56  ;;  %v656_v41 = vmul.f32 0.044715, %v624_v32 }
 0x1ab   :  { %v657_v60 = vmul.f32 0.044715, %v625_v57  ;;  %v658_v61 = vmul.f32 0.044715, %v626_v58  ;;  %v542_v62 = vpop.f32.mrf.mxu2  ;;  %v571_v63 = vpop.f32.mrf.mxu3 }
 0x1ac   :  { %v687_v0 = vadd.f32 %v655_v59, %v1576_v25  ;;  %v688_v1 = vadd.f32 %v656_v41, %v1579_v43  ;;  %v1604_v50 = vadd.f32 %v542_v62, %v1569_v31  ;;  %v1607_v3 = vadd.f32 %v571_v63, %v1571_v34  ;;  %v487_v4 = vpop.f32.mrf.mxu0  ;;  %v516_v5 = vpop.f32.mrf.mxu1 }
 0x1ad   :  { %v689_v6 = vadd.f32 %v657_v60, %v1584_v48  ;;  %v690_v7 = vadd.f32 %v658_v61, %v1587_v49  ;;  %v1612_v8 = vadd.f32 %v487_v4, %v1555_v26  ;;  %v1615_v9 = vadd.f32 %v516_v5, %v1557_v30 }
 0x1ae   :  { %v719_v10 = vmul.f32 0.7978846, %v687_v0  ;;  %v720_v11 = vmul.f32 0.7978846, %v688_v1  ;;  %v595_v12 = vmul.f32 %v1604_v50, %v1604_v50  ;;  %v596_v14 = vmul.f32 %v1607_v3, %v1607_v3 }
 0x1af   :  { %v1138_v15 = vpop.eup %1137  ;;  %v721_v13 = vmul.f32 0.7978846, %v689_v6  ;;  %v722_v16 = vmul.f32 0.7978846, %v690_v7  ;;  %v597_v17 = vmul.f32 %v1612_v8, %v1612_v8  ;;  %v598_v19 = vmul.f32 %v1615_v9, %v1615_v9 }
 0x1b0   :  { %v1140_v20 = vpop.eup %1139  ;;  %v781_v21 = vadd.f32 1.0, %v1138_v15  ;;  %1141 = vtanh.f32 %v719_v10  ;;  %v627_v23 = vmul.f32 %v595_v12, %v1604_v50  ;;  %v628_v36 = vmul.f32 %v596_v14, %v1607_v3 }
 0x1b1   :  { %v782_v24 = vadd.f32 1.0, %v1140_v20  ;;  %1143 = vtanh.f32 %v720_v11  ;;  %v629_v22 = vmul.f32 %v597_v17, %v1612_v8  ;;  %v630_v2 = vmul.f32 %v598_v19, %v1615_v9 }
 0x1b2   :  { %v813_v28 = vmul.f32 0.5, %v781_v21  ;;  %1145 = vtanh.f32 %v721_v13  ;;  %v659_v29 = vmul.f32 0.044715, %v627_v23  ;;  %v660_v35 = vmul.f32 0.044715, %v628_v36 }
 0x1b3   :  { %v814_v37 = vmul.f32 0.5, %v782_v24  ;;  %1147 = vtanh.f32 %v722_v16  ;;  %v661_v38 = vmul.f32 0.044715, %v629_v22  ;;  %v662_v39 = vmul.f32 0.044715, %v630_v2  ;;  %v545_v40 = vpop.f32.mrf.mxu2  ;;  %v574_v42 = vpop.f32.mrf.mxu3 }
 0x1b4   :  { %v845_v44 = vmul.f32 %v813_v28, %v1560_v27  ;;  %v691_v45 = vadd.f32 %v659_v29, %v1604_v50  ;;  %v692_v46 = vadd.f32 %v660_v35, %v1607_v3  ;;  %v1633_v47 = vadd.f32 %v545_v40, %v1569_v31  ;;  %v489_v51 = vpop.f32.mrf.mxu0  ;;  %v518_v7 = vpop.f32.mrf.mxu1 }
 0x1b5   :  { %v846_v52 = vmul.f32 %v814_v37, %v1563_v18  ;;  %v693_v33 = vadd.f32 %v661_v38, %v1612_v8  ;;  %v694_v53 = vadd.f32 %v662_v39, %v1615_v9  ;;  %v1639_v54 = vadd.f32 %v574_v42, %v1571_v34 }
 0x1b6   :  { %v1142_v55 = vpop.eup %1141  ;;  %v723_v56 = vmul.f32 0.7978846, %v691_v45  ;;  %v724_v27 = vmul.f32 0.7978846, %v692_v46  ;;  %v599_v32 = vmul.f32 %v1633_v47, %v1633_v47  ;;  %v1644_v57 = vadd.f32 %v489_v51, %v1555_v26 }
 0x1b7   :  { %v1144_v58 = vpop.eup %1143  ;;  %v877_v59 = vpack.c.bf16 %v846_v52, %v845_v44  ;;  %v783_v41 = vadd.f32 1.0, %v1142_v55  ;;  %v725_v18 = vmul.f32 0.7978846, %v693_v33  ;;  %v726_v60 = vmul.f32 0.7978846, %v694_v53 }
 0x1b8   :  { %v1146_v61 = vpop.eup %1145  ;;  %v784_v62 = vadd.f32 1.0, %v1144_v58  ;;  %1149 = vtanh.f32 %v723_v56  ;;  %v631_v63 = vmul.f32 %v599_v32, %v1633_v47  ;;  %v600_v0 = vmul.f32 %v1639_v54, %v1639_v54 }
 0x1b9   :  { %v1148_v1 = vpop.eup %1147  ;;  %893 = vst [vmem:[%s1851_s5] sm:$0xff] %v877_v59  ;;  %v815_v4 = vmul.f32 0.5, %v783_v41  ;;  %v785_v5 = vadd.f32 1.0, %v1146_v61  ;;  %1151 = vtanh.f32 %v724_v27  ;;  %v601_v6 = vmul.f32 %v1644_v57, %v1644_v57 }
 0x1ba   :  { %v816_v10 = vmul.f32 0.5, %v784_v62  ;;  %v786_v11 = vadd.f32 1.0, %v1148_v1  ;;  %1153 = vtanh.f32 %v725_v18  ;;  %v663_v12 = vmul.f32 0.044715, %v631_v63 }
 0x1bb   :  { %v847_v14 = vmul.f32 %v815_v4, %v1576_v25  ;;  %v817_v15 = vmul.f32 0.5, %v785_v5  ;;  %1155 = vtanh.f32 %v726_v60  ;;  %v632_v13 = vmul.f32 %v600_v0, %v1639_v54  ;;  %v547_v16 = vpop.f32.mrf.mxu2  ;;  %v576_v35 = vpop.f32.mrf.mxu3 }
 0x1bc   :  { %v848_v17 = vmul.f32 %v816_v10, %v1579_v43  ;;  %v818_v19 = vmul.f32 0.5, %v786_v11  ;;  %v695_v20 = vadd.f32 %v663_v12, %v1633_v47  ;;  %v633_v21 = vmul.f32 %v601_v6, %v1644_v57  ;;  %v492_v46 = vpop.f32.mrf.mxu0  ;;  %v521_v60 = vpop.f32.mrf.mxu1 }
 0x1bd   :  { %v849_v23 = vmul.f32 %v817_v15, %v1584_v48  ;;  %v664_v36 = vmul.f32 0.044715, %v632_v13  ;;  %v1661_v24 = vadd.f32 %v518_v7, %v1557_v30  ;;  %v1664_v25 = vadd.f32 %v547_v16, %v1569_v31 }
 0x1be   :  { %v1150_v22 = vpop.eup %1149  ;;  %v878_v2 = vpack.c.bf16 %v848_v17, %v847_v14  ;;  %v850_v28 = vmul.f32 %v818_v19, %v1587_v49  ;;  %v727_v29 = vmul.f32 0.7978846, %v695_v20  ;;  %v665_v43 = vmul.f32 0.044715, %v633_v21 }
 0x1bf   :  { %v1152_v37 = vpop.eup %1151  ;;  %v787_v38 = vadd.f32 1.0, %v1150_v22  ;;  %v696_v39 = vadd.f32 %v664_v36, %v1639_v54  ;;  %v602_v48 = vmul.f32 %v1661_v24, %v1661_v24  ;;  %v603_v40 = vmul.f32 %v1664_v25, %v1664_v25 }
 0x1c0   :  { %v1154_v42 = vpop.eup %1153  ;;  %894 = vst [vmem:[%s1851_s5 + $0x8] sm:$0xff] %v878_v2  ;;  %v879_v44 = vpack.c.bf16 %v850_v28, %v849_v23  ;;  %v788_v49 = vadd.f32 1.0, %v1152_v37  ;;  %1157 = vtanh.f32 %v727_v29  ;;  %v697_v45 = vadd.f32 %v665_v43, %v1644_v57 }
 0x1c1   :  { %v1156_v51 = vpop.eup %1155  ;;  %v819_v52 = vmul.f32 0.5, %v787_v38  ;;  %v789_v33 = vadd.f32 1.0, %v1154_v42  ;;  %v728_v53 = vmul.f32 0.7978846, %v696_v39  ;;  %v634_v55 = vmul.f32 %v602_v48, %v1661_v24 }
 0x1c2   :  { %895 = vst [vmem:[%s1851_s5 + $0x10] sm:$0xff] %v879_v44  ;;  %v820_v56 = vmul.f32 0.5, %v788_v49  ;;  %v790_v27 = vadd.f32 1.0, %v1156_v51  ;;  %v729_v32 = vmul.f32 0.7978846, %v697_v45  ;;  %v635_v58 = vmul.f32 %v603_v40, %v1664_v25 }
 0x1c3   :  { %v851_v59 = vmul.f32 %v819_v52, %v1604_v50  ;;  %v821_v41 = vmul.f32 0.5, %v789_v33  ;;  %1159 = vtanh.f32 %v728_v53  ;;  %v666_v18 = vmul.f32 0.044715, %v634_v55  ;;  %v550_v50 = vpop.f32.mrf.mxu2  ;;  %v579_v19 = vpop.f32.mrf.mxu3 }
 0x1c4   :  { %v852_v61 = vmul.f32 %v820_v56, %v1607_v3  ;;  %v822_v62 = vmul.f32 0.5, %v790_v27  ;;  %1161 = vtanh.f32 %v729_v32  ;;  %v667_v63 = vmul.f32 0.044715, %v635_v58  ;;  %v494_v43 = vpop.f32.mrf.mxu0 }
 0x1c5   :  { %v853_v0 = vmul.f32 %v821_v41, %v1612_v8  ;;  %v698_v1 = vadd.f32 %v666_v18, %v1661_v24  ;;  %v1686_v4 = vadd.f32 %v576_v35, %v1571_v34  ;;  %v1689_v5 = vadd.f32 %v492_v46, %v1555_v26 }
 0x1c6   :  { %v1158_v6 = vpop.eup %1157  ;;  %v880_v7 = vpack.c.bf16 %v852_v61, %v851_v59  ;;  %v854_v10 = vmul.f32 %v822_v62, %v1615_v9  ;;  %v699_v3 = vadd.f32 %v667_v63, %v1664_v25  ;;  %v1694_v11 = vadd.f32 %v521_v60, %v1557_v30  ;;  %v523_v59 = vpop.f32.mrf.mxu1 }
 0x1c7   :  { %v791_v12 = vadd.f32 1.0, %v1158_v6  ;;  %v730_v8 = vmul.f32 0.7978846, %v698_v1  ;;  %v604_v14 = vmul.f32 %v1686_v4, %v1686_v4  ;;  %v605_v15 = vmul.f32 %v1689_v5, %v1689_v5 }
 0x1c8   :  { %896 = vst [vmem:[%s1851_s5 + $0x18] sm:$0xff] %v880_v7  ;;  %v881_v13 = vpack.c.bf16 %v854_v10, %v853_v0  ;;  %v731_v16 = vmul.f32 0.7978846, %v699_v3  ;;  %v606_v9 = vmul.f32 %v1694_v11, %v1694_v11  ;;  %v1706_v17 = vadd.f32 %v550_v50, %v1569_v31 }
 0x1c9   :  { %v1160_v20 = vpop.eup %1159  ;;  %v823_v21 = vmul.f32 0.5, %v791_v12  ;;  %1163 = vtanh.f32 %v730_v8  ;;  %v636_v23 = vmul.f32 %v604_v14, %v1686_v4  ;;  %v637_v36 = vmul.f32 %v605_v15, %v1689_v5 }
 0x1ca   :  { %v1162_v22 = vpop.eup %1161  ;;  %897 = vst [vmem:[%s1851_s5 + $0x20] sm:$0xff] %v881_v13  ;;  %v792_v2 = vadd.f32 1.0, %v1160_v20  ;;  %1165 = vtanh.f32 %v731_v16  ;;  %v638_v28 = vmul.f32 %v606_v9, %v1694_v11  ;;  %v607_v29 = vmul.f32 %v1706_v17, %v1706_v17 }
 0x1cb   :  { %v855_v35 = vmul.f32 %v823_v21, %v1633_v47  ;;  %v793_v37 = vadd.f32 1.0, %v1162_v22  ;;  %v668_v38 = vmul.f32 0.044715, %v636_v23  ;;  %v669_v39 = vmul.f32 0.044715, %v637_v36  ;;  %v552_v1 = vpop.f32.mrf.mxu2  ;;  %v581_v7 = vpop.f32.mrf.mxu3 }
 0x1cc   :  { %v824_v48 = vmul.f32 0.5, %v792_v2  ;;  %v670_v40 = vmul.f32 0.044715, %v638_v28  ;;  %v639_v42 = vmul.f32 %v607_v29, %v1706_v17  ;;  %v1719_v44 = vadd.f32 %v579_v19, %v1571_v34 }
 0x1cd   :  { %v825_v49 = vmul.f32 0.5, %v793_v37  ;;  %v700_v45 = vadd.f32 %v668_v38, %v1686_v4  ;;  %v701_v46 = vadd.f32 %v669_v39, %v1689_v5  ;;  %v1724_v51 = vadd.f32 %v494_v43, %v1555_v26 }
 0x1ce   :  { %v856_v47 = vmul.f32 %v824_v48, %v1639_v54  ;;  %v702_v52 = vadd.f32 %v670_v40, %v1694_v11  ;;  %v671_v33 = vmul.f32 0.044715, %v639_v42  ;;  %v608_v53 = vmul.f32 %v1719_v44, %v1719_v44 }
 0x1cf   :  { %v1164_v55 = vpop.eup %1163  ;;  %v857_v56 = vmul.f32 %v825_v49, %v1644_v57  ;;  %v732_v27 = vmul.f32 0.7978846, %v700_v45  ;;  %v733_v32 = vmul.f32 0.7978846, %v701_v46  ;;  %v609_v58 = vmul.f32 %v1724_v51, %v1724_v51 }
 0x1d0   :  { %v1166_v41 = vpop.eup %1165  ;;  %v882_v18 = vpack.c.bf16 %v856_v47, %v855_v35  ;;  %v794_v60 = vadd.f32 1.0, %v1164_v55  ;;  %v734_v61 = vmul.f32 0.7978846, %v702_v52  ;;  %v703_v54 = vadd.f32 %v671_v33, %v1706_v17 }
 0x1d1   :  { %v795_v62 = vadd.f32 1.0, %v1166_v41  ;;  %1167 = vtanh.f32 %v732_v27  ;;  %v640_v63 = vmul.f32 %v608_v53, %v1719_v44  ;;  %v641_v0 = vmul.f32 %v609_v58, %v1724_v51 }
 0x1d2   :  { %898 = vst [vmem:[%s1851_s5 + $0x28] sm:$0xff] %v882_v18  ;;  %v826_v57 = vmul.f32 0.5, %v794_v60  ;;  %1169 = vtanh.f32 %v733_v32  ;;  %v735_v50 = vmul.f32 0.7978846, %v703_v54  ;;  %v1740_v6 = vadd.f32 %v523_v59, %v1557_v30 }
 0x1d3   :  { %1171 = vtanh.f32 %v734_v61  ;;  %v672_v10 = vmul.f32 0.044715, %v640_v63  ;;  %v673_v3 = vmul.f32 0.044715, %v641_v0  ;;  %v1746_v14 = vadd.f32 %v552_v1, %v1569_v31 }
 0x1d4   :  { %v858_v12 = vmul.f32 %v826_v57, %v1661_v24  ;;  %1173 = vtanh.f32 %v735_v50  ;;  %v610_v8 = vmul.f32 %v1740_v6, %v1740_v6  ;;  %v827_v15 = vmul.f32 0.5, %v795_v62 }
 0x1d5   :  { %v704_v13 = vadd.f32 %v672_v10, %v1719_v44  ;;  %v705_v16 = vadd.f32 %v673_v3, %v1724_v51  ;;  %v1751_v9 = vadd.f32 %v581_v7, %v1571_v34  ;;  %v611_v24 = vmul.f32 %v1746_v14, %v1746_v14 }
 0x1d6   :  { %v883_v19 = vpack.c.bf16 %v858_v12, %v857_v56  ;;  %v642_v20 = vmul.f32 %v610_v8, %v1740_v6  ;;  %v859_v37 = vmul.f32 %v827_v15, %v1664_v25 }
 0x1d7   :  { %v1168_v21 = vpop.eup %1167  ;;  %v736_v23 = vmul.f32 0.7978846, %v704_v13  ;;  %v737_v36 = vmul.f32 0.7978846, %v705_v16  ;;  %v612_v22 = vmul.f32 %v1751_v9, %v1751_v9  ;;  %v643_v43 = vmul.f32 %v611_v24, %v1746_v14 }
 0x1d8   :  { %v1170_v2 = vpop.eup %1169  ;;  %899 = vst [vmem:[%s1851_s5 + $0x30] sm:$0xff] %v883_v19  ;;  %v796_v28 = vadd.f32 1.0, %v1168_v21  ;;  %v674_v29 = vmul.f32 0.044715, %v642_v20 }
 0x1d9   :  { %v1172_v35 = vpop.eup %1171  ;;  %v797_v38 = vadd.f32 1.0, %v1170_v2  ;;  %1175 = vtanh.f32 %v736_v23  ;;  %v644_v39 = vmul.f32 %v612_v22, %v1751_v9  ;;  %v675_v47 = vmul.f32 0.044715, %v643_v43 }
 0x1da   :  { %v1174_v48 = vpop.eup %1173  ;;  %v828_v40 = vmul.f32 0.5, %v796_v28  ;;  %v798_v42 = vadd.f32 1.0, %v1172_v35  ;;  %1177 = vtanh.f32 %v737_v36  ;;  %v706_v49 = vadd.f32 %v674_v29, %v1740_v6 }
 0x1db   :  { %v829_v45 = vmul.f32 0.5, %v797_v38  ;;  %v799_v46 = vadd.f32 1.0, %v1174_v48  ;;  %v676_v52 = vmul.f32 0.044715, %v644_v39  ;;  %v707_v56 = vadd.f32 %v675_v47, %v1746_v14 }
 0x1dc   :  { %v860_v33 = vmul.f32 %v828_v40, %v1686_v4  ;;  %v830_v53 = vmul.f32 0.5, %v798_v42  ;;  %v738_v55 = vmul.f32 0.7978846, %v706_v49 }
 0x1dd   :  { %v861_v25 = vmul.f32 %v829_v45, %v1689_v5  ;;  %v708_v27 = vadd.f32 %v676_v52, %v1751_v9  ;;  %v831_v59 = vmul.f32 0.5, %v799_v46  ;;  %v739_v18 = vmul.f32 0.7978846, %v707_v56 }
 0x1de   :  { %v884_v32 = vpack.c.bf16 %v860_v33, %v859_v37  ;;  %v862_v58 = vmul.f32 %v830_v53, %v1694_v11  ;;  %1179 = vtanh.f32 %v738_v55 }
 0x1df   :  { %v1176_v41 = vpop.eup %1175  ;;  %v740_v60 = vmul.f32 0.7978846, %v708_v27  ;;  %1181 = vtanh.f32 %v739_v18  ;;  %v863_v11 = vmul.f32 %v831_v59, %v1706_v17 }
 0x1e0   :  { %v1178_v61 = vpop.eup %1177  ;;  %900 = vst [vmem:[%s1851_s5 + $0x38] sm:$0xff] %v884_v32  ;;  %v885_v4 = vpack.c.bf16 %v862_v58, %v861_v25  ;;  %v800_v54 = vadd.f32 1.0, %v1176_v41 }
 0x1e1   :  { %v801_v5 = vadd.f32 1.0, %v1178_v61  ;;  %1183 = vtanh.f32 %v740_v60 }
 0x1e2   :  { %901 = vst [vmem:[%s1851_s5 + $0x40] sm:$0xff] %v885_v4  ;;  %v832_v62 = vmul.f32 0.5, %v800_v54 }
 0x1e3   :  { %v833_v63 = vmul.f32 0.5, %v801_v5 }
 0x1e4   :  { %v1180_v0 = vpop.eup %1179  ;;  %v864_v1 = vmul.f32 %v832_v62, %v1719_v44 }
 0x1e5   :  { %v802_v57 = vadd.f32 1.0, %v1180_v0  ;;  %v1182_v7 = vpop.eup %1181  ;;  %v865_v10 = vmul.f32 %v833_v63, %v1724_v51 }
 0x1e6   :  { %v886_v50 = vpack.c.bf16 %v864_v1, %v863_v11  ;;  %v803_v8 = vadd.f32 1.0, %v1182_v7 }
 0x1e7   :  { %v834_v3 = vmul.f32 0.5, %v802_v57  ;;  %v1184_v12 = vpop.eup %1183 }
 0x1e8   :  { %902 = vst [vmem:[%s1851_s5 + $0x48] sm:$0xff] %v886_v50  ;;  %v804_v15 = vadd.f32 1.0, %v1184_v12  ;;  %v835_v13 = vmul.f32 0.5, %v803_v8 }
 0x1e9   :  { %v866_v17 = vmul.f32 %v834_v3, %v1740_v6 }
 0x1ea   :  { %v836_v19 = vmul.f32 0.5, %v804_v15  ;;  %v867_v44 = vmul.f32 %v835_v13, %v1746_v14 }
 0x1eb   :  { %v887_v16 = vpack.c.bf16 %v866_v17, %v865_v10 }
 0x1ec   :  { %v868_v51 = vmul.f32 %v836_v19, %v1751_v9 }
 0x1ed   :  { %903 = vst [vmem:[%s1851_s5 + $0x50] sm:$0xff] %v887_v16 }
 0x1ee   :  { %v888_v20 = vpack.c.bf16 %v868_v51, %v867_v44 }
 0x1f0   :  { %904 = vst [vmem:[%s1851_s5 + $0x58] sm:$0xff] %v888_v20 }
 0x216   :  { %v497_v24 = vpop.f32.mrf.mxu0  ;;  %v526_v21 = vpop.f32.mrf.mxu1 }
 0x217   :  { %v498_v6 = vadd.f32 %v497_v24, %v1555_v26  ;;  %v1793_v23 = vadd.f32 %v526_v21, %v1557_v30 }
 0x219   :  { %v613_v36 = vmul.f32 %v498_v6, %v498_v6  ;;  %v614_v14 = vmul.f32 %v1793_v23, %v1793_v23 }
 0x21b   :  { %v645_v22 = vmul.f32 %v613_v36, %v498_v6  ;;  %v646_v2 = vmul.f32 %v614_v14, %v1793_v23 }
 0x21d   :  { %v677_v9 = vmul.f32 0.044715, %v645_v22  ;;  %v678_v28 = vmul.f32 0.044715, %v646_v2  ;;  %v555_v29 = vpop.f32.mrf.mxu2  ;;  %v584_v43 = vpop.f32.mrf.mxu3 }
 0x21e   :  { %v1799_v35 = vadd.f32 %v555_v29, %v1569_v31  ;;  %v1802_v37 = vadd.f32 %v584_v43, %v1571_v34  ;;  %v499_v38 = vpop.f32.mrf.mxu0  ;;  %v528_v39 = vpop.f32.mrf.mxu1 }
 0x21f   :  { %v709_v48 = vadd.f32 %v677_v9, %v498_v6  ;;  %v710_v40 = vadd.f32 %v678_v28, %v1793_v23  ;;  %v1806_v42 = vadd.f32 %v499_v38, %v1555_v26  ;;  %v1809_v49 = vadd.f32 %v528_v39, %v1557_v30 }
 0x220   :  { %v615_v45 = vmul.f32 %v1799_v35, %v1799_v35  ;;  %v616_v46 = vmul.f32 %v1802_v37, %v1802_v37 }
 0x221   :  { %v741_v47 = vmul.f32 0.7978846, %v709_v48  ;;  %v742_v52 = vmul.f32 0.7978846, %v710_v40  ;;  %v617_v33 = vmul.f32 %v1806_v42, %v1806_v42  ;;  %v618_v53 = vmul.f32 %v1809_v49, %v1809_v49 }
 0x222   :  { %v647_v26 = vmul.f32 %v615_v45, %v1799_v35  ;;  %v648_v55 = vmul.f32 %v616_v46, %v1802_v37 }
 0x223   :  { %1185 = vtanh.f32 %v741_v47  ;;  %v649_v30 = vmul.f32 %v617_v33, %v1806_v42  ;;  %v650_v25 = vmul.f32 %v618_v53, %v1809_v49 }
 0x224   :  { %1187 = vtanh.f32 %v742_v52  ;;  %v679_v56 = vmul.f32 0.044715, %v647_v26  ;;  %v680_v27 = vmul.f32 0.044715, %v648_v55 }
 0x225   :  { %v681_v32 = vmul.f32 0.044715, %v649_v30  ;;  %v682_v58 = vmul.f32 0.044715, %v650_v25  ;;  %v557_v59 = vpop.f32.mrf.mxu2  ;;  %v586_v41 = vpop.f32.mrf.mxu3 }
 0x226   :  { %v711_v18 = vadd.f32 %v679_v56, %v1799_v35  ;;  %v712_v60 = vadd.f32 %v680_v27, %v1802_v37  ;;  %v558_v61 = vadd.f32 %v557_v59, %v1569_v31  ;;  %v587_v4 = vadd.f32 %v586_v41, %v1571_v34 }
 0x227   :  { %v713_v54 = vadd.f32 %v681_v32, %v1806_v42  ;;  %v714_v5 = vadd.f32 %v682_v58, %v1809_v49 }
 0x228   :  { %v743_v11 = vmul.f32 0.7978846, %v711_v18  ;;  %v744_v62 = vmul.f32 0.7978846, %v712_v60  ;;  %v619_v63 = vmul.f32 %v558_v61, %v558_v61  ;;  %v620_v0 = vmul.f32 %v587_v4, %v587_v4 }
 0x229   :  { %v1186_v1 = vpop.eup %1185  ;;  %v745_v57 = vmul.f32 0.7978846, %v713_v54  ;;  %v746_v50 = vmul.f32 0.7978846, %v714_v5 }
 0x22a   :  { %v1188_v7 = vpop.eup %1187  ;;  %v805_v10 = vadd.f32 1.0, %v1186_v1  ;;  %1189 = vtanh.f32 %v743_v11  ;;  %v651_v3 = vmul.f32 %v619_v63, %v558_v61  ;;  %v652_v12 = vmul.f32 %v620_v0, %v587_v4 }
 0x22b   :  { %v806_v8 = vadd.f32 1.0, %v1188_v7  ;;  %1191 = vtanh.f32 %v744_v62 }
 0x22c   :  { %v837_v31 = vmul.f32 0.5, %v805_v10  ;;  %1193 = vtanh.f32 %v745_v57  ;;  %v683_v34 = vmul.f32 0.044715, %v651_v3  ;;  %v684_v17 = vmul.f32 0.044715, %v652_v12 }
 0x22d   :  { %v838_v15 = vmul.f32 0.5, %v806_v8  ;;  %1195 = vtanh.f32 %v746_v50 }
 0x22e   :  { %v869_v13 = vmul.f32 %v837_v31, %v498_v6  ;;  %v715_v16 = vadd.f32 %v683_v34, %v558_v61  ;;  %v716_v19 = vadd.f32 %v684_v17, %v587_v4 }
 0x22f   :  { %v870_v44 = vmul.f32 %v838_v15, %v1793_v23 }
 0x230   :  { %v1190_v51 = vpop.eup %1189  ;;  %v747_v20 = vmul.f32 0.7978846, %v715_v16  ;;  %v748_v24 = vmul.f32 0.7978846, %v716_v19 }
 0x231   :  { %v1192_v21 = vpop.eup %1191  ;;  %v889_v36 = vpack.c.bf16 %v870_v44, %v869_v13  ;;  %v807_v14 = vadd.f32 1.0, %v1190_v51 }
 0x232   :  { %v1194_v22 = vpop.eup %1193  ;;  %v808_v2 = vadd.f32 1.0, %v1192_v21  ;;  %1197 = vtanh.f32 %v747_v20 }
 0x233   :  { %v1196_v9 = vpop.eup %1195  ;;  %905 = vst [vmem:[%s1851_s5 + $0x60] sm:$0xff] %v889_v36  ;;  %v839_v28 = vmul.f32 0.5, %v807_v14  ;;  %v809_v6 = vadd.f32 1.0, %v1194_v22  ;;  %1199 = vtanh.f32 %v748_v24 }
 0x234   :  { %v840_v29 = vmul.f32 0.5, %v808_v2  ;;  %v810_v43 = vadd.f32 1.0, %v1196_v9 }
 0x235   :  { %v871_v23 = vmul.f32 %v839_v28, %v1799_v35  ;;  %v841_v38 = vmul.f32 0.5, %v809_v6 }
 0x236   :  { %v872_v39 = vmul.f32 %v840_v29, %v1802_v37  ;;  %v842_v48 = vmul.f32 0.5, %v810_v43 }
 0x237   :  { %v873_v40 = vmul.f32 %v841_v38, %v1806_v42 }
 0x238   :  { %v1198_v45 = vpop.eup %1197  ;;  %v890_v46 = vpack.c.bf16 %v872_v39, %v871_v23  ;;  %v874_v47 = vmul.f32 %v842_v48, %v1809_v49 }
 0x239   :  { %v1200_v52 = vpop.eup %1199  ;;  %v811_v33 = vadd.f32 1.0, %v1198_v45 }
 0x23a   :  { %906 = vst [vmem:[%s1851_s5 + $0x68] sm:$0xff] %v890_v46  ;;  %v891_v53 = vpack.c.bf16 %v874_v47, %v873_v40  ;;  %v812_v26 = vadd.f32 1.0, %v1200_v52 }
 0x23b   :  { %v843_v55 = vmul.f32 0.5, %v811_v33 }
 0x23c   :  { %907 = vst [vmem:[%s1851_s5 + $0x70] sm:$0xff] %v891_v53  ;;  %v844_v35 = vmul.f32 0.5, %v812_v26 }
 0x23d   :  { %v875_v37 = vmul.f32 %v843_v55, %v558_v61 }
 0x23e   :  { %v876_v42 = vmul.f32 %v844_v35, %v587_v4 }
 0x240   :  { %v892_v30 = vpack.c.bf16 %v876_v42, %v875_v37 }
 0x242   :  { %908 = vst [vmem:[%s1851_s5 + $0x78] sm:$0xff] %v892_v30 }

// kernel: _lambda_.33
= control target key start
LH: loop header
LB: loop body
LE: loop exit
PB: predicated region body
PF: predicated region fallthrough
CT: control target
= control target key end

     0   :  { %s769_s12 = smov 0   ;;  %s771_s13 = smov 0   ;;  %s861_s0 = inlined_call_operand.vmem [shape: bf16[2,8,384], index: 0, kind: input, shape index: {}, may-alias: {0,1,2}]   ;;  %s862_s1 = inlined_call_operand.vmem [shape: bf16[2,8,384], index: 1, kind: input, shape index: {}, may-alias: {0,1,2}]   ;;  %s863_s2 = inlined_call_operand.vmem [shape: bf16[2,8,384], index: 2, kind: input, shape index: {}, may-alias: {0,1,2}]   ;;  %s864_s3 = inlined_call_operand.vmem [shape: bf16[2,8,128], index: 3, kind: output, shape index: {}]  }
   0x1   :  { %s773_s14 = smov 0  }
   0x2 LB: > { %s25_s15 = sadd.s32 1, %s740_s13  ;;  %p657_p0 = scmp.ge.s32.totalorder %s744_s14, 1  ;;  %s744_s14 = sphi %s773_s14, %s13_s14   ;;  %s740_s13 = sphi %s771_s13, %s866_s13   ;;  %s736_s12 = sphi %s769_s12, %s865_s12  }
   0x3   : > { %p27_p1 = scmp.ge.s32.totalorder %s25_s15, 2  ;;  %p194_p2 = scmp.lt.s32.totalorder %s744_s14, 3 }
   0x5   : > { %s868_s15 = smov (%p27_p1, %s25_s15), 0  ;;  %p195_p3 = pnand %p657_p0, %p194_p2 }
   0x6   : > { %p241_p4 = scmp.lt.s32.totalorder (!%p195_p3), %s736_s12, 1  ;;  %s746_s24 = smov (!%p195_p3), 64  }
   0x7   : > { %198 = sbr.rel (%p195_p3) target bundleno = 1086 (0x43e), region = 32  ;;  %s747_s25 = smov (!%p195_p3), 32  }
   0x8   : > { %s748_s26 = smov (!%p195_p3), 96  }
   0xc   : > { %s870_s12 = smov (!%p241_p4, %s736_s12), 1  ;;  %vm283_vm0 = vcmask 261120   ;;  %v277_v7 = vlaneseq  ;;  %vm305_vm2 = vcmask 64512   ;;  %vm321_vm3 = vcmask 1043456  }
   0xd   : > { %s790_s16 = smul.u32 12, %s870_s12  ;;  %vm534_vm4 = vcmask 523264   ;;  %s661_s4 = sshll.u32 %s870_s12, 2  ;;  %vm536_vm5 = vcmask 785408  }
   0xe   : > { %v278_v8 = vand.u32 127, %v277_v7  ;;  %s275_s7 = scalar_lea.vmem %s864_s3, %s661_s4 }
   0xf   : > { %s673_s17 = sadd.s32 4, %s790_s16  ;;  %s248_s23 = scalar_lea.vmem %s861_s0, %s790_s16 }
  0x10   : > { %s257_s20 = scalar_lea.vmem %s862_s1, %s673_s17  ;;  %v280_v2 = vld [vmem:[%s248_s23] sm:$0xf]  ;;  %vm279_vm1 = vcmp.lt.s32.totalorder %v278_v8, 4  ;;  %s675_s27 = sadd.s32 8, %s790_s16 }
  0x11   : > { %v281_v0 = vld [vmem:[%s257_s20] sm:$0xf]  ;;  %v339_v5 = vunpack.c.l.b16 %v280_v2  ;;  %s267_s30 = scalar_lea.vmem %s863_s2, %s675_s27 }
  0x12   : > { %v288_v1 = vsel %vm283_vm0, %v281_v0, 0  ;;  %v344_v3 = vunpack.c.l.b16 %v281_v0  ;;  %v282_v24 = vld [vmem:[%s267_s30] sm:$0xf] }
  0x13   : > { %297 = vmatpush.bf16.xpose.msra.mxu0 %v288_v1  ;;  %v340_v6 = vpack.c.b16 %v339_v5, %v339_v5  ;;  %v323_v25 = vsel %vm321_vm3, %v282_v24, 0  ;;  %v382_v51 = vunpack.c.l.b16 %v282_v24 }
  0x14   : > { %v345_v4 = vpack.c.b16 %v344_v3, %v344_v3  ;;  %332 = vmatpush.bf16.msra.mxu1 %v323_v25 }
  0x15   : > { %v383_v52 = vpack.c.b16 %v382_v51, %v382_v51 }
  0x16   : > { %407 = vrot.lane.b32.xlu2 %v345_v4, %s746_s24 }
  0x1a   : > { %662 = vmatmul.msk.bf16.vlgmr.msra.gmra.mxu0 %vm283_vm0, %v280_v2 }
  0x1e   : > { %465 = vrot.lane.b32.xlu2 %v345_v4, %s747_s25 }
  0x26   : > { %405 = vrot.lane.b32.xlu2 %v340_v6, %s746_s24 }
  0x2e   : > { %463 = vrot.lane.b32.xlu2 %v340_v6, %s747_s25 }
  0x70   : > { %v408_v14 = vpop.permute.xlu2 %407 }
  0x71   : > { %v413_v26 = vsel %vm283_vm0, %v408_v14, 0 }
  0x72   : > { %422 = vmatpush.bf16.xpose.msrb.mxu1 %v413_v26 }
  0x78   : > { %v466_v15 = vpop.permute.xlu2 %465 }
  0x79   : > { %v471_v20 = vsel %vm283_vm0, %v466_v15, 0 }
  0x7a   : > { %480 = vmatpush.bf16.xpose.msrb.mxu0 %v471_v20 }
  0x80   : > { %v406_v19 = vpop.permute.xlu2 %405 }
  0x88   : > { %v464_v23 = vpop.permute.xlu2 %463 }
  0x89   : > { %668 = vmatmul.msk.bf16.vlgmr.msrb.gmra.mxu0 %vm283_vm0, %v464_v23 }
  0x97   : > { %v299_v9 = vpop.f32.mrf.mxu0 }
  0x98   : > { %v303_v10 = vmul.f32 0.17677669, %v299_v9 }
  0x9a   : > { %v304_v11 = vsel %vm279_vm1, %v303_v10, -1e+30 }
  0x9b   : > { %v306_v12 = vsel %vm305_vm2, %v304_v11, -inf }
  0x9c   : > { %307 = vmax.xlane.f32.xlu0 %v306_v12 }
  0x9f   : > { %v301_v13 = vpop.f32.mrf.mxu0 }
  0xb0   : > { %346 = vrot.lane.b32.xlu0 %v345_v4, %s748_s26 }
 0x106   : > { %v482_v33 = vpop.f32.mrf.mxu0 }
 0x107   : > { %v486_v34 = vmul.f32 0.17677669, %v482_v33 }
 0x109   : > { %v487_v35 = vsel %vm279_vm1, %v486_v34, -1e+30 }
 0x10a   : > { %v488_v36 = vsel %vm305_vm2, %v487_v35, -inf }
 0x10e   : > { %v484_v37 = vpop.f32.mrf.mxu0 }
 0x10f   : > { %v308_v16 = vpop.xlane.xlu0 %307 }
 0x110   : > { %v309_v17 = vsub.f32 %v304_v11, %v308_v16 }
 0x112   : > { %v310_v18 = vmul.f32 1.442695, %v309_v17 }
 0x114   : > { %706 = vpow2.f32 %v310_v18 }
 0x11a   : > { %v707_v21 = vpop.eup %706 }
 0x11b   : > { %v312_v22 = vsel %vm305_vm2, %v707_v21, 0.0 }
 0x11c   : > { %313 = vadd.xlane.f32.xlu1 %v312_v22 }
 0x122   : > { %v347_v27 = vpop.permute.xlu0 %346 }
 0x123   : > { %v352_v28 = vsel %vm283_vm0, %v347_v27, 0 }
 0x124   : > { %361 = vmatpush.bf16.xpose.msra.mxu2 %v352_v28 }
 0x135   : > { %341 = vrot.lane.b32.xlu1 %v340_v6, %s748_s26 }
 0x15f   : > { %489 = vmax.xlane.f32.xlu1 %v488_v36 }
 0x18f   : > { %v314_v29 = vpop.xlane.xlu1 %313 }
 0x190   : > { %708 = vrcp.f32 %v314_v29 }
 0x196   : > { %v709_v30 = vpop.eup %708 }
 0x197   : > { %v316_v31 = vmul.f32 %v709_v30, %v707_v21 }
 0x199   : > { %v317_v32 = vpack.c.bf16 %v316_v31, %v316_v31 }
 0x19b   : > { %663 = vmatmul.msk.bf16.vlgmr.msra.gmra.mxu1 %vm305_vm2, %v317_v32 }
 0x1a7   : > { %v342_v38 = vpop.permute.xlu1 %341 }
 0x1a8   : > { %664 = vmatmul.msk.bf16.vlgmr.msra.gmra.mxu2 %vm283_vm0, %v342_v38 }
 0x1ab   : > { %666 = vmatmul.msk.bf16.vlgmr.msrb.gmra.mxu1 %vm283_vm0, %v406_v19 }
 0x1d2   : > { %v490_v55 = vpop.xlane.xlu1 %489 }
 0x1d3   : > { %v491_v59 = vsub.f32 %v487_v35, %v490_v55 }
 0x1d5   : > { %v492_v61 = vmul.f32 1.442695, %v491_v59 }
 0x218   : > { %v825_v39 = vpop.f32.mrf.mxu1 }
 0x220   : > { %v336_v40 = vpop.f32.mrf.mxu1 }
 0x228   : > { %v424_v41 = vpop.f32.mrf.mxu1 }
 0x229   : > { %v428_v42 = vmul.f32 0.17677669, %v424_v41 }
 0x22b   : > { %v363_v43 = vpop.f32.mrf.mxu2  ;;  %v429_v44 = vsel %vm279_vm1, %v428_v42, -1e+30 }
 0x22c   : > { %v367_v45 = vmul.f32 0.17677669, %v363_v43  ;;  %v430_v46 = vsel %vm305_vm2, %v429_v44, -inf }
 0x22d   : > { %431 = vmax.xlane.f32.xlu2 %v430_v46 }
 0x22e   : > { %v368_v47 = vsel %vm279_vm1, %v367_v45, -1e+30 }
 0x22f   : > { %v369_v48 = vsel %vm305_vm2, %v368_v47, -inf }
 0x230   : > { %v426_v49 = vpop.f32.mrf.mxu1  ;;  %370 = vmax.xlane.f32.xlu0 %v369_v48 }
 0x233   : > { %v365_v50 = vpop.f32.mrf.mxu2 }
 0x245   : > { %384 = vrot.lane.b32.xlu2 %v383_v52, %s748_s26 }
 0x2a0   : > { %v432_v53 = vpop.xlane.xlu2 %431 }
 0x2a1   : > { %v433_v54 = vsub.f32 %v429_v44, %v432_v53 }
 0x2a3   : > { %v434_v56 = vmul.f32 1.442695, %v433_v54  ;;  %v371_v57 = vpop.xlane.xlu0 %370 }
 0x2a4   : > { %v372_v58 = vsub.f32 %v368_v47, %v371_v57 }
 0x2a5   : > { %710 = vpow2.f32 %v434_v56 }
 0x2a6   : > { %v373_v60 = vmul.f32 1.442695, %v372_v58 }
 0x2a8   : > { %712 = vpow2.f32 %v373_v60  ;;  %v385_v4 = vpop.permute.xlu2 %384 }
 0x2a9   : > { %714 = vpow2.f32 %v492_v61  ;;  %v390_v5 = vsel %vm321_vm3, %v385_v4, 0 }
 0x2aa   : > { %399 = vmatpush.bf16.msra.mxu3 %v390_v5 }
 0x2ab   : > { %v711_v62 = vpop.eup %710 }
 0x2ac   : > { %v436_v63 = vsel %vm305_vm2, %v711_v62, 0.0 }
 0x2ad   : > { %437 = vadd.xlane.f32.xlu1 %v436_v63 }
 0x2ae   : > { %v713_v0 = vpop.eup %712 }
 0x2af   : > { %v375_v1 = vsel %vm305_vm2, %v713_v0, 0.0  ;;  %v715_v2 = vpop.eup %714 }
 0x2b0   : > { %376 = vadd.xlane.f32.xlu0 %v375_v1  ;;  %v494_v3 = vsel %vm305_vm2, %v715_v2, 0.0 }
 0x2b8   : > { %495 = vadd.xlane.f32.xlu0 %v494_v3 }
 0x2c6   : > { %442 = vrot.lane.b32.xlu1 %v383_v52, %s746_s24 }
 0x2cc   : > { %500 = vrot.lane.b32.xlu0 %v383_v52, %s747_s25 }
 0x320   : > { %v438_v9 = vpop.xlane.xlu1 %437 }
 0x323   : > { %v377_v6 = vpop.xlane.xlu0 %376 }
 0x324   : > { %716 = vrcp.f32 %v377_v6 }
 0x325   : > { %718 = vrcp.f32 %v438_v9 }
 0x32a   : > { %v717_v7 = vpop.eup %716 }
 0x32b   : > { %v379_v8 = vmul.f32 %v717_v7, %v713_v0  ;;  %v496_v11 = vpop.xlane.xlu0 %495  ;;  %v719_v12 = vpop.eup %718 }
 0x32c   : > { %720 = vrcp.f32 %v496_v11  ;;  %v440_v14 = vmul.f32 %v719_v12, %v711_v62 }
 0x32d   : > { %v380_v10 = vpack.c.bf16 %v379_v8, %v379_v8 }
 0x32e   : > { %v441_v18 = vpack.c.bf16 %v440_v14, %v440_v14 }
 0x32f   : > { %665 = vmatmul.msk.bf16.vlgmr.msra.gmra.mxu3 %vm305_vm2, %v380_v10 }
 0x332   : > { %v721_v16 = vpop.eup %720 }
 0x333   : > { %v498_v17 = vmul.f32 %v721_v16, %v715_v2 }
 0x335   : > { %v499_v21 = vpack.c.bf16 %v498_v17, %v498_v17 }
 0x338   : > { %v443_v13 = vpop.permute.xlu1 %442 }
 0x339   : > { %v448_v15 = vsel %vm321_vm3, %v443_v13, 0 }
 0x33a   : > { %457 = vmatpush.bf16.msrb.mxu3 %v448_v15 }
 0x33e   : > { %v501_v19 = vpop.permute.xlu0 %500 }
 0x33f   : > { %667 = vmatmul.msk.bf16.vlgmr.msrb.gmra.mxu3 %vm305_vm2, %v441_v18  ;;  %v506_v20 = vsel %vm321_vm3, %v501_v19, 0 }
 0x340   : > { %515 = vmatpush.bf16.msrb.mxu2 %v506_v20 }
 0x343   : > { %669 = vmatmul.msk.bf16.vlgmr.msrb.gmra.mxu2 %vm305_vm2, %v499_v21 }
 0x3b2   : > { %v401_v22 = vpop.f32.mrf.mxu3 }
 0x3b3   : > { %522 = vrot.lane.b32.xlu2 %v401_v22, %s747_s25 }
 0x3ba   : > { %v403_v23 = vpop.f32.mrf.mxu3 }
 0x3c2   : > { %v459_v24 = vpop.f32.mrf.mxu3 }
 0x3c3   : > { %526 = vrot.lane.b32.xlu2 %v459_v24, %s746_s24 }
 0x3c6   : > { %v517_v25 = vpop.f32.mrf.mxu2 }
 0x3c7   : > { %530 = vrot.lane.b32.xlu0 %v517_v25, %s748_s26 }
 0x3ca   : > { %v461_v26 = vpop.f32.mrf.mxu3 }
 0x3ce   : > { %v519_v27 = vpop.f32.mrf.mxu2 }
 0x40d   : > { %v523_v28 = vpop.permute.xlu2 %522 }
 0x40e   : > { %v533_v30 = vsel %vm283_vm0, %v825_v39, %v523_v28 }
 0x41d   : > { %v527_v29 = vpop.permute.xlu2 %526 }
 0x41e   : > { %v535_v31 = vsel %vm534_vm4, %v533_v30, %v527_v29 }
 0x439   : > { %v531_v32 = vpop.permute.xlu0 %530 }
 0x43a   : > { %v537_v33 = vsel %vm536_vm5, %v535_v31, %v531_v32 }
 0x43b   : > { %v538_v34 = vpack.c.bf16 %v537_v33, %v537_v33 }
 0x43d   : > { %539 = vst [vmem:[%s275_s7] sm:$0xf] %v538_v34 }
 0x43e PF: > { %s13_s14 = sadd.s32 1, %s744_s14   ;;  %s865_s12 = smov %s740_s13 }
 0x43f   : > { %p10_p5 = scmp.ge.s32.totalorder %s13_s14, 4   ;;  %s866_s13 = smov %s868_s15 }
 0x441   :  { %12 = sbr.rel (!%p10_p5) target bundleno = 2 (0x2), region = 68 }

// kernel: _lambda_.34
= control target key start
LH: loop header
LB: loop body
LE: loop exit
PB: predicated region body
PF: predicated region fallthrough
CT: control target
= control target key end

     0   :  { %s249_s1 = inlined_call_operand.vmem [shape: bf16[128,128], index: 1, kind: input, shape index: {}]   ;;  %s250_s2 = inlined_call_operand.vmem [shape: f32[1,128], index: 2, kind: input, shape index: {}]   ;;  %s251_s0 = inlined_call_operand.vmem [shape: bf16[16,128], index: 0, kind: input, shape index: {}]   ;;  %s252_s3 = inlined_call_operand.vmem [shape: f32[16,128], index: 3, kind: input, shape index: {}]   ;;  %s253_s4 = inlined_call_operand.vmem [shape: f32[16,128], index: 4, kind: output, shape index: {}]  }
   0x1   :  { %v180_v0 = vld [vmem:[%s249_s1 + $0x38] sm:$0xff]  ;;  %v179_v1 = vld [vmem:[%s249_s1 + $0x30] sm:$0xff]  ;;  %v178_v2 = vld [vmem:[%s249_s1 + $0x28] sm:$0xff] }
   0x2   :  { %97 = vmatpush.bf16.msra.mxu0 %v180_v0  ;;  %v177_v3 = vld [vmem:[%s249_s1 + $0x20] sm:$0xff]  ;;  %v176_v4 = vld [vmem:[%s249_s1 + $0x18] sm:$0xff]  ;;  %v175_v5 = vld [vmem:[%s249_s1 + $0x10] sm:$0xff] }
   0x3   :  { %v174_v6 = vld [vmem:[%s249_s1 + $0x8] sm:$0xff]  ;;  %v173_v7 = vld [vmem:[%s249_s1] sm:$0xff] }
   0x4   :  { %v172_v8 = vld [vmem:[%s251_s0] sm:$0xff]  ;;  %v127_v15 = vld [vmem:[%s252_s3 + $0x8] sm:$0xff] }
   0x5   :  { %v181_v9 = vld [vmem:[%s250_s2] ss:$0 sm:$0xff] }
   0x6   :  { %98 = vmatpush.bf16.msra.mxu0 %v179_v1  ;;  %v126_v11 = vld [vmem:[%s252_s3] sm:$0xff] }
   0xa   :  { %99 = vmatpush.bf16.msra.mxu0 %v178_v2 }
   0xe   :  { %100 = vmatpush.bf16.msra.mxu0 %v177_v3 }
  0x12   :  { %101 = vmatpush.bf16.msra.mxu0 %v176_v4 }
  0x16   :  { %102 = vmatpush.bf16.msra.mxu0 %v175_v5 }
  0x1a   :  { %103 = vmatpush.bf16.msra.mxu0 %v174_v6 }
  0x1e   :  { %104 = vmatpush.bf16.msra.mxu0 %v173_v7 }
  0x21   :  { %105 = vmatmul.bf16.vlgmr.msra.gmra.mxu0 %v172_v8 }
  0x9e   :  { %v106_v10 = vpop.f32.mrf.mxu0 }
  0x9f   :  { %v124_v12 = vadd.f32 %v181_v9, %v106_v10 }
  0xa1   :  { %v128_v13 = vadd.f32 %v126_v11, %v124_v12 }
  0xa3   :  { %130 = vst [vmem:[%s253_s4] sm:$0xff] %v128_v13 }
  0xa6   :  { %v108_v14 = vpop.f32.mrf.mxu0 }
  0xa7   :  { %v125_v16 = vadd.f32 %v181_v9, %v108_v14 }
  0xa9   :  { %v129_v17 = vadd.f32 %v127_v15, %v125_v16 }
  0xab   :  { %131 = vst [vmem:[%s253_s4 + $0x8] sm:$0xff] %v129_v17 }

// kernel: _lambda_.32
= control target key start
LH: loop header
LB: loop body
LE: loop exit
PB: predicated region body
PF: predicated region fallthrough
CT: control target
= control target key end

     0   :  { %v458_v2 = vmov 128.0   ;;  %s676_s0 = inlined_call_operand.vmem [shape: f32[16,128], index: 0, kind: input, shape index: {}]   ;;  %s677_s1 = inlined_call_operand.vmem [shape: f32[1,128], index: 1, kind: input, shape index: {}]   ;;  %s678_s2 = inlined_call_operand.vmem [shape: f32[1,128], index: 2, kind: input, shape index: {}]   ;;  %s679_s3 = inlined_call_operand.vmem [shape: bf16[128,384], index: 3, kind: input, shape index: {}]   ;;  %s680_s4 = inlined_call_operand.vmem [shape: f32[1,384], index: 4, kind: input, shape index: {}]   ;;  %s681_s5 = inlined_call_operand.vmem [shape: bf16[16,384], index: 5, kind: output, shape index: {}]  }
   0x1   :  { %v24_v0 = vld [vmem:[%s676_s0] sm:$0xff]  ;;  %v25_v1 = vld [vmem:[%s676_s0 + $0x8] sm:$0xff]  ;;  %452 = vrcp.f32 %v458_v2  ;;  %v442_v18 = vld [vmem:[%s679_s3 + $0xb0] sm:$0xf0] }
   0x2   :  { %26 = vadd.xlane.f32.xlu0 %v24_v0  ;;  %v409_v17 = vld [vmem:[%s679_s3 + $0xa8] sm:$0xf]  ;;  %v441_v19 = vld [vmem:[%s679_s3 + $0xac] sm:$0xf]  ;;  %v411_v21 = vld [vmem:[%s679_s3 + $0xb4] sm:$0xf0] }
   0x3   :  { %v410_v20 = vor.u32 %v442_v18, %v409_v17  ;;  %v417_v22 = vld [vmem:[%s679_s3 + $0xb0] sm:$0xf]  ;;  %v443_v23 = vld [vmem:[%s679_s3 + $0xb8] sm:$0xf0]  ;;  %v414_v24 = vor.u32 %v441_v19, %v411_v21  ;;  %v438_v28 = vld [vmem:[%s679_s3 + $0x94] sm:$0xf] }
   0x4   :  { %v418_v25 = vor.u32 %v443_v23, %v417_v22  ;;  %v397_v26 = vld [vmem:[%s679_s3 + $0x90] sm:$0xf]  ;;  %v439_v27 = vld [vmem:[%s679_s3 + $0x98] sm:$0xf0]  ;;  %v399_v30 = vld [vmem:[%s679_s3 + $0x9c] sm:$0xf0] }
   0x5   :  { %265 = vmatpush.bf16.msra.mxu0 %v410_v20  ;;  %279 = vmatpush.bf16.msra.mxu1 %v414_v24  ;;  %v398_v29 = vor.u32 %v439_v27, %v397_v26  ;;  %v405_v31 = vld [vmem:[%s679_s3 + $0x98] sm:$0xf]  ;;  %v440_v32 = vld [vmem:[%s679_s3 + $0xa0] sm:$0xf0]  ;;  %v402_v33 = vor.u32 %v438_v28, %v399_v30  ;;  %v435_v37 = vld [vmem:[%s679_s3 + $0x7c] sm:$0xf] }
   0x6   :  { %293 = vmatpush.bf16.msra.mxu2 %v418_v25  ;;  %v406_v34 = vor.u32 %v440_v32, %v405_v31  ;;  %v385_v35 = vld [vmem:[%s679_s3 + $0x78] sm:$0xf]  ;;  %v436_v36 = vld [vmem:[%s679_s3 + $0x80] sm:$0xf0]  ;;  %v387_v39 = vld [vmem:[%s679_s3 + $0x84] sm:$0xf0] }
   0x7   :  { %v453_v3 = vpop.eup %452  ;;  %v386_v38 = vor.u32 %v436_v36, %v385_v35  ;;  %v393_v40 = vld [vmem:[%s679_s3 + $0x80] sm:$0xf]  ;;  %v437_v41 = vld [vmem:[%s679_s3 + $0x88] sm:$0xf0]  ;;  %v390_v42 = vor.u32 %v435_v37, %v387_v39  ;;  %v432_v46 = vld [vmem:[%s679_s3 + $0x64] sm:$0xf] }
   0x8   :  { %v31_v4 = vmul.f32 128.0, %v453_v3  ;;  %vm35_vm0 = vweird.f32 %v453_v3  ;;  %v394_v43 = vor.u32 %v437_v41, %v393_v40  ;;  %v373_v44 = vld [vmem:[%s679_s3 + $0x60] sm:$0xf]  ;;  %v433_v45 = vld [vmem:[%s679_s3 + $0x68] sm:$0xf0] }
   0x9   :  { %266 = vmatpush.bf16.msra.mxu0 %v398_v29  ;;  %280 = vmatpush.bf16.msra.mxu1 %v402_v33  ;;  %v374_v47 = vor.u32 %v433_v45, %v373_v44  ;;  %v375_v48 = vld [vmem:[%s679_s3 + $0x6c] sm:$0xf0]  ;;  %v381_v49 = vld [vmem:[%s679_s3 + $0x68] sm:$0xf]  ;;  %v434_v50 = vld [vmem:[%s679_s3 + $0x70] sm:$0xf0] }
   0xa   :  { %28 = vadd.xlane.f32.xlu0 %v25_v1  ;;  %v32_v5 = vsub.f32 1.0, %v31_v4  ;;  %294 = vmatpush.bf16.msra.mxu2 %v406_v34  ;;  %v378_v51 = vor.u32 %v432_v46, %v375_v48  ;;  %v382_v52 = vor.u32 %v434_v50, %v381_v49  ;;  %v361_v53 = vld [vmem:[%s679_s3 + $0x48] sm:$0xf]  ;;  %v430_v54 = vld [vmem:[%s679_s3 + $0x50] sm:$0xf0] }
   0xb   :  { %v429_v55 = vld [vmem:[%s679_s3 + $0x4c] sm:$0xf]  ;;  %v362_v56 = vor.u32 %v430_v54, %v361_v53  ;;  %v363_v57 = vld [vmem:[%s679_s3 + $0x54] sm:$0xf0]  ;;  %v369_v58 = vld [vmem:[%s679_s3 + $0x50] sm:$0xf] }
   0xc   :  { %v33_v6 = vmul.f32 %v453_v3, %v32_v5  ;;  %v431_v59 = vld [vmem:[%s679_s3 + $0x58] sm:$0xf0]  ;;  %v366_v61 = vor.u32 %v429_v55, %v363_v57  ;;  %v426_v2 = vld [vmem:[%s679_s3 + $0x34] sm:$0xf]  ;;  %v351_v5 = vld [vmem:[%s679_s3 + $0x3c] sm:$0xf0] }
   0xd   :  { %267 = vmatpush.bf16.msra.mxu0 %v386_v38  ;;  %281 = vmatpush.bf16.msra.mxu1 %v390_v42  ;;  %v370_v62 = vor.u32 %v431_v59, %v369_v58  ;;  %v339_v17 = vld [vmem:[%s679_s3 + $0x24] sm:$0xf0]  ;;  %v345_v18 = vld [vmem:[%s679_s3 + $0x20] sm:$0xf]  ;;  %v425_v19 = vld [vmem:[%s679_s3 + $0x28] sm:$0xf0] }
   0xe   :  { %v34_v7 = vadd.f32 %v453_v3, %v33_v6  ;;  %295 = vmatpush.bf16.msra.mxu2 %v394_v43  ;;  %v357_v6 = vld [vmem:[%s679_s3 + $0x38] sm:$0xf]  ;;  %v346_v22 = vor.u32 %v425_v19, %v345_v18  ;;  %v325_v23 = vld [vmem:[%s679_s3] sm:$0xf]  ;;  %v421_v24 = vld [vmem:[%s679_s3 + $0x8] sm:$0xf0] }
   0xf   :  { %v420_v25 = vld [vmem:[%s679_s3 + $0x4] sm:$0xf]  ;;  %v326_v27 = vor.u32 %v421_v24, %v325_v23  ;;  %v327_v28 = vld [vmem:[%s679_s3 + $0xc] sm:$0xf0]  ;;  %v333_v29 = vld [vmem:[%s679_s3 + $0x8] sm:$0xf] }
  0x10   :  { %v495_v8 = vsel %vm35_vm0, %v453_v3, %v34_v7  ;;  %v354_v7 = vor.u32 %v426_v2, %v351_v5  ;;  %v422_v30 = vld [vmem:[%s679_s3 + $0x10] sm:$0xf0]  ;;  %v330_v31 = vor.u32 %v420_v25, %v327_v28  ;;  %v450_v45 = vld [vmem:[%s677_s1] ss:$0 sm:$0xff] }
  0x11   :  { %268 = vmatpush.bf16.msra.mxu0 %v374_v47  ;;  %282 = vmatpush.bf16.msra.mxu1 %v378_v51  ;;  %v451_v49 = vld [vmem:[%s678_s2] ss:$0 sm:$0xff] }
  0x12   :  { %296 = vmatpush.bf16.msra.mxu2 %v382_v52 }
  0x15   :  { %269 = vmatpush.bf16.msra.mxu0 %v362_v56  ;;  %283 = vmatpush.bf16.msra.mxu1 %v366_v61 }
  0x16   :  { %297 = vmatpush.bf16.msra.mxu2 %v370_v62 }
  0x19   :  { %284 = vmatpush.bf16.msra.mxu1 %v354_v7 }
  0x75   :  { %v27_v9 = vpop.xlane.xlu0 %26 }
  0x76   :  { %v37_v10 = vmul.f32 %v495_v8, %v27_v9  ;;  %v428_v9 = vld [vmem:[%s679_s3 + $0x40] sm:$0xf0] }
  0x78   :  { %v498_v11 = vsub.f32 %v24_v0, %v37_v10  ;;  %v349_v0 = vld [vmem:[%s679_s3 + $0x30] sm:$0xf]  ;;  %v358_v10 = vor.u32 %v428_v9, %v357_v6 }
  0x7a   :  { %v41_v12 = vmul.f32 %v498_v11, %v498_v11  ;;  %298 = vmatpush.bf16.msra.mxu2 %v358_v10 }
  0x7c   :  { %43 = vadd.xlane.f32.xlu1 %v41_v12  ;;  %v337_v12 = vld [vmem:[%s679_s3 + $0x18] sm:$0xf] }
  0x7d   :  { %v29_v13 = vpop.xlane.xlu0 %28 }
  0x7e   :  { %v38_v14 = vmul.f32 %v495_v8, %v29_v13  ;;  %v424_v13 = vld [vmem:[%s679_s3 + $0x20] sm:$0xf0]  ;;  %299 = vmatpush.bf16.msra.mxu2 %v346_v22 }
  0x80   :  { %v503_v15 = vsub.f32 %v25_v1, %v38_v14  ;;  %v427_v1 = vld [vmem:[%s679_s3 + $0x38] sm:$0xf0] }
  0x81   :  { %v350_v4 = vor.u32 %v427_v1, %v349_v0  ;;  %v423_v14 = vld [vmem:[%s679_s3 + $0x1c] sm:$0xf] }
  0x82   :  { %v42_v16 = vmul.f32 %v503_v15, %v503_v15  ;;  %v342_v21 = vor.u32 %v423_v14, %v339_v17 }
  0x83   :  { %270 = vmatpush.bf16.msra.mxu0 %v350_v4 }
  0x84   :  { %45 = vadd.xlane.f32.xlu1 %v42_v16  ;;  %v338_v16 = vor.u32 %v424_v13, %v337_v12  ;;  %285 = vmatpush.bf16.msra.mxu1 %v342_v21 }
  0x87   :  { %271 = vmatpush.bf16.msra.mxu0 %v338_v16 }
  0x88   :  { %286 = vmatpush.bf16.msra.mxu1 %v330_v31 }
  0x8b   :  { %272 = vmatpush.bf16.msra.mxu0 %v326_v27 }
  0xef   :  { %v44_v60 = vpop.xlane.xlu1 %43 }
  0xf0   :  { %v47_v63 = vmul.f32 %v44_v60, %v495_v8 }
  0xf2   :  { %v49_v3 = vadd.f32 1e-05, %v47_v63 }
  0xf4   :  { %454 = vrsqrt.f32 %v49_v3  ;;  %vm57_vm2 = vweird.f32 %v49_v3 }
  0xf7   :  { %v46_v20 = vpop.xlane.xlu1 %45 }
  0xf8   :  { %v48_v26 = vmul.f32 %v46_v20, %v495_v8  ;;  %v334_v8 = vor.u32 %v422_v30, %v333_v29 }
  0xfa   :  { %v455_v32 = vpop.eup %454  ;;  %v50_v33 = vadd.f32 1e-05, %v48_v26  ;;  %300 = vmatpush.bf16.msra.mxu2 %v334_v8 }
  0xfb   :  { %v52_v34 = vmul.f32 %v455_v32, %v49_v3  ;;  %vm58_vm1 = vweird.f32 %v455_v32 }
  0xfc   :  { %456 = vrsqrt.f32 %v50_v33  ;;  %vm59_vm3 = vmor %vm57_vm2, %vm58_vm1  ;;  %vm67_vm5 = vweird.f32 %v50_v33 }
  0xfd   :  { %v53_v35 = vmul.f32 %v455_v32, %v52_v34 }
  0xff   :  { %v54_v36 = vmul.f32 0.5, %v53_v35 }
 0x101   :  { %v55_v37 = vsub.f32 1.5, %v54_v36 }
 0x102   :  { %v457_v38 = vpop.eup %456 }
 0x103   :  { %v56_v39 = vmul.f32 %v455_v32, %v55_v37  ;;  %v62_v40 = vmul.f32 %v457_v38, %v50_v33  ;;  %vm68_vm4 = vweird.f32 %v457_v38 }
 0x104   :  { %vm69_vm6 = vmor %vm67_vm5, %vm68_vm4 }
 0x105   :  { %v63_v41 = vmul.f32 %v457_v38, %v62_v40  ;;  %v60_v42 = vsel %vm59_vm3, %v455_v32, %v56_v39 }
 0x106   :  { %v71_v46 = vmul.f32 %v60_v42, %v498_v11  ;;  %v123_v11 = vld [vmem:[%s680_s4] sm:$0x7] }
 0x107   :  { %v64_v43 = vmul.f32 0.5, %v63_v41  ;;  %v125_v57 = vperm.slane %v123_v11, 0  ;;  %v126_v58 = vperm.slane %v123_v11, 1  ;;  %v127_v63 = vperm.slane %v123_v11, 2 }
 0x108   :  { %v77_v50 = vmul.f32 %v450_v45, %v71_v46 }
 0x109   :  { %v65_v44 = vsub.f32 1.5, %v64_v43 }
 0x10a   :  { %v83_v53 = vadd.f32 %v451_v49, %v77_v50 }
 0x10b   :  { %v66_v47 = vmul.f32 %v457_v38, %v65_v44 }
 0x10d   :  { %v70_v48 = vsel %vm69_vm6, %v457_v38, %v66_v47 }
 0x10e   :  { %v72_v51 = vmul.f32 %v70_v48, %v503_v15 }
 0x110   :  { %v78_v52 = vmul.f32 %v450_v45, %v72_v51 }
 0x112   :  { %v84_v54 = vadd.f32 %v451_v49, %v78_v52 }
 0x114   :  { %v447_v55 = vpack.c.bf16 %v84_v54, %v83_v53 }
 0x116   :  { %448 = vst [vmem:[#allocation2] sm:$0xff] %v447_v55  }
 0x11d   :  { %v419_v56 = vld [vmem:[#allocation2] sm:$0xff] }
 0x11e   :  { %273 = vmatmul.bf16.vlgmr.msra.gmra.mxu0 %v419_v56  ;;  %287 = vmatmul.bf16.vlgmr.msra.gmra.mxu1 %v419_v56 }
 0x11f   :  { %301 = vmatmul.bf16.vlgmr.msra.gmra.mxu2 %v419_v56 }
 0x19b   :  { %v274_v59 = vpop.f32.mrf.mxu0  ;;  %v288_v60 = vpop.f32.mrf.mxu1 }
 0x19c   :  { %v275_v61 = vadd.f32 %v274_v59, %v125_v57  ;;  %v289_v62 = vadd.f32 %v288_v60, %v126_v58 }
 0x19e   :  { %v307_v15 = vpack.c.bf16 %v289_v62, %v275_v61 }
 0x1a0   :  { %311 = vst [vmem:[%s681_s5] sm:$0xff] %v307_v15 }
 0x1a2   :  { %v302_v0 = vpop.f32.mrf.mxu2 }
 0x1a3   :  { %v303_v1 = vadd.f32 %v302_v0, %v127_v63  ;;  %v276_v2 = vpop.f32.mrf.mxu0  ;;  %v290_v3 = vpop.f32.mrf.mxu1 }
 0x1a4   :  { %v277_v4 = vadd.f32 %v276_v2, %v125_v57  ;;  %v291_v5 = vadd.f32 %v290_v3, %v126_v58 }
 0x1a5   :  { %v308_v6 = vpack.c.bf16 %v303_v1, %v303_v1 }
 0x1a6   :  { %v309_v7 = vpack.c.bf16 %v291_v5, %v277_v4 }
 0x1a7   :  { %312 = vst [vmem:[%s681_s5 + $0x8] sm:$0xf] %v308_v6 }
 0x1a8   :  { %313 = vst [vmem:[%s681_s5 + $0xc] sm:$0xff] %v309_v7 }
 0x1aa   :  { %v304_v9 = vpop.f32.mrf.mxu2 }
 0x1ab   :  { %v305_v10 = vadd.f32 %v304_v9, %v127_v63 }
 0x1ad   :  { %v310_v12 = vpack.c.bf16 %v305_v10, %v305_v10 }
 0x1af   :  { %314 = vst [vmem:[%s681_s5 + $0x14] sm:$0xf] %v310_v12 }

// kernel: _lambda_.35
= control target key start
LH: loop header
LB: loop body
LE: loop exit
PB: predicated region body
PF: predicated region fallthrough
CT: control target
= control target key end

     0   :  { %v634_v2 = vmov 128.0   ;;  %s947_s0 = inlined_call_operand.vmem [shape: f32[16,128], index: 0, kind: input, shape index: {}]   ;;  %s948_s1 = inlined_call_operand.vmem [shape: f32[1,128], index: 1, kind: input, shape index: {}]   ;;  %s949_s2 = inlined_call_operand.vmem [shape: f32[1,128], index: 2, kind: input, shape index: {}]   ;;  %s950_s3 = inlined_call_operand.vmem [shape: bf16[128,512], index: 3, kind: input, shape index: {}]   ;;  %s951_s4 = inlined_call_operand.vmem [shape: f32[1,512], index: 4, kind: input, shape index: {}]   ;;  %s952_s5 = inlined_call_operand.vmem [shape: bf16[16,512], index: 5, kind: output, shape index: {}]  }
   0x1   :  { %v24_v0 = vld [vmem:[%s947_s0] sm:$0xff]  ;;  %v25_v1 = vld [vmem:[%s947_s0 + $0x8] sm:$0xff]  ;;  %612 = vrcp.f32 %v634_v2  ;;  %v602_v18 = vld [vmem:[%s950_s3 + $0xec] sm:$0xf0] }
   0x2   :  { %26 = vadd.xlane.f32.xlu0 %v24_v0  ;;  %v557_v17 = vld [vmem:[%s950_s3 + $0xe0] sm:$0xf]  ;;  %v600_v19 = vld [vmem:[%s950_s3 + $0xe4] sm:$0xf]  ;;  %v559_v21 = vld [vmem:[%s950_s3 + $0xf0] sm:$0xf0] }
   0x3   :  { %v558_v20 = vor.u32 %v602_v18, %v557_v17  ;;  %v565_v22 = vld [vmem:[%s950_s3 + $0xe8] sm:$0xf]  ;;  %v603_v23 = vld [vmem:[%s950_s3 + $0xf4] sm:$0xf0]  ;;  %v562_v24 = vor.u32 %v600_v19, %v559_v21  ;;  %v601_v26 = vld [vmem:[%s950_s3 + $0xec] sm:$0xf] }
   0x4   :  { %v566_v25 = vor.u32 %v603_v23, %v565_v22  ;;  %v567_v27 = vld [vmem:[%s950_s3 + $0xf8] sm:$0xf0]  ;;  %v541_v29 = vld [vmem:[%s950_s3 + $0xc0] sm:$0xf]  ;;  %v598_v30 = vld [vmem:[%s950_s3 + $0xcc] sm:$0xf0] }
   0x5   :  { %299 = vmatpush.bf16.msra.mxu0 %v558_v20  ;;  %v570_v28 = vor.u32 %v601_v26, %v567_v27  ;;  %313 = vmatpush.bf16.msra.mxu1 %v562_v24  ;;  %v596_v31 = vld [vmem:[%s950_s3 + $0xc4] sm:$0xf]  ;;  %v542_v32 = vor.u32 %v598_v30, %v541_v29  ;;  %v543_v33 = vld [vmem:[%s950_s3 + $0xd0] sm:$0xf0]  ;;  %v549_v34 = vld [vmem:[%s950_s3 + $0xc8] sm:$0xf] }
   0x6   :  { %327 = vmatpush.bf16.msra.mxu2 %v566_v25  ;;  %v599_v35 = vld [vmem:[%s950_s3 + $0xd4] sm:$0xf0]  ;;  %v546_v36 = vor.u32 %v596_v31, %v543_v33  ;;  %v597_v38 = vld [vmem:[%s950_s3 + $0xcc] sm:$0xf]  ;;  %v551_v39 = vld [vmem:[%s950_s3 + $0xd8] sm:$0xf0] }
   0x7   :  { %v613_v3 = vpop.eup %612  ;;  %341 = vmatpush.bf16.msra.mxu3 %v570_v28  ;;  %v550_v37 = vor.u32 %v599_v35, %v549_v34  ;;  %v554_v40 = vor.u32 %v597_v38, %v551_v39  ;;  %v525_v41 = vld [vmem:[%s950_s3 + $0xa0] sm:$0xf]  ;;  %v594_v42 = vld [vmem:[%s950_s3 + $0xac] sm:$0xf0]  ;;  %v592_v43 = vld [vmem:[%s950_s3 + $0xa4] sm:$0xf] }
   0x8   :  { %v31_v4 = vmul.f32 128.0, %v613_v3  ;;  %vm35_vm0 = vweird.f32 %v613_v3  ;;  %v526_v44 = vor.u32 %v594_v42, %v525_v41  ;;  %v527_v45 = vld [vmem:[%s950_s3 + $0xb0] sm:$0xf0]  ;;  %v533_v46 = vld [vmem:[%s950_s3 + $0xa8] sm:$0xf] }
   0x9   :  { %300 = vmatpush.bf16.msra.mxu0 %v542_v32  ;;  %314 = vmatpush.bf16.msra.mxu1 %v546_v36  ;;  %v595_v47 = vld [vmem:[%s950_s3 + $0xb4] sm:$0xf0]  ;;  %v530_v48 = vor.u32 %v592_v43, %v527_v45  ;;  %v593_v50 = vld [vmem:[%s950_s3 + $0xac] sm:$0xf]  ;;  %v535_v51 = vld [vmem:[%s950_s3 + $0xb8] sm:$0xf0] }
   0xa   :  { %28 = vadd.xlane.f32.xlu0 %v25_v1  ;;  %v32_v5 = vsub.f32 1.0, %v31_v4  ;;  %328 = vmatpush.bf16.msra.mxu2 %v550_v37  ;;  %v534_v49 = vor.u32 %v595_v47, %v533_v46  ;;  %v538_v52 = vor.u32 %v593_v50, %v535_v51  ;;  %v509_v53 = vld [vmem:[%s950_s3 + $0x80] sm:$0xf]  ;;  %v590_v54 = vld [vmem:[%s950_s3 + $0x8c] sm:$0xf0] }
   0xb   :  { %342 = vmatpush.bf16.msra.mxu3 %v554_v40  ;;  %v588_v55 = vld [vmem:[%s950_s3 + $0x84] sm:$0xf]  ;;  %v510_v56 = vor.u32 %v590_v54, %v509_v53  ;;  %v511_v57 = vld [vmem:[%s950_s3 + $0x90] sm:$0xf0]  ;;  %v517_v58 = vld [vmem:[%s950_s3 + $0x88] sm:$0xf] }
   0xc   :  { %v33_v6 = vmul.f32 %v613_v3, %v32_v5  ;;  %v591_v59 = vld [vmem:[%s950_s3 + $0x94] sm:$0xf0]  ;;  %v514_v60 = vor.u32 %v588_v55, %v511_v57  ;;  %v589_v62 = vld [vmem:[%s950_s3 + $0x8c] sm:$0xf]  ;;  %v519_v63 = vld [vmem:[%s950_s3 + $0x98] sm:$0xf0] }
   0xd   :  { %301 = vmatpush.bf16.msra.mxu0 %v526_v44  ;;  %315 = vmatpush.bf16.msra.mxu1 %v530_v48  ;;  %v518_v61 = vor.u32 %v591_v59, %v517_v58  ;;  %v586_v2 = vld [vmem:[%s950_s3 + $0x6c] sm:$0xf0]  ;;  %v495_v5 = vld [vmem:[%s950_s3 + $0x70] sm:$0xf0]  ;;  %v477_v18 = vld [vmem:[%s950_s3 + $0x40] sm:$0xf] }
   0xe   :  { %v34_v7 = vadd.f32 %v613_v3, %v33_v6  ;;  %329 = vmatpush.bf16.msra.mxu2 %v534_v49  ;;  %v501_v6 = vld [vmem:[%s950_s3 + $0x68] sm:$0xf]  ;;  %v582_v19 = vld [vmem:[%s950_s3 + $0x4c] sm:$0xf0]  ;;  %v580_v20 = vld [vmem:[%s950_s3 + $0x44] sm:$0xf] }
   0xf   :  { %343 = vmatpush.bf16.msra.mxu3 %v538_v52  ;;  %v478_v22 = vor.u32 %v582_v19, %v477_v18  ;;  %v479_v23 = vld [vmem:[%s950_s3 + $0x50] sm:$0xf0]  ;;  %v485_v24 = vld [vmem:[%s950_s3 + $0x48] sm:$0xf]  ;;  %v583_v26 = vld [vmem:[%s950_s3 + $0x54] sm:$0xf0] }
  0x10   :  { %v671_v8 = vsel %vm35_vm0, %v613_v3, %v34_v7  ;;  %v584_v3 = vld [vmem:[%s950_s3 + $0x64] sm:$0xf]  ;;  %v587_v7 = vld [vmem:[%s950_s3 + $0x74] sm:$0xf0]  ;;  %v482_v25 = vor.u32 %v580_v20, %v479_v23  ;;  %v581_v27 = vld [vmem:[%s950_s3 + $0x4c] sm:$0xf]  ;;  %v486_v29 = vor.u32 %v583_v26, %v485_v24 }
  0x11   :  { %302 = vmatpush.bf16.msra.mxu0 %v510_v56  ;;  %316 = vmatpush.bf16.msra.mxu1 %v514_v60  ;;  %v487_v28 = vld [vmem:[%s950_s3 + $0x58] sm:$0xf0]  ;;  %v461_v31 = vld [vmem:[%s950_s3 + $0x20] sm:$0xf]  ;;  %v578_v32 = vld [vmem:[%s950_s3 + $0x2c] sm:$0xf0] }
  0x12   :  { %330 = vmatpush.bf16.msra.mxu2 %v518_v61  ;;  %v490_v30 = vor.u32 %v581_v27, %v487_v28  ;;  %v576_v33 = vld [vmem:[%s950_s3 + $0x24] sm:$0xf]  ;;  %v462_v34 = vor.u32 %v578_v32, %v461_v31  ;;  %v463_v35 = vld [vmem:[%s950_s3 + $0x30] sm:$0xf0]  ;;  %v469_v36 = vld [vmem:[%s950_s3 + $0x28] sm:$0xf] }
  0x13   :  { %v579_v37 = vld [vmem:[%s950_s3 + $0x34] sm:$0xf0]  ;;  %v466_v39 = vor.u32 %v576_v33, %v463_v35  ;;  %v577_v41 = vld [vmem:[%s950_s3 + $0x2c] sm:$0xf]  ;;  %v471_v42 = vld [vmem:[%s950_s3 + $0x38] sm:$0xf0] }
  0x14   :  { %v470_v40 = vor.u32 %v579_v37, %v469_v36  ;;  %v445_v43 = vld [vmem:[%s950_s3] sm:$0xf]  ;;  %v474_v45 = vor.u32 %v577_v41, %v471_v42  ;;  %v574_v46 = vld [vmem:[%s950_s3 + $0xc] sm:$0xf0]  ;;  %v572_v47 = vld [vmem:[%s950_s3 + $0x4] sm:$0xf] }
  0x15   :  { %v447_v48 = vld [vmem:[%s950_s3 + $0x10] sm:$0xf0]  ;;  %v446_v49 = vor.u32 %v574_v46, %v445_v43  ;;  %v575_v51 = vld [vmem:[%s950_s3 + $0x14] sm:$0xf0]  ;;  %v573_v52 = vld [vmem:[%s950_s3 + $0xc] sm:$0xf] }
  0x16   :  { %v450_v50 = vor.u32 %v572_v47, %v447_v48  ;;  %v455_v56 = vld [vmem:[%s950_s3 + $0x18] sm:$0xf0] }
  0x17   :  { %v458_v58 = vor.u32 %v573_v52, %v455_v56 }
  0x75   :  { %v27_v9 = vpop.xlane.xlu0 %26 }
  0x76   :  { %v37_v10 = vmul.f32 %v671_v8, %v27_v9 }
  0x78   :  { %v674_v11 = vsub.f32 %v24_v0, %v37_v10  ;;  %v522_v0 = vor.u32 %v589_v62, %v519_v63  ;;  %v498_v10 = vor.u32 %v584_v3, %v495_v5  ;;  %v610_v5 = vld [vmem:[%s948_s1] ss:$0 sm:$0xff] }
  0x7a   :  { %v41_v12 = vmul.f32 %v674_v11, %v674_v11  ;;  %344 = vmatpush.bf16.msra.mxu3 %v522_v0  ;;  %317 = vmatpush.bf16.msra.mxu1 %v498_v10  ;;  %v611_v10 = vld [vmem:[%s949_s2] ss:$0 sm:$0xff] }
  0x7c   :  { %43 = vadd.xlane.f32.xlu1 %v41_v12  ;;  %v502_v12 = vor.u32 %v587_v7, %v501_v6 }
  0x7d   :  { %v29_v13 = vpop.xlane.xlu0 %28 }
  0x7e   :  { %v38_v14 = vmul.f32 %v671_v8, %v29_v13  ;;  %v585_v13 = vld [vmem:[%s950_s3 + $0x6c] sm:$0xf]  ;;  %331 = vmatpush.bf16.msra.mxu2 %v502_v12  ;;  %318 = vmatpush.bf16.msra.mxu1 %v482_v25 }
  0x80   :  { %v679_v15 = vsub.f32 %v25_v1, %v38_v14  ;;  %v493_v1 = vld [vmem:[%s950_s3 + $0x60] sm:$0xf]  ;;  %v503_v14 = vld [vmem:[%s950_s3 + $0x78] sm:$0xf0] }
  0x81   :  { %v494_v4 = vor.u32 %v586_v2, %v493_v1  ;;  %v506_v17 = vor.u32 %v585_v13, %v503_v14 }
  0x82   :  { %v42_v16 = vmul.f32 %v679_v15, %v679_v15  ;;  %332 = vmatpush.bf16.msra.mxu2 %v486_v29  ;;  %319 = vmatpush.bf16.msra.mxu1 %v466_v39 }
  0x83   :  { %303 = vmatpush.bf16.msra.mxu0 %v494_v4  ;;  %345 = vmatpush.bf16.msra.mxu3 %v506_v17 }
  0x84   :  { %45 = vadd.xlane.f32.xlu1 %v42_v16 }
  0x86   :  { %333 = vmatpush.bf16.msra.mxu2 %v470_v40  ;;  %320 = vmatpush.bf16.msra.mxu1 %v450_v50 }
  0x87   :  { %304 = vmatpush.bf16.msra.mxu0 %v478_v22  ;;  %346 = vmatpush.bf16.msra.mxu3 %v490_v30 }
  0x8b   :  { %305 = vmatpush.bf16.msra.mxu0 %v462_v34  ;;  %347 = vmatpush.bf16.msra.mxu3 %v474_v45 }
  0x8f   :  { %306 = vmatpush.bf16.msra.mxu0 %v446_v49  ;;  %348 = vmatpush.bf16.msra.mxu3 %v458_v58 }
  0xef   :  { %v44_v9 = vpop.xlane.xlu1 %43 }
  0xf0   :  { %v47_v16 = vmul.f32 %v44_v9, %v671_v8 }
  0xf2   :  { %v813_v21 = vadd.f32 1e-05, %v47_v16 }
  0xf4   :  { %614 = vrsqrt.f32 %v813_v21  ;;  %vm57_vm2 = vweird.f32 %v813_v21 }
  0xf7   :  { %v46_v38 = vpop.xlane.xlu1 %45 }
  0xf8   :  { %v48_v44 = vmul.f32 %v46_v38, %v671_v8  ;;  %v453_v8 = vld [vmem:[%s950_s3 + $0x8] sm:$0xf] }
  0xf9   :  { %v454_v55 = vor.u32 %v575_v51, %v453_v8 }
  0xfa   :  { %v615_v53 = vpop.eup %614  ;;  %v50_v54 = vadd.f32 1e-05, %v48_v44 }
  0xfb   :  { %v52_v57 = vmul.f32 %v615_v53, %v813_v21  ;;  %334 = vmatpush.bf16.msra.mxu2 %v454_v55  ;;  %vm58_vm1 = vweird.f32 %v615_v53 }
  0xfc   :  { %616 = vrsqrt.f32 %v50_v54  ;;  %vm59_vm3 = vmor %vm57_vm2, %vm58_vm1  ;;  %vm67_vm5 = vweird.f32 %v50_v54 }
  0xfd   :  { %v53_v59 = vmul.f32 %v615_v53, %v52_v57 }
  0xff   :  { %v54_v60 = vmul.f32 0.5, %v53_v59 }
 0x101   :  { %v55_v61 = vsub.f32 1.5, %v54_v60 }
 0x102   :  { %v617_v62 = vpop.eup %616 }
 0x103   :  { %v56_v63 = vmul.f32 %v615_v53, %v55_v61  ;;  %v62_v0 = vmul.f32 %v617_v62, %v50_v54  ;;  %vm68_vm4 = vweird.f32 %v617_v62 }
 0x104   :  { %vm69_vm6 = vmor %vm67_vm5, %vm68_vm4 }
 0x105   :  { %v63_v1 = vmul.f32 %v617_v62, %v62_v0  ;;  %v60_v2 = vsel %vm59_vm3, %v615_v53, %v56_v63 }
 0x106   :  { %v71_v6 = vmul.f32 %v60_v2, %v674_v11  ;;  %v123_v11 = vld [vmem:[%s951_s4] sm:$0xf] }
 0x107   :  { %v64_v3 = vmul.f32 0.5, %v63_v1  ;;  %v125_v20 = vperm.slane %v123_v11, 0  ;;  %v126_v21 = vperm.slane %v123_v11, 1  ;;  %v127_v27 = vperm.slane %v123_v11, 2 }
 0x108   :  { %v77_v12 = vmul.f32 %v610_v5, %v71_v6  ;;  %v128_v28 = vperm.slane %v123_v11, 3 }
 0x109   :  { %v65_v4 = vsub.f32 1.5, %v64_v3 }
 0x10a   :  { %v83_v16 = vadd.f32 %v611_v10, %v77_v12 }
 0x10b   :  { %v66_v7 = vmul.f32 %v617_v62, %v65_v4 }
 0x10d   :  { %v70_v9 = vsel %vm69_vm6, %v617_v62, %v66_v7 }
 0x10e   :  { %v72_v13 = vmul.f32 %v70_v9, %v679_v15 }
 0x110   :  { %v78_v14 = vmul.f32 %v610_v5, %v72_v13 }
 0x112   :  { %v84_v17 = vadd.f32 %v611_v10, %v78_v14 }
 0x114   :  { %v607_v18 = vpack.c.bf16 %v84_v17, %v83_v16 }
 0x116   :  { %608 = vst [vmem:[#allocation2] sm:$0xff] %v607_v18  }
 0x11d   :  { %v571_v19 = vld [vmem:[#allocation2] sm:$0xff] }
 0x11e   :  { %307 = vmatmul.bf16.vlgmr.msra.gmra.mxu0 %v571_v19  ;;  %321 = vmatmul.bf16.vlgmr.msra.gmra.mxu1 %v571_v19 }
 0x11f   :  { %335 = vmatmul.bf16.vlgmr.msra.gmra.mxu2 %v571_v19  ;;  %349 = vmatmul.bf16.vlgmr.msra.gmra.mxu3 %v571_v19 }
 0x19b   :  { %v308_v22 = vpop.f32.mrf.mxu0  ;;  %v322_v23 = vpop.f32.mrf.mxu1 }
 0x19c   :  { %v893_v24 = vadd.f32 %v308_v22, %v125_v20  ;;  %v895_v15 = vadd.f32 %v322_v23, %v126_v21 }
 0x19e   :  { %v355_v25 = vmul.f32 %v893_v24, %v893_v24  ;;  %v356_v26 = vmul.f32 %v895_v15, %v895_v15 }
 0x1a0   :  { %v363_v29 = vmul.f32 %v355_v25, %v893_v24  ;;  %v364_v30 = vmul.f32 %v356_v26, %v895_v15 }
 0x1a2   :  { %v371_v31 = vmul.f32 0.044715, %v363_v29  ;;  %v372_v32 = vmul.f32 0.044715, %v364_v30  ;;  %v336_v33 = vpop.f32.mrf.mxu2  ;;  %v350_v34 = vpop.f32.mrf.mxu3 }
 0x1a3   :  { %v903_v35 = vadd.f32 %v336_v33, %v127_v27  ;;  %v905_v36 = vadd.f32 %v350_v34, %v128_v28  ;;  %v310_v37 = vpop.f32.mrf.mxu0  ;;  %v324_v38 = vpop.f32.mrf.mxu1 }
 0x1a4   :  { %v379_v39 = vadd.f32 %v371_v31, %v893_v24  ;;  %v380_v40 = vadd.f32 %v372_v32, %v895_v15  ;;  %v909_v41 = vadd.f32 %v310_v37, %v125_v20  ;;  %v911_v42 = vadd.f32 %v324_v38, %v126_v21 }
 0x1a5   :  { %v357_v43 = vmul.f32 %v903_v35, %v903_v35  ;;  %v358_v44 = vmul.f32 %v905_v36, %v905_v36 }
 0x1a6   :  { %v387_v45 = vmul.f32 0.7978846, %v379_v39  ;;  %v388_v46 = vmul.f32 0.7978846, %v380_v40  ;;  %v359_v47 = vmul.f32 %v909_v41, %v909_v41  ;;  %v360_v48 = vmul.f32 %v911_v42, %v911_v42 }
 0x1a7   :  { %v365_v49 = vmul.f32 %v357_v43, %v903_v35  ;;  %v366_v50 = vmul.f32 %v358_v44, %v905_v36 }
 0x1a8   :  { %618 = vtanh.f32 %v387_v45  ;;  %v367_v8 = vmul.f32 %v359_v47, %v909_v41  ;;  %v368_v51 = vmul.f32 %v360_v48, %v911_v42 }
 0x1a9   :  { %620 = vtanh.f32 %v388_v46  ;;  %v373_v52 = vmul.f32 0.044715, %v365_v49  ;;  %v374_v53 = vmul.f32 0.044715, %v366_v50 }
 0x1aa   :  { %v375_v54 = vmul.f32 0.044715, %v367_v8  ;;  %v376_v55 = vmul.f32 0.044715, %v368_v51  ;;  %v338_v56 = vpop.f32.mrf.mxu2  ;;  %v352_v57 = vpop.f32.mrf.mxu3 }
 0x1ab   :  { %v381_v58 = vadd.f32 %v373_v52, %v903_v35  ;;  %v382_v59 = vadd.f32 %v374_v53, %v905_v36  ;;  %v339_v60 = vadd.f32 %v338_v56, %v127_v27  ;;  %v353_v61 = vadd.f32 %v352_v57, %v128_v28 }
 0x1ac   :  { %v383_v62 = vadd.f32 %v375_v54, %v909_v41  ;;  %v384_v63 = vadd.f32 %v376_v55, %v911_v42 }
 0x1ad   :  { %v389_v0 = vmul.f32 0.7978846, %v381_v58  ;;  %v390_v1 = vmul.f32 0.7978846, %v382_v59  ;;  %v361_v2 = vmul.f32 %v339_v60, %v339_v60  ;;  %v362_v3 = vmul.f32 %v353_v61, %v353_v61 }
 0x1ae   :  { %v619_v4 = vpop.eup %618  ;;  %v391_v5 = vmul.f32 0.7978846, %v383_v62  ;;  %v392_v6 = vmul.f32 0.7978846, %v384_v63 }
 0x1af   :  { %v621_v7 = vpop.eup %620  ;;  %v403_v9 = vadd.f32 1.0, %v619_v4  ;;  %622 = vtanh.f32 %v389_v0  ;;  %v369_v10 = vmul.f32 %v361_v2, %v339_v60  ;;  %v370_v12 = vmul.f32 %v362_v3, %v353_v61 }
 0x1b0   :  { %v404_v13 = vadd.f32 1.0, %v621_v7  ;;  %624 = vtanh.f32 %v390_v1 }
 0x1b1   :  { %v411_v14 = vmul.f32 0.5, %v403_v9  ;;  %626 = vtanh.f32 %v391_v5  ;;  %v377_v16 = vmul.f32 0.044715, %v369_v10  ;;  %v378_v17 = vmul.f32 0.044715, %v370_v12 }
 0x1b2   :  { %v412_v18 = vmul.f32 0.5, %v404_v13  ;;  %628 = vtanh.f32 %v392_v6 }
 0x1b3   :  { %v419_v19 = vmul.f32 %v411_v14, %v893_v24  ;;  %v385_v11 = vadd.f32 %v377_v16, %v339_v60  ;;  %v386_v20 = vadd.f32 %v378_v17, %v353_v61 }
 0x1b4   :  { %v420_v21 = vmul.f32 %v412_v18, %v895_v15 }
 0x1b5   :  { %v623_v22 = vpop.eup %622  ;;  %v393_v23 = vmul.f32 0.7978846, %v385_v11  ;;  %v394_v25 = vmul.f32 0.7978846, %v386_v20 }
 0x1b6   :  { %v625_v26 = vpop.eup %624  ;;  %v427_v27 = vpack.c.bf16 %v420_v21, %v419_v19  ;;  %v405_v28 = vadd.f32 1.0, %v623_v22 }
 0x1b7   :  { %v627_v29 = vpop.eup %626  ;;  %v406_v30 = vadd.f32 1.0, %v625_v26  ;;  %630 = vtanh.f32 %v393_v23 }
 0x1b8   :  { %v629_v31 = vpop.eup %628  ;;  %431 = vst [vmem:[%s952_s5] sm:$0xff] %v427_v27  ;;  %v413_v32 = vmul.f32 0.5, %v405_v28  ;;  %v407_v24 = vadd.f32 1.0, %v627_v29  ;;  %632 = vtanh.f32 %v394_v25 }
 0x1b9   :  { %v414_v33 = vmul.f32 0.5, %v406_v30  ;;  %v408_v34 = vadd.f32 1.0, %v629_v31 }
 0x1ba   :  { %v421_v15 = vmul.f32 %v413_v32, %v903_v35  ;;  %v415_v37 = vmul.f32 0.5, %v407_v24 }
 0x1bb   :  { %v422_v38 = vmul.f32 %v414_v33, %v905_v36  ;;  %v416_v39 = vmul.f32 0.5, %v408_v34 }
 0x1bc   :  { %v423_v40 = vmul.f32 %v415_v37, %v909_v41 }
 0x1bd   :  { %v631_v43 = vpop.eup %630  ;;  %v428_v44 = vpack.c.bf16 %v422_v38, %v421_v15  ;;  %v424_v45 = vmul.f32 %v416_v39, %v911_v42 }
 0x1be   :  { %v633_v46 = vpop.eup %632  ;;  %v409_v47 = vadd.f32 1.0, %v631_v43 }
 0x1bf   :  { %432 = vst [vmem:[%s952_s5 + $0x8] sm:$0xff] %v428_v44  ;;  %v429_v48 = vpack.c.bf16 %v424_v45, %v423_v40  ;;  %v410_v49 = vadd.f32 1.0, %v633_v46 }
 0x1c0   :  { %v417_v50 = vmul.f32 0.5, %v409_v47 }
 0x1c1   :  { %433 = vst [vmem:[%s952_s5 + $0x10] sm:$0xff] %v429_v48  ;;  %v418_v35 = vmul.f32 0.5, %v410_v49 }
 0x1c2   :  { %v425_v36 = vmul.f32 %v417_v50, %v339_v60 }
 0x1c3   :  { %v426_v41 = vmul.f32 %v418_v35, %v353_v61 }
 0x1c5   :  { %v430_v8 = vpack.c.bf16 %v426_v41, %v425_v36 }
 0x1c7   :  { %434 = vst [vmem:[%s952_s5 + $0x18] sm:$0xff] %v430_v8 }

// kernel: _lambda_.37
= control target key start
LH: loop header
LB: loop body
LE: loop exit
PB: predicated region body
PF: predicated region fallthrough
CT: control target
= control target key end

     0   :  { %v90_v2 = vmov 128.0   ;;  %s129_s0 = inlined_call_operand.vmem [shape: f32[16,128], index: 0, kind: input, shape index: {}]   ;;  %s130_s1 = inlined_call_operand.vmem [shape: f32[1,128], index: 1, kind: input, shape index: {}]   ;;  %s131_s2 = inlined_call_operand.vmem [shape: f32[1,128], index: 2, kind: input, shape index: {}]   ;;  %s132_s3 = inlined_call_operand.vmem [shape: f32[16,128], index: 3, kind: output, shape index: {}]  }
   0x1   :  { %v14_v0 = vld [vmem:[%s129_s0] sm:$0xff]  ;;  %v15_v1 = vld [vmem:[%s129_s0 + $0x8] sm:$0xff]  ;;  %84 = vrcp.f32 %v90_v2 }
   0x2   :  { %16 = vadd.xlane.f32.xlu0 %v14_v0  ;;  %v82_v31 = vld [vmem:[%s130_s1] ss:$0 sm:$0xff] }
   0x3   :  { %v83_v34 = vld [vmem:[%s131_s2] ss:$0 sm:$0xff] }
   0x7   :  { %v85_v3 = vpop.eup %84 }
   0x8   :  { %v21_v4 = vmul.f32 128.0, %v85_v3  ;;  %vm25_vm0 = vweird.f32 %v85_v3 }
   0xa   :  { %18 = vadd.xlane.f32.xlu0 %v15_v1  ;;  %v22_v5 = vsub.f32 1.0, %v21_v4 }
   0xc   :  { %v23_v6 = vmul.f32 %v85_v3, %v22_v5 }
   0xe   :  { %v24_v7 = vadd.f32 %v85_v3, %v23_v6 }
  0x10   :  { %v26_v8 = vsel %vm25_vm0, %v85_v3, %v24_v7 }
  0x75   :  { %v17_v9 = vpop.xlane.xlu0 %16 }
  0x76   :  { %v27_v10 = vmul.f32 %v26_v8, %v17_v9 }
  0x78   :  { %v29_v11 = vsub.f32 %v14_v0, %v27_v10 }
  0x7a   :  { %v31_v12 = vmul.f32 %v29_v11, %v29_v11 }
  0x7c   :  { %33 = vadd.xlane.f32.xlu1 %v31_v12 }
  0x7d   :  { %v19_v13 = vpop.xlane.xlu0 %18 }
  0x7e   :  { %v28_v14 = vmul.f32 %v26_v8, %v19_v13 }
  0x80   :  { %v30_v15 = vsub.f32 %v15_v1, %v28_v14 }
  0x82   :  { %v32_v16 = vmul.f32 %v30_v15, %v30_v15 }
  0x84   :  { %35 = vadd.xlane.f32.xlu1 %v32_v16 }
  0xef   :  { %v34_v17 = vpop.xlane.xlu1 %33 }
  0xf0   :  { %v37_v18 = vmul.f32 %v34_v17, %v26_v8 }
  0xf2   :  { %v39_v19 = vadd.f32 1e-05, %v37_v18 }
  0xf4   :  { %86 = vrsqrt.f32 %v39_v19  ;;  %vm47_vm2 = vweird.f32 %v39_v19 }
  0xf7   :  { %v36_v20 = vpop.xlane.xlu1 %35 }
  0xf8   :  { %v38_v21 = vmul.f32 %v36_v20, %v26_v8 }
  0xfa   :  { %v87_v22 = vpop.eup %86  ;;  %v40_v23 = vadd.f32 1e-05, %v38_v21 }
  0xfb   :  { %v42_v24 = vmul.f32 %v87_v22, %v39_v19  ;;  %vm48_vm1 = vweird.f32 %v87_v22 }
  0xfc   :  { %88 = vrsqrt.f32 %v40_v23  ;;  %vm49_vm3 = vmor %vm47_vm2, %vm48_vm1  ;;  %vm57_vm5 = vweird.f32 %v40_v23 }
  0xfd   :  { %v43_v25 = vmul.f32 %v87_v22, %v42_v24 }
  0xff   :  { %v44_v26 = vmul.f32 0.5, %v43_v25 }
 0x101   :  { %v45_v27 = vsub.f32 1.5, %v44_v26 }
 0x102   :  { %v89_v28 = vpop.eup %88 }
 0x103   :  { %v46_v29 = vmul.f32 %v87_v22, %v45_v27  ;;  %v52_v30 = vmul.f32 %v89_v28, %v40_v23  ;;  %vm58_vm4 = vweird.f32 %v89_v28 }
 0x104   :  { %vm59_vm6 = vmor %vm57_vm5, %vm58_vm4 }
 0x105   :  { %v50_v32 = vsel %vm49_vm3, %v87_v22, %v46_v29  ;;  %v53_v33 = vmul.f32 %v89_v28, %v52_v30 }
 0x106   :  { %v61_v35 = vmul.f32 %v50_v32, %v29_v11 }
 0x107   :  { %v54_v36 = vmul.f32 0.5, %v53_v33 }
 0x108   :  { %v67_v37 = vmul.f32 %v82_v31, %v61_v35 }
 0x109   :  { %v55_v38 = vsub.f32 1.5, %v54_v36 }
 0x10a   :  { %v73_v39 = vadd.f32 %v83_v34, %v67_v37 }
 0x10b   :  { %v56_v40 = vmul.f32 %v89_v28, %v55_v38 }
 0x10c   :  { %75 = vst [vmem:[%s132_s3] sm:$0xff] %v73_v39 }
 0x10d   :  { %v60_v41 = vsel %vm59_vm6, %v89_v28, %v56_v40 }
 0x10e   :  { %v62_v42 = vmul.f32 %v60_v41, %v30_v15 }
 0x110   :  { %v68_v43 = vmul.f32 %v82_v31, %v62_v42 }
 0x112   :  { %v74_v44 = vadd.f32 %v83_v34, %v68_v43 }
 0x114   :  { %76 = vst [vmem:[%s132_s3 + $0x8] sm:$0xff] %v74_v44 }

// kernel: _lambda_.36
= control target key start
LH: loop header
LB: loop body
LE: loop exit
PB: predicated region body
PF: predicated region fallthrough
CT: control target
= control target key end

     0   :  { %s727_s1 = inlined_call_operand.vmem [shape: bf16[512,128], index: 1, kind: input, shape index: {}]   ;;  %s728_s0 = inlined_call_operand.vmem [shape: bf16[16,512], index: 0, kind: input, shape index: {}]   ;;  %s729_s2 = inlined_call_operand.vmem [shape: f32[1,128], index: 2, kind: input, shape index: {}]   ;;  %s730_s3 = inlined_call_operand.vmem [shape: f32[16,128], index: 3, kind: input, shape index: {}]   ;;  %s731_s4 = inlined_call_operand.vmem [shape: f32[16,128], index: 4, kind: output, shape index: {}]  }
   0x1   :  { %v541_v0 = vld [vmem:[%s727_s1 + $0x38] sm:$0xff]  ;;  %v540_v4 = vld [vmem:[%s727_s1 + $0x30] sm:$0xff]  ;;  %v539_v8 = vld [vmem:[%s727_s1 + $0x28] sm:$0xff] }
   0x2   :  { %v549_v1 = vld [vmem:[%s727_s1 + $0x78] sm:$0xff]  ;;  %305 = vmatpush.bf16.msra.mxu0 %v541_v0  ;;  %v548_v5 = vld [vmem:[%s727_s1 + $0x70] sm:$0xff]  ;;  %v547_v9 = vld [vmem:[%s727_s1 + $0x68] sm:$0xff] }
   0x3   :  { %v557_v2 = vld [vmem:[%s727_s1 + $0xb8] sm:$0xff]  ;;  %319 = vmatpush.bf16.msra.mxu1 %v549_v1  ;;  %v556_v6 = vld [vmem:[%s727_s1 + $0xb0] sm:$0xff]  ;;  %v555_v10 = vld [vmem:[%s727_s1 + $0xa8] sm:$0xff] }
   0x4   :  { %v565_v3 = vld [vmem:[%s727_s1 + $0xf8] sm:$0xff]  ;;  %333 = vmatpush.bf16.msra.mxu2 %v557_v2  ;;  %v564_v7 = vld [vmem:[%s727_s1 + $0xf0] sm:$0xff]  ;;  %v563_v11 = vld [vmem:[%s727_s1 + $0xe8] sm:$0xff] }
   0x5   :  { %347 = vmatpush.bf16.msra.mxu3 %v565_v3  ;;  %v538_v12 = vld [vmem:[%s727_s1 + $0x20] sm:$0xff]  ;;  %v537_v16 = vld [vmem:[%s727_s1 + $0x18] sm:$0xff]  ;;  %v536_v20 = vld [vmem:[%s727_s1 + $0x10] sm:$0xff] }
   0x6   :  { %306 = vmatpush.bf16.msra.mxu0 %v540_v4  ;;  %v546_v13 = vld [vmem:[%s727_s1 + $0x60] sm:$0xff]  ;;  %v545_v17 = vld [vmem:[%s727_s1 + $0x58] sm:$0xff]  ;;  %v544_v21 = vld [vmem:[%s727_s1 + $0x50] sm:$0xff] }
   0x7   :  { %320 = vmatpush.bf16.msra.mxu1 %v548_v5  ;;  %v554_v14 = vld [vmem:[%s727_s1 + $0xa0] sm:$0xff]  ;;  %v553_v18 = vld [vmem:[%s727_s1 + $0x98] sm:$0xff]  ;;  %v552_v22 = vld [vmem:[%s727_s1 + $0x90] sm:$0xff] }
   0x8   :  { %334 = vmatpush.bf16.msra.mxu2 %v556_v6  ;;  %v562_v15 = vld [vmem:[%s727_s1 + $0xe0] sm:$0xff]  ;;  %v561_v19 = vld [vmem:[%s727_s1 + $0xd8] sm:$0xff]  ;;  %v560_v23 = vld [vmem:[%s727_s1 + $0xd0] sm:$0xff] }
   0x9   :  { %348 = vmatpush.bf16.msra.mxu3 %v564_v7  ;;  %v535_v24 = vld [vmem:[%s727_s1 + $0x8] sm:$0xff]  ;;  %v534_v28 = vld [vmem:[%s727_s1] sm:$0xff]  ;;  %v532_v33 = vld [vmem:[%s728_s0 + $0xc] sm:$0xf0] }
   0xa   :  { %307 = vmatpush.bf16.msra.mxu0 %v539_v8  ;;  %v543_v25 = vld [vmem:[%s727_s1 + $0x48] sm:$0xff]  ;;  %v542_v29 = vld [vmem:[%s727_s1 + $0x40] sm:$0xff]  ;;  %v390_v35 = vld [vmem:[%s728_s0 + $0x10] sm:$0xf0] }
   0xb   :  { %321 = vmatpush.bf16.msra.mxu1 %v547_v9  ;;  %v551_v26 = vld [vmem:[%s727_s1 + $0x88] sm:$0xff]  ;;  %v550_v30 = vld [vmem:[%s727_s1 + $0x80] sm:$0xff]  ;;  %v533_v37 = vld [vmem:[%s728_s0 + $0x14] sm:$0xf0] }
   0xc   :  { %335 = vmatpush.bf16.msra.mxu2 %v555_v10  ;;  %v559_v27 = vld [vmem:[%s727_s1 + $0xc8] sm:$0xff]  ;;  %v558_v31 = vld [vmem:[%s727_s1 + $0xc0] sm:$0xff]  ;;  %v398_v39 = vld [vmem:[%s728_s0 + $0x18] sm:$0xf0] }
   0xd   :  { %349 = vmatpush.bf16.msra.mxu3 %v563_v11  ;;  %v388_v32 = vld [vmem:[%s728_s0] sm:$0xf]  ;;  %v530_v34 = vld [vmem:[%s728_s0 + $0x4] sm:$0xf]  ;;  %v396_v36 = vld [vmem:[%s728_s0 + $0x8] sm:$0xf] }
   0xe   :  { %308 = vmatpush.bf16.msra.mxu0 %v538_v12  ;;  %v531_v38 = vld [vmem:[%s728_s0 + $0xc] sm:$0xf]  ;;  %v389_v40 = vor.u32 %v532_v33, %v388_v32  ;;  %v393_v41 = vor.u32 %v530_v34, %v390_v35  ;;  %v397_v42 = vor.u32 %v533_v37, %v396_v36  ;;  %v566_v50 = vld [vmem:[%s729_s2] ss:$0 sm:$0xff] }
   0xf   :  { %322 = vmatpush.bf16.msra.mxu1 %v546_v13  ;;  %v401_v43 = vor.u32 %v531_v38, %v398_v39  ;;  %v376_v52 = vld [vmem:[%s730_s3] sm:$0xff]  ;;  %v377_v62 = vld [vmem:[%s730_s3 + $0x8] sm:$0xff] }
  0x10   :  { %336 = vmatpush.bf16.msra.mxu2 %v554_v14 }
  0x11   :  { %350 = vmatpush.bf16.msra.mxu3 %v562_v15 }
  0x12   :  { %309 = vmatpush.bf16.msra.mxu0 %v537_v16 }
  0x13   :  { %323 = vmatpush.bf16.msra.mxu1 %v545_v17 }
  0x14   :  { %337 = vmatpush.bf16.msra.mxu2 %v553_v18 }
  0x15   :  { %351 = vmatpush.bf16.msra.mxu3 %v561_v19 }
  0x16   :  { %310 = vmatpush.bf16.msra.mxu0 %v536_v20 }
  0x17   :  { %324 = vmatpush.bf16.msra.mxu1 %v544_v21 }
  0x18   :  { %338 = vmatpush.bf16.msra.mxu2 %v552_v22 }
  0x19   :  { %352 = vmatpush.bf16.msra.mxu3 %v560_v23 }
  0x1a   :  { %311 = vmatpush.bf16.msra.mxu0 %v535_v24 }
  0x1b   :  { %325 = vmatpush.bf16.msra.mxu1 %v543_v25 }
  0x1c   :  { %339 = vmatpush.bf16.msra.mxu2 %v551_v26 }
  0x1d   :  { %353 = vmatpush.bf16.msra.mxu3 %v559_v27 }
  0x1e   :  { %312 = vmatpush.bf16.msra.mxu0 %v534_v28 }
  0x1f   :  { %326 = vmatpush.bf16.msra.mxu1 %v542_v29 }
  0x20   :  { %340 = vmatpush.bf16.msra.mxu2 %v550_v30 }
  0x21   :  { %354 = vmatpush.bf16.msra.mxu3 %v558_v31  ;;  %313 = vmatmul.bf16.vlgmr.msra.gmra.mxu0 %v389_v40 }
  0x22   :  { %327 = vmatmul.bf16.vlgmr.msra.gmra.mxu1 %v393_v41 }
  0x23   :  { %341 = vmatmul.bf16.vlgmr.msra.gmra.mxu2 %v397_v42 }
  0x24   :  { %355 = vmatmul.bf16.vlgmr.msra.gmra.mxu3 %v401_v43 }
  0x9e   :  { %v314_v44 = vpop.f32.mrf.mxu0 }
  0x9f   :  { %v328_v45 = vpop.f32.mrf.mxu1 }
  0xa0   :  { %v329_v46 = vadd.f32 %v328_v45, %v314_v44 }
  0xa6   :  { %v342_v47 = vpop.f32.mrf.mxu2  ;;  %v316_v53 = vpop.f32.mrf.mxu0 }
  0xa7   :  { %v356_v48 = vpop.f32.mrf.mxu3  ;;  %v343_v49 = vadd.f32 %v342_v47, %v329_v46  ;;  %v330_v54 = vpop.f32.mrf.mxu1 }
  0xa8   :  { %v331_v57 = vadd.f32 %v330_v54, %v316_v53 }
  0xa9   :  { %v357_v51 = vadd.f32 %v356_v48, %v343_v49 }
  0xab   :  { %v374_v55 = vadd.f32 %v566_v50, %v357_v51 }
  0xad   :  { %v378_v56 = vadd.f32 %v376_v52, %v374_v55 }
  0xae   :  { %v344_v58 = vpop.f32.mrf.mxu2 }
  0xaf   :  { %380 = vst [vmem:[%s731_s4] sm:$0xff] %v378_v56  ;;  %v345_v59 = vadd.f32 %v344_v58, %v331_v57  ;;  %v358_v60 = vpop.f32.mrf.mxu3 }
  0xb1   :  { %v359_v61 = vadd.f32 %v358_v60, %v345_v59 }
  0xb3   :  { %v375_v63 = vadd.f32 %v566_v50, %v359_v61 }
  0xb5   :  { %v379_v0 = vadd.f32 %v377_v62, %v375_v63 }
  0xb7   :  { %381 = vst [vmem:[%s731_s4 + $0x8] sm:$0xff] %v379_v0 }

</bundles_post_ra>
